<compile_context>
chip_gen: v7x
topology: tpu7x:2x2x1
jax: 0.10.0
libtpu: 0.0.40
codegen_flags: <defaults>
</compile_context>

<pallas_src>
import functools

import jax
import jax.numpy as jnp
from jax.experimental import pallas as pl
from jax.experimental.pallas import tpu as pltpu

_SELU_ALPHA = 1.6732632423543772
_SELU_SCALE = 1.0507009873554805


def _vmem_limit_bytes():
    # Generation-aware scoped-VMEM budget (v7x has only 64 MiB physical);
    # fall back to the compiler default if the query is unavailable.
    try:
        info = pltpu.get_tpu_info()
        cap = getattr(info, "vmem_capacity_bytes", None)
        if cap:
            return int(min(cap * 3 // 4, 96 * 1024 * 1024))
    except Exception:
        pass
    return None


_VMEM_LIMIT = _vmem_limit_bytes()


def _compiler_params():
    return pltpu.CompilerParams(
        dimension_semantics=("parallel",),
        vmem_limit_bytes=_VMEM_LIMIT,
    )


def _apply_act(acc, act):
    if act == "relu":
        return jnp.maximum(acc, 0.0)
    if act == "selu":
        # exponentiate only the negative lobe (no overflow on the positive side)
        neg = jnp.minimum(acc, 0.0)
        return _SELU_SCALE * (jnp.maximum(acc, 0.0)
                              + _SELU_ALPHA * (jnp.exp(neg) - 1.0))
    return acc


# ----------------------------------------------------------------------------
# Generic fused conv kernel: K-merged tap groups (channel-concat in VMEM),
# one MXU dot per group, f32 accumulate, bias + activation (+ optional fused
# residual), one contiguous bulk store per output phase.
# ----------------------------------------------------------------------------
def _conv_taps_kernel(x_ref, w_ref, b_ref, *rest, phase_groups, act, has_res):
    # x_ref : (1, P, L, Cin)          bf16  (P input planes, flat length L)
    # w_ref : (K_total, Cout)         bf16  (K-merged weight blocks, stacked)
    # b_ref : (1, Cout)               f32
    # res   : (1, M, Cout)            bf16  (optional, 1x1 conv only)
    # o_ref : (1, OP, M, Cout)
    if has_res:
        res_ref, o_ref = rest
    else:
        (o_ref,) = rest
    Cin = x_ref.shape[-1]
    Cout = w_ref.shape[-1]
    M = o_ref.shape[2]
    bias = b_ref[...].astype(jnp.float32)                       # (1, Cout)

    # Hoist all merged weight blocks: loaded once per grid step.
    w_groups, k0 = [], 0
    for groups in phase_groups:
        for g in groups:
            sz = len(g) * Cin
            w_groups.append(w_ref[k0:k0 + sz, :])
            k0 += sz

    gi = 0
    for op, groups in enumerate(phase_groups):
        acc = jnp.zeros((M, Cout), jnp.float32)
        for g in groups:
            if len(g) == 1:
                p, shift = g[0]
                patch = x_ref[0, p, shift:shift + M, :]
            else:
                patch = jnp.concatenate(
                    [x_ref[0, p, shift:shift + M, :] for (p, shift) in g],
                    axis=-1)
            acc = acc + jnp.dot(patch, w_groups[gi],
                                preferred_element_type=jnp.float32)
            gi += 1
        acc = _apply_act(acc + bias, act)
        if has_res:
            acc = acc + res_ref[0].astype(jnp.float32)
        o_ref[0, op] = acc.astype(o_ref.dtype)                  # one bulk store


def _run_conv(x4, w_flat, bias, *, phase_groups, M, act, residual=None,
              out_dtype=jnp.bfloat16):
    """x4: (B, P, L, Cin) bf16; w_flat: (K_total, Cout) bf16."""
    B, P, L, Cin = x4.shape
    Ktot, Cout = w_flat.shape
    OP = len(phase_groups)
    n_taps = sum(len(g) for groups in phase_groups for g in groups)
    assert Ktot == n_taps * Cin, (Ktot, n_taps, Cin)
    has_res = residual is not None

    kernel = functools.partial(_conv_taps_kernel, phase_groups=phase_groups,
                               act=act, has_res=has_res)

    in_specs = [
        pl.BlockSpec((1, P, L, Cin), lambda b: (b, 0, 0, 0)),
        pl.BlockSpec((Ktot, Cout), lambda b: (0, 0)),
        pl.BlockSpec((1, Cout), lambda b: (0, 0)),
    ]
    args = [x4, w_flat, bias.reshape(1, Cout).astype(jnp.float32)]
    if has_res:
        in_specs.append(pl.BlockSpec((1, M, Cout), lambda b: (b, 0, 0)))
        args.append(residual)

    return pl.pallas_call(
        kernel,
        out_shape=jax.ShapeDtypeStruct((B, OP, M, Cout), out_dtype),
        grid=(B,),
        in_specs=in_specs,
        out_specs=pl.BlockSpec((1, OP, M, Cout), lambda b: (b, 0, 0, 0)),
        compiler_params=_compiler_params(),
    )(*args)


# ----------------------------------------------------------------------------
# Conv wrappers (only cheap padding / metadata reshapes in JAX glue)
# ----------------------------------------------------------------------------
def conv3d_s1(x, w, b, *, padding=(0, 0, 0), act="none", residual=None):
    """Stride-1 Conv3d with KD=1.  x: (N, D, H, W, Cin); w: (1,KH,KW,Cin,Cout)."""
    KD, KH, KW, Cin, Cout = w.shape
    assert KD == 1 and padding[0] == 0
    ph, pw = padding[1], padding[2]
    N, D, H, W, _ = x.shape
    Hp, Wp = H + 2 * ph, W + 2 * pw
    Ho, Wo = Hp - KH + 1, Wp - KW + 1
    extra = 1 if (KH > 1 or KW > 1) else 0      # extra bottom row for bulk acc
    xp = jnp.pad(x, ((0, 0), (0, 0), (ph, ph + extra), (pw, pw), (0, 0)))
    L = (Hp + extra) * Wp
    x4 = xp.reshape(N * D, 1, L, Cin)
    M = Ho * Wp
    # one group per kh, the KW taps K-merged along channels
    groups = [[(0, kh * Wp + kw) for kw in range(KW)] for kh in range(KH)]
    w_flat = jnp.concatenate(
        [w[0, kh, kw] for kh in range(KH) for kw in range(KW)], axis=0)
    res = None
    if residual is not None:
        assert Wp == Wo and Hp == Ho            # only fused for the 1x1 conv
        res = residual.reshape(N * D, M, Cout)
    out = _run_conv(x4, w_flat, b, phase_groups=[groups], M=M, act=act,
                    residual=res)
    out = out.reshape(N * D, Ho, Wp, Cout)[:, :, :Wo, :]   # drop wrap columns
    return out.reshape(N, D, Ho, Wo, Cout)


def conv3d_stride2(x, w, b, *, act="none"):
    """Conv3d, kernel (3,3,3), stride (1,2,2), padding (1,1,1).
    2x2 spatial phase decomposition + per-output-depth halo -> grid over N*D,
    9 K-merged dots (K = 3*Cin) per step."""
    N, D, H, W, Cin = x.shape
    Cout = w.shape[-1]
    assert H % 2 == 0 and W % 2 == 0
    Ho, Wo = H // 2, W // 2
    Hpp, Wpp = (H + 2) // 2, (W + 2) // 2
    xp = jnp.pad(x, ((0, 0), (1, 1), (1, 1), (1, 1), (0, 0)))
    phases = jnp.stack(
        [xp[:, :, a::2, b::2, :] for a in range(2) for b in range(2)], axis=2)
    phases = jnp.pad(phases, ((0, 0), (0, 0), (0, 0), (0, 1), (0, 0), (0, 0)))
    # depth halo: output depth d uses padded depths d..d+2 (3x re-read of this
    # layer's input in exchange for small per-step VMEM and N*D grid steps)
    xw = jnp.stack([phases[:, d:d + 3] for d in range(D)], axis=1)
    L = (Hpp + 1) * Wpp
    x4 = xw.reshape(N * D, 12, L, Cin)
    M = Ho * Wpp
    groups, wlist = [], []
    for kd in range(3):
        for kh in range(3):
            g = []
            for kw in range(3):
                plane = kd * 4 + (kh & 1) * 2 + (kw & 1)
                g.append((plane, (kh // 2) * Wpp + (kw // 2)))
                wlist.append(w[kd, kh, kw])
            groups.append(g)
    w_flat = jnp.concatenate(wlist, axis=0)      # (27*Cin, Cout)
    out = _run_conv(x4, w_flat, b, phase_groups=[groups], M=M, act=act)
    out = out.reshape(N * D, Ho, Wpp, Cout)[:, :, :Wo, :]
    return out.reshape(N, D, Ho, Wo, Cout)


def conv_transpose3d_x2(x, w, b, *, act="none"):
    """ConvTranspose3d kernel (3,3,3), stride (1,2,2), padding (1,1,1),
    output_padding (0,1,1).  Sub-pixel decomposition: 4 output phases, each a
    small stride-1 conv on the high-side padded input; per-phase taps are
    K-merged per depth offset (K up to 4*Cin).  w is (Cin, Cout, KD, KH, KW)."""
    N, D, H, W, Cin = x.shape
    Cout = w.shape[1]
    Wpp = W + 1
    xp = jnp.pad(x, ((0, 0), (1, 1), (0, 2), (0, 1), (0, 0)))
    xw = jnp.stack([xp[:, d:d + 3] for d in range(D)], axis=1)  # depth halo
    L = (H + 2) * Wpp
    x4 = xw.reshape(N * D, 3, L, Cin)
    M = H * Wpp
    # phase r (resp. s): list of (input spatial offset, weight kernel index)
    offk = {0: [(0, 1)], 1: [(1, 0), (0, 2)]}
    phase_groups, wlist = [], []
    for r in range(2):
        for s in range(2):
            groups = []
            for dd in range(3):                  # plane dd; weight kd = 2 - dd
                g = []
                for hoff, kh in offk[r]:
                    for woff, kw in offk[s]:
                        g.append((dd, hoff * Wpp + woff))
                        wlist.append(w[:, :, 2 - dd, kh, kw])
                groups.append(g)
            phase_groups.append(groups)
    w_flat = jnp.concatenate(wlist, axis=0)
    out = _run_conv(x4, w_flat, b, phase_groups=phase_groups, M=M, act=act)
    # (N*D, 4, H*Wpp, Cout); phase op = r*2 + s
    out = out.reshape(N * D, 2, 2, H, Wpp, Cout)[:, :, :, :, :W, :]
    out = out.reshape(N, D, 2, 2, H, W, Cout)
    # TODO(synk): interleave phases via a strided out index_map instead of
    # this XLA transpose (kept in XLA for lowering robustness).
    out = jnp.transpose(out, (0, 1, 4, 2, 5, 3, 6))
    return out.reshape(N, D, 2 * H, 2 * W, Cout)


# ----------------------------------------------------------------------------
# conv_last head (Cin=16, Cout=1): VPU kernel, W on lanes (lane-dense),
# per-channel scalar weights from SMEM, no cross-lane reduction.
# ----------------------------------------------------------------------------
def _conv_last_kernel(x_ref, w_ref, b_ref, o_ref, *, Ho, Wo, KH, KW, TH):
    # x_ref : (1, Cin, Hp, Wp)  bf16 VMEM
    # w_ref : (Cin, KH*KW)      f32  SMEM
    # b_ref : (1, 1)            f32  SMEM
    # o_ref : (1, Ho, Wo)       f32
    Cin = x_ref.shape[1]
    bias = b_ref[0, 0]
    for y0 in range(0, Ho, TH):                  # row chunks bound vreg usage
        acc = jnp.zeros((TH, Wo), jnp.float32)
        for ci in range(Cin):
            for kw in range(KW):
                xs = x_ref[0, ci, y0:y0 + TH + KH - 1,
                           kw:kw + Wo].astype(jnp.float32)
                for kh in range(KH):
                    acc = acc + xs[kh:kh + TH, :] * w_ref[ci, kh * KW + kw]
        o_ref[0, y0:y0 + TH, :] = acc + bias


def conv_last(x_cf, w, b):
    """Conv3d(16, 1, kernel (1,3,3), padding (0,1,1)).
    x_cf: (B, 16, H, W) channel-first bf16; w: (16, 9) f32; b: (1,) f32."""
    B, Cin, H, W = x_cf.shape
    xp = jnp.pad(x_cf, ((0, 0), (0, 0), (1, 1), (1, 1)))
    TH = next((t for t in (32, 16, 8) if H % t == 0), H)
    out = pl.pallas_call(
        functools.partial(_conv_last_kernel, Ho=H, Wo=W, KH=3, KW=3, TH=TH),
        out_shape=jax.ShapeDtypeStruct((B, H, W), jnp.float32),
        grid=(B,),
        in_specs=[
            pl.BlockSpec((1, Cin, H + 2, W + 2), lambda i: (i, 0, 0, 0)),
            pl.BlockSpec(memory_space=pltpu.MemorySpace.SMEM),
            pl.BlockSpec(memory_space=pltpu.MemorySpace.SMEM),
        ],
        out_specs=pl.BlockSpec((1, H, W), lambda i: (i, 0, 0)),
        compiler_params=_compiler_params(),
    )(xp, w.astype(jnp.float32), b.reshape(1, 1).astype(jnp.float32))
    return out                                    # (B, H, W) f32


# ----------------------------------------------------------------------------
# Pure data-movement glue
# ----------------------------------------------------------------------------
def pixel_shuffle_cl(x, r):
    """Channel-last PixelShuffle: (n, d, h, w, C*r*r) -> (n, d, h*r, w*r, C)."""
    n, d, h, w, crr = x.shape
    C = crr // (r * r)
    x = x.reshape(n, d, h, w, C, r, r)
    x = jnp.transpose(x, (0, 1, 2, 5, 3, 6, 4))
    return x.reshape(n, d, h * r, w * r, C)


def pixel_shuffle_to_cf(x, r):
    """PixelShuffle that lands channel-first: (n,d,h,w,C*r*r) -> (n*d, C, h*r, w*r).
    Feeds conv_last directly (one transpose instead of shuffle + transpose)."""
    n, d, h, w, crr = x.shape
    C = crr // (r * r)
    x = x.reshape(n * d, h, w, C, r, r)
    x = jnp.transpose(x, (0, 3, 1, 4, 2, 5))
    return x.reshape(n * d, C, h * r, w * r)


# ----------------------------------------------------------------------------
# Parameters (deterministic synthetic init; shapes follow the module __init__)
# ----------------------------------------------------------------------------
def init_params(key, F, c_in=1):
    keys = iter(jax.random.split(key, 40))

    def wf(shape, scale=0.05):
        return (scale * jax.random.normal(next(keys), shape, jnp.float32)
                ).astype(jnp.bfloat16)

    def bf(nc):
        return 0.01 * jax.random.normal(next(keys), (nc,), jnp.float32)

    p = {}
    # TODO(synk): ConvNeXt-tiny backbone + ProjectionHead definitions absent;
    # stand-in stride-4 patch-embedding projection.
    p["feat_w"] = wf((1, 1, 1, 16 * c_in, F)); p["feat_b"] = bf(F)
    # refine: Conv2d 3x3 -> SELU -> Conv2d 3x3 -> SELU -> Conv2d 1x1 (+residual)
    p["ref1_w"] = wf((1, 3, 3, F, F)); p["ref1_b"] = bf(F)
    p["ref2_w"] = wf((1, 3, 3, F, F)); p["ref2_b"] = bf(F)
    p["ref3_w"] = wf((1, 1, 1, F, F)); p["ref3_b"] = bf(F)
    # conv1: Conv3d(F, 2F, (3,3,3), stride (1,2,2), pad 1)
    p["conv1_w"] = wf((3, 3, 3, F, 2 * F)); p["conv1_b"] = bf(2 * F)
    # upconv2: ConvTranspose3d(2F, F, (3,3,3), stride (1,2,2), pad 1, out_pad (0,1,1))
    p["upconv2_w"] = wf((2 * F, F, 3, 3, 3)); p["upconv2_b"] = bf(F)
    # up / up_1 / up_2 paths (channel counts hardcoded in the module)
    for s in ["", "_M1", "_M2"]:
        p["cbu1_w" + s] = wf((1, 3, 3, F, 128)); p["cbu1_b" + s] = bf(128)
        p["cbu2_w" + s] = wf((1, 3, 3, 32, 64)); p["cbu2_b" + s] = bf(64)
        p["clast_w" + s] = 0.05 * jax.random.normal(next(keys), (16, 9),
                                                    jnp.float32)
        p["clast_b" + s] = bf(1)
    return p


def up_path(x, p, s):
    y = conv3d_s1(x, p["cbu1_w" + s], p["cbu1_b" + s], padding=(0, 1, 1))
    y = pixel_shuffle_cl(y, 2)
    y = conv3d_s1(y, p["cbu2_w" + s], p["cbu2_b" + s], padding=(0, 1, 1))
    return pixel_shuffle_to_cf(y, 2)   # (N*D, 16, h, w) for conv_last


# ----------------------------------------------------------------------------
# Forward (mirrors RISE_Mamba.forward, TRAIN_MODE=True)
# ----------------------------------------------------------------------------
def rise_mamba_forward(lqs, p):
    n, t, c, h, w = lqs.shape
    # TODO(synk): check_if_mirror_extended() only sets an unused flag; skipped
    # here to avoid a blocking device->host sync (jit-safe, outputs unchanged).

    x = lqs.astype(jnp.bfloat16)

    # --- feature extraction + multi-scale fusion (stand-in) ---
    # TODO(synk): ConvNeXt backbone, ProjectionHead and the bilinear multi-scale
    # fusion are external modules whose definitions are not given; replaced by a
    # single stride-4 patch-embedding projection producing (nt, h/4, w/4, F).
    h4, w4 = h // 4, w // 4
    x2d = jnp.transpose(x.reshape(n * t, c, h, w), (0, 2, 3, 1))
    xpat = x2d.reshape(n * t, h4, 4, w4, 4, c)
    xpat = jnp.transpose(xpat, (0, 1, 3, 2, 4, 5)).reshape(n * t, h4, w4, 16 * c)
    f0 = conv3d_s1(xpat[:, None], p["feat_w"], p["feat_b"])[:, 0]  # (nt,h4,w4,F)
    F_ = f0.shape[-1]

    # refine(f) + f  (the 1x1 conv fuses the residual add)
    r = conv3d_s1(f0[:, None], p["ref1_w"], p["ref1_b"],
                  padding=(0, 1, 1), act="selu")
    r = conv3d_s1(r, p["ref2_w"], p["ref2_b"], padding=(0, 1, 1), act="selu")
    f = conv3d_s1(r, p["ref3_w"], p["ref3_b"], residual=f0[:, None])[:, 0]

    x_new = f.reshape(n, t, h4, w4, F_)                            # (n,d,h,w,c)

    # TODO(synk): InceptionDWConv3d / MambaLayerglobal / MambaLayerlocal / DTFF
    # (and the Hilbert-curve .pt scan orders) have no provided definitions;
    # treated as identity placeholders.
    M1 = x_new
    M_mid = M1

    # TRAIN_MODE branch: mid feature 1
    M1_Mid = conv_last(up_path(M1, p, "_M1"),
                       p["clast_w_M1"], p["clast_b_M1"]).reshape(n, t, 1, h, w)

    # low-resolution branch
    x_down = conv3d_stride2(M1, p["conv1_w"], p["conv1_b"], act="relu")
    M2 = x_down                                                    # low-res blocks: identity
    x_up = conv_transpose3d_x2(M2, p["upconv2_w"], p["upconv2_b"], act="relu")

    # TRAIN_MODE branch: mid feature 2
    M2_Mid = conv_last(up_path(x_up, p, "_M2"),
                       p["clast_w_M2"], p["clast_b_M2"]).reshape(n, t, 1, h, w)

    M3 = x_up + M_mid                                              # high-res blocks: identity

    final = conv_last(up_path(M3, p, ""),
                      p["clast_w"], p["clast_b"]).reshape(n, t, 1, h, w)

    to_ntchw = lambda a: jnp.transpose(a, (0, 1, 4, 2, 3)).astype(jnp.float32)
    return (final, to_ntchw(M1), to_ntchw(x_up), to_ntchw(M3), M1_Mid, M2_Mid)


# ----------------------------------------------------------------------------
if __name__ == "__main__":
    F = 32                       # num_features (scaled down from 128 for demo)
    n, t, c, h, w = 1, 2, 1, 16, 16

    key = jax.random.PRNGKey(0)
    k_in, k_par = jax.random.split(key)
    lqs = jax.random.normal(k_in, (n, t, c, h, w), jnp.float32)
    params = init_params(k_par, F, c_in=c)

    fwd = jax.jit(rise_mamba_forward)
    outs = jax.block_until_ready(fwd(lqs, params))

    final, M1, x_up, M3, M1_Mid, M2_Mid = outs
    assert final.shape == (n, t, 1, h, w), final.shape
    assert M1.shape == (n, t, F, h // 4, w // 4), M1.shape
    assert x_up.shape == (n, t, F, h // 4, w // 4), x_up.shape
    assert M3.shape == (n, t, F, h // 4, w // 4), M3.shape
    assert M1_Mid.shape == (n, t, 1, h, w), M1_Mid.shape
    assert M2_Mid.shape == (n, t, 1, h, w), M2_Mid.shape
    for o in outs:
        assert bool(jnp.all(jnp.isfinite(o))), "non-finite output"
    print("KERNEL_OK")
</pallas_src>

<mosaic_0001>
module attributes {stable_mosaic.version = 11 : i64} {
  func.func @_conv_taps_kernel(%arg0: i32, %arg1: memref<1x1x16x16xbf16, #tpu.memory_space<vmem>>, %arg2: memref<16x32xbf16, #tpu.memory_space<vmem>>, %arg3: memref<1x32xf32, #tpu.memory_space<vmem>>, %arg4: memref<1x1x16x32xbf16, #tpu.memory_space<vmem>>) attributes {dimension_semantics = [#tpu.dimension_semantics<parallel>], iteration_bounds = array<i64: 2>, scalar_prefetch = 0 : i64, scratch_operands = 0 : i64, tpu.core_type = #tpu.core_type<tc>, window_params = [{transform_indices = @transform_0, window_bounds = array<i64: 1, 1, 16, 16>}, {pipeline_mode = #tpu.pipeline_mode<synchronous>, transform_indices = @transform_1, window_bounds = array<i64: 16, 32>}, {pipeline_mode = #tpu.pipeline_mode<synchronous>, transform_indices = @transform_2, window_bounds = array<i64: 1, 32>}, {transform_indices = @transform_3, window_bounds = array<i64: 1, 1, 16, 32>}]} {
    %c0 = arith.constant 0 : index
    %c0_0 = arith.constant 0 : index
    %0 = vector.load %arg3[%c0, %c0_0] : memref<1x32xf32, #tpu.memory_space<vmem>>, vector<1x32xf32>
    %c0_1 = arith.constant 0 : index
    %c0_2 = arith.constant 0 : index
    %1 = vector.load %arg2[%c0_1, %c0_2] : memref<16x32xbf16, #tpu.memory_space<vmem>>, vector<16x32xbf16>
    %cst = arith.constant 0.000000e+00 : f32
    %2 = vector.broadcast %cst : f32 to vector<16x32xf32>
    %c0_3 = arith.constant 0 : index
    %c0_4 = arith.constant 0 : index
    %c0_5 = arith.constant 0 : index
    %c0_6 = arith.constant 0 : index
    %3 = vector.load %arg1[%c0_3, %c0_4, %c0_5, %c0_6] : memref<1x1x16x16xbf16, #tpu.memory_space<vmem>>, vector<1x1x16x16xbf16>
    %4 = vector.shape_cast %3 : vector<1x1x16x16xbf16> to vector<16x16xbf16>
    %cst_7 = arith.constant dense<0.000000e+00> : vector<16x32xf32>
    %5 = tpu.matmul %4, %1, %cst_7 {dimension_numbers = #tpu.dot_dimension_numbers<[1], [0], [0], [1], [0, 0, 1, 1], [], []>} : vector<16x16xbf16>, vector<16x32xbf16>, vector<16x32xf32> -> vector<16x32xf32>
    %6 = arith.addf %2, %5 : vector<16x32xf32>
    %7 = vector.broadcast %0 : vector<1x32xf32> to vector<16x32xf32>
    %8 = arith.addf %6, %7 : vector<16x32xf32>
    %9 = arith.truncf %8 : vector<16x32xf32> to vector<16x32xbf16>
    %c0_8 = arith.constant 0 : index
    %c0_9 = arith.constant 0 : index
    %c0_10 = arith.constant 0 : index
    %c0_11 = arith.constant 0 : index
    %10 = vector.load %arg4[%c0_8, %c0_9, %c0_10, %c0_11] : memref<1x1x16x32xbf16, #tpu.memory_space<vmem>>, vector<1x1x16x32xbf16>
    %11 = vector.shape_cast %10 : vector<1x1x16x32xbf16> to vector<16x32xbf16>
    %12 = vector.shape_cast %9 : vector<16x32xbf16> to vector<1x1x16x32xbf16>
    tpu.vector_store %arg4[%c0_8, %c0_9, %c0_10, %c0_11], %12 {strides = array<i32>} : memref<1x1x16x32xbf16, #tpu.memory_space<vmem>>, vector<1x1x16x32xbf16>,
    return
  }
  func.func @transform_0(%arg0: i32) -> (i32, i32, i32, i32) {
    %c0_i32 = arith.constant 0 : i32
    %c0_i32_0 = arith.constant 0 : i32
    %c0_i32_1 = arith.constant 0 : i32
    %c0_i32_2 = arith.constant 0 : i32
    return %arg0, %c0_i32, %c0_i32_0, %c0_i32_1 : i32, i32, i32, i32
  }
  func.func @transform_1(%arg0: i32) -> (i32, i32) {
    %c0_i32 = arith.constant 0 : i32
    %c0_i32_0 = arith.constant 0 : i32
    %c0_i32_1 = arith.constant 0 : i32
    return %c0_i32, %c0_i32_0 : i32, i32
  }
  func.func @transform_2(%arg0: i32) -> (i32, i32) {
    %c0_i32 = arith.constant 0 : i32
    %c0_i32_0 = arith.constant 0 : i32
    %c0_i32_1 = arith.constant 0 : i32
    return %c0_i32, %c0_i32_0 : i32, i32
  }
  func.func @transform_3(%arg0: i32) -> (i32, i32, i32, i32) {
    %c0_i32 = arith.constant 0 : i32
    %c0_i32_0 = arith.constant 0 : i32
    %c0_i32_1 = arith.constant 0 : i32
    %c0_i32_2 = arith.constant 0 : i32
    return %arg0, %c0_i32, %c0_i32_0, %c0_i32_1 : i32, i32, i32, i32
  }
}

module attributes {stable_mosaic.version = 11 : i64} {
  func.func @_conv_taps_kernel(%arg0: i32, %arg1: memref<1x1x42x32xbf16, #tpu.memory_space<vmem>>, %arg2: memref<288x32xbf16, #tpu.memory_space<vmem>>, %arg3: memref<1x32xf32, #tpu.memory_space<vmem>>, %arg4: memref<1x1x24x32xbf16, #tpu.memory_space<vmem>>) attributes {dimension_semantics = [#tpu.dimension_semantics<parallel>], iteration_bounds = array<i64: 2>, scalar_prefetch = 0 : i64, scratch_operands = 0 : i64, tpu.core_type = #tpu.core_type<tc>, window_params = [{transform_indices = @transform_0, window_bounds = array<i64: 1, 1, 42, 32>}, {pipeline_mode = #tpu.pipeline_mode<synchronous>, transform_indices = @transform_1, window_bounds = array<i64: 288, 32>}, {pipeline_mode = #tpu.pipeline_mode<synchronous>, transform_indices = @transform_2, window_bounds = array<i64: 1, 32>}, {transform_indices = @transform_3, window_bounds = array<i64: 1, 1, 24, 32>}]} {
    %c0 = arith.constant 0 : index
    %c0_0 = arith.constant 0 : index
    %0 = vector.load %arg3[%c0, %c0_0] : memref<1x32xf32, #tpu.memory_space<vmem>>, vector<1x32xf32>
    %c0_1 = arith.constant 0 : index
    %c0_2 = arith.constant 0 : index
    %1 = vector.load %arg2[%c0_1, %c0_2] : memref<288x32xbf16, #tpu.memory_space<vmem>>, vector<96x32xbf16>
    %c96 = arith.constant 96 : index
    %c0_3 = arith.constant 0 : index
    %2 = vector.load %arg2[%c96, %c0_3] : memref<288x32xbf16, #tpu.memory_space<vmem>>, vector<96x32xbf16>
    %c192 = arith.constant 192 : index
    %c0_4 = arith.constant 0 : index
    %3 = vector.load %arg2[%c192, %c0_4] : memref<288x32xbf16, #tpu.memory_space<vmem>>, vector<96x32xbf16>
    %cst = arith.constant 0.000000e+00 : f32
    %4 = vector.broadcast %cst : f32 to vector<24x32xf32>
    %c0_5 = arith.constant 0 : index
    %c0_6 = arith.constant 0 : index
    %c0_7 = arith.constant 0 : index
    %c0_8 = arith.constant 0 : index
    %5 = vector.load %arg1[%c0_5, %c0_6, %c0_7, %c0_8] : memref<1x1x42x32xbf16, #tpu.memory_space<vmem>>, vector<1x1x24x32xbf16>
    %6 = vector.shape_cast %5 : vector<1x1x24x32xbf16> to vector<24x32xbf16>
    %c0_9 = arith.constant 0 : index
    %c0_10 = arith.constant 0 : index
    %c1 = arith.constant 1 : index
    %c0_11 = arith.constant 0 : index
    %7 = vector.load %arg1[%c0_9, %c0_10, %c1, %c0_11] : memref<1x1x42x32xbf16, #tpu.memory_space<vmem>>, vector<1x1x24x32xbf16>
    %8 = vector.shape_cast %7 : vector<1x1x24x32xbf16> to vector<24x32xbf16>
    %c0_12 = arith.constant 0 : index
    %c0_13 = arith.constant 0 : index
    %c2 = arith.constant 2 : index
    %c0_14 = arith.constant 0 : index
    %9 = vector.load %arg1[%c0_12, %c0_13, %c2, %c0_14] : memref<1x1x42x32xbf16, #tpu.memory_space<vmem>>, vector<1x1x24x32xbf16>
    %10 = vector.shape_cast %9 : vector<1x1x24x32xbf16> to vector<24x32xbf16>
    %11 = tpu.concatenate %6, %8, %10 in 1 : vector<24x32xbf16>, vector<24x32xbf16>, vector<24x32xbf16> -> vector<24x96xbf16>
    %cst_15 = arith.constant dense<0.000000e+00> : vector<24x32xf32>
    %12 = tpu.matmul %11, %1, %cst_15 {dimension_numbers = #tpu.dot_dimension_numbers<[1], [0], [0], [1], [0, 0, 1, 1], [], []>} : vector<24x96xbf16>, vector<96x32xbf16>, vector<24x32xf32> -> vector<24x32xf32>
    %13 = arith.addf %4, %12 : vector<24x32xf32>
    %c0_16 = arith.constant 0 : index
    %c0_17 = arith.constant 0 : index
    %c6 = arith.constant 6 : index
    %c0_18 = arith.constant 0 : index
    %14 = vector.load %arg1[%c0_16, %c0_17, %c6, %c0_18] : memref<1x1x42x32xbf16, #tpu.memory_space<vmem>>, vector<1x1x24x32xbf16>
    %15 = vector.shape_cast %14 : vector<1x1x24x32xbf16> to vector<24x32xbf16>
    %c0_19 = arith.constant 0 : index
    %c0_20 = arith.constant 0 : index
    %c7 = arith.constant 7 : index
    %c0_21 = arith.constant 0 : index
    %16 = vector.load %arg1[%c0_19, %c0_20, %c7, %c0_21] : memref<1x1x42x32xbf16, #tpu.memory_space<vmem>>, vector<1x1x24x32xbf16>
    %17 = vector.shape_cast %16 : vector<1x1x24x32xbf16> to vector<24x32xbf16>
    %c0_22 = arith.constant 0 : index
    %c0_23 = arith.constant 0 : index
    %c8 = arith.constant 8 : index
    %c0_24 = arith.constant 0 : index
    %18 = vector.load %arg1[%c0_22, %c0_23, %c8, %c0_24] : memref<1x1x42x32xbf16, #tpu.memory_space<vmem>>, vector<1x1x24x32xbf16>
    %19 = vector.shape_cast %18 : vector<1x1x24x32xbf16> to vector<24x32xbf16>
    %20 = tpu.concatenate %15, %17, %19 in 1 : vector<24x32xbf16>, vector<24x32xbf16>, vector<24x32xbf16> -> vector<24x96xbf16>
    %cst_25 = arith.constant dense<0.000000e+00> : vector<24x32xf32>
    %21 = tpu.matmul %20, %2, %cst_25 {dimension_numbers = #tpu.dot_dimension_numbers<[1], [0], [0], [1], [0, 0, 1, 1], [], []>} : vector<24x96xbf16>, vector<96x32xbf16>, vector<24x32xf32> -> vector<24x32xf32>
    %22 = arith.addf %13, %21 : vector<24x32xf32>
    %c0_26 = arith.constant 0 : index
    %c0_27 = arith.constant 0 : index
    %c12 = arith.constant 12 : index
    %c0_28 = arith.constant 0 : index
    %23 = vector.load %arg1[%c0_26, %c0_27, %c12, %c0_28] : memref<1x1x42x32xbf16, #tpu.memory_space<vmem>>, vector<1x1x24x32xbf16>
    %24 = vector.shape_cast %23 : vector<1x1x24x32xbf16> to vector<24x32xbf16>
    %c0_29 = arith.constant 0 : index
    %c0_30 = arith.constant 0 : index
    %c13 = arith.constant 13 : index
    %c0_31 = arith.constant 0 : index
    %25 = vector.load %arg1[%c0_29, %c0_30, %c13, %c0_31] : memref<1x1x42x32xbf16, #tpu.memory_space<vmem>>, vector<1x1x24x32xbf16>
    %26 = vector.shape_cast %25 : vector<1x1x24x32xbf16> to vector<24x32xbf16>
    %c0_32 = arith.constant 0 : index
    %c0_33 = arith.constant 0 : index
    %c14 = arith.constant 14 : index
    %c0_34 = arith.constant 0 : index
    %27 = vector.load %arg1[%c0_32, %c0_33, %c14, %c0_34] : memref<1x1x42x32xbf16, #tpu.memory_space<vmem>>, vector<1x1x24x32xbf16>
    %28 = vector.shape_cast %27 : vector<1x1x24x32xbf16> to vector<24x32xbf16>
    %29 = tpu.concatenate %24, %26, %28 in 1 : vector<24x32xbf16>, vector<24x32xbf16>, vector<24x32xbf16> -> vector<24x96xbf16>
    %cst_35 = arith.constant dense<0.000000e+00> : vector<24x32xf32>
    %30 = tpu.matmul %29, %3, %cst_35 {dimension_numbers = #tpu.dot_dimension_numbers<[1], [0], [0], [1], [0, 0, 1, 1], [], []>} : vector<24x96xbf16>, vector<96x32xbf16>, vector<24x32xf32> -> vector<24x32xf32>
    %31 = arith.addf %22, %30 : vector<24x32xf32>
    %32 = vector.broadcast %0 : vector<1x32xf32> to vector<24x32xf32>
    %33 = arith.addf %31, %32 : vector<24x32xf32>
    %cst_36 = arith.constant 0.000000e+00 : f32
    %34 = vector.broadcast %cst_36 : f32 to vector<24x32xf32>
    %35 = arith.minimumf %33, %34 : vector<24x32xf32>
    %cst_37 = arith.constant 0.000000e+00 : f32
    %36 = vector.broadcast %cst_37 : f32 to vector<24x32xf32>
    %37 = arith.maximumf %33, %36 : vector<24x32xf32>
    %38 = math.exp %35 : vector<24x32xf32>
    %cst_38 = arith.constant 1.000000e+00 : f32
    %39 = vector.broadcast %cst_38 : f32 to vector<24x32xf32>
    %40 = arith.subf %38, %39 : vector<24x32xf32>
    %cst_39 = arith.constant 1.67326319 : f32
    %41 = vector.broadcast %cst_39 : f32 to vector<24x32xf32>
    %42 = arith.mulf %41, %40 : vector<24x32xf32>
    %43 = arith.addf %37, %42 : vector<24x32xf32>
    %cst_40 = arith.constant 1.05070102 : f32
    %44 = vector.broadcast %cst_40 : f32 to vector<24x32xf32>
    %45 = arith.mulf %44, %43 : vector<24x32xf32>
    %46 = arith.truncf %45 : vector<24x32xf32> to vector<24x32xbf16>
    %c0_41 = arith.constant 0 : index
    %c0_42 = arith.constant 0 : index
    %c0_43 = arith.constant 0 : index
    %c0_44 = arith.constant 0 : index
    %47 = vector.load %arg4[%c0_41, %c0_42, %c0_43, %c0_44] : memref<1x1x24x32xbf16, #tpu.memory_space<vmem>>, vector<1x1x24x32xbf16>
    %48 = vector.shape_cast %47 : vector<1x1x24x32xbf16> to vector<24x32xbf16>
    %49 = vector.shape_cast %46 : vector<24x32xbf16> to vector<1x1x24x32xbf16>
    tpu.vector_store %arg4[%c0_41, %c0_42, %c0_43, %c0_44], %49 {strides = array<i32>} : memref<1x1x24x32xbf16, #tpu.memory_space<vmem>>, vector<1x1x24x32xbf16>,
    return
  }
  func.func @transform_0(%arg0: i32) -> (i32, i32, i32, i32) {
    %c0_i32 = arith.constant 0 : i32
    %c0_i32_0 = arith.constant 0 : i32
    %c0_i32_1 = arith.constant 0 : i32
    %c0_i32_2 = arith.constant 0 : i32
    return %arg0, %c0_i32, %c0_i32_0, %c0_i32_1 : i32, i32, i32, i32
  }
  func.func @transform_1(%arg0: i32) -> (i32, i32) {
    %c0_i32 = arith.constant 0 : i32
    %c0_i32_0 = arith.constant 0 : i32
    %c0_i32_1 = arith.constant 0 : i32
    return %c0_i32, %c0_i32_0 : i32, i32
  }
  func.func @transform_2(%arg0: i32) -> (i32, i32) {
    %c0_i32 = arith.constant 0 : i32
    %c0_i32_0 = arith.constant 0 : i32
    %c0_i32_1 = arith.constant 0 : i32
    return %c0_i32, %c0_i32_0 : i32, i32
  }
  func.func @transform_3(%arg0: i32) -> (i32, i32, i32, i32) {
    %c0_i32 = arith.constant 0 : i32
    %c0_i32_0 = arith.constant 0 : i32
    %c0_i32_1 = arith.constant 0 : i32
    %c0_i32_2 = arith.constant 0 : i32
    return %arg0, %c0_i32, %c0_i32_0, %c0_i32_1 : i32, i32, i32, i32
  }
}

module attributes {stable_mosaic.version = 11 : i64} {
  func.func @_conv_taps_kernel(%arg0: i32, %arg1: memref<1x1x16x32xbf16, #tpu.memory_space<vmem>>, %arg2: memref<32x32xbf16, #tpu.memory_space<vmem>>, %arg3: memref<1x32xf32, #tpu.memory_space<vmem>>, %arg4: memref<1x16x32xbf16, #tpu.memory_space<vmem>>, %arg5: memref<1x1x16x32xbf16, #tpu.memory_space<vmem>>) attributes {dimension_semantics = [#tpu.dimension_semantics<parallel>], iteration_bounds = array<i64: 2>, scalar_prefetch = 0 : i64, scratch_operands = 0 : i64, tpu.core_type = #tpu.core_type<tc>, window_params = [{transform_indices = @transform_0, window_bounds = array<i64: 1, 1, 16, 32>}, {pipeline_mode = #tpu.pipeline_mode<synchronous>, transform_indices = @transform_1, window_bounds = array<i64: 32, 32>}, {pipeline_mode = #tpu.pipeline_mode<synchronous>, transform_indices = @transform_2, window_bounds = array<i64: 1, 32>}, {transform_indices = @transform_3, window_bounds = array<i64: 1, 16, 32>}, {transform_indices = @transform_4, window_bounds = array<i64: 1, 1, 16, 32>}]} {
    %c0 = arith.constant 0 : index
    %c0_0 = arith.constant 0 : index
    %0 = vector.load %arg3[%c0, %c0_0] : memref<1x32xf32, #tpu.memory_space<vmem>>, vector<1x32xf32>
    %c0_1 = arith.constant 0 : index
    %c0_2 = arith.constant 0 : index
    %1 = vector.load %arg2[%c0_1, %c0_2] : memref<32x32xbf16, #tpu.memory_space<vmem>>, vector<32x32xbf16>
    %cst = arith.constant 0.000000e+00 : f32
    %2 = vector.broadcast %cst : f32 to vector<16x32xf32>
    %c0_3 = arith.constant 0 : index
    %c0_4 = arith.constant 0 : index
    %c0_5 = arith.constant 0 : index
    %c0_6 = arith.constant 0 : index
    %3 = vector.load %arg1[%c0_3, %c0_4, %c0_5, %c0_6] : memref<1x1x16x32xbf16, #tpu.memory_space<vmem>>, vector<1x1x16x32xbf16>
    %4 = vector.shape_cast %3 : vector<1x1x16x32xbf16> to vector<16x32xbf16>
    %cst_7 = arith.constant dense<0.000000e+00> : vector<16x32xf32>
    %5 = tpu.matmul %4, %1, %cst_7 {dimension_numbers = #tpu.dot_dimension_numbers<[1], [0], [0], [1], [0, 0, 1, 1], [], []>} : vector<16x32xbf16>, vector<32x32xbf16>, vector<16x32xf32> -> vector<16x32xf32>
    %6 = arith.addf %2, %5 : vector<16x32xf32>
    %7 = vector.broadcast %0 : vector<1x32xf32> to vector<16x32xf32>
    %8 = arith.addf %6, %7 : vector<16x32xf32>
    %c0_8 = arith.constant 0 : index
    %c0_9 = arith.constant 0 : index
    %c0_10 = arith.constant 0 : index
    %9 = vector.load %arg4[%c0_8, %c0_9, %c0_10] : memref<1x16x32xbf16, #tpu.memory_space<vmem>>, vector<1x16x32xbf16>
    %10 = vector.shape_cast %9 : vector<1x16x32xbf16> to vector<16x32xbf16>
    %11 = arith.extf %10 : vector<16x32xbf16> to vector<16x32xf32>
    %12 = arith.addf %8, %11 : vector<16x32xf32>
    %13 = arith.truncf %12 : vector<16x32xf32> to vector<16x32xbf16>
    %c0_11 = arith.constant 0 : index
    %c0_12 = arith.constant 0 : index
    %c0_13 = arith.constant 0 : index
    %c0_14 = arith.constant 0 : index
    %14 = vector.load %arg5[%c0_11, %c0_12, %c0_13, %c0_14] : memref<1x1x16x32xbf16, #tpu.memory_space<vmem>>, vector<1x1x16x32xbf16>
    %15 = vector.shape_cast %14 : vector<1x1x16x32xbf16> to vector<16x32xbf16>
    %16 = vector.shape_cast %13 : vector<16x32xbf16> to vector<1x1x16x32xbf16>
    tpu.vector_store %arg5[%c0_11, %c0_12, %c0_13, %c0_14], %16 {strides = array<i32>} : memref<1x1x16x32xbf16, #tpu.memory_space<vmem>>, vector<1x1x16x32xbf16>,
    return
  }
  func.func @transform_0(%arg0: i32) -> (i32, i32, i32, i32) {
    %c0_i32 = arith.constant 0 : i32
    %c0_i32_0 = arith.constant 0 : i32
    %c0_i32_1 = arith.constant 0 : i32
    %c0_i32_2 = arith.constant 0 : i32
    return %arg0, %c0_i32, %c0_i32_0, %c0_i32_1 : i32, i32, i32, i32
  }
  func.func @transform_1(%arg0: i32) -> (i32, i32) {
    %c0_i32 = arith.constant 0 : i32
    %c0_i32_0 = arith.constant 0 : i32
    %c0_i32_1 = arith.constant 0 : i32
    return %c0_i32, %c0_i32_0 : i32, i32
  }
  func.func @transform_2(%arg0: i32) -> (i32, i32) {
    %c0_i32 = arith.constant 0 : i32
    %c0_i32_0 = arith.constant 0 : i32
    %c0_i32_1 = arith.constant 0 : i32
    return %c0_i32, %c0_i32_0 : i32, i32
  }
  func.func @transform_3(%arg0: i32) -> (i32, i32, i32) {
    %c0_i32 = arith.constant 0 : i32
    %c0_i32_0 = arith.constant 0 : i32
    %c0_i32_1 = arith.constant 0 : i32
    return %arg0, %c0_i32, %c0_i32_0 : i32, i32, i32
  }
  func.func @transform_4(%arg0: i32) -> (i32, i32, i32, i32) {
    %c0_i32 = arith.constant 0 : i32
    %c0_i32_0 = arith.constant 0 : i32
    %c0_i32_1 = arith.constant 0 : i32
    %c0_i32_2 = arith.constant 0 : i32
    return %arg0, %c0_i32, %c0_i32_0, %c0_i32_1 : i32, i32, i32, i32
  }
}

module attributes {stable_mosaic.version = 11 : i64} {
  func.func @_conv_taps_kernel(%arg0: i32, %arg1: memref<1x12x12x32xbf16, #tpu.memory_space<vmem>>, %arg2: memref<864x64xbf16, #tpu.memory_space<vmem>>, %arg3: memref<1x64xf32, #tpu.memory_space<vmem>>, %arg4: memref<1x1x6x64xbf16, #tpu.memory_space<vmem>>) attributes {dimension_semantics = [#tpu.dimension_semantics<parallel>], iteration_bounds = array<i64: 2>, scalar_prefetch = 0 : i64, scratch_operands = 0 : i64, tpu.core_type = #tpu.core_type<tc>, window_params = [{transform_indices = @transform_0, window_bounds = array<i64: 1, 12, 12, 32>}, {pipeline_mode = #tpu.pipeline_mode<synchronous>, transform_indices = @transform_1, window_bounds = array<i64: 864, 64>}, {pipeline_mode = #tpu.pipeline_mode<synchronous>, transform_indices = @transform_2, window_bounds = array<i64: 1, 64>}, {transform_indices = @transform_3, window_bounds = array<i64: 1, 1, 6, 64>}]} {
    %c0 = arith.constant 0 : index
    %c0_0 = arith.constant 0 : index
    %0 = vector.load %arg3[%c0, %c0_0] : memref<1x64xf32, #tpu.memory_space<vmem>>, vector<1x64xf32>
    %c0_1 = arith.constant 0 : index
    %c0_2 = arith.constant 0 : index
    %1 = vector.load %arg2[%c0_1, %c0_2] : memref<864x64xbf16, #tpu.memory_space<vmem>>, vector<96x64xbf16>
    %c96 = arith.constant 96 : index
    %c0_3 = arith.constant 0 : index
    %2 = vector.load %arg2[%c96, %c0_3] : memref<864x64xbf16, #tpu.memory_space<vmem>>, vector<96x64xbf16>
    %c192 = arith.constant 192 : index
    %c0_4 = arith.constant 0 : index
    %3 = vector.load %arg2[%c192, %c0_4] : memref<864x64xbf16, #tpu.memory_space<vmem>>, vector<96x64xbf16>
    %c288 = arith.constant 288 : index
    %c0_5 = arith.constant 0 : index
    %4 = vector.load %arg2[%c288, %c0_5] : memref<864x64xbf16, #tpu.memory_space<vmem>>, vector<96x64xbf16>
    %c384 = arith.constant 384 : index
    %c0_6 = arith.constant 0 : index
    %5 = vector.load %arg2[%c384, %c0_6] : memref<864x64xbf16, #tpu.memory_space<vmem>>, vector<96x64xbf16>
    %c480 = arith.constant 480 : index
    %c0_7 = arith.constant 0 : index
    %6 = vector.load %arg2[%c480, %c0_7] : memref<864x64xbf16, #tpu.memory_space<vmem>>, vector<96x64xbf16>
    %c576 = arith.constant 576 : index
    %c0_8 = arith.constant 0 : index
    %7 = vector.load %arg2[%c576, %c0_8] : memref<864x64xbf16, #tpu.memory_space<vmem>>, vector<96x64xbf16>
    %c672 = arith.constant 672 : index
    %c0_9 = arith.constant 0 : index
    %8 = vector.load %arg2[%c672, %c0_9] : memref<864x64xbf16, #tpu.memory_space<vmem>>, vector<96x64xbf16>
    %c768 = arith.constant 768 : index
    %c0_10 = arith.constant 0 : index
    %9 = vector.load %arg2[%c768, %c0_10] : memref<864x64xbf16, #tpu.memory_space<vmem>>, vector<96x64xbf16>
    %cst = arith.constant 0.000000e+00 : f32
    %10 = vector.broadcast %cst : f32 to vector<6x64xf32>
    %c0_11 = arith.constant 0 : index
    %c0_12 = arith.constant 0 : index
    %c0_13 = arith.constant 0 : index
    %c0_14 = arith.constant 0 : index
    %11 = vector.load %arg1[%c0_11, %c0_12, %c0_13, %c0_14] : memref<1x12x12x32xbf16, #tpu.memory_space<vmem>>, vector<1x1x6x32xbf16>
    %12 = vector.shape_cast %11 : vector<1x1x6x32xbf16> to vector<6x32xbf16>
    %c0_15 = arith.constant 0 : index
    %c1 = arith.constant 1 : index
    %c0_16 = arith.constant 0 : index
    %c0_17 = arith.constant 0 : index
    %13 = vector.load %arg1[%c0_15, %c1, %c0_16, %c0_17] : memref<1x12x12x32xbf16, #tpu.memory_space<vmem>>, vector<1x1x6x32xbf16>
    %14 = vector.shape_cast %13 : vector<1x1x6x32xbf16> to vector<6x32xbf16>
    %c0_18 = arith.constant 0 : index
    %c0_19 = arith.constant 0 : index
    %c1_20 = arith.constant 1 : index
    %c0_21 = arith.constant 0 : index
    %15 = vector.load %arg1[%c0_18, %c0_19, %c1_20, %c0_21] : memref<1x12x12x32xbf16, #tpu.memory_space<vmem>>, vector<1x1x6x32xbf16>
    %16 = vector.shape_cast %15 : vector<1x1x6x32xbf16> to vector<6x32xbf16>
    %17 = tpu.concatenate %12, %14, %16 in 1 : vector<6x32xbf16>, vector<6x32xbf16>, vector<6x32xbf16> -> vector<6x96xbf16>
    %cst_22 = arith.constant dense<0.000000e+00> : vector<6x64xf32>
    %18 = tpu.matmul %17, %1, %cst_22 {dimension_numbers = #tpu.dot_dimension_numbers<[1], [0], [0], [1], [0, 0, 1, 1], [], []>} : vector<6x96xbf16>, vector<96x64xbf16>, vector<6x64xf32> -> vector<6x64xf32>
    %19 = arith.addf %10, %18 : vector<6x64xf32>
    %c0_23 = arith.constant 0 : index
    %c2 = arith.constant 2 : index
    %c0_24 = arith.constant 0 : index
    %c0_25 = arith.constant 0 : index
    %20 = vector.load %arg1[%c0_23, %c2, %c0_24, %c0_25] : memref<1x12x12x32xbf16, #tpu.memory_space<vmem>>, vector<1x1x6x32xbf16>
    %21 = vector.shape_cast %20 : vector<1x1x6x32xbf16> to vector<6x32xbf16>
    %c0_26 = arith.constant 0 : index
    %c3 = arith.constant 3 : index
    %c0_27 = arith.constant 0 : index
    %c0_28 = arith.constant 0 : index
    %22 = vector.load %arg1[%c0_26, %c3, %c0_27, %c0_28] : memref<1x12x12x32xbf16, #tpu.memory_space<vmem>>, vector<1x1x6x32xbf16>
    %23 = vector.shape_cast %22 : vector<1x1x6x32xbf16> to vector<6x32xbf16>
    %c0_29 = arith.constant 0 : index
    %c2_30 = arith.constant 2 : index
    %c1_31 = arith.constant 1 : index
    %c0_32 = arith.constant 0 : index
    %24 = vector.load %arg1[%c0_29, %c2_30, %c1_31, %c0_32] : memref<1x12x12x32xbf16, #tpu.memory_space<vmem>>, vector<1x1x6x32xbf16>
    %25 = vector.shape_cast %24 : vector<1x1x6x32xbf16> to vector<6x32xbf16>
    %26 = tpu.concatenate %21, %23, %25 in 1 : vector<6x32xbf16>, vector<6x32xbf16>, vector<6x32xbf16> -> vector<6x96xbf16>
    %cst_33 = arith.constant dense<0.000000e+00> : vector<6x64xf32>
    %27 = tpu.matmul %26, %2, %cst_33 {dimension_numbers = #tpu.dot_dimension_numbers<[1], [0], [0], [1], [0, 0, 1, 1], [], []>} : vector<6x96xbf16>, vector<96x64xbf16>, vector<6x64xf32> -> vector<6x64xf32>
    %28 = arith.addf %19, %27 : vector<6x64xf32>
    %c0_34 = arith.constant 0 : index
    %c0_35 = arith.constant 0 : index
    %c3_36 = arith.constant 3 : index
    %c0_37 = arith.constant 0 : index
    %29 = vector.load %arg1[%c0_34, %c0_35, %c3_36, %c0_37] : memref<1x12x12x32xbf16, #tpu.memory_space<vmem>>, vector<1x1x6x32xbf16>
    %30 = vector.shape_cast %29 : vector<1x1x6x32xbf16> to vector<6x32xbf16>
    %c0_38 = arith.constant 0 : index
    %c1_39 = arith.constant 1 : index
    %c3_40 = arith.constant 3 : index
    %c0_41 = arith.constant 0 : index
    %31 = vector.load %arg1[%c0_38, %c1_39, %c3_40, %c0_41] : memref<1x12x12x32xbf16, #tpu.memory_space<vmem>>, vector<1x1x6x32xbf16>
    %32 = vector.shape_cast %31 : vector<1x1x6x32xbf16> to vector<6x32xbf16>
    %c0_42 = arith.constant 0 : index
    %c0_43 = arith.constant 0 : index
    %c4 = arith.constant 4 : index
    %c0_44 = arith.constant 0 : index
    %33 = vector.load %arg1[%c0_42, %c0_43, %c4, %c0_44] : memref<1x12x12x32xbf16, #tpu.memory_space<vmem>>, vector<1x1x6x32xbf16>
    %34 = vector.shape_cast %33 : vector<1x1x6x32xbf16> to vector<6x32xbf16>
    %35 = tpu.concatenate %30, %32, %34 in 1 : vector<6x32xbf16>, vector<6x32xbf16>, vector<6x32xbf16> -> vector<6x96xbf16>
    %cst_45 = arith.constant dense<0.000000e+00> : vector<6x64xf32>
    %36 = tpu.matmul %35, %3, %cst_45 {dimension_numbers = #tpu.dot_dimension_numbers<[1], [0], [0], [1], [0, 0, 1, 1], [], []>} : vector<6x96xbf16>, vector<96x64xbf16>, vector<6x64xf32> -> vector<6x64xf32>
    %37 = arith.addf %28, %36 : vector<6x64xf32>
    %c0_46 = arith.constant 0 : index
    %c4_47 = arith.constant 4 : index
    %c0_48 = arith.constant 0 : index
    %c0_49 = arith.constant 0 : index
    %38 = vector.load %arg1[%c0_46, %c4_47, %c0_48, %c0_49] : memref<1x12x12x32xbf16, #tpu.memory_space<vmem>>, vector<1x1x6x32xbf16>
    %39 = vector.shape_cast %38 : vector<1x1x6x32xbf16> to vector<6x32xbf16>
    %c0_50 = arith.constant 0 : index
    %c5 = arith.constant 5 : index
    %c0_51 = arith.constant 0 : index
    %c0_52 = arith.constant 0 : index
    %40 = vector.load %arg1[%c0_50, %c5, %c0_51, %c0_52] : memref<1x12x12x32xbf16, #tpu.memory_space<vmem>>, vector<1x1x6x32xbf16>
    %41 = vector.shape_cast %40 : vector<1x1x6x32xbf16> to vector<6x32xbf16>
    %c0_53 = arith.constant 0 : index
    %c4_54 = arith.constant 4 : index
    %c1_55 = arith.constant 1 : index
    %c0_56 = arith.constant 0 : index
    %42 = vector.load %arg1[%c0_53, %c4_54, %c1_55, %c0_56] : memref<1x12x12x32xbf16, #tpu.memory_space<vmem>>, vector<1x1x6x32xbf16>
    %43 = vector.shape_cast %42 : vector<1x1x6x32xbf16> to vector<6x32xbf16>
    %44 = tpu.concatenate %39, %41, %43 in 1 : vector<6x32xbf16>, vector<6x32xbf16>, vector<6x32xbf16> -> vector<6x96xbf16>
    %cst_57 = arith.constant dense<0.000000e+00> : vector<6x64xf32>
    %45 = tpu.matmul %44, %4, %cst_57 {dimension_numbers = #tpu.dot_dimension_numbers<[1], [0], [0], [1], [0, 0, 1, 1], [], []>} : vector<6x96xbf16>, vector<96x64xbf16>, vector<6x64xf32> -> vector<6x64xf32>
    %46 = arith.addf %37, %45 : vector<6x64xf32>
    %c0_58 = arith.constant 0 : index
    %c6 = arith.constant 6 : index
    %c0_59 = arith.constant 0 : index
    %c0_60 = arith.constant 0 : index
    %47 = vector.load %arg1[%c0_58, %c6, %c0_59, %c0_60] : memref<1x12x12x32xbf16, #tpu.memory_space<vmem>>, vector<1x1x6x32xbf16>
    %48 = vector.shape_cast %47 : vector<1x1x6x32xbf16> to vector<6x32xbf16>
    %c0_61 = arith.constant 0 : index
    %c7 = arith.constant 7 : index
    %c0_62 = arith.constant 0 : index
    %c0_63 = arith.constant 0 : index
    %49 = vector.load %arg1[%c0_61, %c7, %c0_62, %c0_63] : memref<1x12x12x32xbf16, #tpu.memory_space<vmem>>, vector<1x1x6x32xbf16>
    %50 = vector.shape_cast %49 : vector<1x1x6x32xbf16> to vector<6x32xbf16>
    %c0_64 = arith.constant 0 : index
    %c6_65 = arith.constant 6 : index
    %c1_66 = arith.constant 1 : index
    %c0_67 = arith.constant 0 : index
    %51 = vector.load %arg1[%c0_64, %c6_65, %c1_66, %c0_67] : memref<1x12x12x32xbf16, #tpu.memory_space<vmem>>, vector<1x1x6x32xbf16>
    %52 = vector.shape_cast %51 : vector<1x1x6x32xbf16> to vector<6x32xbf16>
    %53 = tpu.concatenate %48, %50, %52 in 1 : vector<6x32xbf16>, vector<6x32xbf16>, vector<6x32xbf16> -> vector<6x96xbf16>
    %cst_68 = arith.constant dense<0.000000e+00> : vector<6x64xf32>
    %54 = tpu.matmul %53, %5, %cst_68 {dimension_numbers = #tpu.dot_dimension_numbers<[1], [0], [0], [1], [0, 0, 1, 1], [], []>} : vector<6x96xbf16>, vector<96x64xbf16>, vector<6x64xf32> -> vector<6x64xf32>
    %55 = arith.addf %46, %54 : vector<6x64xf32>
    %c0_69 = arith.constant 0 : index
    %c4_70 = arith.constant 4 : index
    %c3_71 = arith.constant 3 : index
    %c0_72 = arith.constant 0 : index
    %56 = vector.load %arg1[%c0_69, %c4_70, %c3_71, %c0_72] : memref<1x12x12x32xbf16, #tpu.memory_space<vmem>>, vector<1x1x6x32xbf16>
    %57 = vector.shape_cast %56 : vector<1x1x6x32xbf16> to vector<6x32xbf16>
    %c0_73 = arith.constant 0 : index
    %c5_74 = arith.constant 5 : index
    %c3_75 = arith.constant 3 : index
    %c0_76 = arith.constant 0 : index
    %58 = vector.load %arg1[%c0_73, %c5_74, %c3_75, %c0_76] : memref<1x12x12x32xbf16, #tpu.memory_space<vmem>>, vector<1x1x6x32xbf16>
    %59 = vector.shape_cast %58 : vector<1x1x6x32xbf16> to vector<6x32xbf16>
    %c0_77 = arith.constant 0 : index
    %c4_78 = arith.constant 4 : index
    %c4_79 = arith.constant 4 : index
    %c0_80 = arith.constant 0 : index
    %60 = vector.load %arg1[%c0_77, %c4_78, %c4_79, %c0_80] : memref<1x12x12x32xbf16, #tpu.memory_space<vmem>>, vector<1x1x6x32xbf16>
    %61 = vector.shape_cast %60 : vector<1x1x6x32xbf16> to vector<6x32xbf16>
    %62 = tpu.concatenate %57, %59, %61 in 1 : vector<6x32xbf16>, vector<6x32xbf16>, vector<6x32xbf16> -> vector<6x96xbf16>
    %cst_81 = arith.constant dense<0.000000e+00> : vector<6x64xf32>
    %63 = tpu.matmul %62, %6, %cst_81 {dimension_numbers = #tpu.dot_dimension_numbers<[1], [0], [0], [1], [0, 0, 1, 1], [], []>} : vector<6x96xbf16>, vector<96x64xbf16>, vector<6x64xf32> -> vector<6x64xf32>
    %64 = arith.addf %55, %63 : vector<6x64xf32>
    %c0_82 = arith.constant 0 : index
    %c8 = arith.constant 8 : index
    %c0_83 = arith.constant 0 : index
    %c0_84 = arith.constant 0 : index
    %65 = vector.load %arg1[%c0_82, %c8, %c0_83, %c0_84] : memref<1x12x12x32xbf16, #tpu.memory_space<vmem>>, vector<1x1x6x32xbf16>
    %66 = vector.shape_cast %65 : vector<1x1x6x32xbf16> to vector<6x32xbf16>
    %c0_85 = arith.constant 0 : index
    %c9 = arith.constant 9 : index
    %c0_86 = arith.constant 0 : index
    %c0_87 = arith.constant 0 : index
    %67 = vector.load %arg1[%c0_85, %c9, %c0_86, %c0_87] : memref<1x12x12x32xbf16, #tpu.memory_space<vmem>>, vector<1x1x6x32xbf16>
    %68 = vector.shape_cast %67 : vector<1x1x6x32xbf16> to vector<6x32xbf16>
    %c0_88 = arith.constant 0 : index
    %c8_89 = arith.constant 8 : index
    %c1_90 = arith.constant 1 : index
    %c0_91 = arith.constant 0 : index
    %69 = vector.load %arg1[%c0_88, %c8_89, %c1_90, %c0_91] : memref<1x12x12x32xbf16, #tpu.memory_space<vmem>>, vector<1x1x6x32xbf16>
    %70 = vector.shape_cast %69 : vector<1x1x6x32xbf16> to vector<6x32xbf16>
    %71 = tpu.concatenate %66, %68, %70 in 1 : vector<6x32xbf16>, vector<6x32xbf16>, vector<6x32xbf16> -> vector<6x96xbf16>
    %cst_92 = arith.constant dense<0.000000e+00> : vector<6x64xf32>
    %72 = tpu.matmul %71, %7, %cst_92 {dimension_numbers = #tpu.dot_dimension_numbers<[1], [0], [0], [1], [0, 0, 1, 1], [], []>} : vector<6x96xbf16>, vector<96x64xbf16>, vector<6x64xf32> -> vector<6x64xf32>
    %73 = arith.addf %64, %72 : vector<6x64xf32>
    %c0_93 = arith.constant 0 : index
    %c10 = arith.constant 10 : index
    %c0_94 = arith.constant 0 : index
    %c0_95 = arith.constant 0 : index
    %74 = vector.load %arg1[%c0_93, %c10, %c0_94, %c0_95] : memref<1x12x12x32xbf16, #tpu.memory_space<vmem>>, vector<1x1x6x32xbf16>
    %75 = vector.shape_cast %74 : vector<1x1x6x32xbf16> to vector<6x32xbf16>
    %c0_96 = arith.constant 0 : index
    %c11 = arith.constant 11 : index
    %c0_97 = arith.constant 0 : index
    %c0_98 = arith.constant 0 : index
    %76 = vector.load %arg1[%c0_96, %c11, %c0_97, %c0_98] : memref<1x12x12x32xbf16, #tpu.memory_space<vmem>>, vector<1x1x6x32xbf16>
    %77 = vector.shape_cast %76 : vector<1x1x6x32xbf16> to vector<6x32xbf16>
    %c0_99 = arith.constant 0 : index
    %c10_100 = arith.constant 10 : index
    %c1_101 = arith.constant 1 : index
    %c0_102 = arith.constant 0 : index
    %78 = vector.load %arg1[%c0_99, %c10_100, %c1_101, %c0_102] : memref<1x12x12x32xbf16, #tpu.memory_space<vmem>>, vector<1x1x6x32xbf16>
    %79 = vector.shape_cast %78 : vector<1x1x6x32xbf16> to vector<6x32xbf16>
    %80 = tpu.concatenate %75, %77, %79 in 1 : vector<6x32xbf16>, vector<6x32xbf16>, vector<6x32xbf16> -> vector<6x96xbf16>
    %cst_103 = arith.constant dense<0.000000e+00> : vector<6x64xf32>
    %81 = tpu.matmul %80, %8, %cst_103 {dimension_numbers = #tpu.dot_dimension_numbers<[1], [0], [0], [1], [0, 0, 1, 1], [], []>} : vector<6x96xbf16>, vector<96x64xbf16>, vector<6x64xf32> -> vector<6x64xf32>
    %82 = arith.addf %73, %81 : vector<6x64xf32>
    %c0_104 = arith.constant 0 : index
    %c8_105 = arith.constant 8 : index
    %c3_106 = arith.constant 3 : index
    %c0_107 = arith.constant 0 : index
    %83 = vector.load %arg1[%c0_104, %c8_105, %c3_106, %c0_107] : memref<1x12x12x32xbf16, #tpu.memory_space<vmem>>, vector<1x1x6x32xbf16>
    %84 = vector.shape_cast %83 : vector<1x1x6x32xbf16> to vector<6x32xbf16>
    %c0_108 = arith.constant 0 : index
    %c9_109 = arith.constant 9 : index
    %c3_110 = arith.constant 3 : index
    %c0_111 = arith.constant 0 : index
    %85 = vector.load %arg1[%c0_108, %c9_109, %c3_110, %c0_111] : memref<1x12x12x32xbf16, #tpu.memory_space<vmem>>, vector<1x1x6x32xbf16>
    %86 = vector.shape_cast %85 : vector<1x1x6x32xbf16> to vector<6x32xbf16>
    %c0_112 = arith.constant 0 : index
    %c8_113 = arith.constant 8 : index
    %c4_114 = arith.constant 4 : index
    %c0_115 = arith.constant 0 : index
    %87 = vector.load %arg1[%c0_112, %c8_113, %c4_114, %c0_115] : memref<1x12x12x32xbf16, #tpu.memory_space<vmem>>, vector<1x1x6x32xbf16>
    %88 = vector.shape_cast %87 : vector<1x1x6x32xbf16> to vector<6x32xbf16>
    %89 = tpu.concatenate %84, %86, %88 in 1 : vector<6x32xbf16>, vector<6x32xbf16>, vector<6x32xbf16> -> vector<6x96xbf16>
    %cst_116 = arith.constant dense<0.000000e+00> : vector<6x64xf32>
    %90 = tpu.matmul %89, %9, %cst_116 {dimension_numbers = #tpu.dot_dimension_numbers<[1], [0], [0], [1], [0, 0, 1, 1], [], []>} : vector<6x96xbf16>, vector<96x64xbf16>, vector<6x64xf32> -> vector<6x64xf32>
    %91 = arith.addf %82, %90 : vector<6x64xf32>
    %92 = vector.broadcast %0 : vector<1x64xf32> to vector<6x64xf32>
    %93 = arith.addf %91, %92 : vector<6x64xf32>
    %cst_117 = arith.constant 0.000000e+00 : f32
    %94 = vector.broadcast %cst_117 : f32 to vector<6x64xf32>
    %95 = arith.maximumf %93, %94 : vector<6x64xf32>
    %96 = arith.truncf %95 : vector<6x64xf32> to vector<6x64xbf16>
    %c0_118 = arith.constant 0 : index
    %c0_119 = arith.constant 0 : index
    %c0_120 = arith.constant 0 : index
    %c0_121 = arith.constant 0 : index
    %97 = vector.load %arg4[%c0_118, %c0_119, %c0_120, %c0_121] : memref<1x1x6x64xbf16, #tpu.memory_space<vmem>>, vector<1x1x6x64xbf16>
    %98 = vector.shape_cast %97 : vector<1x1x6x64xbf16> to vector<6x64xbf16>
    %99 = vector.shape_cast %96 : vector<6x64xbf16> to vector<1x1x6x64xbf16>
    tpu.vector_store %arg4[%c0_118, %c0_119, %c0_120, %c0_121], %99 {strides = array<i32>} : memref<1x1x6x64xbf16, #tpu.memory_space<vmem>>, vector<1x1x6x64xbf16>,
    return
  }
  func.func @transform_0(%arg0: i32) -> (i32, i32, i32, i32) {
    %c0_i32 = arith.constant 0 : i32
    %c0_i32_0 = arith.constant 0 : i32
    %c0_i32_1 = arith.constant 0 : i32
    %c0_i32_2 = arith.constant 0 : i32
    return %arg0, %c0_i32, %c0_i32_0, %c0_i32_1 : i32, i32, i32, i32
  }
  func.func @transform_1(%arg0: i32) -> (i32, i32) {
    %c0_i32 = arith.constant 0 : i32
    %c0_i32_0 = arith.constant 0 : i32
    %c0_i32_1 = arith.constant 0 : i32
    return %c0_i32, %c0_i32_0 : i32, i32
  }
  func.func @transform_2(%arg0: i32) -> (i32, i32) {
    %c0_i32 = arith.constant 0 : i32
    %c0_i32_0 = arith.constant 0 : i32
    %c0_i32_1 = arith.constant 0 : i32
    return %c0_i32, %c0_i32_0 : i32, i32
  }
  func.func @transform_3(%arg0: i32) -> (i32, i32, i32, i32) {
    %c0_i32 = arith.constant 0 : i32
    %c0_i32_0 = arith.constant 0 : i32
    %c0_i32_1 = arith.constant 0 : i32
    %c0_i32_2 = arith.constant 0 : i32
    return %arg0, %c0_i32, %c0_i32_0, %c0_i32_1 : i32, i32, i32, i32
  }
}

module attributes {stable_mosaic.version = 11 : i64} {
  func.func @_conv_taps_kernel(%arg0: i32, %arg1: memref<1x3x12x64xbf16, #tpu.memory_space<vmem>>, %arg2: memref<1728x32xbf16, #tpu.memory_space<vmem>>, %arg3: memref<1x32xf32, #tpu.memory_space<vmem>>, %arg4: memref<1x4x6x32xbf16, #tpu.memory_space<vmem>>) attributes {dimension_semantics = [#tpu.dimension_semantics<parallel>], iteration_bounds = array<i64: 2>, scalar_prefetch = 0 : i64, scratch_operands = 0 : i64, tpu.core_type = #tpu.core_type<tc>, window_params = [{transform_indices = @transform_0, window_bounds = array<i64: 1, 3, 12, 64>}, {pipeline_mode = #tpu.pipeline_mode<synchronous>, transform_indices = @transform_1, window_bounds = array<i64: 1728, 32>}, {pipeline_mode = #tpu.pipeline_mode<synchronous>, transform_indices = @transform_2, window_bounds = array<i64: 1, 32>}, {transform_indices = @transform_3, window_bounds = array<i64: 1, 4, 6, 32>}]} {
    %c0 = arith.constant 0 : index
    %c0_0 = arith.constant 0 : index
    %0 = vector.load %arg3[%c0, %c0_0] : memref<1x32xf32, #tpu.memory_space<vmem>>, vector<1x32xf32>
    %c0_1 = arith.constant 0 : index
    %c0_2 = arith.constant 0 : index
    %1 = vector.load %arg2[%c0_1, %c0_2] : memref<1728x32xbf16, #tpu.memory_space<vmem>>, vector<64x32xbf16>
    %c64 = arith.constant 64 : index
    %c0_3 = arith.constant 0 : index
    %2 = vector.load %arg2[%c64, %c0_3] : memref<1728x32xbf16, #tpu.memory_space<vmem>>, vector<64x32xbf16>
    %c128 = arith.constant 128 : index
    %c0_4 = arith.constant 0 : index
    %3 = vector.load %arg2[%c128, %c0_4] : memref<1728x32xbf16, #tpu.memory_space<vmem>>, vector<64x32xbf16>
    %c192 = arith.constant 192 : index
    %c0_5 = arith.constant 0 : index
    %4 = vector.load %arg2[%c192, %c0_5] : memref<1728x32xbf16, #tpu.memory_space<vmem>>, vector<128x32xbf16>
    %c320 = arith.constant 320 : index
    %c0_6 = arith.constant 0 : index
    %5 = vector.load %arg2[%c320, %c0_6] : memref<1728x32xbf16, #tpu.memory_space<vmem>>, vector<128x32xbf16>
    %c448 = arith.constant 448 : index
    %c0_7 = arith.constant 0 : index
    %6 = vector.load %arg2[%c448, %c0_7] : memref<1728x32xbf16, #tpu.memory_space<vmem>>, vector<128x32xbf16>
    %c576 = arith.constant 576 : index
    %c0_8 = arith.constant 0 : index
    %7 = vector.load %arg2[%c576, %c0_8] : memref<1728x32xbf16, #tpu.memory_space<vmem>>, vector<128x32xbf16>
    %c704 = arith.constant 704 : index
    %c0_9 = arith.constant 0 : index
    %8 = vector.load %arg2[%c704, %c0_9] : memref<1728x32xbf16, #tpu.memory_space<vmem>>, vector<128x32xbf16>
    %c832 = arith.constant 832 : index
    %c0_10 = arith.constant 0 : index
    %9 = vector.load %arg2[%c832, %c0_10] : memref<1728x32xbf16, #tpu.memory_space<vmem>>, vector<128x32xbf16>
    %c960 = arith.constant 960 : index
    %c0_11 = arith.constant 0 : index
    %10 = vector.load %arg2[%c960, %c0_11] : memref<1728x32xbf16, #tpu.memory_space<vmem>>, vector<256x32xbf16>
    %c1216 = arith.constant 1216 : index
    %c0_12 = arith.constant 0 : index
    %11 = vector.load %arg2[%c1216, %c0_12] : memref<1728x32xbf16, #tpu.memory_space<vmem>>, vector<256x32xbf16>
    %c1472 = arith.constant 1472 : index
    %c0_13 = arith.constant 0 : index
    %12 = vector.load %arg2[%c1472, %c0_13] : memref<1728x32xbf16, #tpu.memory_space<vmem>>, vector<256x32xbf16>
    %cst = arith.constant 0.000000e+00 : f32
    %13 = vector.broadcast %cst : f32 to vector<6x32xf32>
    %c0_14 = arith.constant 0 : index
    %c0_15 = arith.constant 0 : index
    %c0_16 = arith.constant 0 : index
    %c0_17 = arith.constant 0 : index
    %14 = vector.load %arg1[%c0_14, %c0_15, %c0_16, %c0_17] : memref<1x3x12x64xbf16, #tpu.memory_space<vmem>>, vector<1x1x6x64xbf16>
    %15 = vector.shape_cast %14 : vector<1x1x6x64xbf16> to vector<6x64xbf16>
    %cst_18 = arith.constant dense<0.000000e+00> : vector<6x32xf32>
    %16 = tpu.matmul %15, %1, %cst_18 {dimension_numbers = #tpu.dot_dimension_numbers<[1], [0], [0], [1], [0, 0, 1, 1], [], []>} : vector<6x64xbf16>, vector<64x32xbf16>, vector<6x32xf32> -> vector<6x32xf32>
    %17 = arith.addf %13, %16 : vector<6x32xf32>
    %c0_19 = arith.constant 0 : index
    %c1 = arith.constant 1 : index
    %c0_20 = arith.constant 0 : index
    %c0_21 = arith.constant 0 : index
    %18 = vector.load %arg1[%c0_19, %c1, %c0_20, %c0_21] : memref<1x3x12x64xbf16, #tpu.memory_space<vmem>>, vector<1x1x6x64xbf16>
    %19 = vector.shape_cast %18 : vector<1x1x6x64xbf16> to vector<6x64xbf16>
    %cst_22 = arith.constant dense<0.000000e+00> : vector<6x32xf32>
    %20 = tpu.matmul %19, %2, %cst_22 {dimension_numbers = #tpu.dot_dimension_numbers<[1], [0], [0], [1], [0, 0, 1, 1], [], []>} : vector<6x64xbf16>, vector<64x32xbf16>, vector<6x32xf32> -> vector<6x32xf32>
    %21 = arith.addf %17, %20 : vector<6x32xf32>
    %c0_23 = arith.constant 0 : index
    %c2 = arith.constant 2 : index
    %c0_24 = arith.constant 0 : index
    %c0_25 = arith.constant 0 : index
    %22 = vector.load %arg1[%c0_23, %c2, %c0_24, %c0_25] : memref<1x3x12x64xbf16, #tpu.memory_space<vmem>>, vector<1x1x6x64xbf16>
    %23 = vector.shape_cast %22 : vector<1x1x6x64xbf16> to vector<6x64xbf16>
    %cst_26 = arith.constant dense<0.000000e+00> : vector<6x32xf32>
    %24 = tpu.matmul %23, %3, %cst_26 {dimension_numbers = #tpu.dot_dimension_numbers<[1], [0], [0], [1], [0, 0, 1, 1], [], []>} : vector<6x64xbf16>, vector<64x32xbf16>, vector<6x32xf32> -> vector<6x32xf32>
    %25 = arith.addf %21, %24 : vector<6x32xf32>
    %26 = vector.broadcast %0 : vector<1x32xf32> to vector<6x32xf32>
    %27 = arith.addf %25, %26 : vector<6x32xf32>
    %cst_27 = arith.constant 0.000000e+00 : f32
    %28 = vector.broadcast %cst_27 : f32 to vector<6x32xf32>
    %29 = arith.maximumf %27, %28 : vector<6x32xf32>
    %30 = arith.truncf %29 : vector<6x32xf32> to vector<6x32xbf16>
    %c0_28 = arith.constant 0 : index
    %c0_29 = arith.constant 0 : index
    %c0_30 = arith.constant 0 : index
    %c0_31 = arith.constant 0 : index
    %31 = vector.load %arg4[%c0_28, %c0_29, %c0_30, %c0_31] : memref<1x4x6x32xbf16, #tpu.memory_space<vmem>>, vector<1x1x6x32xbf16>
    %32 = vector.shape_cast %31 : vector<1x1x6x32xbf16> to vector<6x32xbf16>
    %33 = vector.shape_cast %30 : vector<6x32xbf16> to vector<1x1x6x32xbf16>
    tpu.vector_store %arg4[%c0_28, %c0_29, %c0_30, %c0_31], %33 {strides = array<i32>} : memref<1x4x6x32xbf16, #tpu.memory_space<vmem>>, vector<1x1x6x32xbf16>,
    %cst_32 = arith.constant 0.000000e+00 : f32
    %34 = vector.broadcast %cst_32 : f32 to vector<6x32xf32>
    %c0_33 = arith.constant 0 : index
    %c0_34 = arith.constant 0 : index
    %c1_35 = arith.constant 1 : index
    %c0_36 = arith.constant 0 : index
    %35 = vector.load %arg1[%c0_33, %c0_34, %c1_35, %c0_36] : memref<1x3x12x64xbf16, #tpu.memory_space<vmem>>, vector<1x1x6x64xbf16>
    %36 = vector.shape_cast %35 : vector<1x1x6x64xbf16> to vector<6x64xbf16>
    %c0_37 = arith.constant 0 : index
    %c0_38 = arith.constant 0 : index
    %c0_39 = arith.constant 0 : index
    %c0_40 = arith.constant 0 : index
    %37 = vector.load %arg1[%c0_37, %c0_38, %c0_39, %c0_40] : memref<1x3x12x64xbf16, #tpu.memory_space<vmem>>, vector<1x1x6x64xbf16>
    %38 = vector.shape_cast %37 : vector<1x1x6x64xbf16> to vector<6x64xbf16>
    %39 = tpu.concatenate %36, %38 in 1 : vector<6x64xbf16>, vector<6x64xbf16> -> vector<6x128xbf16>
    %cst_41 = arith.constant dense<0.000000e+00> : vector<6x32xf32>
    %40 = tpu.matmul %39, %4, %cst_41 {dimension_numbers = #tpu.dot_dimension_numbers<[1], [0], [0], [1], [0, 0, 1, 1], [], []>} : vector<6x128xbf16>, vector<128x32xbf16>, vector<6x32xf32> -> vector<6x32xf32>
    %41 = arith.addf %34, %40 : vector<6x32xf32>
    %c0_42 = arith.constant 0 : index
    %c1_43 = arith.constant 1 : index
    %c1_44 = arith.constant 1 : index
    %c0_45 = arith.constant 0 : index
    %42 = vector.load %arg1[%c0_42, %c1_43, %c1_44, %c0_45] : memref<1x3x12x64xbf16, #tpu.memory_space<vmem>>, vector<1x1x6x64xbf16>
    %43 = vector.shape_cast %42 : vector<1x1x6x64xbf16> to vector<6x64xbf16>
    %c0_46 = arith.constant 0 : index
    %c1_47 = arith.constant 1 : index
    %c0_48 = arith.constant 0 : index
    %c0_49 = arith.constant 0 : index
    %44 = vector.load %arg1[%c0_46, %c1_47, %c0_48, %c0_49] : memref<1x3x12x64xbf16, #tpu.memory_space<vmem>>, vector<1x1x6x64xbf16>
    %45 = vector.shape_cast %44 : vector<1x1x6x64xbf16> to vector<6x64xbf16>
    %46 = tpu.concatenate %43, %45 in 1 : vector<6x64xbf16>, vector<6x64xbf16> -> vector<6x128xbf16>
    %cst_50 = arith.constant dense<0.000000e+00> : vector<6x32xf32>
    %47 = tpu.matmul %46, %5, %cst_50 {dimension_numbers = #tpu.dot_dimension_numbers<[1], [0], [0], [1], [0, 0, 1, 1], [], []>} : vector<6x128xbf16>, vector<128x32xbf16>, vector<6x32xf32> -> vector<6x32xf32>
    %48 = arith.addf %41, %47 : vector<6x32xf32>
    %c0_51 = arith.constant 0 : index
    %c2_52 = arith.constant 2 : index
    %c1_53 = arith.constant 1 : index
    %c0_54 = arith.constant 0 : index
    %49 = vector.load %arg1[%c0_51, %c2_52, %c1_53, %c0_54] : memref<1x3x12x64xbf16, #tpu.memory_space<vmem>>, vector<1x1x6x64xbf16>
    %50 = vector.shape_cast %49 : vector<1x1x6x64xbf16> to vector<6x64xbf16>
    %c0_55 = arith.constant 0 : index
    %c2_56 = arith.constant 2 : index
    %c0_57 = arith.constant 0 : index
    %c0_58 = arith.constant 0 : index
    %51 = vector.load %arg1[%c0_55, %c2_56, %c0_57, %c0_58] : memref<1x3x12x64xbf16, #tpu.memory_space<vmem>>, vector<1x1x6x64xbf16>
    %52 = vector.shape_cast %51 : vector<1x1x6x64xbf16> to vector<6x64xbf16>
    %53 = tpu.concatenate %50, %52 in 1 : vector<6x64xbf16>, vector<6x64xbf16> -> vector<6x128xbf16>
    %cst_59 = arith.constant dense<0.000000e+00> : vector<6x32xf32>
    %54 = tpu.matmul %53, %6, %cst_59 {dimension_numbers = #tpu.dot_dimension_numbers<[1], [0], [0], [1], [0, 0, 1, 1], [], []>} : vector<6x128xbf16>, vector<128x32xbf16>, vector<6x32xf32> -> vector<6x32xf32>
    %55 = arith.addf %48, %54 : vector<6x32xf32>
    %56 = vector.broadcast %0 : vector<1x32xf32> to vector<6x32xf32>
    %57 = arith.addf %55, %56 : vector<6x32xf32>
    %cst_60 = arith.constant 0.000000e+00 : f32
    %58 = vector.broadcast %cst_60 : f32 to vector<6x32xf32>
    %59 = arith.maximumf %57, %58 : vector<6x32xf32>
    %60 = arith.truncf %59 : vector<6x32xf32> to vector<6x32xbf16>
    %c0_61 = arith.constant 0 : index
    %c1_62 = arith.constant 1 : index
    %c0_63 = arith.constant 0 : index
    %c0_64 = arith.constant 0 : index
    %61 = vector.load %arg4[%c0_61, %c1_62, %c0_63, %c0_64] : memref<1x4x6x32xbf16, #tpu.memory_space<vmem>>, vector<1x1x6x32xbf16>
    %62 = vector.shape_cast %61 : vector<1x1x6x32xbf16> to vector<6x32xbf16>
    %63 = vector.shape_cast %60 : vector<6x32xbf16> to vector<1x1x6x32xbf16>
    tpu.vector_store %arg4[%c0_61, %c1_62, %c0_63, %c0_64], %63 {strides = array<i32>} : memref<1x4x6x32xbf16, #tpu.memory_space<vmem>>, vector<1x1x6x32xbf16>,
    %cst_65 = arith.constant 0.000000e+00 : f32
    %64 = vector.broadcast %cst_65 : f32 to vector<6x32xf32>
    %c0_66 = arith.constant 0 : index
    %c0_67 = arith.constant 0 : index
    %c3 = arith.constant 3 : index
    %c0_68 = arith.constant 0 : index
    %65 = vector.load %arg1[%c0_66, %c0_67, %c3, %c0_68] : memref<1x3x12x64xbf16, #tpu.memory_space<vmem>>, vector<1x1x6x64xbf16>
    %66 = vector.shape_cast %65 : vector<1x1x6x64xbf16> to vector<6x64xbf16>
    %c0_69 = arith.constant 0 : index
    %c0_70 = arith.constant 0 : index
    %c0_71 = arith.constant 0 : index
    %c0_72 = arith.constant 0 : index
    %67 = vector.load %arg1[%c0_69, %c0_70, %c0_71, %c0_72] : memref<1x3x12x64xbf16, #tpu.memory_space<vmem>>, vector<1x1x6x64xbf16>
    %68 = vector.shape_cast %67 : vector<1x1x6x64xbf16> to vector<6x64xbf16>
    %69 = tpu.concatenate %66, %68 in 1 : vector<6x64xbf16>, vector<6x64xbf16> -> vector<6x128xbf16>
    %cst_73 = arith.constant dense<0.000000e+00> : vector<6x32xf32>
    %70 = tpu.matmul %69, %7, %cst_73 {dimension_numbers = #tpu.dot_dimension_numbers<[1], [0], [0], [1], [0, 0, 1, 1], [], []>} : vector<6x128xbf16>, vector<128x32xbf16>, vector<6x32xf32> -> vector<6x32xf32>
    %71 = arith.addf %64, %70 : vector<6x32xf32>
    %c0_74 = arith.constant 0 : index
    %c1_75 = arith.constant 1 : index
    %c3_76 = arith.constant 3 : index
    %c0_77 = arith.constant 0 : index
    %72 = vector.load %arg1[%c0_74, %c1_75, %c3_76, %c0_77] : memref<1x3x12x64xbf16, #tpu.memory_space<vmem>>, vector<1x1x6x64xbf16>
    %73 = vector.shape_cast %72 : vector<1x1x6x64xbf16> to vector<6x64xbf16>
    %c0_78 = arith.constant 0 : index
    %c1_79 = arith.constant 1 : index
    %c0_80 = arith.constant 0 : index
    %c0_81 = arith.constant 0 : index
    %74 = vector.load %arg1[%c0_78, %c1_79, %c0_80, %c0_81] : memref<1x3x12x64xbf16, #tpu.memory_space<vmem>>, vector<1x1x6x64xbf16>
    %75 = vector.shape_cast %74 : vector<1x1x6x64xbf16> to vector<6x64xbf16>
    %76 = tpu.concatenate %73, %75 in 1 : vector<6x64xbf16>, vector<6x64xbf16> -> vector<6x128xbf16>
    %cst_82 = arith.constant dense<0.000000e+00> : vector<6x32xf32>
    %77 = tpu.matmul %76, %8, %cst_82 {dimension_numbers = #tpu.dot_dimension_numbers<[1], [0], [0], [1], [0, 0, 1, 1], [], []>} : vector<6x128xbf16>, vector<128x32xbf16>, vector<6x32xf32> -> vector<6x32xf32>
    %78 = arith.addf %71, %77 : vector<6x32xf32>
    %c0_83 = arith.constant 0 : index
    %c2_84 = arith.constant 2 : index
    %c3_85 = arith.constant 3 : index
    %c0_86 = arith.constant 0 : index
    %79 = vector.load %arg1[%c0_83, %c2_84, %c3_85, %c0_86] : memref<1x3x12x64xbf16, #tpu.memory_space<vmem>>, vector<1x1x6x64xbf16>
    %80 = vector.shape_cast %79 : vector<1x1x6x64xbf16> to vector<6x64xbf16>
    %c0_87 = arith.constant 0 : index
    %c2_88 = arith.constant 2 : index
    %c0_89 = arith.constant 0 : index
    %c0_90 = arith.constant 0 : index
    %81 = vector.load %arg1[%c0_87, %c2_88, %c0_89, %c0_90] : memref<1x3x12x64xbf16, #tpu.memory_space<vmem>>, vector<1x1x6x64xbf16>
    %82 = vector.shape_cast %81 : vector<1x1x6x64xbf16> to vector<6x64xbf16>
    %83 = tpu.concatenate %80, %82 in 1 : vector<6x64xbf16>, vector<6x64xbf16> -> vector<6x128xbf16>
    %cst_91 = arith.constant dense<0.000000e+00> : vector<6x32xf32>
    %84 = tpu.matmul %83, %9, %cst_91 {dimension_numbers = #tpu.dot_dimension_numbers<[1], [0], [0], [1], [0, 0, 1, 1], [], []>} : vector<6x128xbf16>, vector<128x32xbf16>, vector<6x32xf32> -> vector<6x32xf32>
    %85 = arith.addf %78, %84 : vector<6x32xf32>
    %86 = vector.broadcast %0 : vector<1x32xf32> to vector<6x32xf32>
    %87 = arith.addf %85, %86 : vector<6x32xf32>
    %cst_92 = arith.constant 0.000000e+00 : f32
    %88 = vector.broadcast %cst_92 : f32 to vector<6x32xf32>
    %89 = arith.maximumf %87, %88 : vector<6x32xf32>
    %90 = arith.truncf %89 : vector<6x32xf32> to vector<6x32xbf16>
    %c0_93 = arith.constant 0 : index
    %c2_94 = arith.constant 2 : index
    %c0_95 = arith.constant 0 : index
    %c0_96 = arith.constant 0 : index
    %91 = vector.load %arg4[%c0_93, %c2_94, %c0_95, %c0_96] : memref<1x4x6x32xbf16, #tpu.memory_space<vmem>>, vector<1x1x6x32xbf16>
    %92 = vector.shape_cast %91 : vector<1x1x6x32xbf16> to vector<6x32xbf16>
    %93 = vector.shape_cast %90 : vector<6x32xbf16> to vector<1x1x6x32xbf16>
    tpu.vector_store %arg4[%c0_93, %c2_94, %c0_95, %c0_96], %93 {strides = array<i32>} : memref<1x4x6x32xbf16, #tpu.memory_space<vmem>>, vector<1x1x6x32xbf16>,
    %cst_97 = arith.constant 0.000000e+00 : f32
    %94 = vector.broadcast %cst_97 : f32 to vector<6x32xf32>
    %c0_98 = arith.constant 0 : index
    %c0_99 = arith.constant 0 : index
    %c4 = arith.constant 4 : index
    %c0_100 = arith.constant 0 : index
    %95 = vector.load %arg1[%c0_98, %c0_99, %c4, %c0_100] : memref<1x3x12x64xbf16, #tpu.memory_space<vmem>>, vector<1x1x6x64xbf16>
    %96 = vector.shape_cast %95 : vector<1x1x6x64xbf16> to vector<6x64xbf16>
    %c0_101 = arith.constant 0 : index
    %c0_102 = arith.constant 0 : index
    %c3_103 = arith.constant 3 : index
    %c0_104 = arith.constant 0 : index
    %97 = vector.load %arg1[%c0_101, %c0_102, %c3_103, %c0_104] : memref<1x3x12x64xbf16, #tpu.memory_space<vmem>>, vector<1x1x6x64xbf16>
    %98 = vector.shape_cast %97 : vector<1x1x6x64xbf16> to vector<6x64xbf16>
    %c0_105 = arith.constant 0 : index
    %c0_106 = arith.constant 0 : index
    %c1_107 = arith.constant 1 : index
    %c0_108 = arith.constant 0 : index
    %99 = vector.load %arg1[%c0_105, %c0_106, %c1_107, %c0_108] : memref<1x3x12x64xbf16, #tpu.memory_space<vmem>>, vector<1x1x6x64xbf16>
    %100 = vector.shape_cast %99 : vector<1x1x6x64xbf16> to vector<6x64xbf16>
    %c0_109 = arith.constant 0 : index
    %c0_110 = arith.constant 0 : index
    %c0_111 = arith.constant 0 : index
    %c0_112 = arith.constant 0 : index
    %101 = vector.load %arg1[%c0_109, %c0_110, %c0_111, %c0_112] : memref<1x3x12x64xbf16, #tpu.memory_space<vmem>>, vector<1x1x6x64xbf16>
    %102 = vector.shape_cast %101 : vector<1x1x6x64xbf16> to vector<6x64xbf16>
    %103 = tpu.concatenate %96, %98, %100, %102 in 1 : vector<6x64xbf16>, vector<6x64xbf16>, vector<6x64xbf16>, vector<6x64xbf16> -> vector<6x256xbf16>
    %cst_113 = arith.constant dense<0.000000e+00> : vector<6x32xf32>
    %104 = tpu.matmul %103, %10, %cst_113 {dimension_numbers = #tpu.dot_dimension_numbers<[1], [0], [0], [1], [0, 0, 1, 1], [], []>} : vector<6x256xbf16>, vector<256x32xbf16>, vector<6x32xf32> -> vector<6x32xf32>
    %105 = arith.addf %94, %104 : vector<6x32xf32>
    %c0_114 = arith.constant 0 : index
    %c1_115 = arith.constant 1 : index
    %c4_116 = arith.constant 4 : index
    %c0_117 = arith.constant 0 : index
    %106 = vector.load %arg1[%c0_114, %c1_115, %c4_116, %c0_117] : memref<1x3x12x64xbf16, #tpu.memory_space<vmem>>, vector<1x1x6x64xbf16>
    %107 = vector.shape_cast %106 : vector<1x1x6x64xbf16> to vector<6x64xbf16>
    %c0_118 = arith.constant 0 : index
    %c1_119 = arith.constant 1 : index
    %c3_120 = arith.constant 3 : index
    %c0_121 = arith.constant 0 : index
    %108 = vector.load %arg1[%c0_118, %c1_119, %c3_120, %c0_121] : memref<1x3x12x64xbf16, #tpu.memory_space<vmem>>, vector<1x1x6x64xbf16>
    %109 = vector.shape_cast %108 : vector<1x1x6x64xbf16> to vector<6x64xbf16>
    %c0_122 = arith.constant 0 : index
    %c1_123 = arith.constant 1 : index
    %c1_124 = arith.constant 1 : index
    %c0_125 = arith.constant 0 : index
    %110 = vector.load %arg1[%c0_122, %c1_123, %c1_124, %c0_125] : memref<1x3x12x64xbf16, #tpu.memory_space<vmem>>, vector<1x1x6x64xbf16>
    %111 = vector.shape_cast %110 : vector<1x1x6x64xbf16> to vector<6x64xbf16>
    %c0_126 = arith.constant 0 : index
    %c1_127 = arith.constant 1 : index
    %c0_128 = arith.constant 0 : index
    %c0_129 = arith.constant 0 : index
    %112 = vector.load %arg1[%c0_126, %c1_127, %c0_128, %c0_129] : memref<1x3x12x64xbf16, #tpu.memory_space<vmem>>, vector<1x1x6x64xbf16>
    %113 = vector.shape_cast %112 : vector<1x1x6x64xbf16> to vector<6x64xbf16>
    %114 = tpu.concatenate %107, %109, %111, %113 in 1 : vector<6x64xbf16>, vector<6x64xbf16>, vector<6x64xbf16>, vector<6x64xbf16> -> vector<6x256xbf16>
    %cst_130 = arith.constant dense<0.000000e+00> : vector<6x32xf32>
    %115 = tpu.matmul %114, %11, %cst_130 {dimension_numbers = #tpu.dot_dimension_numbers<[1], [0], [0], [1], [0, 0, 1, 1], [], []>} : vector<6x256xbf16>, vector<256x32xbf16>, vector<6x32xf32> -> vector<6x32xf32>
    %116 = arith.addf %105, %115 : vector<6x32xf32>
    %c0_131 = arith.constant 0 : index
    %c2_132 = arith.constant 2 : index
    %c4_133 = arith.constant 4 : index
    %c0_134 = arith.constant 0 : index
    %117 = vector.load %arg1[%c0_131, %c2_132, %c4_133, %c0_134] : memref<1x3x12x64xbf16, #tpu.memory_space<vmem>>, vector<1x1x6x64xbf16>
    %118 = vector.shape_cast %117 : vector<1x1x6x64xbf16> to vector<6x64xbf16>
    %c0_135 = arith.constant 0 : index
    %c2_136 = arith.constant 2 : index
    %c3_137 = arith.constant 3 : index
    %c0_138 = arith.constant 0 : index
    %119 = vector.load %arg1[%c0_135, %c2_136, %c3_137, %c0_138] : memref<1x3x12x64xbf16, #tpu.memory_space<vmem>>, vector<1x1x6x64xbf16>
    %120 = vector.shape_cast %119 : vector<1x1x6x64xbf16> to vector<6x64xbf16>
    %c0_139 = arith.constant 0 : index
    %c2_140 = arith.constant 2 : index
    %c1_141 = arith.constant 1 : index
    %c0_142 = arith.constant 0 : index
    %121 = vector.load %arg1[%c0_139, %c2_140, %c1_141, %c0_142] : memref<1x3x12x64xbf16, #tpu.memory_space<vmem>>, vector<1x1x6x64xbf16>
    %122 = vector.shape_cast %121 : vector<1x1x6x64xbf16> to vector<6x64xbf16>
    %c0_143 = arith.constant 0 : index
    %c2_144 = arith.constant 2 : index
    %c0_145 = arith.constant 0 : index
    %c0_146 = arith.constant 0 : index
    %123 = vector.load %arg1[%c0_143, %c2_144, %c0_145, %c0_146] : memref<1x3x12x64xbf16, #tpu.memory_space<vmem>>, vector<1x1x6x64xbf16>
    %124 = vector.shape_cast %123 : vector<1x1x6x64xbf16> to vector<6x64xbf16>
    %125 = tpu.concatenate %118, %120, %122, %124 in 1 : vector<6x64xbf16>, vector<6x64xbf16>, vector<6x64xbf16>, vector<6x64xbf16> -> vector<6x256xbf16>
    %cst_147 = arith.constant dense<0.000000e+00> : vector<6x32xf32>
    %126 = tpu.matmul %125, %12, %cst_147 {dimension_numbers = #tpu.dot_dimension_numbers<[1], [0], [0], [1], [0, 0, 1, 1], [], []>} : vector<6x256xbf16>, vector<256x32xbf16>, vector<6x32xf32> -> vector<6x32xf32>
    %127 = arith.addf %116, %126 : vector<6x32xf32>
    %128 = vector.broadcast %0 : vector<1x32xf32> to vector<6x32xf32>
    %129 = arith.addf %127, %128 : vector<6x32xf32>
    %cst_148 = arith.constant 0.000000e+00 : f32
    %130 = vector.broadcast %cst_148 : f32 to vector<6x32xf32>
    %131 = arith.maximumf %129, %130 : vector<6x32xf32>
    %132 = arith.truncf %131 : vector<6x32xf32> to vector<6x32xbf16>
    %c0_149 = arith.constant 0 : index
    %c3_150 = arith.constant 3 : index
    %c0_151 = arith.constant 0 : index
    %c0_152 = arith.constant 0 : index
    %133 = vector.load %arg4[%c0_149, %c3_150, %c0_151, %c0_152] : memref<1x4x6x32xbf16, #tpu.memory_space<vmem>>, vector<1x1x6x32xbf16>
    %134 = vector.shape_cast %133 : vector<1x1x6x32xbf16> to vector<6x32xbf16>
    %135 = vector.shape_cast %132 : vector<6x32xbf16> to vector<1x1x6x32xbf16>
    tpu.vector_store %arg4[%c0_149, %c3_150, %c0_151, %c0_152], %135 {strides = array<i32>} : memref<1x4x6x32xbf16, #tpu.memory_space<vmem>>, vector<1x1x6x32xbf16>,
    return
  }
  func.func @transform_0(%arg0: i32) -> (i32, i32, i32, i32) {
    %c0_i32 = arith.constant 0 : i32
    %c0_i32_0 = arith.constant 0 : i32
    %c0_i32_1 = arith.constant 0 : i32
    %c0_i32_2 = arith.constant 0 : i32
    return %arg0, %c0_i32, %c0_i32_0, %c0_i32_1 : i32, i32, i32, i32
  }
  func.func @transform_1(%arg0: i32) -> (i32, i32) {
    %c0_i32 = arith.constant 0 : i32
    %c0_i32_0 = arith.constant 0 : i32
    %c0_i32_1 = arith.constant 0 : i32
    return %c0_i32, %c0_i32_0 : i32, i32
  }
  func.func @transform_2(%arg0: i32) -> (i32, i32) {
    %c0_i32 = arith.constant 0 : i32
    %c0_i32_0 = arith.constant 0 : i32
    %c0_i32_1 = arith.constant 0 : i32
    return %c0_i32, %c0_i32_0 : i32, i32
  }
  func.func @transform_3(%arg0: i32) -> (i32, i32, i32, i32) {
    %c0_i32 = arith.constant 0 : i32
    %c0_i32_0 = arith.constant 0 : i32
    %c0_i32_1 = arith.constant 0 : i32
    %c0_i32_2 = arith.constant 0 : i32
    return %arg0, %c0_i32, %c0_i32_0, %c0_i32_1 : i32, i32, i32, i32
  }
}

module attributes {stable_mosaic.version = 11 : i64} {
  func.func @_conv_taps_kernel(%arg0: i32, %arg1: memref<1x1x42x32xbf16, #tpu.memory_space<vmem>>, %arg2: memref<288x128xbf16, #tpu.memory_space<vmem>>, %arg3: memref<1x128xf32, #tpu.memory_space<vmem>>, %arg4: memref<1x1x24x128xbf16, #tpu.memory_space<vmem>>) attributes {dimension_semantics = [#tpu.dimension_semantics<parallel>], iteration_bounds = array<i64: 2>, scalar_prefetch = 0 : i64, scratch_operands = 0 : i64, tpu.core_type = #tpu.core_type<tc>, window_params = [{transform_indices = @transform_0, window_bounds = array<i64: 1, 1, 42, 32>}, {pipeline_mode = #tpu.pipeline_mode<synchronous>, transform_indices = @transform_1, window_bounds = array<i64: 288, 128>}, {pipeline_mode = #tpu.pipeline_mode<synchronous>, transform_indices = @transform_2, window_bounds = array<i64: 1, 128>}, {transform_indices = @transform_3, window_bounds = array<i64: 1, 1, 24, 128>}]} {
    %c0 = arith.constant 0 : index
    %c0_0 = arith.constant 0 : index
    %0 = vector.load %arg3[%c0, %c0_0] : memref<1x128xf32, #tpu.memory_space<vmem>>, vector<1x128xf32>
    %c0_1 = arith.constant 0 : index
    %c0_2 = arith.constant 0 : index
    %1 = vector.load %arg2[%c0_1, %c0_2] : memref<288x128xbf16, #tpu.memory_space<vmem>>, vector<96x128xbf16>
    %c96 = arith.constant 96 : index
    %c0_3 = arith.constant 0 : index
    %2 = vector.load %arg2[%c96, %c0_3] : memref<288x128xbf16, #tpu.memory_space<vmem>>, vector<96x128xbf16>
    %c192 = arith.constant 192 : index
    %c0_4 = arith.constant 0 : index
    %3 = vector.load %arg2[%c192, %c0_4] : memref<288x128xbf16, #tpu.memory_space<vmem>>, vector<96x128xbf16>
    %cst = arith.constant 0.000000e+00 : f32
    %4 = vector.broadcast %cst : f32 to vector<24x128xf32>
    %c0_5 = arith.constant 0 : index
    %c0_6 = arith.constant 0 : index
    %c0_7 = arith.constant 0 : index
    %c0_8 = arith.constant 0 : index
    %5 = vector.load %arg1[%c0_5, %c0_6, %c0_7, %c0_8] : memref<1x1x42x32xbf16, #tpu.memory_space<vmem>>, vector<1x1x24x32xbf16>
    %6 = vector.shape_cast %5 : vector<1x1x24x32xbf16> to vector<24x32xbf16>
    %c0_9 = arith.constant 0 : index
    %c0_10 = arith.constant 0 : index
    %c1 = arith.constant 1 : index
    %c0_11 = arith.constant 0 : index
    %7 = vector.load %arg1[%c0_9, %c0_10, %c1, %c0_11] : memref<1x1x42x32xbf16, #tpu.memory_space<vmem>>, vector<1x1x24x32xbf16>
    %8 = vector.shape_cast %7 : vector<1x1x24x32xbf16> to vector<24x32xbf16>
    %c0_12 = arith.constant 0 : index
    %c0_13 = arith.constant 0 : index
    %c2 = arith.constant 2 : index
    %c0_14 = arith.constant 0 : index
    %9 = vector.load %arg1[%c0_12, %c0_13, %c2, %c0_14] : memref<1x1x42x32xbf16, #tpu.memory_space<vmem>>, vector<1x1x24x32xbf16>
    %10 = vector.shape_cast %9 : vector<1x1x24x32xbf16> to vector<24x32xbf16>
    %11 = tpu.concatenate %6, %8, %10 in 1 : vector<24x32xbf16>, vector<24x32xbf16>, vector<24x32xbf16> -> vector<24x96xbf16>
    %cst_15 = arith.constant dense<0.000000e+00> : vector<24x128xf32>
    %12 = tpu.matmul %11, %1, %cst_15 {dimension_numbers = #tpu.dot_dimension_numbers<[1], [0], [0], [1], [0, 0, 1, 1], [], []>} : vector<24x96xbf16>, vector<96x128xbf16>, vector<24x128xf32> -> vector<24x128xf32>
    %13 = arith.addf %4, %12 : vector<24x128xf32>
    %c0_16 = arith.constant 0 : index
    %c0_17 = arith.constant 0 : index
    %c6 = arith.constant 6 : index
    %c0_18 = arith.constant 0 : index
    %14 = vector.load %arg1[%c0_16, %c0_17, %c6, %c0_18] : memref<1x1x42x32xbf16, #tpu.memory_space<vmem>>, vector<1x1x24x32xbf16>
    %15 = vector.shape_cast %14 : vector<1x1x24x32xbf16> to vector<24x32xbf16>
    %c0_19 = arith.constant 0 : index
    %c0_20 = arith.constant 0 : index
    %c7 = arith.constant 7 : index
    %c0_21 = arith.constant 0 : index
    %16 = vector.load %arg1[%c0_19, %c0_20, %c7, %c0_21] : memref<1x1x42x32xbf16, #tpu.memory_space<vmem>>, vector<1x1x24x32xbf16>
    %17 = vector.shape_cast %16 : vector<1x1x24x32xbf16> to vector<24x32xbf16>
    %c0_22 = arith.constant 0 : index
    %c0_23 = arith.constant 0 : index
    %c8 = arith.constant 8 : index
    %c0_24 = arith.constant 0 : index
    %18 = vector.load %arg1[%c0_22, %c0_23, %c8, %c0_24] : memref<1x1x42x32xbf16, #tpu.memory_space<vmem>>, vector<1x1x24x32xbf16>
    %19 = vector.shape_cast %18 : vector<1x1x24x32xbf16> to vector<24x32xbf16>
    %20 = tpu.concatenate %15, %17, %19 in 1 : vector<24x32xbf16>, vector<24x32xbf16>, vector<24x32xbf16> -> vector<24x96xbf16>
    %cst_25 = arith.constant dense<0.000000e+00> : vector<24x128xf32>
    %21 = tpu.matmul %20, %2, %cst_25 {dimension_numbers = #tpu.dot_dimension_numbers<[1], [0], [0], [1], [0, 0, 1, 1], [], []>} : vector<24x96xbf16>, vector<96x128xbf16>, vector<24x128xf32> -> vector<24x128xf32>
    %22 = arith.addf %13, %21 : vector<24x128xf32>
    %c0_26 = arith.constant 0 : index
    %c0_27 = arith.constant 0 : index
    %c12 = arith.constant 12 : index
    %c0_28 = arith.constant 0 : index
    %23 = vector.load %arg1[%c0_26, %c0_27, %c12, %c0_28] : memref<1x1x42x32xbf16, #tpu.memory_space<vmem>>, vector<1x1x24x32xbf16>
    %24 = vector.shape_cast %23 : vector<1x1x24x32xbf16> to vector<24x32xbf16>
    %c0_29 = arith.constant 0 : index
    %c0_30 = arith.constant 0 : index
    %c13 = arith.constant 13 : index
    %c0_31 = arith.constant 0 : index
    %25 = vector.load %arg1[%c0_29, %c0_30, %c13, %c0_31] : memref<1x1x42x32xbf16, #tpu.memory_space<vmem>>, vector<1x1x24x32xbf16>
    %26 = vector.shape_cast %25 : vector<1x1x24x32xbf16> to vector<24x32xbf16>
    %c0_32 = arith.constant 0 : index
    %c0_33 = arith.constant 0 : index
    %c14 = arith.constant 14 : index
    %c0_34 = arith.constant 0 : index
    %27 = vector.load %arg1[%c0_32, %c0_33, %c14, %c0_34] : memref<1x1x42x32xbf16, #tpu.memory_space<vmem>>, vector<1x1x24x32xbf16>
    %28 = vector.shape_cast %27 : vector<1x1x24x32xbf16> to vector<24x32xbf16>
    %29 = tpu.concatenate %24, %26, %28 in 1 : vector<24x32xbf16>, vector<24x32xbf16>, vector<24x32xbf16> -> vector<24x96xbf16>
    %cst_35 = arith.constant dense<0.000000e+00> : vector<24x128xf32>
    %30 = tpu.matmul %29, %3, %cst_35 {dimension_numbers = #tpu.dot_dimension_numbers<[1], [0], [0], [1], [0, 0, 1, 1], [], []>} : vector<24x96xbf16>, vector<96x128xbf16>, vector<24x128xf32> -> vector<24x128xf32>
    %31 = arith.addf %22, %30 : vector<24x128xf32>
    %32 = vector.broadcast %0 : vector<1x128xf32> to vector<24x128xf32>
    %33 = arith.addf %31, %32 : vector<24x128xf32>
    %34 = arith.truncf %33 : vector<24x128xf32> to vector<24x128xbf16>
    %c0_36 = arith.constant 0 : index
    %c0_37 = arith.constant 0 : index
    %c0_38 = arith.constant 0 : index
    %c0_39 = arith.constant 0 : index
    %35 = vector.load %arg4[%c0_36, %c0_37, %c0_38, %c0_39] : memref<1x1x24x128xbf16, #tpu.memory_space<vmem>>, vector<1x1x24x128xbf16>
    %36 = vector.shape_cast %35 : vector<1x1x24x128xbf16> to vector<24x128xbf16>
    %37 = vector.shape_cast %34 : vector<24x128xbf16> to vector<1x1x24x128xbf16>
    tpu.vector_store %arg4[%c0_36, %c0_37, %c0_38, %c0_39], %37 {strides = array<i32>} : memref<1x1x24x128xbf16, #tpu.memory_space<vmem>>, vector<1x1x24x128xbf16>,
    return
  }
  func.func @transform_0(%arg0: i32) -> (i32, i32, i32, i32) {
    %c0_i32 = arith.constant 0 : i32
    %c0_i32_0 = arith.constant 0 : i32
    %c0_i32_1 = arith.constant 0 : i32
    %c0_i32_2 = arith.constant 0 : i32
    return %arg0, %c0_i32, %c0_i32_0, %c0_i32_1 : i32, i32, i32, i32
  }
  func.func @transform_1(%arg0: i32) -> (i32, i32) {
    %c0_i32 = arith.constant 0 : i32
    %c0_i32_0 = arith.constant 0 : i32
    %c0_i32_1 = arith.constant 0 : i32
    return %c0_i32, %c0_i32_0 : i32, i32
  }
  func.func @transform_2(%arg0: i32) -> (i32, i32) {
    %c0_i32 = arith.constant 0 : i32
    %c0_i32_0 = arith.constant 0 : i32
    %c0_i32_1 = arith.constant 0 : i32
    return %c0_i32, %c0_i32_0 : i32, i32
  }
  func.func @transform_3(%arg0: i32) -> (i32, i32, i32, i32) {
    %c0_i32 = arith.constant 0 : i32
    %c0_i32_0 = arith.constant 0 : i32
    %c0_i32_1 = arith.constant 0 : i32
    %c0_i32_2 = arith.constant 0 : i32
    return %arg0, %c0_i32, %c0_i32_0, %c0_i32_1 : i32, i32, i32, i32
  }
}

module attributes {stable_mosaic.version = 11 : i64} {
  func.func @_conv_taps_kernel(%arg0: i32, %arg1: memref<1x1x110x32xbf16, #tpu.memory_space<vmem>>, %arg2: memref<288x64xbf16, #tpu.memory_space<vmem>>, %arg3: memref<1x64xf32, #tpu.memory_space<vmem>>, %arg4: memref<1x1x80x64xbf16, #tpu.memory_space<vmem>>) attributes {dimension_semantics = [#tpu.dimension_semantics<parallel>], iteration_bounds = array<i64: 2>, scalar_prefetch = 0 : i64, scratch_operands = 0 : i64, tpu.core_type = #tpu.core_type<tc>, window_params = [{transform_indices = @transform_0, window_bounds = array<i64: 1, 1, 110, 32>}, {pipeline_mode = #tpu.pipeline_mode<synchronous>, transform_indices = @transform_1, window_bounds = array<i64: 288, 64>}, {pipeline_mode = #tpu.pipeline_mode<synchronous>, transform_indices = @transform_2, window_bounds = array<i64: 1, 64>}, {transform_indices = @transform_3, window_bounds = array<i64: 1, 1, 80, 64>}]} {
    %c0 = arith.constant 0 : index
    %c0_0 = arith.constant 0 : index
    %0 = vector.load %arg3[%c0, %c0_0] : memref<1x64xf32, #tpu.memory_space<vmem>>, vector<1x64xf32>
    %c0_1 = arith.constant 0 : index
    %c0_2 = arith.constant 0 : index
    %1 = vector.load %arg2[%c0_1, %c0_2] : memref<288x64xbf16, #tpu.memory_space<vmem>>, vector<96x64xbf16>
    %c96 = arith.constant 96 : index
    %c0_3 = arith.constant 0 : index
    %2 = vector.load %arg2[%c96, %c0_3] : memref<288x64xbf16, #tpu.memory_space<vmem>>, vector<96x64xbf16>
    %c192 = arith.constant 192 : index
    %c0_4 = arith.constant 0 : index
    %3 = vector.load %arg2[%c192, %c0_4] : memref<288x64xbf16, #tpu.memory_space<vmem>>, vector<96x64xbf16>
    %cst = arith.constant 0.000000e+00 : f32
    %4 = vector.broadcast %cst : f32 to vector<80x64xf32>
    %c0_5 = arith.constant 0 : index
    %c0_6 = arith.constant 0 : index
    %c0_7 = arith.constant 0 : index
    %c0_8 = arith.constant 0 : index
    %5 = vector.load %arg1[%c0_5, %c0_6, %c0_7, %c0_8] : memref<1x1x110x32xbf16, #tpu.memory_space<vmem>>, vector<1x1x80x32xbf16>
    %6 = vector.shape_cast %5 : vector<1x1x80x32xbf16> to vector<80x32xbf16>
    %c0_9 = arith.constant 0 : index
    %c0_10 = arith.constant 0 : index
    %c1 = arith.constant 1 : index
    %c0_11 = arith.constant 0 : index
    %7 = vector.load %arg1[%c0_9, %c0_10, %c1, %c0_11] : memref<1x1x110x32xbf16, #tpu.memory_space<vmem>>, vector<1x1x80x32xbf16>
    %8 = vector.shape_cast %7 : vector<1x1x80x32xbf16> to vector<80x32xbf16>
    %c0_12 = arith.constant 0 : index
    %c0_13 = arith.constant 0 : index
    %c2 = arith.constant 2 : index
    %c0_14 = arith.constant 0 : index
    %9 = vector.load %arg1[%c0_12, %c0_13, %c2, %c0_14] : memref<1x1x110x32xbf16, #tpu.memory_space<vmem>>, vector<1x1x80x32xbf16>
    %10 = vector.shape_cast %9 : vector<1x1x80x32xbf16> to vector<80x32xbf16>
    %11 = tpu.concatenate %6, %8, %10 in 1 : vector<80x32xbf16>, vector<80x32xbf16>, vector<80x32xbf16> -> vector<80x96xbf16>
    %cst_15 = arith.constant dense<0.000000e+00> : vector<80x64xf32>
    %12 = tpu.matmul %11, %1, %cst_15 {dimension_numbers = #tpu.dot_dimension_numbers<[1], [0], [0], [1], [0, 0, 1, 1], [], []>} : vector<80x96xbf16>, vector<96x64xbf16>, vector<80x64xf32> -> vector<80x64xf32>
    %13 = arith.addf %4, %12 : vector<80x64xf32>
    %c0_16 = arith.constant 0 : index
    %c0_17 = arith.constant 0 : index
    %c10 = arith.constant 10 : index
    %c0_18 = arith.constant 0 : index
    %14 = vector.load %arg1[%c0_16, %c0_17, %c10, %c0_18] : memref<1x1x110x32xbf16, #tpu.memory_space<vmem>>, vector<1x1x80x32xbf16>
    %15 = vector.shape_cast %14 : vector<1x1x80x32xbf16> to vector<80x32xbf16>
    %c0_19 = arith.constant 0 : index
    %c0_20 = arith.constant 0 : index
    %c11 = arith.constant 11 : index
    %c0_21 = arith.constant 0 : index
    %16 = vector.load %arg1[%c0_19, %c0_20, %c11, %c0_21] : memref<1x1x110x32xbf16, #tpu.memory_space<vmem>>, vector<1x1x80x32xbf16>
    %17 = vector.shape_cast %16 : vector<1x1x80x32xbf16> to vector<80x32xbf16>
    %c0_22 = arith.constant 0 : index
    %c0_23 = arith.constant 0 : index
    %c12 = arith.constant 12 : index
    %c0_24 = arith.constant 0 : index
    %18 = vector.load %arg1[%c0_22, %c0_23, %c12, %c0_24] : memref<1x1x110x32xbf16, #tpu.memory_space<vmem>>, vector<1x1x80x32xbf16>
    %19 = vector.shape_cast %18 : vector<1x1x80x32xbf16> to vector<80x32xbf16>
    %20 = tpu.concatenate %15, %17, %19 in 1 : vector<80x32xbf16>, vector<80x32xbf16>, vector<80x32xbf16> -> vector<80x96xbf16>
    %cst_25 = arith.constant dense<0.000000e+00> : vector<80x64xf32>
    %21 = tpu.matmul %20, %2, %cst_25 {dimension_numbers = #tpu.dot_dimension_numbers<[1], [0], [0], [1], [0, 0, 1, 1], [], []>} : vector<80x96xbf16>, vector<96x64xbf16>, vector<80x64xf32> -> vector<80x64xf32>
    %22 = arith.addf %13, %21 : vector<80x64xf32>
    %c0_26 = arith.constant 0 : index
    %c0_27 = arith.constant 0 : index
    %c20 = arith.constant 20 : index
    %c0_28 = arith.constant 0 : index
    %23 = vector.load %arg1[%c0_26, %c0_27, %c20, %c0_28] : memref<1x1x110x32xbf16, #tpu.memory_space<vmem>>, vector<1x1x80x32xbf16>
    %24 = vector.shape_cast %23 : vector<1x1x80x32xbf16> to vector<80x32xbf16>
    %c0_29 = arith.constant 0 : index
    %c0_30 = arith.constant 0 : index
    %c21 = arith.constant 21 : index
    %c0_31 = arith.constant 0 : index
    %25 = vector.load %arg1[%c0_29, %c0_30, %c21, %c0_31] : memref<1x1x110x32xbf16, #tpu.memory_space<vmem>>, vector<1x1x80x32xbf16>
    %26 = vector.shape_cast %25 : vector<1x1x80x32xbf16> to vector<80x32xbf16>
    %c0_32 = arith.constant 0 : index
    %c0_33 = arith.constant 0 : index
    %c22 = arith.constant 22 : index
    %c0_34 = arith.constant 0 : index
    %27 = vector.load %arg1[%c0_32, %c0_33, %c22, %c0_34] : memref<1x1x110x32xbf16, #tpu.memory_space<vmem>>, vector<1x1x80x32xbf16>
    %28 = vector.shape_cast %27 : vector<1x1x80x32xbf16> to vector<80x32xbf16>
    %29 = tpu.concatenate %24, %26, %28 in 1 : vector<80x32xbf16>, vector<80x32xbf16>, vector<80x32xbf16> -> vector<80x96xbf16>
    %cst_35 = arith.constant dense<0.000000e+00> : vector<80x64xf32>
    %30 = tpu.matmul %29, %3, %cst_35 {dimension_numbers = #tpu.dot_dimension_numbers<[1], [0], [0], [1], [0, 0, 1, 1], [], []>} : vector<80x96xbf16>, vector<96x64xbf16>, vector<80x64xf32> -> vector<80x64xf32>
    %31 = arith.addf %22, %30 : vector<80x64xf32>
    %32 = vector.broadcast %0 : vector<1x64xf32> to vector<80x64xf32>
    %33 = arith.addf %31, %32 : vector<80x64xf32>
    %34 = arith.truncf %33 : vector<80x64xf32> to vector<80x64xbf16>
    %c0_36 = arith.constant 0 : index
    %c0_37 = arith.constant 0 : index
    %c0_38 = arith.constant 0 : index
    %c0_39 = arith.constant 0 : index
    %35 = vector.load %arg4[%c0_36, %c0_37, %c0_38, %c0_39] : memref<1x1x80x64xbf16, #tpu.memory_space<vmem>>, vector<1x1x80x64xbf16>
    %36 = vector.shape_cast %35 : vector<1x1x80x64xbf16> to vector<80x64xbf16>
    %37 = vector.shape_cast %34 : vector<80x64xbf16> to vector<1x1x80x64xbf16>
    tpu.vector_store %arg4[%c0_36, %c0_37, %c0_38, %c0_39], %37 {strides = array<i32>} : memref<1x1x80x64xbf16, #tpu.memory_space<vmem>>, vector<1x1x80x64xbf16>,
    return
  }
  func.func @transform_0(%arg0: i32) -> (i32, i32, i32, i32) {
    %c0_i32 = arith.constant 0 : i32
    %c0_i32_0 = arith.constant 0 : i32
    %c0_i32_1 = arith.constant 0 : i32
    %c0_i32_2 = arith.constant 0 : i32
    return %arg0, %c0_i32, %c0_i32_0, %c0_i32_1 : i32, i32, i32, i32
  }
  func.func @transform_1(%arg0: i32) -> (i32, i32) {
    %c0_i32 = arith.constant 0 : i32
    %c0_i32_0 = arith.constant 0 : i32
    %c0_i32_1 = arith.constant 0 : i32
    return %c0_i32, %c0_i32_0 : i32, i32
  }
  func.func @transform_2(%arg0: i32) -> (i32, i32) {
    %c0_i32 = arith.constant 0 : i32
    %c0_i32_0 = arith.constant 0 : i32
    %c0_i32_1 = arith.constant 0 : i32
    return %c0_i32, %c0_i32_0 : i32, i32
  }
  func.func @transform_3(%arg0: i32) -> (i32, i32, i32, i32) {
    %c0_i32 = arith.constant 0 : i32
    %c0_i32_0 = arith.constant 0 : i32
    %c0_i32_1 = arith.constant 0 : i32
    %c0_i32_2 = arith.constant 0 : i32
    return %arg0, %c0_i32, %c0_i32_0, %c0_i32_1 : i32, i32, i32, i32
  }
}

module attributes {stable_mosaic.version = 11 : i64} {
  func.func @_conv_last_kernel(%arg0: i32, %arg1: memref<1x16x18x18xbf16, #tpu.memory_space<vmem>>, %arg2: memref<16x9xf32, #tpu.memory_space<smem>>, %arg3: memref<1x1xf32, #tpu.memory_space<smem>>, %arg4: memref<1x16x16xf32, #tpu.memory_space<vmem>>) attributes {dimension_semantics = [#tpu.dimension_semantics<parallel>], iteration_bounds = array<i64: 2>, scalar_prefetch = 0 : i64, scratch_operands = 0 : i64, tpu.core_type = #tpu.core_type<tc>, window_params = [{transform_indices = @transform_0, window_bounds = array<i64: 1, 16, 18, 18>}, {transform_indices = @transform_1, window_bounds = array<i64: 16, 9>}, {transform_indices = @transform_2, window_bounds = array<i64: 1, 1>}, {transform_indices = @transform_3, window_bounds = array<i64: 1, 16, 16>}]} {
    %c0 = arith.constant 0 : index
    %c0_0 = arith.constant 0 : index
    %0 = memref.load %arg3[%c0, %c0_0] : memref<1x1xf32, #tpu.memory_space<smem>>
    %cst = arith.constant 0.000000e+00 : f32
    %1 = vector.broadcast %cst : f32 to vector<16x16xf32>
    %c0_1 = arith.constant 0 : index
    %c0_2 = arith.constant 0 : index
    %c0_3 = arith.constant 0 : index
    %c0_4 = arith.constant 0 : index
    %2 = vector.load %arg1[%c0_1, %c0_2, %c0_3, %c0_4] : memref<1x16x18x18xbf16, #tpu.memory_space<vmem>>, vector<1x1x18x16xbf16>
    %3 = vector.shape_cast %2 : vector<1x1x18x16xbf16> to vector<18x16xbf16>
    %4 = arith.extf %3 : vector<18x16xbf16> to vector<18x16xf32>
    %5 = vector.extract_strided_slice %4 {offsets = [0, 0], sizes = [16, 16], strides = [1, 1]} : vector<18x16xf32> to vector<16x16xf32>
    %c0_5 = arith.constant 0 : index
    %c0_6 = arith.constant 0 : index
    %6 = memref.load %arg2[%c0_5, %c0_6] : memref<16x9xf32, #tpu.memory_space<smem>>
    %7 = vector.broadcast %6 : f32 to vector<16x16xf32>
    %8 = arith.mulf %5, %7 : vector<16x16xf32>
    %9 = arith.addf %1, %8 : vector<16x16xf32>
    %10 = vector.extract_strided_slice %4 {offsets = [1, 0], sizes = [16, 16], strides = [1, 1]} : vector<18x16xf32> to vector<16x16xf32>
    %c0_7 = arith.constant 0 : index
    %c3 = arith.constant 3 : index
    %11 = memref.load %arg2[%c0_7, %c3] : memref<16x9xf32, #tpu.memory_space<smem>>
    %12 = vector.broadcast %11 : f32 to vector<16x16xf32>
    %13 = arith.mulf %10, %12 : vector<16x16xf32>
    %14 = arith.addf %9, %13 : vector<16x16xf32>
    %15 = vector.extract_strided_slice %4 {offsets = [2, 0], sizes = [16, 16], strides = [1, 1]} : vector<18x16xf32> to vector<16x16xf32>
    %c0_8 = arith.constant 0 : index
    %c6 = arith.constant 6 : index
    %16 = memref.load %arg2[%c0_8, %c6] : memref<16x9xf32, #tpu.memory_space<smem>>
    %17 = vector.broadcast %16 : f32 to vector<16x16xf32>
    %18 = arith.mulf %15, %17 : vector<16x16xf32>
    %19 = arith.addf %14, %18 : vector<16x16xf32>
    %c0_9 = arith.constant 0 : index
    %c0_10 = arith.constant 0 : index
    %c0_11 = arith.constant 0 : index
    %c1 = arith.constant 1 : index
    %20 = vector.load %arg1[%c0_9, %c0_10, %c0_11, %c1] : memref<1x16x18x18xbf16, #tpu.memory_space<vmem>>, vector<1x1x18x16xbf16>
    %21 = vector.shape_cast %20 : vector<1x1x18x16xbf16> to vector<18x16xbf16>
    %22 = arith.extf %21 : vector<18x16xbf16> to vector<18x16xf32>
    %23 = vector.extract_strided_slice %22 {offsets = [0, 0], sizes = [16, 16], strides = [1, 1]} : vector<18x16xf32> to vector<16x16xf32>
    %c0_12 = arith.constant 0 : index
    %c1_13 = arith.constant 1 : index
    %24 = memref.load %arg2[%c0_12, %c1_13] : memref<16x9xf32, #tpu.memory_space<smem>>
    %25 = vector.broadcast %24 : f32 to vector<16x16xf32>
    %26 = arith.mulf %23, %25 : vector<16x16xf32>
    %27 = arith.addf %19, %26 : vector<16x16xf32>
    %28 = vector.extract_strided_slice %22 {offsets = [1, 0], sizes = [16, 16], strides = [1, 1]} : vector<18x16xf32> to vector<16x16xf32>
    %c0_14 = arith.constant 0 : index
    %c4 = arith.constant 4 : index
    %29 = memref.load %arg2[%c0_14, %c4] : memref<16x9xf32, #tpu.memory_space<smem>>
    %30 = vector.broadcast %29 : f32 to vector<16x16xf32>
    %31 = arith.mulf %28, %30 : vector<16x16xf32>
    %32 = arith.addf %27, %31 : vector<16x16xf32>
    %33 = vector.extract_strided_slice %22 {offsets = [2, 0], sizes = [16, 16], strides = [1, 1]} : vector<18x16xf32> to vector<16x16xf32>
    %c0_15 = arith.constant 0 : index
    %c7 = arith.constant 7 : index
    %34 = memref.load %arg2[%c0_15, %c7] : memref<16x9xf32, #tpu.memory_space<smem>>
    %35 = vector.broadcast %34 : f32 to vector<16x16xf32>
    %36 = arith.mulf %33, %35 : vector<16x16xf32>
    %37 = arith.addf %32, %36 : vector<16x16xf32>
    %c0_16 = arith.constant 0 : index
    %c0_17 = arith.constant 0 : index
    %c0_18 = arith.constant 0 : index
    %c2 = arith.constant 2 : index
    %38 = vector.load %arg1[%c0_16, %c0_17, %c0_18, %c2] : memref<1x16x18x18xbf16, #tpu.memory_space<vmem>>, vector<1x1x18x16xbf16>
    %39 = vector.shape_cast %38 : vector<1x1x18x16xbf16> to vector<18x16xbf16>
    %40 = arith.extf %39 : vector<18x16xbf16> to vector<18x16xf32>
    %41 = vector.extract_strided_slice %40 {offsets = [0, 0], sizes = [16, 16], strides = [1, 1]} : vector<18x16xf32> to vector<16x16xf32>
    %c0_19 = arith.constant 0 : index
    %c2_20 = arith.constant 2 : index
    %42 = memref.load %arg2[%c0_19, %c2_20] : memref<16x9xf32, #tpu.memory_space<smem>>
    %43 = vector.broadcast %42 : f32 to vector<16x16xf32>
    %44 = arith.mulf %41, %43 : vector<16x16xf32>
    %45 = arith.addf %37, %44 : vector<16x16xf32>
    %46 = vector.extract_strided_slice %40 {offsets = [1, 0], sizes = [16, 16], strides = [1, 1]} : vector<18x16xf32> to vector<16x16xf32>
    %c0_21 = arith.constant 0 : index
    %c5 = arith.constant 5 : index
    %47 = memref.load %arg2[%c0_21, %c5] : memref<16x9xf32, #tpu.memory_space<smem>>
    %48 = vector.broadcast %47 : f32 to vector<16x16xf32>
    %49 = arith.mulf %46, %48 : vector<16x16xf32>
    %50 = arith.addf %45, %49 : vector<16x16xf32>
    %51 = vector.extract_strided_slice %40 {offsets = [2, 0], sizes = [16, 16], strides = [1, 1]} : vector<18x16xf32> to vector<16x16xf32>
    %c0_22 = arith.constant 0 : index
    %c8 = arith.constant 8 : index
    %52 = memref.load %arg2[%c0_22, %c8] : memref<16x9xf32, #tpu.memory_space<smem>>
    %53 = vector.broadcast %52 : f32 to vector<16x16xf32>
    %54 = arith.mulf %51, %53 : vector<16x16xf32>
    %55 = arith.addf %50, %54 : vector<16x16xf32>
    %c0_23 = arith.constant 0 : index
    %c1_24 = arith.constant 1 : index
    %c0_25 = arith.constant 0 : index
    %c0_26 = arith.constant 0 : index
    %56 = vector.load %arg1[%c0_23, %c1_24, %c0_25, %c0_26] : memref<1x16x18x18xbf16, #tpu.memory_space<vmem>>, vector<1x1x18x16xbf16>
    %57 = vector.shape_cast %56 : vector<1x1x18x16xbf16> to vector<18x16xbf16>
    %58 = arith.extf %57 : vector<18x16xbf16> to vector<18x16xf32>
    %59 = vector.extract_strided_slice %58 {offsets = [0, 0], sizes = [16, 16], strides = [1, 1]} : vector<18x16xf32> to vector<16x16xf32>
    %c1_27 = arith.constant 1 : index
    %c0_28 = arith.constant 0 : index
    %60 = memref.load %arg2[%c1_27, %c0_28] : memref<16x9xf32, #tpu.memory_space<smem>>
    %61 = vector.broadcast %60 : f32 to vector<16x16xf32>
    %62 = arith.mulf %59, %61 : vector<16x16xf32>
    %63 = arith.addf %55, %62 : vector<16x16xf32>
    %64 = vector.extract_strided_slice %58 {offsets = [1, 0], sizes = [16, 16], strides = [1, 1]} : vector<18x16xf32> to vector<16x16xf32>
    %c1_29 = arith.constant 1 : index
    %c3_30 = arith.constant 3 : index
    %65 = memref.load %arg2[%c1_29, %c3_30] : memref<16x9xf32, #tpu.memory_space<smem>>
    %66 = vector.broadcast %65 : f32 to vector<16x16xf32>
    %67 = arith.mulf %64, %66 : vector<16x16xf32>
    %68 = arith.addf %63, %67 : vector<16x16xf32>
    %69 = vector.extract_strided_slice %58 {offsets = [2, 0], sizes = [16, 16], strides = [1, 1]} : vector<18x16xf32> to vector<16x16xf32>
    %c1_31 = arith.constant 1 : index
    %c6_32 = arith.constant 6 : index
    %70 = memref.load %arg2[%c1_31, %c6_32] : memref<16x9xf32, #tpu.memory_space<smem>>
    %71 = vector.broadcast %70 : f32 to vector<16x16xf32>
    %72 = arith.mulf %69, %71 : vector<16x16xf32>
    %73 = arith.addf %68, %72 : vector<16x16xf32>
    %c0_33 = arith.constant 0 : index
    %c1_34 = arith.constant 1 : index
    %c0_35 = arith.constant 0 : index
    %c1_36 = arith.constant 1 : index
    %74 = vector.load %arg1[%c0_33, %c1_34, %c0_35, %c1_36] : memref<1x16x18x18xbf16, #tpu.memory_space<vmem>>, vector<1x1x18x16xbf16>
    %75 = vector.shape_cast %74 : vector<1x1x18x16xbf16> to vector<18x16xbf16>
    %76 = arith.extf %75 : vector<18x16xbf16> to vector<18x16xf32>
    %77 = vector.extract_strided_slice %76 {offsets = [0, 0], sizes = [16, 16], strides = [1, 1]} : vector<18x16xf32> to vector<16x16xf32>
    %c1_37 = arith.constant 1 : index
    %c1_38 = arith.constant 1 : index
    %78 = memref.load %arg2[%c1_37, %c1_38] : memref<16x9xf32, #tpu.memory_space<smem>>
    %79 = vector.broadcast %78 : f32 to vector<16x16xf32>
    %80 = arith.mulf %77, %79 : vector<16x16xf32>
    %81 = arith.addf %73, %80 : vector<16x16xf32>
    %82 = vector.extract_strided_slice %76 {offsets = [1, 0], sizes = [16, 16], strides = [1, 1]} : vector<18x16xf32> to vector<16x16xf32>
    %c1_39 = arith.constant 1 : index
    %c4_40 = arith.constant 4 : index
    %83 = memref.load %arg2[%c1_39, %c4_40] : memref<16x9xf32, #tpu.memory_space<smem>>
    %84 = vector.broadcast %83 : f32 to vector<16x16xf32>
    %85 = arith.mulf %82, %84 : vector<16x16xf32>
    %86 = arith.addf %81, %85 : vector<16x16xf32>
    %87 = vector.extract_strided_slice %76 {offsets = [2, 0], sizes = [16, 16], strides = [1, 1]} : vector<18x16xf32> to vector<16x16xf32>
    %c1_41 = arith.constant 1 : index
    %c7_42 = arith.constant 7 : index
    %88 = memref.load %arg2[%c1_41, %c7_42] : memref<16x9xf32, #tpu.memory_space<smem>>
    %89 = vector.broadcast %88 : f32 to vector<16x16xf32>
    %90 = arith.mulf %87, %89 : vector<16x16xf32>
    %91 = arith.addf %86, %90 : vector<16x16xf32>
    %c0_43 = arith.constant 0 : index
    %c1_44 = arith.constant 1 : index
    %c0_45 = arith.constant 0 : index
    %c2_46 = arith.constant 2 : index
    %92 = vector.load %arg1[%c0_43, %c1_44, %c0_45, %c2_46] : memref<1x16x18x18xbf16, #tpu.memory_space<vmem>>, vector<1x1x18x16xbf16>
    %93 = vector.shape_cast %92 : vector<1x1x18x16xbf16> to vector<18x16xbf16>
    %94 = arith.extf %93 : vector<18x16xbf16> to vector<18x16xf32>
    %95 = vector.extract_strided_slice %94 {offsets = [0, 0], sizes = [16, 16], strides = [1, 1]} : vector<18x16xf32> to vector<16x16xf32>
    %c1_47 = arith.constant 1 : index
    %c2_48 = arith.constant 2 : index
    %96 = memref.load %arg2[%c1_47, %c2_48] : memref<16x9xf32, #tpu.memory_space<smem>>
    %97 = vector.broadcast %96 : f32 to vector<16x16xf32>
    %98 = arith.mulf %95, %97 : vector<16x16xf32>
    %99 = arith.addf %91, %98 : vector<16x16xf32>
    %100 = vector.extract_strided_slice %94 {offsets = [1, 0], sizes = [16, 16], strides = [1, 1]} : vector<18x16xf32> to vector<16x16xf32>
    %c1_49 = arith.constant 1 : index
    %c5_50 = arith.constant 5 : index
    %101 = memref.load %arg2[%c1_49, %c5_50] : memref<16x9xf32, #tpu.memory_space<smem>>
    %102 = vector.broadcast %101 : f32 to vector<16x16xf32>
    %103 = arith.mulf %100, %102 : vector<16x16xf32>
    %104 = arith.addf %99, %103 : vector<16x16xf32>
    %105 = vector.extract_strided_slice %94 {offsets = [2, 0], sizes = [16, 16], strides = [1, 1]} : vector<18x16xf32> to vector<16x16xf32>
    %c1_51 = arith.constant 1 : index
    %c8_52 = arith.constant 8 : index
    %106 = memref.load %arg2[%c1_51, %c8_52] : memref<16x9xf32, #tpu.memory_space<smem>>
    %107 = vector.broadcast %106 : f32 to vector<16x16xf32>
    %108 = arith.mulf %105, %107 : vector<16x16xf32>
    %109 = arith.addf %104, %108 : vector<16x16xf32>
    %c0_53 = arith.constant 0 : index
    %c2_54 = arith.constant 2 : index
    %c0_55 = arith.constant 0 : index
    %c0_56 = arith.constant 0 : index
    %110 = vector.load %arg1[%c0_53, %c2_54, %c0_55, %c0_56] : memref<1x16x18x18xbf16, #tpu.memory_space<vmem>>, vector<1x1x18x16xbf16>
    %111 = vector.shape_cast %110 : vector<1x1x18x16xbf16> to vector<18x16xbf16>
    %112 = arith.extf %111 : vector<18x16xbf16> to vector<18x16xf32>
    %113 = vector.extract_strided_slice %112 {offsets = [0, 0], sizes = [16, 16], strides = [1, 1]} : vector<18x16xf32> to vector<16x16xf32>
    %c2_57 = arith.constant 2 : index
    %c0_58 = arith.constant 0 : index
    %114 = memref.load %arg2[%c2_57, %c0_58] : memref<16x9xf32, #tpu.memory_space<smem>>
    %115 = vector.broadcast %114 : f32 to vector<16x16xf32>
    %116 = arith.mulf %113, %115 : vector<16x16xf32>
    %117 = arith.addf %109, %116 : vector<16x16xf32>
    %118 = vector.extract_strided_slice %112 {offsets = [1, 0], sizes = [16, 16], strides = [1, 1]} : vector<18x16xf32> to vector<16x16xf32>
    %c2_59 = arith.constant 2 : index
    %c3_60 = arith.constant 3 : index
    %119 = memref.load %arg2[%c2_59, %c3_60] : memref<16x9xf32, #tpu.memory_space<smem>>
    %120 = vector.broadcast %119 : f32 to vector<16x16xf32>
    %121 = arith.mulf %118, %120 : vector<16x16xf32>
    %122 = arith.addf %117, %121 : vector<16x16xf32>
    %123 = vector.extract_strided_slice %112 {offsets = [2, 0], sizes = [16, 16], strides = [1, 1]} : vector<18x16xf32> to vector<16x16xf32>
    %c2_61 = arith.constant 2 : index
    %c6_62 = arith.constant 6 : index
    %124 = memref.load %arg2[%c2_61, %c6_62] : memref<16x9xf32, #tpu.memory_space<smem>>
    %125 = vector.broadcast %124 : f32 to vector<16x16xf32>
    %126 = arith.mulf %123, %125 : vector<16x16xf32>
    %127 = arith.addf %122, %126 : vector<16x16xf32>
    %c0_63 = arith.constant 0 : index
    %c2_64 = arith.constant 2 : index
    %c0_65 = arith.constant 0 : index
    %c1_66 = arith.constant 1 : index
    %128 = vector.load %arg1[%c0_63, %c2_64, %c0_65, %c1_66] : memref<1x16x18x18xbf16, #tpu.memory_space<vmem>>, vector<1x1x18x16xbf16>
    %129 = vector.shape_cast %128 : vector<1x1x18x16xbf16> to vector<18x16xbf16>
    %130 = arith.extf %129 : vector<18x16xbf16> to vector<18x16xf32>
    %131 = vector.extract_strided_slice %130 {offsets = [0, 0], sizes = [16, 16], strides = [1, 1]} : vector<18x16xf32> to vector<16x16xf32>
    %c2_67 = arith.constant 2 : index
    %c1_68 = arith.constant 1 : index
    %132 = memref.load %arg2[%c2_67, %c1_68] : memref<16x9xf32, #tpu.memory_space<smem>>
    %133 = vector.broadcast %132 : f32 to vector<16x16xf32>
    %134 = arith.mulf %131, %133 : vector<16x16xf32>
    %135 = arith.addf %127, %134 : vector<16x16xf32>
    %136 = vector.extract_strided_slice %130 {offsets = [1, 0], sizes = [16, 16], strides = [1, 1]} : vector<18x16xf32> to vector<16x16xf32>
    %c2_69 = arith.constant 2 : index
    %c4_70 = arith.constant 4 : index
    %137 = memref.load %arg2[%c2_69, %c4_70] : memref<16x9xf32, #tpu.memory_space<smem>>
    %138 = vector.broadcast %137 : f32 to vector<16x16xf32>
    %139 = arith.mulf %136, %138 : vector<16x16xf32>
    %140 = arith.addf %135, %139 : vector<16x16xf32>
    %141 = vector.extract_strided_slice %130 {offsets = [2, 0], sizes = [16, 16], strides = [1, 1]} : vector<18x16xf32> to vector<16x16xf32>
    %c2_71 = arith.constant 2 : index
    %c7_72 = arith.constant 7 : index
    %142 = memref.load %arg2[%c2_71, %c7_72] : memref<16x9xf32, #tpu.memory_space<smem>>
    %143 = vector.broadcast %142 : f32 to vector<16x16xf32>
    %144 = arith.mulf %141, %143 : vector<16x16xf32>
    %145 = arith.addf %140, %144 : vector<16x16xf32>
    %c0_73 = arith.constant 0 : index
    %c2_74 = arith.constant 2 : index
    %c0_75 = arith.constant 0 : index
    %c2_76 = arith.constant 2 : index
    %146 = vector.load %arg1[%c0_73, %c2_74, %c0_75, %c2_76] : memref<1x16x18x18xbf16, #tpu.memory_space<vmem>>, vector<1x1x18x16xbf16>
    %147 = vector.shape_cast %146 : vector<1x1x18x16xbf16> to vector<18x16xbf16>
    %148 = arith.extf %147 : vector<18x16xbf16> to vector<18x16xf32>
    %149 = vector.extract_strided_slice %148 {offsets = [0, 0], sizes = [16, 16], strides = [1, 1]} : vector<18x16xf32> to vector<16x16xf32>
    %c2_77 = arith.constant 2 : index
    %c2_78 = arith.constant 2 : index
    %150 = memref.load %arg2[%c2_77, %c2_78] : memref<16x9xf32, #tpu.memory_space<smem>>
    %151 = vector.broadcast %150 : f32 to vector<16x16xf32>
    %152 = arith.mulf %149, %151 : vector<16x16xf32>
    %153 = arith.addf %145, %152 : vector<16x16xf32>
    %154 = vector.extract_strided_slice %148 {offsets = [1, 0], sizes = [16, 16], strides = [1, 1]} : vector<18x16xf32> to vector<16x16xf32>
    %c2_79 = arith.constant 2 : index
    %c5_80 = arith.constant 5 : index
    %155 = memref.load %arg2[%c2_79, %c5_80] : memref<16x9xf32, #tpu.memory_space<smem>>
    %156 = vector.broadcast %155 : f32 to vector<16x16xf32>
    %157 = arith.mulf %154, %156 : vector<16x16xf32>
    %158 = arith.addf %153, %157 : vector<16x16xf32>
    %159 = vector.extract_strided_slice %148 {offsets = [2, 0], sizes = [16, 16], strides = [1, 1]} : vector<18x16xf32> to vector<16x16xf32>
    %c2_81 = arith.constant 2 : index
    %c8_82 = arith.constant 8 : index
    %160 = memref.load %arg2[%c2_81, %c8_82] : memref<16x9xf32, #tpu.memory_space<smem>>
    %161 = vector.broadcast %160 : f32 to vector<16x16xf32>
    %162 = arith.mulf %159, %161 : vector<16x16xf32>
    %163 = arith.addf %158, %162 : vector<16x16xf32>
    %c0_83 = arith.constant 0 : index
    %c3_84 = arith.constant 3 : index
    %c0_85 = arith.constant 0 : index
    %c0_86 = arith.constant 0 : index
    %164 = vector.load %arg1[%c0_83, %c3_84, %c0_85, %c0_86] : memref<1x16x18x18xbf16, #tpu.memory_space<vmem>>, vector<1x1x18x16xbf16>
    %165 = vector.shape_cast %164 : vector<1x1x18x16xbf16> to vector<18x16xbf16>
    %166 = arith.extf %165 : vector<18x16xbf16> to vector<18x16xf32>
    %167 = vector.extract_strided_slice %166 {offsets = [0, 0], sizes = [16, 16], strides = [1, 1]} : vector<18x16xf32> to vector<16x16xf32>
    %c3_87 = arith.constant 3 : index
    %c0_88 = arith.constant 0 : index
    %168 = memref.load %arg2[%c3_87, %c0_88] : memref<16x9xf32, #tpu.memory_space<smem>>
    %169 = vector.broadcast %168 : f32 to vector<16x16xf32>
    %170 = arith.mulf %167, %169 : vector<16x16xf32>
    %171 = arith.addf %163, %170 : vector<16x16xf32>
    %172 = vector.extract_strided_slice %166 {offsets = [1, 0], sizes = [16, 16], strides = [1, 1]} : vector<18x16xf32> to vector<16x16xf32>
    %c3_89 = arith.constant 3 : index
    %c3_90 = arith.constant 3 : index
    %173 = memref.load %arg2[%c3_89, %c3_90] : memref<16x9xf32, #tpu.memory_space<smem>>
    %174 = vector.broadcast %173 : f32 to vector<16x16xf32>
    %175 = arith.mulf %172, %174 : vector<16x16xf32>
    %176 = arith.addf %171, %175 : vector<16x16xf32>
    %177 = vector.extract_strided_slice %166 {offsets = [2, 0], sizes = [16, 16], strides = [1, 1]} : vector<18x16xf32> to vector<16x16xf32>
    %c3_91 = arith.constant 3 : index
    %c6_92 = arith.constant 6 : index
    %178 = memref.load %arg2[%c3_91, %c6_92] : memref<16x9xf32, #tpu.memory_space<smem>>
    %179 = vector.broadcast %178 : f32 to vector<16x16xf32>
    %180 = arith.mulf %177, %179 : vector<16x16xf32>
    %181 = arith.addf %176, %180 : vector<16x16xf32>
    %c0_93 = arith.constant 0 : index
    %c3_94 = arith.constant 3 : index
    %c0_95 = arith.constant 0 : index
    %c1_96 = arith.constant 1 : index
    %182 = vector.load %arg1[%c0_93, %c3_94, %c0_95, %c1_96] : memref<1x16x18x18xbf16, #tpu.memory_space<vmem>>, vector<1x1x18x16xbf16>
    %183 = vector.shape_cast %182 : vector<1x1x18x16xbf16> to vector<18x16xbf16>
    %184 = arith.extf %183 : vector<18x16xbf16> to vector<18x16xf32>
    %185 = vector.extract_strided_slice %184 {offsets = [0, 0], sizes = [16, 16], strides = [1, 1]} : vector<18x16xf32> to vector<16x16xf32>
    %c3_97 = arith.constant 3 : index
    %c1_98 = arith.constant 1 : index
    %186 = memref.load %arg2[%c3_97, %c1_98] : memref<16x9xf32, #tpu.memory_space<smem>>
    %187 = vector.broadcast %186 : f32 to vector<16x16xf32>
    %188 = arith.mulf %185, %187 : vector<16x16xf32>
    %189 = arith.addf %181, %188 : vector<16x16xf32>
    %190 = vector.extract_strided_slice %184 {offsets = [1, 0], sizes = [16, 16], strides = [1, 1]} : vector<18x16xf32> to vector<16x16xf32>
    %c3_99 = arith.constant 3 : index
    %c4_100 = arith.constant 4 : index
    %191 = memref.load %arg2[%c3_99, %c4_100] : memref<16x9xf32, #tpu.memory_space<smem>>
    %192 = vector.broadcast %191 : f32 to vector<16x16xf32>
    %193 = arith.mulf %190, %192 : vector<16x16xf32>
    %194 = arith.addf %189, %193 : vector<16x16xf32>
    %195 = vector.extract_strided_slice %184 {offsets = [2, 0], sizes = [16, 16], strides = [1, 1]} : vector<18x16xf32> to vector<16x16xf32>
    %c3_101 = arith.constant 3 : index
    %c7_102 = arith.constant 7 : index
    %196 = memref.load %arg2[%c3_101, %c7_102] : memref<16x9xf32, #tpu.memory_space<smem>>
    %197 = vector.broadcast %196 : f32 to vector<16x16xf32>
    %198 = arith.mulf %195, %197 : vector<16x16xf32>
    %199 = arith.addf %194, %198 : vector<16x16xf32>
    %c0_103 = arith.constant 0 : index
    %c3_104 = arith.constant 3 : index
    %c0_105 = arith.constant 0 : index
    %c2_106 = arith.constant 2 : index
    %200 = vector.load %arg1[%c0_103, %c3_104, %c0_105, %c2_106] : memref<1x16x18x18xbf16, #tpu.memory_space<vmem>>, vector<1x1x18x16xbf16>
    %201 = vector.shape_cast %200 : vector<1x1x18x16xbf16> to vector<18x16xbf16>
    %202 = arith.extf %201 : vector<18x16xbf16> to vector<18x16xf32>
    %203 = vector.extract_strided_slice %202 {offsets = [0, 0], sizes = [16, 16], strides = [1, 1]} : vector<18x16xf32> to vector<16x16xf32>
    %c3_107 = arith.constant 3 : index
    %c2_108 = arith.constant 2 : index
    %204 = memref.load %arg2[%c3_107, %c2_108] : memref<16x9xf32, #tpu.memory_space<smem>>
    %205 = vector.broadcast %204 : f32 to vector<16x16xf32>
    %206 = arith.mulf %203, %205 : vector<16x16xf32>
    %207 = arith.addf %199, %206 : vector<16x16xf32>
    %208 = vector.extract_strided_slice %202 {offsets = [1, 0], sizes = [16, 16], strides = [1, 1]} : vector<18x16xf32> to vector<16x16xf32>
    %c3_109 = arith.constant 3 : index
    %c5_110 = arith.constant 5 : index
    %209 = memref.load %arg2[%c3_109, %c5_110] : memref<16x9xf32, #tpu.memory_space<smem>>
    %210 = vector.broadcast %209 : f32 to vector<16x16xf32>
    %211 = arith.mulf %208, %210 : vector<16x16xf32>
    %212 = arith.addf %207, %211 : vector<16x16xf32>
    %213 = vector.extract_strided_slice %202 {offsets = [2, 0], sizes = [16, 16], strides = [1, 1]} : vector<18x16xf32> to vector<16x16xf32>
    %c3_111 = arith.constant 3 : index
    %c8_112 = arith.constant 8 : index
    %214 = memref.load %arg2[%c3_111, %c8_112] : memref<16x9xf32, #tpu.memory_space<smem>>
    %215 = vector.broadcast %214 : f32 to vector<16x16xf32>
    %216 = arith.mulf %213, %215 : vector<16x16xf32>
    %217 = arith.addf %212, %216 : vector<16x16xf32>
    %c0_113 = arith.constant 0 : index
    %c4_114 = arith.constant 4 : index
    %c0_115 = arith.constant 0 : index
    %c0_116 = arith.constant 0 : index
    %218 = vector.load %arg1[%c0_113, %c4_114, %c0_115, %c0_116] : memref<1x16x18x18xbf16, #tpu.memory_space<vmem>>, vector<1x1x18x16xbf16>
    %219 = vector.shape_cast %218 : vector<1x1x18x16xbf16> to vector<18x16xbf16>
    %220 = arith.extf %219 : vector<18x16xbf16> to vector<18x16xf32>
    %221 = vector.extract_strided_slice %220 {offsets = [0, 0], sizes = [16, 16], strides = [1, 1]} : vector<18x16xf32> to vector<16x16xf32>
    %c4_117 = arith.constant 4 : index
    %c0_118 = arith.constant 0 : index
    %222 = memref.load %arg2[%c4_117, %c0_118] : memref<16x9xf32, #tpu.memory_space<smem>>
    %223 = vector.broadcast %222 : f32 to vector<16x16xf32>
    %224 = arith.mulf %221, %223 : vector<16x16xf32>
    %225 = arith.addf %217, %224 : vector<16x16xf32>
    %226 = vector.extract_strided_slice %220 {offsets = [1, 0], sizes = [16, 16], strides = [1, 1]} : vector<18x16xf32> to vector<16x16xf32>
    %c4_119 = arith.constant 4 : index
    %c3_120 = arith.constant 3 : index
    %227 = memref.load %arg2[%c4_119, %c3_120] : memref<16x9xf32, #tpu.memory_space<smem>>
    %228 = vector.broadcast %227 : f32 to vector<16x16xf32>
    %229 = arith.mulf %226, %228 : vector<16x16xf32>
    %230 = arith.addf %225, %229 : vector<16x16xf32>
    %231 = vector.extract_strided_slice %220 {offsets = [2, 0], sizes = [16, 16], strides = [1, 1]} : vector<18x16xf32> to vector<16x16xf32>
    %c4_121 = arith.constant 4 : index
    %c6_122 = arith.constant 6 : index
    %232 = memref.load %arg2[%c4_121, %c6_122] : memref<16x9xf32, #tpu.memory_space<smem>>
    %233 = vector.broadcast %232 : f32 to vector<16x16xf32>
    %234 = arith.mulf %231, %233 : vector<16x16xf32>
    %235 = arith.addf %230, %234 : vector<16x16xf32>
    %c0_123 = arith.constant 0 : index
    %c4_124 = arith.constant 4 : index
    %c0_125 = arith.constant 0 : index
    %c1_126 = arith.constant 1 : index
    %236 = vector.load %arg1[%c0_123, %c4_124, %c0_125, %c1_126] : memref<1x16x18x18xbf16, #tpu.memory_space<vmem>>, vector<1x1x18x16xbf16>
    %237 = vector.shape_cast %236 : vector<1x1x18x16xbf16> to vector<18x16xbf16>
    %238 = arith.extf %237 : vector<18x16xbf16> to vector<18x16xf32>
    %239 = vector.extract_strided_slice %238 {offsets = [0, 0], sizes = [16, 16], strides = [1, 1]} : vector<18x16xf32> to vector<16x16xf32>
    %c4_127 = arith.constant 4 : index
    %c1_128 = arith.constant 1 : index
    %240 = memref.load %arg2[%c4_127, %c1_128] : memref<16x9xf32, #tpu.memory_space<smem>>
    %241 = vector.broadcast %240 : f32 to vector<16x16xf32>
    %242 = arith.mulf %239, %241 : vector<16x16xf32>
    %243 = arith.addf %235, %242 : vector<16x16xf32>
    %244 = vector.extract_strided_slice %238 {offsets = [1, 0], sizes = [16, 16], strides = [1, 1]} : vector<18x16xf32> to vector<16x16xf32>
    %c4_129 = arith.constant 4 : index
    %c4_130 = arith.constant 4 : index
    %245 = memref.load %arg2[%c4_129, %c4_130] : memref<16x9xf32, #tpu.memory_space<smem>>
    %246 = vector.broadcast %245 : f32 to vector<16x16xf32>
    %247 = arith.mulf %244, %246 : vector<16x16xf32>
    %248 = arith.addf %243, %247 : vector<16x16xf32>
    %249 = vector.extract_strided_slice %238 {offsets = [2, 0], sizes = [16, 16], strides = [1, 1]} : vector<18x16xf32> to vector<16x16xf32>
    %c4_131 = arith.constant 4 : index
    %c7_132 = arith.constant 7 : index
    %250 = memref.load %arg2[%c4_131, %c7_132] : memref<16x9xf32, #tpu.memory_space<smem>>
    %251 = vector.broadcast %250 : f32 to vector<16x16xf32>
    %252 = arith.mulf %249, %251 : vector<16x16xf32>
    %253 = arith.addf %248, %252 : vector<16x16xf32>
    %c0_133 = arith.constant 0 : index
    %c4_134 = arith.constant 4 : index
    %c0_135 = arith.constant 0 : index
    %c2_136 = arith.constant 2 : index
    %254 = vector.load %arg1[%c0_133, %c4_134, %c0_135, %c2_136] : memref<1x16x18x18xbf16, #tpu.memory_space<vmem>>, vector<1x1x18x16xbf16>
    %255 = vector.shape_cast %254 : vector<1x1x18x16xbf16> to vector<18x16xbf16>
    %256 = arith.extf %255 : vector<18x16xbf16> to vector<18x16xf32>
    %257 = vector.extract_strided_slice %256 {offsets = [0, 0], sizes = [16, 16], strides = [1, 1]} : vector<18x16xf32> to vector<16x16xf32>
    %c4_137 = arith.constant 4 : index
    %c2_138 = arith.constant 2 : index
    %258 = memref.load %arg2[%c4_137, %c2_138] : memref<16x9xf32, #tpu.memory_space<smem>>
    %259 = vector.broadcast %258 : f32 to vector<16x16xf32>
    %260 = arith.mulf %257, %259 : vector<16x16xf32>
    %261 = arith.addf %253, %260 : vector<16x16xf32>
    %262 = vector.extract_strided_slice %256 {offsets = [1, 0], sizes = [16, 16], strides = [1, 1]} : vector<18x16xf32> to vector<16x16xf32>
    %c4_139 = arith.constant 4 : index
    %c5_140 = arith.constant 5 : index
    %263 = memref.load %arg2[%c4_139, %c5_140] : memref<16x9xf32, #tpu.memory_space<smem>>
    %264 = vector.broadcast %263 : f32 to vector<16x16xf32>
    %265 = arith.mulf %262, %264 : vector<16x16xf32>
    %266 = arith.addf %261, %265 : vector<16x16xf32>
    %267 = vector.extract_strided_slice %256 {offsets = [2, 0], sizes = [16, 16], strides = [1, 1]} : vector<18x16xf32> to vector<16x16xf32>
    %c4_141 = arith.constant 4 : index
    %c8_142 = arith.constant 8 : index
    %268 = memref.load %arg2[%c4_141, %c8_142] : memref<16x9xf32, #tpu.memory_space<smem>>
    %269 = vector.broadcast %268 : f32 to vector<16x16xf32>
    %270 = arith.mulf %267, %269 : vector<16x16xf32>
    %271 = arith.addf %266, %270 : vector<16x16xf32>
    %c0_143 = arith.constant 0 : index
    %c5_144 = arith.constant 5 : index
    %c0_145 = arith.constant 0 : index
    %c0_146 = arith.constant 0 : index
    %272 = vector.load %arg1[%c0_143, %c5_144, %c0_145, %c0_146] : memref<1x16x18x18xbf16, #tpu.memory_space<vmem>>, vector<1x1x18x16xbf16>
    %273 = vector.shape_cast %272 : vector<1x1x18x16xbf16> to vector<18x16xbf16>
    %274 = arith.extf %273 : vector<18x16xbf16> to vector<18x16xf32>
    %275 = vector.extract_strided_slice %274 {offsets = [0, 0], sizes = [16, 16], strides = [1, 1]} : vector<18x16xf32> to vector<16x16xf32>
    %c5_147 = arith.constant 5 : index
    %c0_148 = arith.constant 0 : index
    %276 = memref.load %arg2[%c5_147, %c0_148] : memref<16x9xf32, #tpu.memory_space<smem>>
    %277 = vector.broadcast %276 : f32 to vector<16x16xf32>
    %278 = arith.mulf %275, %277 : vector<16x16xf32>
    %279 = arith.addf %271, %278 : vector<16x16xf32>
    %280 = vector.extract_strided_slice %274 {offsets = [1, 0], sizes = [16, 16], strides = [1, 1]} : vector<18x16xf32> to vector<16x16xf32>
    %c5_149 = arith.constant 5 : index
    %c3_150 = arith.constant 3 : index
    %281 = memref.load %arg2[%c5_149, %c3_150] : memref<16x9xf32, #tpu.memory_space<smem>>
    %282 = vector.broadcast %281 : f32 to vector<16x16xf32>
    %283 = arith.mulf %280, %282 : vector<16x16xf32>
    %284 = arith.addf %279, %283 : vector<16x16xf32>
    %285 = vector.extract_strided_slice %274 {offsets = [2, 0], sizes = [16, 16], strides = [1, 1]} : vector<18x16xf32> to vector<16x16xf32>
    %c5_151 = arith.constant 5 : index
    %c6_152 = arith.constant 6 : index
    %286 = memref.load %arg2[%c5_151, %c6_152] : memref<16x9xf32, #tpu.memory_space<smem>>
    %287 = vector.broadcast %286 : f32 to vector<16x16xf32>
    %288 = arith.mulf %285, %287 : vector<16x16xf32>
    %289 = arith.addf %284, %288 : vector<16x16xf32>
    %c0_153 = arith.constant 0 : index
    %c5_154 = arith.constant 5 : index
    %c0_155 = arith.constant 0 : index
    %c1_156 = arith.constant 1 : index
    %290 = vector.load %arg1[%c0_153, %c5_154, %c0_155, %c1_156] : memref<1x16x18x18xbf16, #tpu.memory_space<vmem>>, vector<1x1x18x16xbf16>
    %291 = vector.shape_cast %290 : vector<1x1x18x16xbf16> to vector<18x16xbf16>
    %292 = arith.extf %291 : vector<18x16xbf16> to vector<18x16xf32>
    %293 = vector.extract_strided_slice %292 {offsets = [0, 0], sizes = [16, 16], strides = [1, 1]} : vector<18x16xf32> to vector<16x16xf32>
    %c5_157 = arith.constant 5 : index
    %c1_158 = arith.constant 1 : index
    %294 = memref.load %arg2[%c5_157, %c1_158] : memref<16x9xf32, #tpu.memory_space<smem>>
    %295 = vector.broadcast %294 : f32 to vector<16x16xf32>
    %296 = arith.mulf %293, %295 : vector<16x16xf32>
    %297 = arith.addf %289, %296 : vector<16x16xf32>
    %298 = vector.extract_strided_slice %292 {offsets = [1, 0], sizes = [16, 16], strides = [1, 1]} : vector<18x16xf32> to vector<16x16xf32>
    %c5_159 = arith.constant 5 : index
    %c4_160 = arith.constant 4 : index
    %299 = memref.load %arg2[%c5_159, %c4_160] : memref<16x9xf32, #tpu.memory_space<smem>>
    %300 = vector.broadcast %299 : f32 to vector<16x16xf32>
    %301 = arith.mulf %298, %300 : vector<16x16xf32>
    %302 = arith.addf %297, %301 : vector<16x16xf32>
    %303 = vector.extract_strided_slice %292 {offsets = [2, 0], sizes = [16, 16], strides = [1, 1]} : vector<18x16xf32> to vector<16x16xf32>
    %c5_161 = arith.constant 5 : index
    %c7_162 = arith.constant 7 : index
    %304 = memref.load %arg2[%c5_161, %c7_162] : memref<16x9xf32, #tpu.memory_space<smem>>
    %305 = vector.broadcast %304 : f32 to vector<16x16xf32>
    %306 = arith.mulf %303, %305 : vector<16x16xf32>
    %307 = arith.addf %302, %306 : vector<16x16xf32>
    %c0_163 = arith.constant 0 : index
    %c5_164 = arith.constant 5 : index
    %c0_165 = arith.constant 0 : index
    %c2_166 = arith.constant 2 : index
    %308 = vector.load %arg1[%c0_163, %c5_164, %c0_165, %c2_166] : memref<1x16x18x18xbf16, #tpu.memory_space<vmem>>, vector<1x1x18x16xbf16>
    %309 = vector.shape_cast %308 : vector<1x1x18x16xbf16> to vector<18x16xbf16>
    %310 = arith.extf %309 : vector<18x16xbf16> to vector<18x16xf32>
    %311 = vector.extract_strided_slice %310 {offsets = [0, 0], sizes = [16, 16], strides = [1, 1]} : vector<18x16xf32> to vector<16x16xf32>
    %c5_167 = arith.constant 5 : index
    %c2_168 = arith.constant 2 : index
    %312 = memref.load %arg2[%c5_167, %c2_168] : memref<16x9xf32, #tpu.memory_space<smem>>
    %313 = vector.broadcast %312 : f32 to vector<16x16xf32>
    %314 = arith.mulf %311, %313 : vector<16x16xf32>
    %315 = arith.addf %307, %314 : vector<16x16xf32>
    %316 = vector.extract_strided_slice %310 {offsets = [1, 0], sizes = [16, 16], strides = [1, 1]} : vector<18x16xf32> to vector<16x16xf32>
    %c5_169 = arith.constant 5 : index
    %c5_170 = arith.constant 5 : index
    %317 = memref.load %arg2[%c5_169, %c5_170] : memref<16x9xf32, #tpu.memory_space<smem>>
    %318 = vector.broadcast %317 : f32 to vector<16x16xf32>
    %319 = arith.mulf %316, %318 : vector<16x16xf32>
    %320 = arith.addf %315, %319 : vector<16x16xf32>
    %321 = vector.extract_strided_slice %310 {offsets = [2, 0], sizes = [16, 16], strides = [1, 1]} : vector<18x16xf32> to vector<16x16xf32>
    %c5_171 = arith.constant 5 : index
    %c8_172 = arith.constant 8 : index
    %322 = memref.load %arg2[%c5_171, %c8_172] : memref<16x9xf32, #tpu.memory_space<smem>>
    %323 = vector.broadcast %322 : f32 to vector<16x16xf32>
    %324 = arith.mulf %321, %323 : vector<16x16xf32>
    %325 = arith.addf %320, %324 : vector<16x16xf32>
    %c0_173 = arith.constant 0 : index
    %c6_174 = arith.constant 6 : index
    %c0_175 = arith.constant 0 : index
    %c0_176 = arith.constant 0 : index
    %326 = vector.load %arg1[%c0_173, %c6_174, %c0_175, %c0_176] : memref<1x16x18x18xbf16, #tpu.memory_space<vmem>>, vector<1x1x18x16xbf16>
    %327 = vector.shape_cast %326 : vector<1x1x18x16xbf16> to vector<18x16xbf16>
    %328 = arith.extf %327 : vector<18x16xbf16> to vector<18x16xf32>
    %329 = vector.extract_strided_slice %328 {offsets = [0, 0], sizes = [16, 16], strides = [1, 1]} : vector<18x16xf32> to vector<16x16xf32>
    %c6_177 = arith.constant 6 : index
    %c0_178 = arith.constant 0 : index
    %330 = memref.load %arg2[%c6_177, %c0_178] : memref<16x9xf32, #tpu.memory_space<smem>>
    %331 = vector.broadcast %330 : f32 to vector<16x16xf32>
    %332 = arith.mulf %329, %331 : vector<16x16xf32>
    %333 = arith.addf %325, %332 : vector<16x16xf32>
    %334 = vector.extract_strided_slice %328 {offsets = [1, 0], sizes = [16, 16], strides = [1, 1]} : vector<18x16xf32> to vector<16x16xf32>
    %c6_179 = arith.constant 6 : index
    %c3_180 = arith.constant 3 : index
    %335 = memref.load %arg2[%c6_179, %c3_180] : memref<16x9xf32, #tpu.memory_space<smem>>
    %336 = vector.broadcast %335 : f32 to vector<16x16xf32>
    %337 = arith.mulf %334, %336 : vector<16x16xf32>
    %338 = arith.addf %333, %337 : vector<16x16xf32>
    %339 = vector.extract_strided_slice %328 {offsets = [2, 0], sizes = [16, 16], strides = [1, 1]} : vector<18x16xf32> to vector<16x16xf32>
    %c6_181 = arith.constant 6 : index
    %c6_182 = arith.constant 6 : index
    %340 = memref.load %arg2[%c6_181, %c6_182] : memref<16x9xf32, #tpu.memory_space<smem>>
    %341 = vector.broadcast %340 : f32 to vector<16x16xf32>
    %342 = arith.mulf %339, %341 : vector<16x16xf32>
    %343 = arith.addf %338, %342 : vector<16x16xf32>
    %c0_183 = arith.constant 0 : index
    %c6_184 = arith.constant 6 : index
    %c0_185 = arith.constant 0 : index
    %c1_186 = arith.constant 1 : index
    %344 = vector.load %arg1[%c0_183, %c6_184, %c0_185, %c1_186] : memref<1x16x18x18xbf16, #tpu.memory_space<vmem>>, vector<1x1x18x16xbf16>
    %345 = vector.shape_cast %344 : vector<1x1x18x16xbf16> to vector<18x16xbf16>
    %346 = arith.extf %345 : vector<18x16xbf16> to vector<18x16xf32>
    %347 = vector.extract_strided_slice %346 {offsets = [0, 0], sizes = [16, 16], strides = [1, 1]} : vector<18x16xf32> to vector<16x16xf32>
    %c6_187 = arith.constant 6 : index
    %c1_188 = arith.constant 1 : index
    %348 = memref.load %arg2[%c6_187, %c1_188] : memref<16x9xf32, #tpu.memory_space<smem>>
    %349 = vector.broadcast %348 : f32 to vector<16x16xf32>
    %350 = arith.mulf %347, %349 : vector<16x16xf32>
    %351 = arith.addf %343, %350 : vector<16x16xf32>
    %352 = vector.extract_strided_slice %346 {offsets = [1, 0], sizes = [16, 16], strides = [1, 1]} : vector<18x16xf32> to vector<16x16xf32>
    %c6_189 = arith.constant 6 : index
    %c4_190 = arith.constant 4 : index
    %353 = memref.load %arg2[%c6_189, %c4_190] : memref<16x9xf32, #tpu.memory_space<smem>>
    %354 = vector.broadcast %353 : f32 to vector<16x16xf32>
    %355 = arith.mulf %352, %354 : vector<16x16xf32>
    %356 = arith.addf %351, %355 : vector<16x16xf32>
    %357 = vector.extract_strided_slice %346 {offsets = [2, 0], sizes = [16, 16], strides = [1, 1]} : vector<18x16xf32> to vector<16x16xf32>
    %c6_191 = arith.constant 6 : index
    %c7_192 = arith.constant 7 : index
    %358 = memref.load %arg2[%c6_191, %c7_192] : memref<16x9xf32, #tpu.memory_space<smem>>
    %359 = vector.broadcast %358 : f32 to vector<16x16xf32>
    %360 = arith.mulf %357, %359 : vector<16x16xf32>
    %361 = arith.addf %356, %360 : vector<16x16xf32>
    %c0_193 = arith.constant 0 : index
    %c6_194 = arith.constant 6 : index
    %c0_195 = arith.constant 0 : index
    %c2_196 = arith.constant 2 : index
    %362 = vector.load %arg1[%c0_193, %c6_194, %c0_195, %c2_196] : memref<1x16x18x18xbf16, #tpu.memory_space<vmem>>, vector<1x1x18x16xbf16>
    %363 = vector.shape_cast %362 : vector<1x1x18x16xbf16> to vector<18x16xbf16>
    %364 = arith.extf %363 : vector<18x16xbf16> to vector<18x16xf32>
    %365 = vector.extract_strided_slice %364 {offsets = [0, 0], sizes = [16, 16], strides = [1, 1]} : vector<18x16xf32> to vector<16x16xf32>
    %c6_197 = arith.constant 6 : index
    %c2_198 = arith.constant 2 : index
    %366 = memref.load %arg2[%c6_197, %c2_198] : memref<16x9xf32, #tpu.memory_space<smem>>
    %367 = vector.broadcast %366 : f32 to vector<16x16xf32>
    %368 = arith.mulf %365, %367 : vector<16x16xf32>
    %369 = arith.addf %361, %368 : vector<16x16xf32>
    %370 = vector.extract_strided_slice %364 {offsets = [1, 0], sizes = [16, 16], strides = [1, 1]} : vector<18x16xf32> to vector<16x16xf32>
    %c6_199 = arith.constant 6 : index
    %c5_200 = arith.constant 5 : index
    %371 = memref.load %arg2[%c6_199, %c5_200] : memref<16x9xf32, #tpu.memory_space<smem>>
    %372 = vector.broadcast %371 : f32 to vector<16x16xf32>
    %373 = arith.mulf %370, %372 : vector<16x16xf32>
    %374 = arith.addf %369, %373 : vector<16x16xf32>
    %375 = vector.extract_strided_slice %364 {offsets = [2, 0], sizes = [16, 16], strides = [1, 1]} : vector<18x16xf32> to vector<16x16xf32>
    %c6_201 = arith.constant 6 : index
    %c8_202 = arith.constant 8 : index
    %376 = memref.load %arg2[%c6_201, %c8_202] : memref<16x9xf32, #tpu.memory_space<smem>>
    %377 = vector.broadcast %376 : f32 to vector<16x16xf32>
    %378 = arith.mulf %375, %377 : vector<16x16xf32>
    %379 = arith.addf %374, %378 : vector<16x16xf32>
    %c0_203 = arith.constant 0 : index
    %c7_204 = arith.constant 7 : index
    %c0_205 = arith.constant 0 : index
    %c0_206 = arith.constant 0 : index
    %380 = vector.load %arg1[%c0_203, %c7_204, %c0_205, %c0_206] : memref<1x16x18x18xbf16, #tpu.memory_space<vmem>>, vector<1x1x18x16xbf16>
    %381 = vector.shape_cast %380 : vector<1x1x18x16xbf16> to vector<18x16xbf16>
    %382 = arith.extf %381 : vector<18x16xbf16> to vector<18x16xf32>
    %383 = vector.extract_strided_slice %382 {offsets = [0, 0], sizes = [16, 16], strides = [1, 1]} : vector<18x16xf32> to vector<16x16xf32>
    %c7_207 = arith.constant 7 : index
    %c0_208 = arith.constant 0 : index
    %384 = memref.load %arg2[%c7_207, %c0_208] : memref<16x9xf32, #tpu.memory_space<smem>>
    %385 = vector.broadcast %384 : f32 to vector<16x16xf32>
    %386 = arith.mulf %383, %385 : vector<16x16xf32>
    %387 = arith.addf %379, %386 : vector<16x16xf32>
    %388 = vector.extract_strided_slice %382 {offsets = [1, 0], sizes = [16, 16], strides = [1, 1]} : vector<18x16xf32> to vector<16x16xf32>
    %c7_209 = arith.constant 7 : index
    %c3_210 = arith.constant 3 : index
    %389 = memref.load %arg2[%c7_209, %c3_210] : memref<16x9xf32, #tpu.memory_space<smem>>
    %390 = vector.broadcast %389 : f32 to vector<16x16xf32>
    %391 = arith.mulf %388, %390 : vector<16x16xf32>
    %392 = arith.addf %387, %391 : vector<16x16xf32>
    %393 = vector.extract_strided_slice %382 {offsets = [2, 0], sizes = [16, 16], strides = [1, 1]} : vector<18x16xf32> to vector<16x16xf32>
    %c7_211 = arith.constant 7 : index
    %c6_212 = arith.constant 6 : index
    %394 = memref.load %arg2[%c7_211, %c6_212] : memref<16x9xf32, #tpu.memory_space<smem>>
    %395 = vector.broadcast %394 : f32 to vector<16x16xf32>
    %396 = arith.mulf %393, %395 : vector<16x16xf32>
    %397 = arith.addf %392, %396 : vector<16x16xf32>
    %c0_213 = arith.constant 0 : index
    %c7_214 = arith.constant 7 : index
    %c0_215 = arith.constant 0 : index
    %c1_216 = arith.constant 1 : index
    %398 = vector.load %arg1[%c0_213, %c7_214, %c0_215, %c1_216] : memref<1x16x18x18xbf16, #tpu.memory_space<vmem>>, vector<1x1x18x16xbf16>
    %399 = vector.shape_cast %398 : vector<1x1x18x16xbf16> to vector<18x16xbf16>
    %400 = arith.extf %399 : vector<18x16xbf16> to vector<18x16xf32>
    %401 = vector.extract_strided_slice %400 {offsets = [0, 0], sizes = [16, 16], strides = [1, 1]} : vector<18x16xf32> to vector<16x16xf32>
    %c7_217 = arith.constant 7 : index
    %c1_218 = arith.constant 1 : index
    %402 = memref.load %arg2[%c7_217, %c1_218] : memref<16x9xf32, #tpu.memory_space<smem>>
    %403 = vector.broadcast %402 : f32 to vector<16x16xf32>
    %404 = arith.mulf %401, %403 : vector<16x16xf32>
    %405 = arith.addf %397, %404 : vector<16x16xf32>
    %406 = vector.extract_strided_slice %400 {offsets = [1, 0], sizes = [16, 16], strides = [1, 1]} : vector<18x16xf32> to vector<16x16xf32>
    %c7_219 = arith.constant 7 : index
    %c4_220 = arith.constant 4 : index
    %407 = memref.load %arg2[%c7_219, %c4_220] : memref<16x9xf32, #tpu.memory_space<smem>>
    %408 = vector.broadcast %407 : f32 to vector<16x16xf32>
    %409 = arith.mulf %406, %408 : vector<16x16xf32>
    %410 = arith.addf %405, %409 : vector<16x16xf32>
    %411 = vector.extract_strided_slice %400 {offsets = [2, 0], sizes = [16, 16], strides = [1, 1]} : vector<18x16xf32> to vector<16x16xf32>
    %c7_221 = arith.constant 7 : index
    %c7_222 = arith.constant 7 : index
    %412 = memref.load %arg2[%c7_221, %c7_222] : memref<16x9xf32, #tpu.memory_space<smem>>
    %413 = vector.broadcast %412 : f32 to vector<16x16xf32>
    %414 = arith.mulf %411, %413 : vector<16x16xf32>
    %415 = arith.addf %410, %414 : vector<16x16xf32>
    %c0_223 = arith.constant 0 : index
    %c7_224 = arith.constant 7 : index
    %c0_225 = arith.constant 0 : index
    %c2_226 = arith.constant 2 : index
    %416 = vector.load %arg1[%c0_223, %c7_224, %c0_225, %c2_226] : memref<1x16x18x18xbf16, #tpu.memory_space<vmem>>, vector<1x1x18x16xbf16>
    %417 = vector.shape_cast %416 : vector<1x1x18x16xbf16> to vector<18x16xbf16>
    %418 = arith.extf %417 : vector<18x16xbf16> to vector<18x16xf32>
    %419 = vector.extract_strided_slice %418 {offsets = [0, 0], sizes = [16, 16], strides = [1, 1]} : vector<18x16xf32> to vector<16x16xf32>
    %c7_227 = arith.constant 7 : index
    %c2_228 = arith.constant 2 : index
    %420 = memref.load %arg2[%c7_227, %c2_228] : memref<16x9xf32, #tpu.memory_space<smem>>
    %421 = vector.broadcast %420 : f32 to vector<16x16xf32>
    %422 = arith.mulf %419, %421 : vector<16x16xf32>
    %423 = arith.addf %415, %422 : vector<16x16xf32>
    %424 = vector.extract_strided_slice %418 {offsets = [1, 0], sizes = [16, 16], strides = [1, 1]} : vector<18x16xf32> to vector<16x16xf32>
    %c7_229 = arith.constant 7 : index
    %c5_230 = arith.constant 5 : index
    %425 = memref.load %arg2[%c7_229, %c5_230] : memref<16x9xf32, #tpu.memory_space<smem>>
    %426 = vector.broadcast %425 : f32 to vector<16x16xf32>
    %427 = arith.mulf %424, %426 : vector<16x16xf32>
    %428 = arith.addf %423, %427 : vector<16x16xf32>
    %429 = vector.extract_strided_slice %418 {offsets = [2, 0], sizes = [16, 16], strides = [1, 1]} : vector<18x16xf32> to vector<16x16xf32>
    %c7_231 = arith.constant 7 : index
    %c8_232 = arith.constant 8 : index
    %430 = memref.load %arg2[%c7_231, %c8_232] : memref<16x9xf32, #tpu.memory_space<smem>>
    %431 = vector.broadcast %430 : f32 to vector<16x16xf32>
    %432 = arith.mulf %429, %431 : vector<16x16xf32>
    %433 = arith.addf %428, %432 : vector<16x16xf32>
    %c0_233 = arith.constant 0 : index
    %c8_234 = arith.constant 8 : index
    %c0_235 = arith.constant 0 : index
    %c0_236 = arith.constant 0 : index
    %434 = vector.load %arg1[%c0_233, %c8_234, %c0_235, %c0_236] : memref<1x16x18x18xbf16, #tpu.memory_space<vmem>>, vector<1x1x18x16xbf16>
    %435 = vector.shape_cast %434 : vector<1x1x18x16xbf16> to vector<18x16xbf16>
    %436 = arith.extf %435 : vector<18x16xbf16> to vector<18x16xf32>
    %437 = vector.extract_strided_slice %436 {offsets = [0, 0], sizes = [16, 16], strides = [1, 1]} : vector<18x16xf32> to vector<16x16xf32>
    %c8_237 = arith.constant 8 : index
    %c0_238 = arith.constant 0 : index
    %438 = memref.load %arg2[%c8_237, %c0_238] : memref<16x9xf32, #tpu.memory_space<smem>>
    %439 = vector.broadcast %438 : f32 to vector<16x16xf32>
    %440 = arith.mulf %437, %439 : vector<16x16xf32>
    %441 = arith.addf %433, %440 : vector<16x16xf32>
    %442 = vector.extract_strided_slice %436 {offsets = [1, 0], sizes = [16, 16], strides = [1, 1]} : vector<18x16xf32> to vector<16x16xf32>
    %c8_239 = arith.constant 8 : index
    %c3_240 = arith.constant 3 : index
    %443 = memref.load %arg2[%c8_239, %c3_240] : memref<16x9xf32, #tpu.memory_space<smem>>
    %444 = vector.broadcast %443 : f32 to vector<16x16xf32>
    %445 = arith.mulf %442, %444 : vector<16x16xf32>
    %446 = arith.addf %441, %445 : vector<16x16xf32>
    %447 = vector.extract_strided_slice %436 {offsets = [2, 0], sizes = [16, 16], strides = [1, 1]} : vector<18x16xf32> to vector<16x16xf32>
    %c8_241 = arith.constant 8 : index
    %c6_242 = arith.constant 6 : index
    %448 = memref.load %arg2[%c8_241, %c6_242] : memref<16x9xf32, #tpu.memory_space<smem>>
    %449 = vector.broadcast %448 : f32 to vector<16x16xf32>
    %450 = arith.mulf %447, %449 : vector<16x16xf32>
    %451 = arith.addf %446, %450 : vector<16x16xf32>
    %c0_243 = arith.constant 0 : index
    %c8_244 = arith.constant 8 : index
    %c0_245 = arith.constant 0 : index
    %c1_246 = arith.constant 1 : index
    %452 = vector.load %arg1[%c0_243, %c8_244, %c0_245, %c1_246] : memref<1x16x18x18xbf16, #tpu.memory_space<vmem>>, vector<1x1x18x16xbf16>
    %453 = vector.shape_cast %452 : vector<1x1x18x16xbf16> to vector<18x16xbf16>
    %454 = arith.extf %453 : vector<18x16xbf16> to vector<18x16xf32>
    %455 = vector.extract_strided_slice %454 {offsets = [0, 0], sizes = [16, 16], strides = [1, 1]} : vector<18x16xf32> to vector<16x16xf32>
    %c8_247 = arith.constant 8 : index
    %c1_248 = arith.constant 1 : index
    %456 = memref.load %arg2[%c8_247, %c1_248] : memref<16x9xf32, #tpu.memory_space<smem>>
    %457 = vector.broadcast %456 : f32 to vector<16x16xf32>
    %458 = arith.mulf %455, %457 : vector<16x16xf32>
    %459 = arith.addf %451, %458 : vector<16x16xf32>
    %460 = vector.extract_strided_slice %454 {offsets = [1, 0], sizes = [16, 16], strides = [1, 1]} : vector<18x16xf32> to vector<16x16xf32>
    %c8_249 = arith.constant 8 : index
    %c4_250 = arith.constant 4 : index
    %461 = memref.load %arg2[%c8_249, %c4_250] : memref<16x9xf32, #tpu.memory_space<smem>>
    %462 = vector.broadcast %461 : f32 to vector<16x16xf32>
    %463 = arith.mulf %460, %462 : vector<16x16xf32>
    %464 = arith.addf %459, %463 : vector<16x16xf32>
    %465 = vector.extract_strided_slice %454 {offsets = [2, 0], sizes = [16, 16], strides = [1, 1]} : vector<18x16xf32> to vector<16x16xf32>
    %c8_251 = arith.constant 8 : index
    %c7_252 = arith.constant 7 : index
    %466 = memref.load %arg2[%c8_251, %c7_252] : memref<16x9xf32, #tpu.memory_space<smem>>
    %467 = vector.broadcast %466 : f32 to vector<16x16xf32>
    %468 = arith.mulf %465, %467 : vector<16x16xf32>
    %469 = arith.addf %464, %468 : vector<16x16xf32>
    %c0_253 = arith.constant 0 : index
    %c8_254 = arith.constant 8 : index
    %c0_255 = arith.constant 0 : index
    %c2_256 = arith.constant 2 : index
    %470 = vector.load %arg1[%c0_253, %c8_254, %c0_255, %c2_256] : memref<1x16x18x18xbf16, #tpu.memory_space<vmem>>, vector<1x1x18x16xbf16>
    %471 = vector.shape_cast %470 : vector<1x1x18x16xbf16> to vector<18x16xbf16>
    %472 = arith.extf %471 : vector<18x16xbf16> to vector<18x16xf32>
    %473 = vector.extract_strided_slice %472 {offsets = [0, 0], sizes = [16, 16], strides = [1, 1]} : vector<18x16xf32> to vector<16x16xf32>
    %c8_257 = arith.constant 8 : index
    %c2_258 = arith.constant 2 : index
    %474 = memref.load %arg2[%c8_257, %c2_258] : memref<16x9xf32, #tpu.memory_space<smem>>
    %475 = vector.broadcast %474 : f32 to vector<16x16xf32>
    %476 = arith.mulf %473, %475 : vector<16x16xf32>
    %477 = arith.addf %469, %476 : vector<16x16xf32>
    %478 = vector.extract_strided_slice %472 {offsets = [1, 0], sizes = [16, 16], strides = [1, 1]} : vector<18x16xf32> to vector<16x16xf32>
    %c8_259 = arith.constant 8 : index
    %c5_260 = arith.constant 5 : index
    %479 = memref.load %arg2[%c8_259, %c5_260] : memref<16x9xf32, #tpu.memory_space<smem>>
    %480 = vector.broadcast %479 : f32 to vector<16x16xf32>
    %481 = arith.mulf %478, %480 : vector<16x16xf32>
    %482 = arith.addf %477, %481 : vector<16x16xf32>
    %483 = vector.extract_strided_slice %472 {offsets = [2, 0], sizes = [16, 16], strides = [1, 1]} : vector<18x16xf32> to vector<16x16xf32>
    %c8_261 = arith.constant 8 : index
    %c8_262 = arith.constant 8 : index
    %484 = memref.load %arg2[%c8_261, %c8_262] : memref<16x9xf32, #tpu.memory_space<smem>>
    %485 = vector.broadcast %484 : f32 to vector<16x16xf32>
    %486 = arith.mulf %483, %485 : vector<16x16xf32>
    %487 = arith.addf %482, %486 : vector<16x16xf32>
    %c0_263 = arith.constant 0 : index
    %c9 = arith.constant 9 : index
    %c0_264 = arith.constant 0 : index
    %c0_265 = arith.constant 0 : index
    %488 = vector.load %arg1[%c0_263, %c9, %c0_264, %c0_265] : memref<1x16x18x18xbf16, #tpu.memory_space<vmem>>, vector<1x1x18x16xbf16>
    %489 = vector.shape_cast %488 : vector<1x1x18x16xbf16> to vector<18x16xbf16>
    %490 = arith.extf %489 : vector<18x16xbf16> to vector<18x16xf32>
    %491 = vector.extract_strided_slice %490 {offsets = [0, 0], sizes = [16, 16], strides = [1, 1]} : vector<18x16xf32> to vector<16x16xf32>
    %c9_266 = arith.constant 9 : index
    %c0_267 = arith.constant 0 : index
    %492 = memref.load %arg2[%c9_266, %c0_267] : memref<16x9xf32, #tpu.memory_space<smem>>
    %493 = vector.broadcast %492 : f32 to vector<16x16xf32>
    %494 = arith.mulf %491, %493 : vector<16x16xf32>
    %495 = arith.addf %487, %494 : vector<16x16xf32>
    %496 = vector.extract_strided_slice %490 {offsets = [1, 0], sizes = [16, 16], strides = [1, 1]} : vector<18x16xf32> to vector<16x16xf32>
    %c9_268 = arith.constant 9 : index
    %c3_269 = arith.constant 3 : index
    %497 = memref.load %arg2[%c9_268, %c3_269] : memref<16x9xf32, #tpu.memory_space<smem>>
    %498 = vector.broadcast %497 : f32 to vector<16x16xf32>
    %499 = arith.mulf %496, %498 : vector<16x16xf32>
    %500 = arith.addf %495, %499 : vector<16x16xf32>
    %501 = vector.extract_strided_slice %490 {offsets = [2, 0], sizes = [16, 16], strides = [1, 1]} : vector<18x16xf32> to vector<16x16xf32>
    %c9_270 = arith.constant 9 : index
    %c6_271 = arith.constant 6 : index
    %502 = memref.load %arg2[%c9_270, %c6_271] : memref<16x9xf32, #tpu.memory_space<smem>>
    %503 = vector.broadcast %502 : f32 to vector<16x16xf32>
    %504 = arith.mulf %501, %503 : vector<16x16xf32>
    %505 = arith.addf %500, %504 : vector<16x16xf32>
    %c0_272 = arith.constant 0 : index
    %c9_273 = arith.constant 9 : index
    %c0_274 = arith.constant 0 : index
    %c1_275 = arith.constant 1 : index
    %506 = vector.load %arg1[%c0_272, %c9_273, %c0_274, %c1_275] : memref<1x16x18x18xbf16, #tpu.memory_space<vmem>>, vector<1x1x18x16xbf16>
    %507 = vector.shape_cast %506 : vector<1x1x18x16xbf16> to vector<18x16xbf16>
    %508 = arith.extf %507 : vector<18x16xbf16> to vector<18x16xf32>
    %509 = vector.extract_strided_slice %508 {offsets = [0, 0], sizes = [16, 16], strides = [1, 1]} : vector<18x16xf32> to vector<16x16xf32>
    %c9_276 = arith.constant 9 : index
    %c1_277 = arith.constant 1 : index
    %510 = memref.load %arg2[%c9_276, %c1_277] : memref<16x9xf32, #tpu.memory_space<smem>>
    %511 = vector.broadcast %510 : f32 to vector<16x16xf32>
    %512 = arith.mulf %509, %511 : vector<16x16xf32>
    %513 = arith.addf %505, %512 : vector<16x16xf32>
    %514 = vector.extract_strided_slice %508 {offsets = [1, 0], sizes = [16, 16], strides = [1, 1]} : vector<18x16xf32> to vector<16x16xf32>
    %c9_278 = arith.constant 9 : index
    %c4_279 = arith.constant 4 : index
    %515 = memref.load %arg2[%c9_278, %c4_279] : memref<16x9xf32, #tpu.memory_space<smem>>
    %516 = vector.broadcast %515 : f32 to vector<16x16xf32>
    %517 = arith.mulf %514, %516 : vector<16x16xf32>
    %518 = arith.addf %513, %517 : vector<16x16xf32>
    %519 = vector.extract_strided_slice %508 {offsets = [2, 0], sizes = [16, 16], strides = [1, 1]} : vector<18x16xf32> to vector<16x16xf32>
    %c9_280 = arith.constant 9 : index
    %c7_281 = arith.constant 7 : index
    %520 = memref.load %arg2[%c9_280, %c7_281] : memref<16x9xf32, #tpu.memory_space<smem>>
    %521 = vector.broadcast %520 : f32 to vector<16x16xf32>
    %522 = arith.mulf %519, %521 : vector<16x16xf32>
    %523 = arith.addf %518, %522 : vector<16x16xf32>
    %c0_282 = arith.constant 0 : index
    %c9_283 = arith.constant 9 : index
    %c0_284 = arith.constant 0 : index
    %c2_285 = arith.constant 2 : index
    %524 = vector.load %arg1[%c0_282, %c9_283, %c0_284, %c2_285] : memref<1x16x18x18xbf16, #tpu.memory_space<vmem>>, vector<1x1x18x16xbf16>
    %525 = vector.shape_cast %524 : vector<1x1x18x16xbf16> to vector<18x16xbf16>
    %526 = arith.extf %525 : vector<18x16xbf16> to vector<18x16xf32>
    %527 = vector.extract_strided_slice %526 {offsets = [0, 0], sizes = [16, 16], strides = [1, 1]} : vector<18x16xf32> to vector<16x16xf32>
    %c9_286 = arith.constant 9 : index
    %c2_287 = arith.constant 2 : index
    %528 = memref.load %arg2[%c9_286, %c2_287] : memref<16x9xf32, #tpu.memory_space<smem>>
    %529 = vector.broadcast %528 : f32 to vector<16x16xf32>
    %530 = arith.mulf %527, %529 : vector<16x16xf32>
    %531 = arith.addf %523, %530 : vector<16x16xf32>
    %532 = vector.extract_strided_slice %526 {offsets = [1, 0], sizes = [16, 16], strides = [1, 1]} : vector<18x16xf32> to vector<16x16xf32>
    %c9_288 = arith.constant 9 : index
    %c5_289 = arith.constant 5 : index
    %533 = memref.load %arg2[%c9_288, %c5_289] : memref<16x9xf32, #tpu.memory_space<smem>>
    %534 = vector.broadcast %533 : f32 to vector<16x16xf32>
    %535 = arith.mulf %532, %534 : vector<16x16xf32>
    %536 = arith.addf %531, %535 : vector<16x16xf32>
    %537 = vector.extract_strided_slice %526 {offsets = [2, 0], sizes = [16, 16], strides = [1, 1]} : vector<18x16xf32> to vector<16x16xf32>
    %c9_290 = arith.constant 9 : index
    %c8_291 = arith.constant 8 : index
    %538 = memref.load %arg2[%c9_290, %c8_291] : memref<16x9xf32, #tpu.memory_space<smem>>
    %539 = vector.broadcast %538 : f32 to vector<16x16xf32>
    %540 = arith.mulf %537, %539 : vector<16x16xf32>
    %541 = arith.addf %536, %540 : vector<16x16xf32>
    %c0_292 = arith.constant 0 : index
    %c10 = arith.constant 10 : index
    %c0_293 = arith.constant 0 : index
    %c0_294 = arith.constant 0 : index
    %542 = vector.load %arg1[%c0_292, %c10, %c0_293, %c0_294] : memref<1x16x18x18xbf16, #tpu.memory_space<vmem>>, vector<1x1x18x16xbf16>
    %543 = vector.shape_cast %542 : vector<1x1x18x16xbf16> to vector<18x16xbf16>
    %544 = arith.extf %543 : vector<18x16xbf16> to vector<18x16xf32>
    %545 = vector.extract_strided_slice %544 {offsets = [0, 0], sizes = [16, 16], strides = [1, 1]} : vector<18x16xf32> to vector<16x16xf32>
    %c10_295 = arith.constant 10 : index
    %c0_296 = arith.constant 0 : index
    %546 = memref.load %arg2[%c10_295, %c0_296] : memref<16x9xf32, #tpu.memory_space<smem>>
    %547 = vector.broadcast %546 : f32 to vector<16x16xf32>
    %548 = arith.mulf %545, %547 : vector<16x16xf32>
    %549 = arith.addf %541, %548 : vector<16x16xf32>
    %550 = vector.extract_strided_slice %544 {offsets = [1, 0], sizes = [16, 16], strides = [1, 1]} : vector<18x16xf32> to vector<16x16xf32>
    %c10_297 = arith.constant 10 : index
    %c3_298 = arith.constant 3 : index
    %551 = memref.load %arg2[%c10_297, %c3_298] : memref<16x9xf32, #tpu.memory_space<smem>>
    %552 = vector.broadcast %551 : f32 to vector<16x16xf32>
    %553 = arith.mulf %550, %552 : vector<16x16xf32>
    %554 = arith.addf %549, %553 : vector<16x16xf32>
    %555 = vector.extract_strided_slice %544 {offsets = [2, 0], sizes = [16, 16], strides = [1, 1]} : vector<18x16xf32> to vector<16x16xf32>
    %c10_299 = arith.constant 10 : index
    %c6_300 = arith.constant 6 : index
    %556 = memref.load %arg2[%c10_299, %c6_300] : memref<16x9xf32, #tpu.memory_space<smem>>
    %557 = vector.broadcast %556 : f32 to vector<16x16xf32>
    %558 = arith.mulf %555, %557 : vector<16x16xf32>
    %559 = arith.addf %554, %558 : vector<16x16xf32>
    %c0_301 = arith.constant 0 : index
    %c10_302 = arith.constant 10 : index
    %c0_303 = arith.constant 0 : index
    %c1_304 = arith.constant 1 : index
    %560 = vector.load %arg1[%c0_301, %c10_302, %c0_303, %c1_304] : memref<1x16x18x18xbf16, #tpu.memory_space<vmem>>, vector<1x1x18x16xbf16>
    %561 = vector.shape_cast %560 : vector<1x1x18x16xbf16> to vector<18x16xbf16>
    %562 = arith.extf %561 : vector<18x16xbf16> to vector<18x16xf32>
    %563 = vector.extract_strided_slice %562 {offsets = [0, 0], sizes = [16, 16], strides = [1, 1]} : vector<18x16xf32> to vector<16x16xf32>
    %c10_305 = arith.constant 10 : index
    %c1_306 = arith.constant 1 : index
    %564 = memref.load %arg2[%c10_305, %c1_306] : memref<16x9xf32, #tpu.memory_space<smem>>
    %565 = vector.broadcast %564 : f32 to vector<16x16xf32>
    %566 = arith.mulf %563, %565 : vector<16x16xf32>
    %567 = arith.addf %559, %566 : vector<16x16xf32>
    %568 = vector.extract_strided_slice %562 {offsets = [1, 0], sizes = [16, 16], strides = [1, 1]} : vector<18x16xf32> to vector<16x16xf32>
    %c10_307 = arith.constant 10 : index
    %c4_308 = arith.constant 4 : index
    %569 = memref.load %arg2[%c10_307, %c4_308] : memref<16x9xf32, #tpu.memory_space<smem>>
    %570 = vector.broadcast %569 : f32 to vector<16x16xf32>
    %571 = arith.mulf %568, %570 : vector<16x16xf32>
    %572 = arith.addf %567, %571 : vector<16x16xf32>
    %573 = vector.extract_strided_slice %562 {offsets = [2, 0], sizes = [16, 16], strides = [1, 1]} : vector<18x16xf32> to vector<16x16xf32>
    %c10_309 = arith.constant 10 : index
    %c7_310 = arith.constant 7 : index
    %574 = memref.load %arg2[%c10_309, %c7_310] : memref<16x9xf32, #tpu.memory_space<smem>>
    %575 = vector.broadcast %574 : f32 to vector<16x16xf32>
    %576 = arith.mulf %573, %575 : vector<16x16xf32>
    %577 = arith.addf %572, %576 : vector<16x16xf32>
    %c0_311 = arith.constant 0 : index
    %c10_312 = arith.constant 10 : index
    %c0_313 = arith.constant 0 : index
    %c2_314 = arith.constant 2 : index
    %578 = vector.load %arg1[%c0_311, %c10_312, %c0_313, %c2_314] : memref<1x16x18x18xbf16, #tpu.memory_space<vmem>>, vector<1x1x18x16xbf16>
    %579 = vector.shape_cast %578 : vector<1x1x18x16xbf16> to vector<18x16xbf16>
    %580 = arith.extf %579 : vector<18x16xbf16> to vector<18x16xf32>
    %581 = vector.extract_strided_slice %580 {offsets = [0, 0], sizes = [16, 16], strides = [1, 1]} : vector<18x16xf32> to vector<16x16xf32>
    %c10_315 = arith.constant 10 : index
    %c2_316 = arith.constant 2 : index
    %582 = memref.load %arg2[%c10_315, %c2_316] : memref<16x9xf32, #tpu.memory_space<smem>>
    %583 = vector.broadcast %582 : f32 to vector<16x16xf32>
    %584 = arith.mulf %581, %583 : vector<16x16xf32>
    %585 = arith.addf %577, %584 : vector<16x16xf32>
    %586 = vector.extract_strided_slice %580 {offsets = [1, 0], sizes = [16, 16], strides = [1, 1]} : vector<18x16xf32> to vector<16x16xf32>
    %c10_317 = arith.constant 10 : index
    %c5_318 = arith.constant 5 : index
    %587 = memref.load %arg2[%c10_317, %c5_318] : memref<16x9xf32, #tpu.memory_space<smem>>
    %588 = vector.broadcast %587 : f32 to vector<16x16xf32>
    %589 = arith.mulf %586, %588 : vector<16x16xf32>
    %590 = arith.addf %585, %589 : vector<16x16xf32>
    %591 = vector.extract_strided_slice %580 {offsets = [2, 0], sizes = [16, 16], strides = [1, 1]} : vector<18x16xf32> to vector<16x16xf32>
    %c10_319 = arith.constant 10 : index
    %c8_320 = arith.constant 8 : index
    %592 = memref.load %arg2[%c10_319, %c8_320] : memref<16x9xf32, #tpu.memory_space<smem>>
    %593 = vector.broadcast %592 : f32 to vector<16x16xf32>
    %594 = arith.mulf %591, %593 : vector<16x16xf32>
    %595 = arith.addf %590, %594 : vector<16x16xf32>
    %c0_321 = arith.constant 0 : index
    %c11 = arith.constant 11 : index
    %c0_322 = arith.constant 0 : index
    %c0_323 = arith.constant 0 : index
    %596 = vector.load %arg1[%c0_321, %c11, %c0_322, %c0_323] : memref<1x16x18x18xbf16, #tpu.memory_space<vmem>>, vector<1x1x18x16xbf16>
    %597 = vector.shape_cast %596 : vector<1x1x18x16xbf16> to vector<18x16xbf16>
    %598 = arith.extf %597 : vector<18x16xbf16> to vector<18x16xf32>
    %599 = vector.extract_strided_slice %598 {offsets = [0, 0], sizes = [16, 16], strides = [1, 1]} : vector<18x16xf32> to vector<16x16xf32>
    %c11_324 = arith.constant 11 : index
    %c0_325 = arith.constant 0 : index
    %600 = memref.load %arg2[%c11_324, %c0_325] : memref<16x9xf32, #tpu.memory_space<smem>>
    %601 = vector.broadcast %600 : f32 to vector<16x16xf32>
    %602 = arith.mulf %599, %601 : vector<16x16xf32>
    %603 = arith.addf %595, %602 : vector<16x16xf32>
    %604 = vector.extract_strided_slice %598 {offsets = [1, 0], sizes = [16, 16], strides = [1, 1]} : vector<18x16xf32> to vector<16x16xf32>
    %c11_326 = arith.constant 11 : index
    %c3_327 = arith.constant 3 : index
    %605 = memref.load %arg2[%c11_326, %c3_327] : memref<16x9xf32, #tpu.memory_space<smem>>
    %606 = vector.broadcast %605 : f32 to vector<16x16xf32>
    %607 = arith.mulf %604, %606 : vector<16x16xf32>
    %608 = arith.addf %603, %607 : vector<16x16xf32>
    %609 = vector.extract_strided_slice %598 {offsets = [2, 0], sizes = [16, 16], strides = [1, 1]} : vector<18x16xf32> to vector<16x16xf32>
    %c11_328 = arith.constant 11 : index
    %c6_329 = arith.constant 6 : index
    %610 = memref.load %arg2[%c11_328, %c6_329] : memref<16x9xf32, #tpu.memory_space<smem>>
    %611 = vector.broadcast %610 : f32 to vector<16x16xf32>
    %612 = arith.mulf %609, %611 : vector<16x16xf32>
    %613 = arith.addf %608, %612 : vector<16x16xf32>
    %c0_330 = arith.constant 0 : index
    %c11_331 = arith.constant 11 : index
    %c0_332 = arith.constant 0 : index
    %c1_333 = arith.constant 1 : index
    %614 = vector.load %arg1[%c0_330, %c11_331, %c0_332, %c1_333] : memref<1x16x18x18xbf16, #tpu.memory_space<vmem>>, vector<1x1x18x16xbf16>
    %615 = vector.shape_cast %614 : vector<1x1x18x16xbf16> to vector<18x16xbf16>
    %616 = arith.extf %615 : vector<18x16xbf16> to vector<18x16xf32>
    %617 = vector.extract_strided_slice %616 {offsets = [0, 0], sizes = [16, 16], strides = [1, 1]} : vector<18x16xf32> to vector<16x16xf32>
    %c11_334 = arith.constant 11 : index
    %c1_335 = arith.constant 1 : index
    %618 = memref.load %arg2[%c11_334, %c1_335] : memref<16x9xf32, #tpu.memory_space<smem>>
    %619 = vector.broadcast %618 : f32 to vector<16x16xf32>
    %620 = arith.mulf %617, %619 : vector<16x16xf32>
    %621 = arith.addf %613, %620 : vector<16x16xf32>
    %622 = vector.extract_strided_slice %616 {offsets = [1, 0], sizes = [16, 16], strides = [1, 1]} : vector<18x16xf32> to vector<16x16xf32>
    %c11_336 = arith.constant 11 : index
    %c4_337 = arith.constant 4 : index
    %623 = memref.load %arg2[%c11_336, %c4_337] : memref<16x9xf32, #tpu.memory_space<smem>>
    %624 = vector.broadcast %623 : f32 to vector<16x16xf32>
    %625 = arith.mulf %622, %624 : vector<16x16xf32>
    %626 = arith.addf %621, %625 : vector<16x16xf32>
    %627 = vector.extract_strided_slice %616 {offsets = [2, 0], sizes = [16, 16], strides = [1, 1]} : vector<18x16xf32> to vector<16x16xf32>
    %c11_338 = arith.constant 11 : index
    %c7_339 = arith.constant 7 : index
    %628 = memref.load %arg2[%c11_338, %c7_339] : memref<16x9xf32, #tpu.memory_space<smem>>
    %629 = vector.broadcast %628 : f32 to vector<16x16xf32>
    %630 = arith.mulf %627, %629 : vector<16x16xf32>
    %631 = arith.addf %626, %630 : vector<16x16xf32>
    %c0_340 = arith.constant 0 : index
    %c11_341 = arith.constant 11 : index
    %c0_342 = arith.constant 0 : index
    %c2_343 = arith.constant 2 : index
    %632 = vector.load %arg1[%c0_340, %c11_341, %c0_342, %c2_343] : memref<1x16x18x18xbf16, #tpu.memory_space<vmem>>, vector<1x1x18x16xbf16>
    %633 = vector.shape_cast %632 : vector<1x1x18x16xbf16> to vector<18x16xbf16>
    %634 = arith.extf %633 : vector<18x16xbf16> to vector<18x16xf32>
    %635 = vector.extract_strided_slice %634 {offsets = [0, 0], sizes = [16, 16], strides = [1, 1]} : vector<18x16xf32> to vector<16x16xf32>
    %c11_344 = arith.constant 11 : index
    %c2_345 = arith.constant 2 : index
    %636 = memref.load %arg2[%c11_344, %c2_345] : memref<16x9xf32, #tpu.memory_space<smem>>
    %637 = vector.broadcast %636 : f32 to vector<16x16xf32>
    %638 = arith.mulf %635, %637 : vector<16x16xf32>
    %639 = arith.addf %631, %638 : vector<16x16xf32>
    %640 = vector.extract_strided_slice %634 {offsets = [1, 0], sizes = [16, 16], strides = [1, 1]} : vector<18x16xf32> to vector<16x16xf32>
    %c11_346 = arith.constant 11 : index
    %c5_347 = arith.constant 5 : index
    %641 = memref.load %arg2[%c11_346, %c5_347] : memref<16x9xf32, #tpu.memory_space<smem>>
    %642 = vector.broadcast %641 : f32 to vector<16x16xf32>
    %643 = arith.mulf %640, %642 : vector<16x16xf32>
    %644 = arith.addf %639, %643 : vector<16x16xf32>
    %645 = vector.extract_strided_slice %634 {offsets = [2, 0], sizes = [16, 16], strides = [1, 1]} : vector<18x16xf32> to vector<16x16xf32>
    %c11_348 = arith.constant 11 : index
    %c8_349 = arith.constant 8 : index
    %646 = memref.load %arg2[%c11_348, %c8_349] : memref<16x9xf32, #tpu.memory_space<smem>>
    %647 = vector.broadcast %646 : f32 to vector<16x16xf32>
    %648 = arith.mulf %645, %647 : vector<16x16xf32>
    %649 = arith.addf %644, %648 : vector<16x16xf32>
    %c0_350 = arith.constant 0 : index
    %c12 = arith.constant 12 : index
    %c0_351 = arith.constant 0 : index
    %c0_352 = arith.constant 0 : index
    %650 = vector.load %arg1[%c0_350, %c12, %c0_351, %c0_352] : memref<1x16x18x18xbf16, #tpu.memory_space<vmem>>, vector<1x1x18x16xbf16>
    %651 = vector.shape_cast %650 : vector<1x1x18x16xbf16> to vector<18x16xbf16>
    %652 = arith.extf %651 : vector<18x16xbf16> to vector<18x16xf32>
    %653 = vector.extract_strided_slice %652 {offsets = [0, 0], sizes = [16, 16], strides = [1, 1]} : vector<18x16xf32> to vector<16x16xf32>
    %c12_353 = arith.constant 12 : index
    %c0_354 = arith.constant 0 : index
    %654 = memref.load %arg2[%c12_353, %c0_354] : memref<16x9xf32, #tpu.memory_space<smem>>
    %655 = vector.broadcast %654 : f32 to vector<16x16xf32>
    %656 = arith.mulf %653, %655 : vector<16x16xf32>
    %657 = arith.addf %649, %656 : vector<16x16xf32>
    %658 = vector.extract_strided_slice %652 {offsets = [1, 0], sizes = [16, 16], strides = [1, 1]} : vector<18x16xf32> to vector<16x16xf32>
    %c12_355 = arith.constant 12 : index
    %c3_356 = arith.constant 3 : index
    %659 = memref.load %arg2[%c12_355, %c3_356] : memref<16x9xf32, #tpu.memory_space<smem>>
    %660 = vector.broadcast %659 : f32 to vector<16x16xf32>
    %661 = arith.mulf %658, %660 : vector<16x16xf32>
    %662 = arith.addf %657, %661 : vector<16x16xf32>
    %663 = vector.extract_strided_slice %652 {offsets = [2, 0], sizes = [16, 16], strides = [1, 1]} : vector<18x16xf32> to vector<16x16xf32>
    %c12_357 = arith.constant 12 : index
    %c6_358 = arith.constant 6 : index
    %664 = memref.load %arg2[%c12_357, %c6_358] : memref<16x9xf32, #tpu.memory_space<smem>>
    %665 = vector.broadcast %664 : f32 to vector<16x16xf32>
    %666 = arith.mulf %663, %665 : vector<16x16xf32>
    %667 = arith.addf %662, %666 : vector<16x16xf32>
    %c0_359 = arith.constant 0 : index
    %c12_360 = arith.constant 12 : index
    %c0_361 = arith.constant 0 : index
    %c1_362 = arith.constant 1 : index
    %668 = vector.load %arg1[%c0_359, %c12_360, %c0_361, %c1_362] : memref<1x16x18x18xbf16, #tpu.memory_space<vmem>>, vector<1x1x18x16xbf16>
    %669 = vector.shape_cast %668 : vector<1x1x18x16xbf16> to vector<18x16xbf16>
    %670 = arith.extf %669 : vector<18x16xbf16> to vector<18x16xf32>
    %671 = vector.extract_strided_slice %670 {offsets = [0, 0], sizes = [16, 16], strides = [1, 1]} : vector<18x16xf32> to vector<16x16xf32>
    %c12_363 = arith.constant 12 : index
    %c1_364 = arith.constant 1 : index
    %672 = memref.load %arg2[%c12_363, %c1_364] : memref<16x9xf32, #tpu.memory_space<smem>>
    %673 = vector.broadcast %672 : f32 to vector<16x16xf32>
    %674 = arith.mulf %671, %673 : vector<16x16xf32>
    %675 = arith.addf %667, %674 : vector<16x16xf32>
    %676 = vector.extract_strided_slice %670 {offsets = [1, 0], sizes = [16, 16], strides = [1, 1]} : vector<18x16xf32> to vector<16x16xf32>
    %c12_365 = arith.constant 12 : index
    %c4_366 = arith.constant 4 : index
    %677 = memref.load %arg2[%c12_365, %c4_366] : memref<16x9xf32, #tpu.memory_space<smem>>
    %678 = vector.broadcast %677 : f32 to vector<16x16xf32>
    %679 = arith.mulf %676, %678 : vector<16x16xf32>
    %680 = arith.addf %675, %679 : vector<16x16xf32>
    %681 = vector.extract_strided_slice %670 {offsets = [2, 0], sizes = [16, 16], strides = [1, 1]} : vector<18x16xf32> to vector<16x16xf32>
    %c12_367 = arith.constant 12 : index
    %c7_368 = arith.constant 7 : index
    %682 = memref.load %arg2[%c12_367, %c7_368] : memref<16x9xf32, #tpu.memory_space<smem>>
    %683 = vector.broadcast %682 : f32 to vector<16x16xf32>
    %684 = arith.mulf %681, %683 : vector<16x16xf32>
    %685 = arith.addf %680, %684 : vector<16x16xf32>
    %c0_369 = arith.constant 0 : index
    %c12_370 = arith.constant 12 : index
    %c0_371 = arith.constant 0 : index
    %c2_372 = arith.constant 2 : index
    %686 = vector.load %arg1[%c0_369, %c12_370, %c0_371, %c2_372] : memref<1x16x18x18xbf16, #tpu.memory_space<vmem>>, vector<1x1x18x16xbf16>
    %687 = vector.shape_cast %686 : vector<1x1x18x16xbf16> to vector<18x16xbf16>
    %688 = arith.extf %687 : vector<18x16xbf16> to vector<18x16xf32>
    %689 = vector.extract_strided_slice %688 {offsets = [0, 0], sizes = [16, 16], strides = [1, 1]} : vector<18x16xf32> to vector<16x16xf32>
    %c12_373 = arith.constant 12 : index
    %c2_374 = arith.constant 2 : index
    %690 = memref.load %arg2[%c12_373, %c2_374] : memref<16x9xf32, #tpu.memory_space<smem>>
    %691 = vector.broadcast %690 : f32 to vector<16x16xf32>
    %692 = arith.mulf %689, %691 : vector<16x16xf32>
    %693 = arith.addf %685, %692 : vector<16x16xf32>
    %694 = vector.extract_strided_slice %688 {offsets = [1, 0], sizes = [16, 16], strides = [1, 1]} : vector<18x16xf32> to vector<16x16xf32>
    %c12_375 = arith.constant 12 : index
    %c5_376 = arith.constant 5 : index
    %695 = memref.load %arg2[%c12_375, %c5_376] : memref<16x9xf32, #tpu.memory_space<smem>>
    %696 = vector.broadcast %695 : f32 to vector<16x16xf32>
    %697 = arith.mulf %694, %696 : vector<16x16xf32>
    %698 = arith.addf %693, %697 : vector<16x16xf32>
    %699 = vector.extract_strided_slice %688 {offsets = [2, 0], sizes = [16, 16], strides = [1, 1]} : vector<18x16xf32> to vector<16x16xf32>
    %c12_377 = arith.constant 12 : index
    %c8_378 = arith.constant 8 : index
    %700 = memref.load %arg2[%c12_377, %c8_378] : memref<16x9xf32, #tpu.memory_space<smem>>
    %701 = vector.broadcast %700 : f32 to vector<16x16xf32>
    %702 = arith.mulf %699, %701 : vector<16x16xf32>
    %703 = arith.addf %698, %702 : vector<16x16xf32>
    %c0_379 = arith.constant 0 : index
    %c13 = arith.constant 13 : index
    %c0_380 = arith.constant 0 : index
    %c0_381 = arith.constant 0 : index
    %704 = vector.load %arg1[%c0_379, %c13, %c0_380, %c0_381] : memref<1x16x18x18xbf16, #tpu.memory_space<vmem>>, vector<1x1x18x16xbf16>
    %705 = vector.shape_cast %704 : vector<1x1x18x16xbf16> to vector<18x16xbf16>
    %706 = arith.extf %705 : vector<18x16xbf16> to vector<18x16xf32>
    %707 = vector.extract_strided_slice %706 {offsets = [0, 0], sizes = [16, 16], strides = [1, 1]} : vector<18x16xf32> to vector<16x16xf32>
    %c13_382 = arith.constant 13 : index
    %c0_383 = arith.constant 0 : index
    %708 = memref.load %arg2[%c13_382, %c0_383] : memref<16x9xf32, #tpu.memory_space<smem>>
    %709 = vector.broadcast %708 : f32 to vector<16x16xf32>
    %710 = arith.mulf %707, %709 : vector<16x16xf32>
    %711 = arith.addf %703, %710 : vector<16x16xf32>
    %712 = vector.extract_strided_slice %706 {offsets = [1, 0], sizes = [16, 16], strides = [1, 1]} : vector<18x16xf32> to vector<16x16xf32>
    %c13_384 = arith.constant 13 : index
    %c3_385 = arith.constant 3 : index
    %713 = memref.load %arg2[%c13_384, %c3_385] : memref<16x9xf32, #tpu.memory_space<smem>>
    %714 = vector.broadcast %713 : f32 to vector<16x16xf32>
    %715 = arith.mulf %712, %714 : vector<16x16xf32>
    %716 = arith.addf %711, %715 : vector<16x16xf32>
    %717 = vector.extract_strided_slice %706 {offsets = [2, 0], sizes = [16, 16], strides = [1, 1]} : vector<18x16xf32> to vector<16x16xf32>
    %c13_386 = arith.constant 13 : index
    %c6_387 = arith.constant 6 : index
    %718 = memref.load %arg2[%c13_386, %c6_387] : memref<16x9xf32, #tpu.memory_space<smem>>
    %719 = vector.broadcast %718 : f32 to vector<16x16xf32>
    %720 = arith.mulf %717, %719 : vector<16x16xf32>
    %721 = arith.addf %716, %720 : vector<16x16xf32>
    %c0_388 = arith.constant 0 : index
    %c13_389 = arith.constant 13 : index
    %c0_390 = arith.constant 0 : index
    %c1_391 = arith.constant 1 : index
    %722 = vector.load %arg1[%c0_388, %c13_389, %c0_390, %c1_391] : memref<1x16x18x18xbf16, #tpu.memory_space<vmem>>, vector<1x1x18x16xbf16>
    %723 = vector.shape_cast %722 : vector<1x1x18x16xbf16> to vector<18x16xbf16>
    %724 = arith.extf %723 : vector<18x16xbf16> to vector<18x16xf32>
    %725 = vector.extract_strided_slice %724 {offsets = [0, 0], sizes = [16, 16], strides = [1, 1]} : vector<18x16xf32> to vector<16x16xf32>
    %c13_392 = arith.constant 13 : index
    %c1_393 = arith.constant 1 : index
    %726 = memref.load %arg2[%c13_392, %c1_393] : memref<16x9xf32, #tpu.memory_space<smem>>
    %727 = vector.broadcast %726 : f32 to vector<16x16xf32>
    %728 = arith.mulf %725, %727 : vector<16x16xf32>
    %729 = arith.addf %721, %728 : vector<16x16xf32>
    %730 = vector.extract_strided_slice %724 {offsets = [1, 0], sizes = [16, 16], strides = [1, 1]} : vector<18x16xf32> to vector<16x16xf32>
    %c13_394 = arith.constant 13 : index
    %c4_395 = arith.constant 4 : index
    %731 = memref.load %arg2[%c13_394, %c4_395] : memref<16x9xf32, #tpu.memory_space<smem>>
    %732 = vector.broadcast %731 : f32 to vector<16x16xf32>
    %733 = arith.mulf %730, %732 : vector<16x16xf32>
    %734 = arith.addf %729, %733 : vector<16x16xf32>
    %735 = vector.extract_strided_slice %724 {offsets = [2, 0], sizes = [16, 16], strides = [1, 1]} : vector<18x16xf32> to vector<16x16xf32>
    %c13_396 = arith.constant 13 : index
    %c7_397 = arith.constant 7 : index
    %736 = memref.load %arg2[%c13_396, %c7_397] : memref<16x9xf32, #tpu.memory_space<smem>>
    %737 = vector.broadcast %736 : f32 to vector<16x16xf32>
    %738 = arith.mulf %735, %737 : vector<16x16xf32>
    %739 = arith.addf %734, %738 : vector<16x16xf32>
    %c0_398 = arith.constant 0 : index
    %c13_399 = arith.constant 13 : index
    %c0_400 = arith.constant 0 : index
    %c2_401 = arith.constant 2 : index
    %740 = vector.load %arg1[%c0_398, %c13_399, %c0_400, %c2_401] : memref<1x16x18x18xbf16, #tpu.memory_space<vmem>>, vector<1x1x18x16xbf16>
    %741 = vector.shape_cast %740 : vector<1x1x18x16xbf16> to vector<18x16xbf16>
    %742 = arith.extf %741 : vector<18x16xbf16> to vector<18x16xf32>
    %743 = vector.extract_strided_slice %742 {offsets = [0, 0], sizes = [16, 16], strides = [1, 1]} : vector<18x16xf32> to vector<16x16xf32>
    %c13_402 = arith.constant 13 : index
    %c2_403 = arith.constant 2 : index
    %744 = memref.load %arg2[%c13_402, %c2_403] : memref<16x9xf32, #tpu.memory_space<smem>>
    %745 = vector.broadcast %744 : f32 to vector<16x16xf32>
    %746 = arith.mulf %743, %745 : vector<16x16xf32>
    %747 = arith.addf %739, %746 : vector<16x16xf32>
    %748 = vector.extract_strided_slice %742 {offsets = [1, 0], sizes = [16, 16], strides = [1, 1]} : vector<18x16xf32> to vector<16x16xf32>
    %c13_404 = arith.constant 13 : index
    %c5_405 = arith.constant 5 : index
    %749 = memref.load %arg2[%c13_404, %c5_405] : memref<16x9xf32, #tpu.memory_space<smem>>
    %750 = vector.broadcast %749 : f32 to vector<16x16xf32>
    %751 = arith.mulf %748, %750 : vector<16x16xf32>
    %752 = arith.addf %747, %751 : vector<16x16xf32>
    %753 = vector.extract_strided_slice %742 {offsets = [2, 0], sizes = [16, 16], strides = [1, 1]} : vector<18x16xf32> to vector<16x16xf32>
    %c13_406 = arith.constant 13 : index
    %c8_407 = arith.constant 8 : index
    %754 = memref.load %arg2[%c13_406, %c8_407] : memref<16x9xf32, #tpu.memory_space<smem>>
    %755 = vector.broadcast %754 : f32 to vector<16x16xf32>
    %756 = arith.mulf %753, %755 : vector<16x16xf32>
    %757 = arith.addf %752, %756 : vector<16x16xf32>
    %c0_408 = arith.constant 0 : index
    %c14 = arith.constant 14 : index
    %c0_409 = arith.constant 0 : index
    %c0_410 = arith.constant 0 : index
    %758 = vector.load %arg1[%c0_408, %c14, %c0_409, %c0_410] : memref<1x16x18x18xbf16, #tpu.memory_space<vmem>>, vector<1x1x18x16xbf16>
    %759 = vector.shape_cast %758 : vector<1x1x18x16xbf16> to vector<18x16xbf16>
    %760 = arith.extf %759 : vector<18x16xbf16> to vector<18x16xf32>
    %761 = vector.extract_strided_slice %760 {offsets = [0, 0], sizes = [16, 16], strides = [1, 1]} : vector<18x16xf32> to vector<16x16xf32>
    %c14_411 = arith.constant 14 : index
    %c0_412 = arith.constant 0 : index
    %762 = memref.load %arg2[%c14_411, %c0_412] : memref<16x9xf32, #tpu.memory_space<smem>>
    %763 = vector.broadcast %762 : f32 to vector<16x16xf32>
    %764 = arith.mulf %761, %763 : vector<16x16xf32>
    %765 = arith.addf %757, %764 : vector<16x16xf32>
    %766 = vector.extract_strided_slice %760 {offsets = [1, 0], sizes = [16, 16], strides = [1, 1]} : vector<18x16xf32> to vector<16x16xf32>
    %c14_413 = arith.constant 14 : index
    %c3_414 = arith.constant 3 : index
    %767 = memref.load %arg2[%c14_413, %c3_414] : memref<16x9xf32, #tpu.memory_space<smem>>
    %768 = vector.broadcast %767 : f32 to vector<16x16xf32>
    %769 = arith.mulf %766, %768 : vector<16x16xf32>
    %770 = arith.addf %765, %769 : vector<16x16xf32>
    %771 = vector.extract_strided_slice %760 {offsets = [2, 0], sizes = [16, 16], strides = [1, 1]} : vector<18x16xf32> to vector<16x16xf32>
    %c14_415 = arith.constant 14 : index
    %c6_416 = arith.constant 6 : index
    %772 = memref.load %arg2[%c14_415, %c6_416] : memref<16x9xf32, #tpu.memory_space<smem>>
    %773 = vector.broadcast %772 : f32 to vector<16x16xf32>
    %774 = arith.mulf %771, %773 : vector<16x16xf32>
    %775 = arith.addf %770, %774 : vector<16x16xf32>
    %c0_417 = arith.constant 0 : index
    %c14_418 = arith.constant 14 : index
    %c0_419 = arith.constant 0 : index
    %c1_420 = arith.constant 1 : index
    %776 = vector.load %arg1[%c0_417, %c14_418, %c0_419, %c1_420] : memref<1x16x18x18xbf16, #tpu.memory_space<vmem>>, vector<1x1x18x16xbf16>
    %777 = vector.shape_cast %776 : vector<1x1x18x16xbf16> to vector<18x16xbf16>
    %778 = arith.extf %777 : vector<18x16xbf16> to vector<18x16xf32>
    %779 = vector.extract_strided_slice %778 {offsets = [0, 0], sizes = [16, 16], strides = [1, 1]} : vector<18x16xf32> to vector<16x16xf32>
    %c14_421 = arith.constant 14 : index
    %c1_422 = arith.constant 1 : index
    %780 = memref.load %arg2[%c14_421, %c1_422] : memref<16x9xf32, #tpu.memory_space<smem>>
    %781 = vector.broadcast %780 : f32 to vector<16x16xf32>
    %782 = arith.mulf %779, %781 : vector<16x16xf32>
    %783 = arith.addf %775, %782 : vector<16x16xf32>
    %784 = vector.extract_strided_slice %778 {offsets = [1, 0], sizes = [16, 16], strides = [1, 1]} : vector<18x16xf32> to vector<16x16xf32>
    %c14_423 = arith.constant 14 : index
    %c4_424 = arith.constant 4 : index
    %785 = memref.load %arg2[%c14_423, %c4_424] : memref<16x9xf32, #tpu.memory_space<smem>>
    %786 = vector.broadcast %785 : f32 to vector<16x16xf32>
    %787 = arith.mulf %784, %786 : vector<16x16xf32>
    %788 = arith.addf %783, %787 : vector<16x16xf32>
    %789 = vector.extract_strided_slice %778 {offsets = [2, 0], sizes = [16, 16], strides = [1, 1]} : vector<18x16xf32> to vector<16x16xf32>
    %c14_425 = arith.constant 14 : index
    %c7_426 = arith.constant 7 : index
    %790 = memref.load %arg2[%c14_425, %c7_426] : memref<16x9xf32, #tpu.memory_space<smem>>
    %791 = vector.broadcast %790 : f32 to vector<16x16xf32>
    %792 = arith.mulf %789, %791 : vector<16x16xf32>
    %793 = arith.addf %788, %792 : vector<16x16xf32>
    %c0_427 = arith.constant 0 : index
    %c14_428 = arith.constant 14 : index
    %c0_429 = arith.constant 0 : index
    %c2_430 = arith.constant 2 : index
    %794 = vector.load %arg1[%c0_427, %c14_428, %c0_429, %c2_430] : memref<1x16x18x18xbf16, #tpu.memory_space<vmem>>, vector<1x1x18x16xbf16>
    %795 = vector.shape_cast %794 : vector<1x1x18x16xbf16> to vector<18x16xbf16>
    %796 = arith.extf %795 : vector<18x16xbf16> to vector<18x16xf32>
    %797 = vector.extract_strided_slice %796 {offsets = [0, 0], sizes = [16, 16], strides = [1, 1]} : vector<18x16xf32> to vector<16x16xf32>
    %c14_431 = arith.constant 14 : index
    %c2_432 = arith.constant 2 : index
    %798 = memref.load %arg2[%c14_431, %c2_432] : memref<16x9xf32, #tpu.memory_space<smem>>
    %799 = vector.broadcast %798 : f32 to vector<16x16xf32>
    %800 = arith.mulf %797, %799 : vector<16x16xf32>
    %801 = arith.addf %793, %800 : vector<16x16xf32>
    %802 = vector.extract_strided_slice %796 {offsets = [1, 0], sizes = [16, 16], strides = [1, 1]} : vector<18x16xf32> to vector<16x16xf32>
    %c14_433 = arith.constant 14 : index
    %c5_434 = arith.constant 5 : index
    %803 = memref.load %arg2[%c14_433, %c5_434] : memref<16x9xf32, #tpu.memory_space<smem>>
    %804 = vector.broadcast %803 : f32 to vector<16x16xf32>
    %805 = arith.mulf %802, %804 : vector<16x16xf32>
    %806 = arith.addf %801, %805 : vector<16x16xf32>
    %807 = vector.extract_strided_slice %796 {offsets = [2, 0], sizes = [16, 16], strides = [1, 1]} : vector<18x16xf32> to vector<16x16xf32>
    %c14_435 = arith.constant 14 : index
    %c8_436 = arith.constant 8 : index
    %808 = memref.load %arg2[%c14_435, %c8_436] : memref<16x9xf32, #tpu.memory_space<smem>>
    %809 = vector.broadcast %808 : f32 to vector<16x16xf32>
    %810 = arith.mulf %807, %809 : vector<16x16xf32>
    %811 = arith.addf %806, %810 : vector<16x16xf32>
    %c0_437 = arith.constant 0 : index
    %c15 = arith.constant 15 : index
    %c0_438 = arith.constant 0 : index
    %c0_439 = arith.constant 0 : index
    %812 = vector.load %arg1[%c0_437, %c15, %c0_438, %c0_439] : memref<1x16x18x18xbf16, #tpu.memory_space<vmem>>, vector<1x1x18x16xbf16>
    %813 = vector.shape_cast %812 : vector<1x1x18x16xbf16> to vector<18x16xbf16>
    %814 = arith.extf %813 : vector<18x16xbf16> to vector<18x16xf32>
    %815 = vector.extract_strided_slice %814 {offsets = [0, 0], sizes = [16, 16], strides = [1, 1]} : vector<18x16xf32> to vector<16x16xf32>
    %c15_440 = arith.constant 15 : index
    %c0_441 = arith.constant 0 : index
    %816 = memref.load %arg2[%c15_440, %c0_441] : memref<16x9xf32, #tpu.memory_space<smem>>
    %817 = vector.broadcast %816 : f32 to vector<16x16xf32>
    %818 = arith.mulf %815, %817 : vector<16x16xf32>
    %819 = arith.addf %811, %818 : vector<16x16xf32>
    %820 = vector.extract_strided_slice %814 {offsets = [1, 0], sizes = [16, 16], strides = [1, 1]} : vector<18x16xf32> to vector<16x16xf32>
    %c15_442 = arith.constant 15 : index
    %c3_443 = arith.constant 3 : index
    %821 = memref.load %arg2[%c15_442, %c3_443] : memref<16x9xf32, #tpu.memory_space<smem>>
    %822 = vector.broadcast %821 : f32 to vector<16x16xf32>
    %823 = arith.mulf %820, %822 : vector<16x16xf32>
    %824 = arith.addf %819, %823 : vector<16x16xf32>
    %825 = vector.extract_strided_slice %814 {offsets = [2, 0], sizes = [16, 16], strides = [1, 1]} : vector<18x16xf32> to vector<16x16xf32>
    %c15_444 = arith.constant 15 : index
    %c6_445 = arith.constant 6 : index
    %826 = memref.load %arg2[%c15_444, %c6_445] : memref<16x9xf32, #tpu.memory_space<smem>>
    %827 = vector.broadcast %826 : f32 to vector<16x16xf32>
    %828 = arith.mulf %825, %827 : vector<16x16xf32>
    %829 = arith.addf %824, %828 : vector<16x16xf32>
    %c0_446 = arith.constant 0 : index
    %c15_447 = arith.constant 15 : index
    %c0_448 = arith.constant 0 : index
    %c1_449 = arith.constant 1 : index
    %830 = vector.load %arg1[%c0_446, %c15_447, %c0_448, %c1_449] : memref<1x16x18x18xbf16, #tpu.memory_space<vmem>>, vector<1x1x18x16xbf16>
    %831 = vector.shape_cast %830 : vector<1x1x18x16xbf16> to vector<18x16xbf16>
    %832 = arith.extf %831 : vector<18x16xbf16> to vector<18x16xf32>
    %833 = vector.extract_strided_slice %832 {offsets = [0, 0], sizes = [16, 16], strides = [1, 1]} : vector<18x16xf32> to vector<16x16xf32>
    %c15_450 = arith.constant 15 : index
    %c1_451 = arith.constant 1 : index
    %834 = memref.load %arg2[%c15_450, %c1_451] : memref<16x9xf32, #tpu.memory_space<smem>>
    %835 = vector.broadcast %834 : f32 to vector<16x16xf32>
    %836 = arith.mulf %833, %835 : vector<16x16xf32>
    %837 = arith.addf %829, %836 : vector<16x16xf32>
    %838 = vector.extract_strided_slice %832 {offsets = [1, 0], sizes = [16, 16], strides = [1, 1]} : vector<18x16xf32> to vector<16x16xf32>
    %c15_452 = arith.constant 15 : index
    %c4_453 = arith.constant 4 : index
    %839 = memref.load %arg2[%c15_452, %c4_453] : memref<16x9xf32, #tpu.memory_space<smem>>
    %840 = vector.broadcast %839 : f32 to vector<16x16xf32>
    %841 = arith.mulf %838, %840 : vector<16x16xf32>
    %842 = arith.addf %837, %841 : vector<16x16xf32>
    %843 = vector.extract_strided_slice %832 {offsets = [2, 0], sizes = [16, 16], strides = [1, 1]} : vector<18x16xf32> to vector<16x16xf32>
    %c15_454 = arith.constant 15 : index
    %c7_455 = arith.constant 7 : index
    %844 = memref.load %arg2[%c15_454, %c7_455] : memref<16x9xf32, #tpu.memory_space<smem>>
    %845 = vector.broadcast %844 : f32 to vector<16x16xf32>
    %846 = arith.mulf %843, %845 : vector<16x16xf32>
    %847 = arith.addf %842, %846 : vector<16x16xf32>
    %c0_456 = arith.constant 0 : index
    %c15_457 = arith.constant 15 : index
    %c0_458 = arith.constant 0 : index
    %c2_459 = arith.constant 2 : index
    %848 = vector.load %arg1[%c0_456, %c15_457, %c0_458, %c2_459] : memref<1x16x18x18xbf16, #tpu.memory_space<vmem>>, vector<1x1x18x16xbf16>
    %849 = vector.shape_cast %848 : vector<1x1x18x16xbf16> to vector<18x16xbf16>
    %850 = arith.extf %849 : vector<18x16xbf16> to vector<18x16xf32>
    %851 = vector.extract_strided_slice %850 {offsets = [0, 0], sizes = [16, 16], strides = [1, 1]} : vector<18x16xf32> to vector<16x16xf32>
    %c15_460 = arith.constant 15 : index
    %c2_461 = arith.constant 2 : index
    %852 = memref.load %arg2[%c15_460, %c2_461] : memref<16x9xf32, #tpu.memory_space<smem>>
    %853 = vector.broadcast %852 : f32 to vector<16x16xf32>
    %854 = arith.mulf %851, %853 : vector<16x16xf32>
    %855 = arith.addf %847, %854 : vector<16x16xf32>
    %856 = vector.extract_strided_slice %850 {offsets = [1, 0], sizes = [16, 16], strides = [1, 1]} : vector<18x16xf32> to vector<16x16xf32>
    %c15_462 = arith.constant 15 : index
    %c5_463 = arith.constant 5 : index
    %857 = memref.load %arg2[%c15_462, %c5_463] : memref<16x9xf32, #tpu.memory_space<smem>>
    %858 = vector.broadcast %857 : f32 to vector<16x16xf32>
    %859 = arith.mulf %856, %858 : vector<16x16xf32>
    %860 = arith.addf %855, %859 : vector<16x16xf32>
    %861 = vector.extract_strided_slice %850 {offsets = [2, 0], sizes = [16, 16], strides = [1, 1]} : vector<18x16xf32> to vector<16x16xf32>
    %c15_464 = arith.constant 15 : index
    %c8_465 = arith.constant 8 : index
    %862 = memref.load %arg2[%c15_464, %c8_465] : memref<16x9xf32, #tpu.memory_space<smem>>
    %863 = vector.broadcast %862 : f32 to vector<16x16xf32>
    %864 = arith.mulf %861, %863 : vector<16x16xf32>
    %865 = arith.addf %860, %864 : vector<16x16xf32>
    %866 = vector.broadcast %0 : f32 to vector<16x16xf32>
    %867 = arith.addf %865, %866 : vector<16x16xf32>
    %c0_466 = arith.constant 0 : index
    %c0_467 = arith.constant 0 : index
    %c0_468 = arith.constant 0 : index
    %868 = vector.load %arg4[%c0_466, %c0_467, %c0_468] : memref<1x16x16xf32, #tpu.memory_space<vmem>>, vector<1x16x16xf32>
    %869 = vector.shape_cast %868 : vector<1x16x16xf32> to vector<16x16xf32>
    %870 = vector.shape_cast %867 : vector<16x16xf32> to vector<1x16x16xf32>
    tpu.vector_store %arg4[%c0_466, %c0_467, %c0_468], %870 {strides = array<i32>} : memref<1x16x16xf32, #tpu.memory_space<vmem>>, vector<1x16x16xf32>,
    return
  }
  func.func @transform_0(%arg0: i32) -> (i32, i32, i32, i32) {
    %c0_i32 = arith.constant 0 : i32
    %c0_i32_0 = arith.constant 0 : i32
    %c0_i32_1 = arith.constant 0 : i32
    %c0_i32_2 = arith.constant 0 : i32
    return %arg0, %c0_i32, %c0_i32_0, %c0_i32_1 : i32, i32, i32, i32
  }
  func.func @transform_1(%arg0: i32) -> (i32, i32) {
    %c0_i32 = arith.constant 0 : i32
    %c0_i32_0 = arith.constant 0 : i32
    %c0_i32_1 = arith.constant 0 : i32
    return %c0_i32, %c0_i32_0 : i32, i32
  }
  func.func @transform_2(%arg0: i32) -> (i32, i32) {
    %c0_i32 = arith.constant 0 : i32
    %c0_i32_0 = arith.constant 0 : i32
    %c0_i32_1 = arith.constant 0 : i32
    return %c0_i32, %c0_i32_0 : i32, i32
  }
  func.func @transform_3(%arg0: i32) -> (i32, i32, i32) {
    %c0_i32 = arith.constant 0 : i32
    %c0_i32_0 = arith.constant 0 : i32
    %c0_i32_1 = arith.constant 0 : i32
    return %arg0, %c0_i32, %c0_i32_0 : i32, i32, i32
  }
}

</mosaic_0001>

<bundles_post_ra>
// kernel: rise_mamba_forward.18
= control target key start
LH: loop header
LB: loop body
LE: loop exit
PB: predicated region body
PF: predicated region fallthrough
CT: control target
= control target key end

     0   :  { %s466_s15 = smov 0   ;;  %s495_s0 = inlined_call_operand.vmem [shape: bf16[2,1,16,32], index: 0, kind: input, shape index: {}]   ;;  %s496_s1 = inlined_call_operand.vmem [shape: bf16[32,32], index: 1, kind: input, shape index: {}]   ;;  %s497_s2 = inlined_call_operand.vmem [shape: f32[1,32], index: 2, kind: input, shape index: {}]   ;;  %s498_s3 = inlined_call_operand.vmem [shape: bf16[2,16,32], index: 3, kind: input, shape index: {}]   ;;  %s499_s4 = inlined_call_operand.vmem [shape: bf16[2,1,16,32], index: 4, kind: output, shape index: {}]  }
   0x1 LB: > { %s378_s16 = sadd.s32 4294967295, %s437_s15   ;;  %p382_p0 = scmp.ge.s32.totalorder %s437_s15, 1  ;;  %s437_s15 = sphi %s466_s15, %s14_s15  }
   0x2   : > { %p172_p1 = scmp.lt.s32.totalorder %s437_s15, 3 }
   0x4   : > { %p173_p2 = pnand %p382_p0, %p172_p1 }
   0x5   : > { %v428_v0 = vld [vmem:[%s496_s1] sm:$0xff] (!%p173_p2)   ;;  %v439_v1 = vmov (!%p173_p2), 0.0   ;;  %v429_v2 = vld [vmem:[%s496_s1 + $0x8] sm:$0xff] (!%p173_p2)   ;;  %vm440_vm0 = vmmov (!%p173_p2), 0   ;;  %p203_p3 = scmp.lt.s32.totalorder (!%p173_p2), %s378_s16, 1  ;;  %vm249_vm1 = vcmask (!%p173_p2), 261120  }
   0x6   : > { %176 = sbr.rel (%p173_p2) target bundleno = 238 (0xee), region = 36  ;;  %410 = vmatprep.subr.bf16.mxu0 (!%p173_p2), %v439_v1  ;;  %414 = vmatprep.mubr.msk.bf16.mxu0 (!%p173_p2), %vm440_vm0, %v439_v1  ;;  %v389_v5 = vld [vmem:[%s497_s2] ss:$0 sm:$0xff] (!%p173_p2)  ;;  %vm308_vm2 = vcmask (!%p173_p2), 257024  }
   0x7   : > { %411 = vmatpush3.bf16.msra.mxu0 (!%p173_p2), %v428_v0 }
   0x8   : > { %412 = vmatprep.subr.bf16.mxu0 (!%p173_p2), %v439_v1 }
   0xb   : > { %413 = vmatpush3.bf16.msra.mxu0 (!%p173_p2), %v429_v2 }
   0xd   : > { %s501_s16 = smov (!%p203_p3, %s378_s16), 1 }
   0xe   : > { %s398_s21 = sshll.u32 %s501_s16, 3 }
   0xf   : > { %s207_s24 = scalar_lea.vmem %s495_s0, %s398_s21  ;;  %s212_s27 = scalar_lea.vmem %s498_s3, %s398_s21 }
  0x10   : > { %v430_v3 = vld [vmem:[%s207_s24] sm:$0xff]   ;;  %s217_s6 = scalar_lea.vmem %s499_s4, %s398_s21 }
  0x11   : > { %415 = vmatmul.mubr.msk.bf16.vlgmr.msra.gmra.mrb[0].mxu0 %vm249_vm1, %v430_v3  ;;  %v404_v4 = vld [vmem:[%s212_s27] sm:$0xff]  }
  0x12   : > { %v405_v6 = vunpack.c.l.bf16 %v404_v4  ;;  %v406_v10 = vunpack.c.h.bf16 %v404_v4 }
  0xe4   : > { %v287_v7 = vpop.f32.mrb[0].mxu0 }
  0xe5   : > { %v288_v8 = vadd.f32 %v389_v5, %v287_v7  ;;  %v416_v9 = vpop.f32.mrb[1].mxu0 }
  0xe6   : > { %v290_v11 = vpop.f32.mrb[2].mxu0 }
  0xe7   : > { %v298_v12 = vadd.f32 %v405_v6, %v288_v8  ;;  %v291_v13 = vadd.f32 %v389_v5, %v290_v11  ;;  %v417_v14 = vpop.f32.mrb[3].mxu0 }
  0xe9   : > { %v401_v15 = vpack.c.bf16 %v298_v12, %v298_v12  ;;  %v299_v16 = vadd.f32 %v406_v10, %v291_v13 }
  0xeb   : > { %309 = vst.msk [vmem:[%s217_s6] sm:$0xf] %vm308_vm2, %v401_v15  ;;  %v402_v17 = vpack.c.bf16 %v299_v16, %v299_v16 }
  0xed   : > { %310 = vst.msk [vmem:[%s217_s6 + $0x4] sm:$0xf] %vm308_vm2, %v402_v17 }
  0xee PF: > { %s14_s15 = sadd.s32 1, %s437_s15  }
  0xef   : > { %p11_p4 = scmp.ge.s32.totalorder %s14_s15, 4  }
  0xf1   :  { %13 = sbr.rel (!%p11_p4) target bundleno = 1 (0x1), region = 69 }

// kernel: rise_mamba_forward.15
= control target key start
LH: loop header
LB: loop body
LE: loop exit
PB: predicated region body
PF: predicated region fallthrough
CT: control target
= control target key end

     0   :  { %s376_s12 = smov 0   ;;  %s399_s0 = inlined_call_operand.vmem [shape: bf16[2,1,16,16], index: 0, kind: input, shape index: {}]   ;;  %s400_s1 = inlined_call_operand.vmem [shape: bf16[16,32], index: 1, kind: input, shape index: {}]   ;;  %s401_s2 = inlined_call_operand.vmem [shape: f32[1,32], index: 2, kind: input, shape index: {}]   ;;  %s402_s3 = inlined_call_operand.vmem [shape: bf16[2,1,16,32], index: 3, kind: output, shape index: {}]  }
   0x1 LB: > { %s305_s13 = sadd.s32 4294967295, %s352_s12   ;;  %p309_p0 = scmp.ge.s32.totalorder %s352_s12, 1  ;;  %s352_s12 = sphi %s376_s12, %s13_s12  }
   0x2   : > { %p137_p1 = scmp.lt.s32.totalorder %s352_s12, 3 }
   0x4   : > { %p138_p2 = pnand %p309_p0, %p137_p1 }
   0x5   : > { %v344_v0 = vld [vmem:[%s400_s1] sm:$0xff] (!%p138_p2)   ;;  %v354_v1 = vmov (!%p138_p2), 0.0   ;;  %p161_p3 = scmp.lt.s32.totalorder (!%p138_p2), %s305_s13, 1  ;;  %vm355_vm0 = vmmov (!%p138_p2), 0   ;;  %vm194_vm1 = vcmask (!%p138_p2), 130048   ;;  %vm247_vm2 = vcmask (!%p138_p2), 257024  }
   0x6   : > { %141 = sbr.rel (%p138_p2) target bundleno = 236 (0xec), region = 32  ;;  %328 = vmatprep.subr.bf16.mxu0 (!%p138_p2), %v354_v1  ;;  %330 = vmatprep.mubr.msk.bf16.mxu0 (!%p138_p2), %vm355_vm0, %v354_v1  ;;  %v314_v3 = vld [vmem:[%s401_s2] ss:$0 sm:$0xff] (!%p138_p2) }
   0x7   : > { %329 = vmatpush3.bf16.msra.mxu0 (!%p138_p2), %v344_v0 }
   0xd   : > { %s404_s13 = smov (!%p161_p3, %s305_s13), 1 }
   0xe   : > { %s322_s16 = sshll.u32 %s404_s13, 3 }
   0xf   : > { %s165_s19 = scalar_lea.vmem %s399_s0, %s322_s16  ;;  %s170_s24 = scalar_lea.vmem %s402_s3, %s322_s16 }
  0x10   : > { %v345_v2 = vld [vmem:[%s165_s19] sm:$0xff]  }
  0x11   : > { %331 = vmatmul.mubr.msk.bf16.vlgmr.msra.gmra.mrb[0].mxu0 %vm194_vm1, %v345_v2 }
  0xe4   : > { %v232_v4 = vpop.f32.mrb[0].mxu0 }
  0xe5   : > { %v233_v5 = vadd.f32 %v314_v3, %v232_v4  ;;  %v332_v6 = vpop.f32.mrb[1].mxu0 }
  0xe6   : > { %v235_v7 = vpop.f32.mrb[2].mxu0 }
  0xe7   : > { %v324_v8 = vpack.c.bf16 %v233_v5, %v233_v5  ;;  %v236_v9 = vadd.f32 %v314_v3, %v235_v7  ;;  %v333_v10 = vpop.f32.mrb[3].mxu0 }
  0xe9   : > { %248 = vst.msk [vmem:[%s170_s24] sm:$0xf] %vm247_vm2, %v324_v8  ;;  %v325_v11 = vpack.c.bf16 %v236_v9, %v236_v9 }
  0xeb   : > { %249 = vst.msk [vmem:[%s170_s24 + $0x4] sm:$0xf] %vm247_vm2, %v325_v11 }
  0xec PF: > { %s13_s12 = sadd.s32 1, %s352_s12  }
  0xed   : > { %p10_p4 = scmp.ge.s32.totalorder %s13_s12, 4  }
  0xef   :  { %12 = sbr.rel (!%p10_p4) target bundleno = 1 (0x1), region = 62 }

// kernel: rise_mamba_forward.16
= control target key start
LH: loop header
LB: loop body
LE: loop exit
PB: predicated region body
PF: predicated region fallthrough
CT: control target
= control target key end

     0   :  { %s970_s12 = smov 0   ;;  %s1149_s0 = inlined_call_operand.vmem [shape: bf16[2,1,42,32], index: 0, kind: input, shape index: {}]   ;;  %s1150_s1 = inlined_call_operand.vmem [shape: bf16[288,32], index: 1, kind: input, shape index: {}]   ;;  %s1151_s2 = inlined_call_operand.vmem [shape: f32[1,32], index: 2, kind: input, shape index: {}]   ;;  %s1152_s3 = inlined_call_operand.vmem [shape: bf16[2,1,24,32], index: 3, kind: output, shape index: {}]  }
   0x1 LB: > { %s763_s13 = sadd.s32 4294967295, %s946_s12   ;;  %p767_p0 = scmp.ge.s32.totalorder %s946_s12, 1  ;;  %s946_s12 = sphi %s970_s12, %s13_s12  }
   0x2   : > { %p137_p1 = scmp.lt.s32.totalorder %s946_s12, 3 }
   0x4   : > { %p138_p2 = pnand %p767_p0, %p137_p1 }
   0x5   : > { %p161_p3 = scmp.lt.s32.totalorder (!%p138_p2), %s763_s13, 1  ;;  %v913_v0 = vld [vmem:[%s1150_s1 + $0x30] sm:$0xff] (!%p138_p2)   ;;  %v914_v1 = vld [vmem:[%s1150_s1 + $0x38] sm:$0xff] (!%p138_p2)   ;;  %v915_v2 = vld [vmem:[%s1150_s1 + $0x40] sm:$0xff] (!%p138_p2)   ;;  %vm225_vm0 = vsmask.f32 (!%p138_p2), 7424 }
   0x6   : > { %141 = sbr.rel (%p138_p2) target bundleno = 421 (0x1a5), region = 32  ;;  %843 = vmatprep.subr.bf16.mxu0 (!%p138_p2), %v913_v0  ;;  %v917_v3 = vld [vmem:[%s1150_s1] sm:$0xff] (!%p138_p2)   ;;  %vm300_vm1 = vcmask (!%p138_p2), 1042432   ;;  %v916_v17 = vld [vmem:[%s1150_s1 + $0x48] sm:$0xff] (!%p138_p2)   ;;  %s948_s30 = smov (!%p138_p2), 64   ;;  %v918_v32 = vld [vmem:[%s1150_s1 + $0x50] sm:$0xff] (!%p138_p2)  }
   0x7   : > { %844 = vmatpush3.bf16.msra.mxu0 (!%p138_p2), %v913_v0  ;;  %859 = vmatprep.subr.bf16.mxu1 (!%p138_p2), %v917_v3  ;;  %v919_v23 = vld [vmem:[%s1150_s1 + $0x8] sm:$0xff] (!%p138_p2)   ;;  %vm248_vm2 = vcmask (!%p138_p2), 1046528   ;;  %v921_v44 = vld [vmem:[%s1150_s1 + $0x58] sm:$0xff] (!%p138_p2)   ;;  %v922_v45 = vld [vmem:[%s1150_s1 + $0x10] sm:$0xff] (!%p138_p2)   ;;  %s949_s10 = smov (!%p138_p2), 32   ;;  %vm256_vm3 = vcmask (!%p138_p2), 261120  }
   0x8   : > { %845 = vmatprep.subr.bf16.mxu0 (!%p138_p2), %v914_v1  ;;  %860 = vmatpush3.bf16.msra.mxu1 (!%p138_p2), %v917_v3  ;;  %v925_v54 = vld [vmem:[%s1150_s1 + $0x18] sm:$0xff] (!%p138_p2)   ;;  %v924_v61 = vld [vmem:[%s1150_s1 + $0x60] sm:$0xff] (!%p138_p2)   ;;  %v930_v3 = vld [vmem:[%s1150_s1 + $0x28] sm:$0xff] (!%p138_p2)   ;;  %vm262_vm4 = vcmask (!%p138_p2), 523264   ;;  %vm319_vm5 = vcmask (!%p138_p2), 1044480   ;;  %vm359_vm6 = vcmask (!%p138_p2), 785408  }
   0x9   : > { %861 = vmatprep.subr.bf16.mxu1 (!%p138_p2), %v919_v23  ;;  %v927_v0 = vld [vmem:[%s1150_s1 + $0x20] sm:$0xff] (!%p138_p2)   ;;  %vm561_vm7 = vcmask (!%p138_p2), 1045504   ;;  %vm704_vm8 = vcmask (!%p138_p2), 257024  }
   0xb   : > { %846 = vmatpush3.bf16.msra.mxu0 (!%p138_p2), %v914_v1 }
   0xc   : > { %847 = vmatprep.subr.bf16.mxu0 (!%p138_p2), %v915_v2  ;;  %862 = vmatpush3.bf16.msra.mxu1 (!%p138_p2), %v919_v23 }
   0xd   : > { %s1154_s13 = smov (!%p161_p3, %s763_s13), 1  ;;  %863 = vmatprep.subr.bf16.mxu1 %v922_v45 }
   0xe   : > { %s891_s18 = smul.u32 24, %s1154_s13 }
   0xf   : > { %848 = vmatpush3.bf16.msra.mxu0 %v915_v2  ;;  %s892_s6 = smul.u32 12, %s1154_s13 }
  0x10   : > { %s996_s25 = scalar_lea.vmem %s1149_s0, %s891_s18  ;;  %849 = vmatprep.subr.bf16.mxu0 %v916_v17  ;;  %864 = vmatpush3.bf16.msra.mxu1 %v922_v45 }
  0x11   : > { %v999_v4 = vld [vmem:[%s996_s25 + $0x4] sm:$0xf]  ;;  %v1002_v5 = vld [vmem:[%s996_s25 + $0x8] sm:$0xf]  ;;  %v267_v6 = vld [vmem:[%s996_s25] sm:$0x8]  ;;  %865 = vmatprep.subr.bf16.mxu1 %v925_v54  ;;  %s170_s9 = scalar_lea.vmem %s1152_s3, %s892_s6 }
  0x12   : > { %v269_v7 = vld [vmem:[%s996_s25 + $0xc] sm:$0xf]  ;;  %v1007_v8 = vcombine.low %v267_v6, %v999_v4  ;;  %v777_v9 = vcombine.low %v999_v4, %v1002_v5  ;;  %v506_v11 = vld [vmem:[%s996_s25 + $0x10] sm:$0x7]  ;;  %v502_v15 = vld [vmem:[%s996_s25 + $0x4] sm:$0xc] }
  0x13   : > { %v1012_v10 = vld [vmem:[%s996_s25 + $0xc] sm:$0xf]  ;;  %v776_v12 = vcombine.low %v1002_v5, %v269_v7  ;;  %v778_v13 = vcombine.low %v269_v7, %v269_v7  ;;  %v503_v16 = vld [vmem:[%s996_s25 + $0x8] sm:$0xf]  ;;  %v507_v22 = vld [vmem:[%s996_s25 + $0x4] sm:$0x8]  ;;  %850 = vmatpush3.bf16.msra.mxu0 %v916_v17 }
  0x14   : > { %v1017_v14 = vcombine.low %v1012_v10, %v506_v11  ;;  %v280_v18 = vshrl.u32 %v1007_v8, 16  ;;  %v282_v19 = vshll.u32 %v1007_v8, 16  ;;  %v301_v20 = vrot.slane %v777_v9, 5  ;;  %v209_v26 = vld [vmem:[%s996_s25] sm:$0xf]  ;;  %851 = vmatprep.subr.bf16.mxu0 %v918_v32  ;;  %866 = vmatpush3.bf16.msra.mxu1 %v925_v54 }
  0x15   : > { %v1026_v21 = vcombine.low %v502_v15, %v503_v16  ;;  %v287_v24 = vshll.u32 %v776_v12, 16  ;;  %v302_v25 = vrot.slane %v778_v13, 5  ;;  %v212_v27 = vld [vmem:[%s996_s25 + $0xc] sm:$0x1]  ;;  %v291_v29 = vshrl.u32 %v776_v12, 16  ;;  %867 = vmatprep.subr.bf16.mxu1 %v927_v0 }
  0x16   : > { %v284_v28 = vrot.slane %v282_v19, 1  ;;  %304 = vrot.lane.b32.xlu1 %v301_v20, %s948_s30  ;;  %v529_v30 = vshll.u32 %v1017_v14, 16  ;;  %v533_v31 = vshrl.u32 %v1017_v14, 16  ;;  %v798_v36 = vcombine.low %v507_v22, %v503_v16  ;;  %v1049_v41 = vld [vmem:[%s996_s25 + $0xc] sm:$0x7] }
  0x17   : > { %v289_v33 = vrot.slane %v287_v24, 1  ;;  %v303_v34 = vsel %vm300_vm1, %v301_v20, %v302_v25  ;;  %v524_v35 = vshll.u32 %v1026_v21, 16  ;;  %v1043_v39 = vcombine.low %v209_v26, %v999_v4  ;;  %v1062_v49 = vld [vmem:[%s996_s25 + $0x10] sm:$0x3]  ;;  %852 = vmatpush3.bf16.msra.mxu0 %v918_v32  ;;  %v213_v1 = vld [vmem:[%s996_s25] sm:$0xe] }
  0x18   : > { %v285_v37 = vor.u32 %v284_v28, %v280_v18  ;;  %v531_v38 = vrot.slane %v529_v30, 1  ;;  %v1046_v40 = vcombine.low %v1002_v5, %v212_v27  ;;  %v543_v47 = vrot.slane %v798_v36, 1  ;;  %853 = vmatprep.subr.bf16.mxu0 %v921_v44  ;;  %868 = vmatpush3.bf16.msra.mxu1 %v927_v0 }
  0x19   : > { %v293_v46 = vor.u32 %v291_v29, %v289_v33  ;;  %v522_v50 = vshrl.u32 %v1026_v21, 16  ;;  %v526_v51 = vrot.slane %v524_v35, 1  ;;  %v229_v52 = vshll.u32 %v1043_v39, 16  ;;  %869 = vmatprep.subr.bf16.mxu1 %v930_v3  ;;  %v929_v35 = vld [vmem:[%s1150_s1 + $0x70] sm:$0xff]  }
  0x1a   : > { %v290_v42 = vsel %vm225_vm0, %v285_v37, %v289_v33  ;;  %306 = vrot.lane.b32.xlu1 %v303_v34, %s948_s30  ;;  %v535_v43 = vor.u32 %v533_v31, %v531_v38  ;;  %v234_v48 = vshll.u32 %v1046_v40, 16  ;;  %v775_v53 = vcombine.low %v1002_v5, %v1049_v41 }
  0x1b   : > { %294 = vrot.lane.b32.xlu0 %v290_v42, %s949_s10  ;;  %v544_v55 = vrot.slane %v1017_v14, 1  ;;  %v796_v56 = vcombine.low %v1012_v10, %v1062_v49  ;;  %v238_v58 = vshrl.u32 %v1046_v40, 16  ;;  %v227_v60 = vshrl.u32 %v1043_v39, 16  ;;  %854 = vmatpush3.bf16.msra.mxu0 %v921_v44 }
  0x1c   : > { %v236_v57 = vrot.slane %v234_v48, 1  ;;  %v527_v62 = vor.u32 %v526_v51, %v522_v50  ;;  %v231_v63 = vrot.slane %v229_v52, 1  ;;  %875 = vmatprep.subr.bf16.mxu0 %v924_v61  ;;  %v773_v9 = vcombine.low %v213_v1, %v999_v4  ;;  %870 = vmatpush3.bf16.msra.mxu1 %v930_v3 }
  0x1d   : > { %v545_v59 = vsel %vm248_vm2, %v543_v47, %v544_v55  ;;  %v250_v12 = vrot.slane %v1046_v40, 1  ;;  %v771_v34 = vcombine.low %v1002_v5, %v1002_v5 }
  0x1e   : > { %538 = vrot.lane.b32.xlu1 %v535_v43, %s949_s10  ;;  %v240_v2 = vor.u32 %v238_v58, %v236_v57  ;;  %v532_v6 = vsel %vm225_vm0, %v527_v62, %v531_v38  ;;  %v232_v7 = vor.u32 %v231_v63, %v227_v60  ;;  %v249_v11 = vrot.slane %v773_v9, 1  ;;  %v807_v58 = vld [vmem:[%s1151_s2] ss:$0 sm:$0xff] }
  0x1f   : > { %296 = vrot.lane.b32.xlu0 %v293_v46, %s949_s10  ;;  %v932_v46 = vld [vmem:[%s1150_s1 + $0x80] sm:$0xff]  }
  0x20   : > { %v237_v10 = vsel %vm225_vm0, %v232_v7, %v236_v57  ;;  %v251_v13 = vsel %vm248_vm2, %v249_v11, %v250_v12 }
  0x22   : > { %546 = vrot.lane.b32.xlu1 %v545_v59, %s948_s30 }
  0x23   : > { %548 = vrot.lane.b32.xlu0 %v544_v55, %s948_s30 }
  0x26   : > { %243 = vrot.lane.b32.xlu1 %v240_v2, %s949_s10 }
  0x27   : > { %536 = vrot.lane.b32.xlu0 %v532_v6, %s949_s10 }
  0x2a   : > { %254 = vrot.lane.b32.xlu1 %v250_v12, %s948_s30 }
  0x2b   : > { %241 = vrot.lane.b32.xlu0 %v237_v10, %s949_s10 }
  0x2f   : > { %252 = vrot.lane.b32.xlu0 %v251_v13, %s948_s30 }
  0x88   : > { %v305_v4 = vpop.permute.xlu1 %304 }
  0x8c   : > { %v307_v14 = vpop.permute.xlu1 %306 }
  0x8d   : > { %v295_v15 = vpop.permute.xlu0 %294 }
  0x8e   : > { %v309_v16 = vsel %vm256_vm3, %v1007_v8, %v295_v15  ;;  %v926_v8 = vld [vmem:[%s1150_s1 + $0x68] sm:$0xff]  }
  0x8f   : > { %v314_v18 = vsel %vm262_vm4, %v309_v16, %v305_v4 }
  0x90   : > { %v539_v17 = vpop.permute.xlu1 %538  ;;  %v320_v23 = vrot.slane %v314_v18, 3 }
  0x91   : > { %v297_v19 = vpop.permute.xlu0 %296  ;;  %v554_v25 = vsel %vm256_vm3, %v796_v56, %v539_v17 }
  0x92   : > { %v312_v20 = vsel %vm256_vm3, %v775_v53, %v297_v19 }
  0x93   : > { %v316_v22 = vsel %vm262_vm4, %v312_v20, %v307_v14 }
  0x94   : > { %v321_v24 = vrot.slane %v316_v22, 3  ;;  %v547_v26 = vpop.permute.xlu1 %546 }
  0x95   : > { %v549_v27 = vpop.permute.xlu0 %548 }
  0x96   : > { %v322_v28 = vsel %vm319_vm5, %v320_v23, %v321_v24  ;;  %v558_v29 = vsel %vm262_vm4, %v554_v25, %v549_v27 }
  0x97   : > { %855 = vmatprep.mubr.msk.bf16.mxu0 %vm359_vm6, %v322_v28  ;;  %v563_v32 = vrot.slane %v558_v29, 2 }
  0x98   : > { %856 = vmatmul.mubr.msk.bf16.vlgmr.msra.gmra.mrb[0].mxu0 %vm359_vm6, %v321_v24  ;;  %v244_v30 = vpop.permute.xlu1 %243 }
  0x99   : > { %876 = vmatpush3.bf16.msra.mxu0 %v924_v61  ;;  %v537_v31 = vpop.permute.xlu0 %536  ;;  %v261_v40 = vsel %vm256_vm3, %v771_v34, %v244_v30 }
  0x9a   : > { %v551_v33 = vsel %vm256_vm3, %v1026_v21, %v537_v31  ;;  %877 = vmatprep.subr.bf16.mxu0 %v926_v8  ;;  %v931_v21 = vld [vmem:[%s1150_s1 + $0x78] sm:$0xff]  }
  0x9b   : > { %v556_v36 = vsel %vm262_vm4, %v551_v33, %v547_v26 }
  0x9c   : > { %v562_v37 = vrot.slane %v556_v36, 2  ;;  %v255_v41 = vpop.permute.xlu1 %254 }
  0x9d   : > { %878 = vmatpush3.bf16.msra.mxu0 %v926_v8  ;;  %v242_v38 = vpop.permute.xlu0 %241  ;;  %v266_v44 = vsel %vm262_vm4, %v261_v40, %v255_v41 }
  0x9e   : > { %879 = vmatprep.subr.bf16.mxu0 %v929_v35  ;;  %v564_v42 = vsel %vm561_vm7, %v562_v37, %v563_v32  ;;  %v258_v5 = vsel %vm256_vm3, %v1043_v39, %v242_v38  ;;  %v933_v39 = vld [vmem:[%s1150_s1 + $0x88] sm:$0xff]  }
  0x9f   : > { %887 = vmatprep.mubr.msk.bf16.mxu0 %vm359_vm6, %v564_v42 }
  0xa1   : > { %880 = vmatpush3.bf16.msra.mxu0 %v929_v35  ;;  %v253_v43 = vpop.permute.xlu0 %252 }
  0xa2   : > { %v264_v45 = vsel %vm262_vm4, %v258_v5, %v253_v43  ;;  %881 = vmatprep.subr.bf16.mxu0 %v931_v21 }
  0xa3   : > { %871 = vmatprep.mubr.msk.bf16.mxu1 %vm359_vm6, %v264_v45 }
  0xa4   : > { %872 = vmatmul.mubr.msk.bf16.vlgmr.msra.gmra.mrb[0].mxu1 %vm359_vm6, %v266_v44 }
  0xa5   : > { %882 = vmatpush3.bf16.msra.mxu0 %v931_v21 }
  0xa6   : > { %883 = vmatprep.subr.bf16.mxu0 %v932_v46 }
  0xa9   : > { %884 = vmatpush3.bf16.msra.mxu0 %v932_v46 }
  0xaa   : > { %885 = vmatprep.subr.bf16.mxu0 %v933_v39 }
  0xad   : > { %886 = vmatpush3.bf16.msra.mxu0 %v933_v39 }
  0xb0   : > { %888 = vmatmul.mubr.msk.bf16.vlgmr.msra.gmra.mrb[4].mxu0 %vm359_vm6, %v563_v32 }
 0x16b   : > { %v857_v47 = vpop.f32.mrb[0].mxu0 }
 0x16c   : > { %v400_v48 = vpop.f32.mrb[1].mxu0 }
 0x16d   : > { %v858_v49 = vpop.f32.mrb[2].mxu0 }
 0x16e   : > { %v403_v50 = vpop.f32.mrb[3].mxu0 }
 0x177   : > { %v873_v51 = vpop.f32.mrb[0].mxu1 }
 0x178   : > { %v497_v52 = vadd.f32 %v873_v51, %v857_v47  ;;  %v488_v53 = vpop.f32.mrb[1].mxu1 }
 0x179   : > { %v489_v54 = vadd.f32 %v488_v53, %v400_v48  ;;  %v874_v55 = vpop.f32.mrb[2].mxu1 }
 0x17a   : > { %v491_v56 = vpop.f32.mrb[3].mxu1 }
 0x17b   : > { %v492_v57 = vadd.f32 %v491_v56, %v403_v50 }
 0x183   : > { %v889_v59 = vpop.f32.mrb[4].mxu0 }
 0x184   : > { %v657_v60 = vadd.f32 %v889_v59, %v497_v52  ;;  %v641_v61 = vpop.f32.mrb[5].mxu0 }
 0x185   : > { %v655_v62 = vadd.f32 %v641_v61, %v489_v54  ;;  %v890_v63 = vpop.f32.mrb[6].mxu0 }
 0x186   : > { %v666_v0 = vadd.f32 %v807_v58, %v657_v60  ;;  %v644_v1 = vpop.f32.mrb[7].mxu0 }
 0x187   : > { %v664_v2 = vadd.f32 %v807_v58, %v655_v62  ;;  %v656_v3 = vadd.f32 %v644_v1, %v492_v57 }
 0x188   : > { %v669_v6 = vmin.f32 %v666_v0, 0.0  ;;  %v672_v18 = vmax.f32 %v666_v0, 0.0 }
 0x189   : > { %v667_v7 = vmin.f32 %v664_v2, 0.0  ;;  %v665_v9 = vadd.f32 %v807_v58, %v656_v3  ;;  %v670_v20 = vmax.f32 %v664_v2, 0.0 }
 0x18a   : > { %v677_v10 = vmul.f32 1.442695, %v669_v6 }
 0x18b   : > { %v673_v11 = vmul.f32 1.442695, %v667_v7  ;;  %v668_v12 = vmin.f32 %v665_v9, 0.0  ;;  %v671_v26 = vmax.f32 %v665_v9, 0.0 }
 0x18c   : > { %934 = vpow2.f32 %v677_v10 }
 0x18d   : > { %936 = vpow2.f32 %v673_v11  ;;  %v675_v13 = vmul.f32 1.442695, %v668_v12 }
 0x18f   : > { %938 = vpow2.f32 %v675_v13 }
 0x196   : > { %v935_v4 = vpop.eup %934 }
 0x197   : > { %v937_v14 = vpop.eup %936  ;;  %v810_v15 = vadd.f32 -1.0, %v935_v4 }
 0x198   : > { %v808_v16 = vadd.f32 -1.0, %v937_v14 }
 0x199   : > { %v939_v17 = vpop.eup %938  ;;  %v684_v19 = vmul.f32 1.6732632, %v810_v15 }
 0x19a   : > { %v682_v22 = vmul.f32 1.6732632, %v808_v16  ;;  %v809_v23 = vadd.f32 -1.0, %v939_v17 }
 0x19b   : > { %v687_v24 = vadd.f32 %v684_v19, %v672_v18 }
 0x19c   : > { %v685_v25 = vadd.f32 %v682_v22, %v670_v20  ;;  %v683_v27 = vmul.f32 1.6732632, %v809_v23 }
 0x19d   : > { %v690_v28 = vmul.f32 1.050701, %v687_v24 }
 0x19e   : > { %v688_v8 = vmul.f32 1.050701, %v685_v25  ;;  %v686_v29 = vadd.f32 %v683_v27, %v671_v26 }
 0x19f   : > { %v818_v30 = vpack.c.bf16 %v690_v28, %v690_v28 }
 0x1a0   : > { %v816_v31 = vpack.c.bf16 %v688_v8, %v688_v8  ;;  %v689_v32 = vmul.f32 1.050701, %v686_v29 }
 0x1a1   : > { %707 = vst.msk [vmem:[%s170_s9 + $0x8] sm:$0xf] %vm704_vm8, %v818_v30 }
 0x1a2   : > { %705 = vst.msk [vmem:[%s170_s9] sm:$0xf] %vm704_vm8, %v816_v31  ;;  %v817_v33 = vpack.c.bf16 %v689_v32, %v689_v32 }
 0x1a4   : > { %706 = vst.msk [vmem:[%s170_s9 + $0x4] sm:$0xf] %vm704_vm8, %v817_v33 }
 0x1a5 PF: > { %s13_s12 = sadd.s32 1, %s946_s12  }
 0x1a6   : > { %p10_p4 = scmp.ge.s32.totalorder %s13_s12, 4  }
 0x1a8   :  { %12 = sbr.rel (!%p10_p4) target bundleno = 1 (0x1), region = 62 }

// kernel: rise_mamba_forward.22
= control target key start
LH: loop header
LB: loop body
LE: loop exit
PB: predicated region body
PF: predicated region fallthrough
CT: control target
= control target key end

     0   :  { %s1791_s12 = smov 0   ;;  %s2160_s0 = inlined_call_operand.vmem [shape: bf16[2,12,12,32], index: 0, kind: input, shape index: {}]   ;;  %s2161_s1 = inlined_call_operand.vmem [shape: bf16[864,64], index: 1, kind: input, shape index: {}]   ;;  %s2162_s2 = inlined_call_operand.vmem [shape: f32[1,64], index: 2, kind: input, shape index: {}]   ;;  %s2163_s3 = inlined_call_operand.vmem [shape: bf16[2,1,6,64], index: 3, kind: output, shape index: {}]  }
   0x1 LB: > { %s1342_s13 = sadd.s32 4294967295, %s1765_s12   ;;  %p1346_p0 = scmp.ge.s32.totalorder %s1765_s12, 1  ;;  %s1765_s12 = sphi %s1791_s12, %s13_s12  }
   0x2   : > { %p137_p1 = scmp.lt.s32.totalorder %s1765_s12, 3 }
   0x4   : > { %p138_p2 = pnand %p1346_p0, %p137_p1 }
   0x5   : > { %p160_p3 = scmp.lt.s32.totalorder (!%p138_p2), %s1342_s13, 1  ;;  %v1702_v0 = vld [vmem:[%s2161_s1 + $0x30] sm:$0xff] (!%p138_p2)   ;;  %v1767_v1 = vmov (!%p138_p2), 0.0   ;;  %v1703_v2 = vld [vmem:[%s2161_s1 + $0x38] sm:$0xff] (!%p138_p2)   ;;  %v1704_v3 = vld [vmem:[%s2161_s1] sm:$0xff] (!%p138_p2)   ;;  %s1768_s5 = smov (!%p138_p2), 32  }
   0x6   : > { %141 = sbr.rel (%p138_p2) target bundleno = 458 (0x1ca), region = 32  ;;  %1527 = vmatprep.subr.bf16.mxu0 (!%p138_p2), %v1767_v1  ;;  %1543 = vmatprep.subr.bf16.mxu1 (!%p138_p2), %v1767_v1  ;;  %v1706_v4 = vld [vmem:[%s2161_s1 + $0x8] sm:$0xff] (!%p138_p2)   ;;  %v1705_v5 = vld [vmem:[%s2161_s1 + $0x40] sm:$0xff] (!%p138_p2)   ;;  %v1708_v7 = vld [vmem:[%s2161_s1 + $0x10] sm:$0xff] (!%p138_p2)   ;;  %s1769_s10 = smov (!%p138_p2), 64   ;;  %vm1770_vm0 = vmmov (!%p138_p2), 0  }
   0x7   : > { %1528 = vmatpush3.bf16.msra.mxu0 (!%p138_p2), %v1702_v0  ;;  %1544 = vmatpush3.bf16.msra.mxu1 (!%p138_p2), %v1704_v3  ;;  %v1707_v9 = vld [vmem:[%s2161_s1 + $0x48] sm:$0xff] (!%p138_p2)   ;;  %v1709_v22 = vld [vmem:[%s2161_s1 + $0x50] sm:$0xff] (!%p138_p2)   ;;  %v1710_v30 = vld [vmem:[%s2161_s1 + $0x18] sm:$0xff] (!%p138_p2)   ;;  %vm300_vm1 = vcmask (!%p138_p2), 261120   ;;  %vm304_vm2 = vcmask (!%p138_p2), 523264   ;;  %vm370_vm3 = vcmask (!%p138_p2), 785408  }
   0x8   : > { %1529 = vmatprep.subr.bf16.mxu0 (!%p138_p2), %v1767_v1  ;;  %1545 = vmatprep.subr.bf16.mxu1 (!%p138_p2), %v1767_v1  ;;  %v1712_v36 = vld [vmem:[%s2161_s1 + $0x58] sm:$0xff] (!%p138_p2)   ;;  %v1713_v43 = vld [vmem:[%s2161_s1 + $0x20] sm:$0xff] (!%p138_p2)   ;;  %v1715_v58 = vld [vmem:[%s2161_s1 + $0x28] sm:$0xff] (!%p138_p2)   ;;  %vm1287_vm4 = vcmask (!%p138_p2), 518144  }
   0x9   : > { %1539 = vmatprep.mubr.msk.bf16.mxu0 (!%p138_p2), %vm1770_vm0, %v1767_v1  ;;  %1555 = vmatprep.mubr.msk.bf16.mxu1 (!%p138_p2), %vm1770_vm0, %v1767_v1 }
   0xb   : > { %1530 = vmatpush3.bf16.msra.mxu0 (!%p138_p2), %v1703_v2  ;;  %1546 = vmatpush3.bf16.msra.mxu1 (!%p138_p2), %v1706_v4 }
   0xc   : > { %1531 = vmatprep.subr.bf16.mxu0 (!%p138_p2), %v1767_v1  ;;  %1547 = vmatprep.subr.bf16.mxu1 (!%p138_p2), %v1767_v1 }
   0xd   : > { %s2165_s13 = smov (!%p160_p3, %s1342_s13), 1 }
   0xe   : > { %s1671_s20 = smul.u32 96, %s2165_s13 }
   0xf   : > { %1532 = vmatpush3.bf16.msra.mxu0 %v1705_v5  ;;  %1548 = vmatpush3.bf16.msra.mxu1 %v1708_v7 }
  0x10   : > { %s1821_s25 = scalar_lea.vmem %s2160_s0, %s1671_s20  ;;  %1533 = vmatprep.subr.bf16.mxu0 %v1767_v1  ;;  %1549 = vmatprep.subr.bf16.mxu1 %v1767_v1 }
  0x11   : > { %v1684_v6 = vld [vmem:[%s1821_s25 + $0x18] ss:$0 sps:$4 sm:$0x77]   ;;  %v1685_v8 = vld [vmem:[%s1821_s25 + $0x8] sm:$0x1e]  }
  0x12   : > { %315 = vrot.lane.b32.xlu0 %v1684_v6, %s1768_s5  ;;  %v1686_v10 = vld [vmem:[%s1821_s25 + $0x10] ss:$0 sps:$4 sm:$0xff]   ;;  %v1838_v11 = vld [vmem:[%s1821_s25 + $0x4] sm:$0x1]  ;;  %506 = vrot.lane.b32.xlu1 %v1685_v8, %s1768_s5 }
  0x13   : > { %v495_v12 = vld [vmem:[%s1821_s25] sm:$0xc]  ;;  %v321_v13 = vshrl.u32 %v1686_v10, 16  ;;  %v323_v14 = vshll.u32 %v1686_v10, 16  ;;  %v1689_v16 = vld [vmem:[%s1821_s25] ss:$0 sps:$4 sm:$0xff]   ;;  %1534 = vmatpush3.bf16.msra.mxu0 %v1707_v9  ;;  %1550 = vmatpush3.bf16.msra.mxu1 %v1710_v30 }
  0x14   : > { %v1375_v15 = vcombine.low %v495_v12, %v1838_v11  ;;  %v294_v20 = vshll.u32 %v1689_v16, 16  ;;  %v1691_v21 = vld [vmem:[%s1821_s25 + $0x20] ss:$0 sps:$4 sm:$0xff]   ;;  %v1688_v25 = vld [vmem:[%s1821_s25 + $0x8] ss:$0 sps:$4 sm:$0x77]   ;;  %1535 = vmatprep.subr.bf16.mxu0 %v1767_v1  ;;  %1551 = vmatprep.subr.bf16.mxu1 %v1767_v1 }
  0x15   : > { %v325_v17 = vrot.slane %v323_v14, 1  ;;  %v292_v26 = vshrl.u32 %v1689_v16, 16  ;;  %v628_v28 = vshll.u32 %v1691_v21, 16  ;;  %v1693_v29 = vld [vmem:[%s1821_s25 + $0x30] ss:$0 sps:$4 sm:$0xff]   ;;  %v626_v32 = vshrl.u32 %v1691_v21, 16 }
  0x16   : > { %v512_v18 = vshrl.u32 %v1375_v15, 16  ;;  %v514_v19 = vshll.u32 %v1375_v15, 16  ;;  %v296_v27 = vrot.slane %v294_v20, 1  ;;  %v734_v34 = vshll.u32 %v1693_v29, 16  ;;  %v1859_v35 = vld [vmem:[%s1821_s25 + $0x24] sm:$0x1] }
  0x17   : > { %v326_v23 = vor.u32 %v325_v17, %v321_v13  ;;  %v630_v33 = vrot.slane %v628_v28, 1  ;;  %1536 = vmatpush3.bf16.msra.mxu0 %v1709_v22  ;;  %v1411_v38 = vld [vmem:[%s1821_s25 + $0x20] sm:$0xc]  ;;  %v1690_v39 = vld [vmem:[%s1821_s25 + $0x28] ss:$0 sps:$4 sm:$0x77]   ;;  %1552 = vmatpush3.bf16.msra.mxu1 %v1713_v43 }
  0x18   : > { %v516_v24 = vrot.slane %v514_v19, 1  ;;  %v297_v37 = vor.u32 %v296_v27, %v292_v26  ;;  %1537 = vmatprep.subr.bf16.mxu0 %v1767_v1  ;;  %v1414_v40 = vcombine.low %v1411_v38, %v1859_v35  ;;  %v732_v41 = vshrl.u32 %v1693_v29, 16  ;;  %v1697_v46 = vld [vmem:[%s1821_s25 + $0x40] ss:$0 sps:$4 sm:$0xff]   ;;  %v1878_v47 = vld [vmem:[%s1821_s25 + $0x44] sm:$0x1]  ;;  %1553 = vmatprep.subr.bf16.mxu1 %v1767_v1 }
  0x19   : > { %327 = vrot.lane.b32.xlu0 %v326_v23, %s1769_s10  ;;  %v736_v42 = vrot.slane %v734_v34, 1  ;;  %v631_v44 = vor.u32 %v630_v33, %v626_v32  ;;  %v1450_v48 = vld [vmem:[%s1821_s25 + $0x40] sm:$0xc]  ;;  %v1692_v49 = vld [vmem:[%s1821_s25 + $0x38] ss:$0 sps:$4 sm:$0x77]  }
  0x1a   : > { %v517_v31 = vor.u32 %v516_v24, %v512_v18  ;;  %v847_v45 = vshll.u32 %v1414_v40, 16  ;;  %v845_v51 = vshrl.u32 %v1414_v40, 16  ;;  %v961_v53 = vshll.u32 %v1697_v46, 16  ;;  %v1694_v55 = vld [vmem:[%s1821_s25 + $0x28] sm:$0x1e]   ;;  %v1714_v14 = vld [vmem:[%s2161_s1 + $0x60] sm:$0xff]  }
  0x1b   : > { %1538 = vmatpush3.bf16.msra.mxu0 %v1712_v36  ;;  %v737_v50 = vor.u32 %v736_v42, %v732_v41  ;;  %v1453_v54 = vcombine.low %v1450_v48, %v1878_v47  ;;  %v959_v56 = vshrl.u32 %v1697_v46, 16  ;;  %v1701_v57 = vld [vmem:[%s1821_s25 + $0x50] ss:$0 sps:$4 sm:$0xff]   ;;  %v1696_v60 = vld [vmem:[%s1821_s25 + $0x48] ss:$0 sps:$4 sm:$0x77]   ;;  %1554 = vmatpush3.bf16.msra.mxu1 %v1715_v58 }
  0x1c   : > { %518 = vrot.lane.b32.xlu1 %v517_v31, %s1769_s10  ;;  %1559 = vmatprep.subr.bf16.mxu0 %v1767_v1  ;;  %v849_v52 = vrot.slane %v847_v45, 1  ;;  %v963_v61 = vrot.slane %v961_v53, 1  ;;  %v1067_v3 = vshll.u32 %v1701_v57, 16  ;;  %v1698_v4 = vld [vmem:[%s1821_s25 + $0x48] sm:$0x1e]   ;;  %v1065_v7 = vshrl.u32 %v1701_v57, 16 }
  0x1d   : > { %286 = vrot.lane.b32.xlu0 %v1688_v25, %s1768_s5  ;;  %v1180_v62 = vshll.u32 %v1453_v54, 16  ;;  %1575 = vmatprep.subr.bf16.mxu1 %v1767_v1  ;;  %v1178_v63 = vshrl.u32 %v1453_v54, 16  ;;  %v1700_v6 = vld [vmem:[%s1821_s25 + $0x58] ss:$0 sps:$4 sm:$0x77]   ;;  %v1716_v21 = vld [vmem:[%s2161_s1 + $0x68] sm:$0xff]  }
  0x1e   : > { %v850_v59 = vor.u32 %v849_v52, %v845_v51  ;;  %v964_v0 = vor.u32 %v963_v61, %v959_v56  ;;  %v1069_v8 = vrot.slane %v1067_v3, 1  ;;  %v1352_v13 = vld [vmem:[%s1821_s25 + $0x10] sm:$0x7]  ;;  %v279_v19 = vld [vmem:[%s1821_s25] sm:$0x7]  ;;  %v1719_v30 = vld [vmem:[%s2161_s1 + $0x98] sm:$0xff]  }
  0x1f   : > { %v1182_v2 = vrot.slane %v1180_v62, 1  ;;  %v491_v20 = vld [vmem:[%s1821_s25] sm:$0xe]  ;;  %v1717_v24 = vld [vmem:[%s2161_s1 + $0x90] sm:$0xff]   ;;  %v1720_v32 = vld [vmem:[%s2161_s1 + $0x78] sm:$0xff]  }
  0x20   : > { %298 = vrot.lane.b32.xlu1 %v297_v37, %s1769_s10  ;;  %v1070_v9 = vor.u32 %v1069_v8, %v1065_v7  ;;  %v1373_v25 = vcombine.low %v491_v20, %v1838_v11  ;;  %v1718_v28 = vld [vmem:[%s2161_s1 + $0x70] sm:$0xff]   ;;  %v1721_v36 = vld [vmem:[%s2161_s1 + $0xa0] sm:$0xff]   ;;  %v1723_v42 = vld [vmem:[%s2161_s1 + $0xa8] sm:$0xff]  }
  0x21   : > { %620 = vrot.lane.b32.xlu0 %v1690_v39, %s1768_s5  ;;  %v1183_v5 = vor.u32 %v1182_v2, %v1178_v63  ;;  %v1722_v38 = vld [vmem:[%s2161_s1 + $0x80] sm:$0xff]   ;;  %v1724_v46 = vld [vmem:[%s2161_s1 + $0x88] sm:$0xff]   ;;  %v1725_v51 = vld [vmem:[%s2161_s1 + $0xb0] sm:$0xff]  }
  0x22   : > { %v1446_v45 = vld [vmem:[%s1821_s25 + $0x40] sm:$0xe]  ;;  %v1434_v63 = vld [vmem:[%s1821_s25 + $0x50] sm:$0x7]  ;;  %v1737_v20 = vld [vmem:[%s2161_s1 + $0xe8] sm:$0xff]  }
  0x23   : > { %v1451_v53 = vcombine.low %v1446_v45, %v1878_v47  ;;  %v1383_v56 = vld [vmem:[%s1821_s25 + $0x20] sm:$0x7]  ;;  %v1727_v47 = vld [vmem:[%s2161_s1 + $0xb8] sm:$0xff]   ;;  %v1730_v8 = vld [vmem:[%s2161_s1 + $0xd0] sm:$0xff]  }
  0x24   : > { %632 = vrot.lane.b32.xlu1 %v631_v44, %s1769_s10  ;;  %v1422_v44 = vld [vmem:[%s1821_s25 + $0x40] sm:$0x7]  ;;  %v1756_v45 = vld [vmem:[%s2161_s1 + $0x198] sm:$0xff]  }
  0x25   : > { %726 = vrot.lane.b32.xlu0 %v1692_v49, %s1768_s5 }
  0x28   : > { %738 = vrot.lane.b32.xlu1 %v737_v50, %s1769_s10 }
  0x29   : > { %839 = vrot.lane.b32.xlu0 %v1694_v55, %s1768_s5  ;;  %v1726_v55 = vld [vmem:[%s2161_s1 + $0xc0] sm:$0xff]  }
  0x2c   : > { %851 = vrot.lane.b32.xlu1 %v850_v59, %s1769_s10 }
  0x2d   : > { %953 = vrot.lane.b32.xlu0 %v1696_v60, %s1768_s5 }
  0x30   : > { %965 = vrot.lane.b32.xlu1 %v964_v0, %s1769_s10  ;;  %v1728_v0 = vld [vmem:[%s2161_s1 + $0xc8] sm:$0xff]  }
  0x31   : > { %1172 = vrot.lane.b32.xlu0 %v1698_v4, %s1768_s5 }
  0x34   : > { %1184 = vrot.lane.b32.xlu1 %v1183_v5, %s1769_s10  ;;  %v1729_v5 = vld [vmem:[%s2161_s1 + $0xf0] sm:$0xff]  }
  0x35   : > { %1059 = vrot.lane.b32.xlu0 %v1700_v6, %s1768_s5  ;;  %s1348_s5 = sshll.u32 %s2165_s13, 2 }
  0x36   : > { %s168_s8 = scalar_lea.vmem %s2163_s3, %s1348_s5 }
  0x38   : > { %1071 = vrot.lane.b32.xlu1 %v1070_v9, %s1769_s10  ;;  %v1407_v9 = vld [vmem:[%s1821_s25 + $0x20] sm:$0xe] }
  0x84   : > { %v316_v10 = vpop.permute.xlu0 %315  ;;  %v507_v12 = vpop.permute.xlu1 %506 }
  0x85   : > { %v331_v15 = vsel %vm300_vm1, %v1352_v13, %v316_v10  ;;  %v522_v11 = vsel %vm300_vm1, %v1373_v25, %v507_v12  ;;  %v1731_v12 = vld [vmem:[%s2161_s1 + $0xf8] sm:$0xff]   ;;  %v1412_v13 = vcombine.low %v1407_v9, %v1859_v35  ;;  %v1734_v35 = vld [vmem:[%s2161_s1 + $0xe0] sm:$0xff]  }
  0x8b   : > { %v328_v16 = vpop.permute.xlu0 %327 }
  0x8c   : > { %v333_v17 = vsel %vm304_vm2, %v331_v15, %v328_v16  ;;  %v1733_v15 = vld [vmem:[%s2161_s1 + $0x100] sm:$0xff]  }
  0x8d   : > { %1540 = vmatmul.mubr.msk.bf16.vlgmr.msra.gmra.mrb[0].mxu0 %vm370_vm3, %v333_v17  ;;  %v1395_v17 = vld [vmem:[%s1821_s25 + $0x30] sm:$0x7] }
  0x8e   : > { %v519_v18 = vpop.permute.xlu1 %518  ;;  %1560 = vmatpush3.bf16.msra.mxu0 %v1714_v14  ;;  %1571 = vmatprep.mubr.msk.bf16.mxu0 %vm1770_vm0, %v1767_v1  ;;  %v1732_v14 = vld [vmem:[%s2161_s1 + $0xd8] sm:$0xff]  }
  0x8f   : > { %v287_v22 = vpop.permute.xlu0 %286  ;;  %1561 = vmatprep.subr.bf16.mxu0 %v1767_v1  ;;  %v524_v34 = vsel %vm304_vm2, %v522_v11, %v519_v18  ;;  %v1735_v18 = vld [vmem:[%s2161_s1 + $0x108] sm:$0xff]  }
  0x90   : > { %v303_v23 = vsel %vm300_vm1, %v279_v19, %v287_v22  ;;  %v525_v39 = vshrl.u32 %v524_v34, 16  ;;  %v528_v40 = vshll.u32 %v524_v34, 16  ;;  %v1745_v34 = vld [vmem:[%s2161_s1 + $0x138] sm:$0xff]  }
  0x92   : > { %v299_v26 = vpop.permute.xlu1 %298  ;;  %1562 = vmatpush3.bf16.msra.mxu0 %v1716_v21  ;;  %v527_v48 = vrot.slane %v525_v39, 1  ;;  %v530_v49 = vrot.slane %v528_v40, 2  ;;  %v1749_v39 = vld [vmem:[%s2161_s1 + $0x148] sm:$0xff]   ;;  %v1751_v40 = vld [vmem:[%s2161_s1 + $0x170] sm:$0xff]  }
  0x93   : > { %v306_v27 = vsel %vm304_vm2, %v303_v23, %v299_v26  ;;  %1563 = vmatprep.subr.bf16.mxu0 %v1767_v1  ;;  %v621_v29 = vpop.permute.xlu0 %620  ;;  %v1739_v26 = vld [vmem:[%s2161_s1 + $0x120] sm:$0xff]  }
  0x94   : > { %1556 = vmatmul.mubr.msk.bf16.vlgmr.msra.gmra.mrb[0].mxu1 %vm370_vm3, %v306_v27  ;;  %v531_v58 = vor.u32 %v530_v49, %v527_v48  ;;  %v636_v61 = vsel %vm300_vm1, %v1383_v56, %v621_v29  ;;  %v1740_v29 = vld [vmem:[%s2161_s1 + $0x118] sm:$0xff]   ;;  %v1757_v49 = vld [vmem:[%s2161_s1 + $0x1a0] sm:$0xff]  }
  0x95   : > { %1576 = vmatpush3.bf16.msra.mxu1 %v1717_v24  ;;  %1587 = vmatprep.mubr.msk.bf16.mxu1 %vm1770_vm0, %v1767_v1  ;;  %v1738_v24 = vld [vmem:[%s2161_s1 + $0x110] sm:$0xff]  }
  0x96   : > { %1577 = vmatprep.subr.bf16.mxu1 %v1767_v1  ;;  %v633_v31 = vpop.permute.xlu1 %632  ;;  %1564 = vmatpush3.bf16.msra.mxu0 %v1718_v28 }
  0x97   : > { %1565 = vmatprep.subr.bf16.mxu0 %v1767_v1  ;;  %v1946_v33 = vpop.permute.xlu0 %726  ;;  %v638_v4 = vsel %vm304_vm2, %v636_v61, %v633_v31  ;;  %v1742_v31 = vld [vmem:[%s2161_s1 + $0x150] sm:$0xff]  }
  0x98   : > { %v742_v21 = vsel %vm300_vm1, %v1395_v17, %v1946_v33  ;;  %v1744_v33 = vld [vmem:[%s2161_s1 + $0x158] sm:$0xff]  }
  0x99   : > { %1578 = vmatpush3.bf16.msra.mxu1 %v1719_v30  ;;  %v1741_v30 = vld [vmem:[%s2161_s1 + $0x128] sm:$0xff]  }
  0x9a   : > { %1579 = vmatprep.subr.bf16.mxu1 %v1767_v1  ;;  %v1953_v37 = vpop.permute.xlu1 %738  ;;  %1566 = vmatpush3.bf16.msra.mxu0 %v1720_v32  ;;  %v1743_v32 = vld [vmem:[%s2161_s1 + $0x130] sm:$0xff]  }
  0x9b   : > { %1567 = vmatprep.subr.bf16.mxu0 %v1767_v1  ;;  %v1959_v41 = vpop.permute.xlu0 %839  ;;  %v744_v25 = vsel %vm304_vm2, %v742_v21, %v1953_v37  ;;  %v1747_v37 = vld [vmem:[%s2161_s1 + $0x140] sm:$0xff]  }
  0x9c   : > { %v855_v16 = vsel %vm300_vm1, %v1412_v13, %v1959_v41  ;;  %v1752_v41 = vld [vmem:[%s2161_s1 + $0x180] sm:$0xff]  }
  0x9d   : > { %1580 = vmatpush3.bf16.msra.mxu1 %v1721_v36  ;;  %v1746_v36 = vld [vmem:[%s2161_s1 + $0x160] sm:$0xff]  }
  0x9e   : > { %1581 = vmatprep.subr.bf16.mxu1 %v1767_v1  ;;  %v1965_v43 = vpop.permute.xlu1 %851  ;;  %1568 = vmatpush3.bf16.msra.mxu0 %v1722_v38  ;;  %v1748_v38 = vld [vmem:[%s2161_s1 + $0x168] sm:$0xff]  }
  0x9f   : > { %1569 = vmatprep.subr.bf16.mxu0 %v1767_v1  ;;  %v954_v50 = vpop.permute.xlu0 %953  ;;  %v857_v19 = vsel %vm304_vm2, %v855_v16, %v1965_v43  ;;  %v1754_v43 = vld [vmem:[%s2161_s1 + $0x188] sm:$0xff]  }
  0xa0   : > { %v969_v52 = vsel %vm300_vm1, %v1422_v44, %v954_v50  ;;  %v858_v22 = vshrl.u32 %v857_v19, 16  ;;  %v861_v23 = vshll.u32 %v857_v19, 16  ;;  %v1755_v44 = vld [vmem:[%s2161_s1 + $0x190] sm:$0xff]  }
  0xa1   : > { %1582 = vmatpush3.bf16.msra.mxu1 %v1723_v42  ;;  %v1753_v42 = vld [vmem:[%s2161_s1 + $0x178] sm:$0xff]  }
  0xa2   : > { %1583 = vmatprep.subr.bf16.mxu1 %v1767_v1  ;;  %v966_v54 = vpop.permute.xlu1 %965  ;;  %1570 = vmatpush3.bf16.msra.mxu0 %v1724_v46  ;;  %v860_v27 = vrot.slane %v858_v22, 1  ;;  %v863_v28 = vrot.slane %v861_v23, 2 }
  0xa3   : > { %v1984_v57 = vsel %vm304_vm2, %v969_v52, %v966_v54  ;;  %1591 = vmatprep.subr.bf16.mxu0 %v1767_v1  ;;  %v1173_v59 = vpop.permute.xlu0 %1172  ;;  %v1758_v52 = vld [vmem:[%s2161_s1 + $0x1a8] sm:$0xff]  }
  0xa4   : > { %v1188_v60 = vsel %vm300_vm1, %v1451_v53, %v1173_v59  ;;  %v864_v11 = vor.u32 %v863_v28, %v860_v27  ;;  %v1461_v28 = vld [vmem:[%s2162_s2] ss:$0 sm:$0xff] }
  0xa5   : > { %1584 = vmatpush3.bf16.msra.mxu1 %v1725_v51  ;;  %1572 = vmatmul.mubr.msk.bf16.vlgmr.msra.gmra.mrb[4].mxu0 %vm370_vm3, %v531_v58 }
  0xa6   : > { %1585 = vmatprep.subr.bf16.mxu1 %v1767_v1  ;;  %v1185_v62 = vpop.permute.xlu1 %1184  ;;  %1592 = vmatpush3.bf16.msra.mxu0 %v1726_v55 }
  0xa7   : > { %1603 = vmatprep.mubr.msk.bf16.mxu0 %vm1770_vm0, %v1767_v1  ;;  %v2001_v2 = vsel %vm304_vm2, %v1188_v60, %v1185_v62  ;;  %1593 = vmatprep.subr.bf16.mxu0 %v1767_v1  ;;  %v1060_v3 = vpop.permute.xlu0 %1059 }
  0xa8   : > { %v1075_v6 = vsel %vm300_vm1, %v1434_v63, %v1060_v3  ;;  %v1191_v46 = vshrl.u32 %v2001_v2, 16  ;;  %v1194_v48 = vshll.u32 %v2001_v2, 16 }
  0xa9   : > { %1586 = vmatpush3.bf16.msra.mxu1 %v1727_v47 }
  0xaa   : > { %1607 = vmatprep.subr.bf16.mxu1 %v1767_v1  ;;  %v1072_v7 = vpop.permute.xlu1 %1071  ;;  %1594 = vmatpush3.bf16.msra.mxu0 %v1728_v0  ;;  %v1193_v50 = vrot.slane %v1191_v46, 1  ;;  %v1196_v51 = vrot.slane %v1194_v48, 2 }
  0xab   : > { %v2015_v10 = vsel %vm304_vm2, %v1075_v6, %v1072_v7  ;;  %1595 = vmatprep.subr.bf16.mxu0 %v1767_v1 }
  0xac   : > { %1588 = vmatmul.mubr.msk.bf16.vlgmr.msra.gmra.mrb[4].mxu1 %vm370_vm3, %v638_v4  ;;  %v1197_v53 = vor.u32 %v1196_v51, %v1193_v50 }
  0xad   : > { %1608 = vmatpush3.bf16.msra.mxu1 %v1729_v5  ;;  %1619 = vmatprep.mubr.msk.bf16.mxu1 %vm1770_vm0, %v1767_v1 }
  0xae   : > { %1609 = vmatprep.subr.bf16.mxu1 %v1767_v1  ;;  %1596 = vmatpush3.bf16.msra.mxu0 %v1730_v8 }
  0xaf   : > { %1597 = vmatprep.subr.bf16.mxu0 %v1767_v1 }
  0xb1   : > { %1610 = vmatpush3.bf16.msra.mxu1 %v1731_v12 }
  0xb2   : > { %1611 = vmatprep.subr.bf16.mxu1 %v1767_v1  ;;  %1598 = vmatpush3.bf16.msra.mxu0 %v1732_v14 }
  0xb3   : > { %1599 = vmatprep.subr.bf16.mxu0 %v1767_v1 }
  0xb5   : > { %1612 = vmatpush3.bf16.msra.mxu1 %v1733_v15 }
  0xb6   : > { %1613 = vmatprep.subr.bf16.mxu1 %v1767_v1  ;;  %1600 = vmatpush3.bf16.msra.mxu0 %v1734_v35 }
  0xb7   : > { %1601 = vmatprep.subr.bf16.mxu0 %v1767_v1 }
  0xb9   : > { %1614 = vmatpush3.bf16.msra.mxu1 %v1735_v18 }
  0xba   : > { %1615 = vmatprep.subr.bf16.mxu1 %v1767_v1  ;;  %1602 = vmatpush3.bf16.msra.mxu0 %v1737_v20 }
  0xbb   : > { %1623 = vmatprep.subr.bf16.mxu0 %v1767_v1 }
  0xbd   : > { %1616 = vmatpush3.bf16.msra.mxu1 %v1738_v24  ;;  %1604 = vmatmul.mubr.msk.bf16.vlgmr.msra.gmra.mrb[8].mxu0 %vm370_vm3, %v744_v25 }
  0xbe   : > { %1617 = vmatprep.subr.bf16.mxu1 %v1767_v1  ;;  %1624 = vmatpush3.bf16.msra.mxu0 %v1739_v26 }
  0xbf   : > { %1635 = vmatprep.mubr.msk.bf16.mxu0 %vm1770_vm0, %v1767_v1  ;;  %1625 = vmatprep.subr.bf16.mxu0 %v1767_v1 }
  0xc1   : > { %1618 = vmatpush3.bf16.msra.mxu1 %v1740_v29 }
  0xc2   : > { %1639 = vmatprep.subr.bf16.mxu1 %v1767_v1  ;;  %1626 = vmatpush3.bf16.msra.mxu0 %v1741_v30 }
  0xc3   : > { %1627 = vmatprep.subr.bf16.mxu0 %v1767_v1 }
  0xc4   : > { %1620 = vmatmul.mubr.msk.bf16.vlgmr.msra.gmra.mrb[8].mxu1 %vm370_vm3, %v864_v11 }
  0xc5   : > { %1640 = vmatpush3.bf16.msra.mxu1 %v1742_v31  ;;  %1651 = vmatprep.mubr.msk.bf16.mxu1 %vm1770_vm0, %v1767_v1 }
  0xc6   : > { %1641 = vmatprep.subr.bf16.mxu1 %v1767_v1  ;;  %1628 = vmatpush3.bf16.msra.mxu0 %v1743_v32 }
  0xc7   : > { %1629 = vmatprep.subr.bf16.mxu0 %v1767_v1 }
  0xc9   : > { %1642 = vmatpush3.bf16.msra.mxu1 %v1744_v33 }
  0xca   : > { %1643 = vmatprep.subr.bf16.mxu1 %v1767_v1  ;;  %1630 = vmatpush3.bf16.msra.mxu0 %v1745_v34 }
  0xcb   : > { %1631 = vmatprep.subr.bf16.mxu0 %v1767_v1 }
  0xcd   : > { %1644 = vmatpush3.bf16.msra.mxu1 %v1746_v36 }
  0xce   : > { %1645 = vmatprep.subr.bf16.mxu1 %v1767_v1  ;;  %1632 = vmatpush3.bf16.msra.mxu0 %v1747_v37 }
  0xcf   : > { %1633 = vmatprep.subr.bf16.mxu0 %v1767_v1 }
  0xd1   : > { %1646 = vmatpush3.bf16.msra.mxu1 %v1748_v38 }
  0xd2   : > { %1647 = vmatprep.subr.bf16.mxu1 %v1767_v1  ;;  %1634 = vmatpush3.bf16.msra.mxu0 %v1749_v39 }
  0xd3   : > { %1655 = vmatprep.subr.bf16.mxu0 %v1767_v1 }
  0xd5   : > { %1648 = vmatpush3.bf16.msra.mxu1 %v1751_v40  ;;  %1636 = vmatmul.mubr.msk.bf16.vlgmr.msra.gmra.mrb[12].mxu0 %vm370_vm3, %v1984_v57 }
  0xd6   : > { %1649 = vmatprep.subr.bf16.mxu1 %v1767_v1  ;;  %1656 = vmatpush3.bf16.msra.mxu0 %v1752_v41 }
  0xd7   : > { %1667 = vmatprep.mubr.msk.bf16.mxu0 %vm1770_vm0, %v1767_v1  ;;  %1657 = vmatprep.subr.bf16.mxu0 %v1767_v1 }
  0xd9   : > { %1650 = vmatpush3.bf16.msra.mxu1 %v1753_v42 }
  0xda   : > { %1658 = vmatpush3.bf16.msra.mxu0 %v1754_v43 }
  0xdb   : > { %1659 = vmatprep.subr.bf16.mxu0 %v1767_v1 }
  0xdc   : > { %1652 = vmatmul.mubr.msk.bf16.vlgmr.msra.gmra.mrb[12].mxu1 %vm370_vm3, %v2015_v10 }
  0xde   : > { %1660 = vmatpush3.bf16.msra.mxu0 %v1755_v44 }
  0xdf   : > { %1661 = vmatprep.subr.bf16.mxu0 %v1767_v1 }
  0xe2   : > { %1662 = vmatpush3.bf16.msra.mxu0 %v1756_v45 }
  0xe3   : > { %1663 = vmatprep.subr.bf16.mxu0 %v1767_v1 }
  0xe6   : > { %1664 = vmatpush3.bf16.msra.mxu0 %v1757_v49 }
  0xe7   : > { %1665 = vmatprep.subr.bf16.mxu0 %v1767_v1 }
  0xea   : > { %1666 = vmatpush3.bf16.msra.mxu0 %v1758_v52 }
  0xed   : > { %1668 = vmatmul.mubr.msk.bf16.vlgmr.msra.gmra.mrb[16].mxu0 %vm370_vm3, %v1197_v53 }
 0x160   : > { %v407_v54 = vpop.f32.mrb[0].mxu0 }
 0x161   : > { %v1541_v55 = vpop.f32.mrb[1].mxu0 }
 0x162   : > { %v410_v56 = vpop.f32.mrb[2].mxu0 }
 0x163   : > { %v1542_v57 = vpop.f32.mrb[3].mxu0 }
 0x167   : > { %v485_v58 = vpop.f32.mrb[0].mxu1 }
 0x168   : > { %v486_v59 = vadd.f32 %v485_v58, %v407_v54  ;;  %v1557_v47 = vpop.f32.mrb[1].mxu1 }
 0x169   : > { %v488_v60 = vpop.f32.mrb[2].mxu1 }
 0x16a   : > { %v1558_v61 = vpop.f32.mrb[3].mxu1 }
 0x178   : > { %v605_v62 = vpop.f32.mrb[4].mxu0 }
 0x179   : > { %v611_v63 = vadd.f32 %v605_v62, %v486_v59  ;;  %v1573_v0 = vpop.f32.mrb[5].mxu0 }
 0x17a   : > { %v608_v2 = vpop.f32.mrb[6].mxu0 }
 0x17b   : > { %v1574_v3 = vpop.f32.mrb[7].mxu0 }
 0x17f   : > { %v711_v4 = vpop.f32.mrb[4].mxu1 }
 0x180   : > { %v717_v1 = vadd.f32 %v711_v4, %v611_v63  ;;  %v1589_v5 = vpop.f32.mrb[5].mxu1 }
 0x181   : > { %v714_v6 = vpop.f32.mrb[6].mxu1 }
 0x182   : > { %v1590_v7 = vpop.f32.mrb[7].mxu1 }
 0x190   : > { %v817_v8 = vpop.f32.mrb[8].mxu0 }
 0x191   : > { %v823_v9 = vadd.f32 %v817_v8, %v717_v1  ;;  %v1605_v10 = vpop.f32.mrb[9].mxu0 }
 0x192   : > { %v820_v12 = vpop.f32.mrb[10].mxu0 }
 0x193   : > { %v1606_v13 = vpop.f32.mrb[11].mxu0 }
 0x197   : > { %v938_v14 = vpop.f32.mrb[8].mxu1 }
 0x198   : > { %v944_v15 = vadd.f32 %v938_v14, %v823_v9  ;;  %v1621_v16 = vpop.f32.mrb[9].mxu1 }
 0x199   : > { %v941_v35 = vpop.f32.mrb[10].mxu1 }
 0x19a   : > { %v1622_v17 = vpop.f32.mrb[11].mxu1 }
 0x1a8   : > { %v1044_v18 = vpop.f32.mrb[12].mxu0 }
 0x1a9   : > { %v1050_v19 = vadd.f32 %v1044_v18, %v944_v15  ;;  %v1637_v20 = vpop.f32.mrb[13].mxu0 }
 0x1aa   : > { %v1047_v21 = vpop.f32.mrb[14].mxu0 }
 0x1ab   : > { %v1638_v22 = vpop.f32.mrb[15].mxu0 }
 0x1af   : > { %v1150_v23 = vpop.f32.mrb[12].mxu1 }
 0x1b0   : > { %v1156_v24 = vadd.f32 %v1150_v23, %v1050_v19  ;;  %v1653_v25 = vpop.f32.mrb[13].mxu1 }
 0x1b1   : > { %v1153_v26 = vpop.f32.mrb[14].mxu1 }
 0x1b2   : > { %v1654_v27 = vpop.f32.mrb[15].mxu1 }
 0x1c0   : > { %v1271_v29 = vpop.f32.mrb[16].mxu0 }
 0x1c1   : > { %v1277_v30 = vadd.f32 %v1271_v29, %v1156_v24  ;;  %v1669_v11 = vpop.f32.mrb[17].mxu0 }
 0x1c2   : > { %v1274_v31 = vpop.f32.mrb[18].mxu0 }
 0x1c3   : > { %v1284_v32 = vadd.f32 %v1461_v28, %v1277_v30  ;;  %v1670_v33 = vpop.f32.mrb[19].mxu0 }
 0x1c5   : > { %v1285_v34 = vmax.f32 %v1284_v32, 0.0 }
 0x1c7   : > { %v1286_v36 = vpack.c.bf16 %v1285_v34, %v1285_v34 }
 0x1c9   : > { %1288 = vst.msk [vmem:[%s168_s8] sm:$0x7] %vm1287_vm4, %v1286_v36 }
 0x1ca PF: > { %s13_s12 = sadd.s32 1, %s1765_s12  }
 0x1cb   : > { %p10_p4 = scmp.ge.s32.totalorder %s13_s12, 4  }
 0x1cd   :  { %12 = sbr.rel (!%p10_p4) target bundleno = 1 (0x1), region = 73 }

// kernel: rise_mamba_forward.23
= control target key start
LH: loop header
LB: loop body
LE: loop exit
PB: predicated region body
PF: predicated region fallthrough
CT: control target
= control target key end

     0   :  { %s2570_s12 = smov 0   ;;  %s3083_s0 = inlined_call_operand.vmem [shape: bf16[2,3,12,64], index: 0, kind: input, shape index: {}]   ;;  %s3084_s1 = inlined_call_operand.vmem [shape: bf16[1728,32], index: 1, kind: input, shape index: {}]   ;;  %s3085_s2 = inlined_call_operand.vmem [shape: f32[1,32], index: 2, kind: input, shape index: {}]   ;;  %s3086_s3 = inlined_call_operand.vmem [shape: bf16[2,4,6,32], index: 3, kind: output, shape index: {}]  }
   0x1 LB: > { %s1938_s13 = sadd.s32 4294967295, %s2545_s12   ;;  %p1942_p0 = scmp.ge.s32.totalorder %s2545_s12, 1  ;;  %s2545_s12 = sphi %s2570_s12, %s13_s12  }
   0x2   : > { %p137_p1 = scmp.lt.s32.totalorder %s2545_s12, 3 }
   0x4   : > { %p138_p2 = pnand %p1942_p0, %p137_p1 }
   0x5   : > { %p161_p3 = scmp.lt.s32.totalorder (!%p138_p2), %s1938_s13, 1  ;;  %v2414_v0 = vld [vmem:[%s3084_s1 + $0x20] sm:$0xff] (!%p138_p2)   ;;  %v2547_v1 = vmov (!%p138_p2), 0.0   ;;  %v2416_v2 = vld [vmem:[%s3084_s1 + $0x28] sm:$0xff] (!%p138_p2)   ;;  %vm2548_vm0 = vmmov (!%p138_p2), 0   ;;  %v2418_v4 = vld [vmem:[%s3084_s1 + $0x30] sm:$0xff] (!%p138_p2)  }
   0x6   : > { %141 = sbr.rel (%p138_p2) target bundleno = 498 (0x1f2), region = 32  ;;  %2242 = vmatprep.subr.bf16.mxu0 (!%p138_p2), %v2547_v1  ;;  %2254 = vmatprep.subr.bf16.mxu1 (!%p138_p2), %v2547_v1  ;;  %v2419_v3 = vld [vmem:[%s3084_s1] sm:$0xff] (!%p138_p2)   ;;  %v2421_v5 = vld [vmem:[%s3084_s1 + $0x8] sm:$0xff] (!%p138_p2)   ;;  %v2420_v8 = vld [vmem:[%s3084_s1 + $0x38] sm:$0xff] (!%p138_p2)   ;;  %vm416_vm1 = vcmask (!%p138_p2), 523264   ;;  %s2549_s7 = smov (!%p138_p2), 64  }
   0x7   : > { %2243 = vmatpush3.bf16.msra.mxu0 (!%p138_p2), %v2414_v0  ;;  %2250 = vmatprep.mubr.msk.bf16.mxu0 (!%p138_p2), %vm2548_vm0, %v2547_v1  ;;  %v2423_v14 = vld [vmem:[%s3084_s1 + $0x10] sm:$0xff] (!%p138_p2)   ;;  %v2422_v21 = vld [vmem:[%s3084_s1 + $0x40] sm:$0xff] (!%p138_p2)   ;;  %v2425_v37 = vld [vmem:[%s3084_s1 + $0x18] sm:$0xff] (!%p138_p2)   ;;  %vm606_vm2 = vcmask (!%p138_p2), 256000  }
   0x8   : > { %2244 = vmatprep.subr.bf16.mxu0 (!%p138_p2), %v2547_v1  ;;  %2262 = vmatprep.mubr.msk.bf16.mxu1 (!%p138_p2), %vm2548_vm0, %v2547_v1  ;;  %v2424_v41 = vld [vmem:[%s3084_s1 + $0x48] sm:$0xff] (!%p138_p2)   ;;  %v2428_v45 = vld [vmem:[%s3084_s1 + $0xa0] sm:$0xff] (!%p138_p2)   ;;  %v2426_v47 = vld [vmem:[%s3084_s1 + $0x50] sm:$0xff] (!%p138_p2)  }
   0x9   : > { %2255 = vmatpush3.bf16.msra.mxu1 (!%p138_p2), %v2419_v3  ;;  %v2429_v48 = vld [vmem:[%s3084_s1 + $0xa8] sm:$0xff] (!%p138_p2)   ;;  %v2427_v50 = vld [vmem:[%s3084_s1 + $0x58] sm:$0xff] (!%p138_p2)   ;;  %v2430_v57 = vld [vmem:[%s3084_s1 + $0x60] sm:$0xff] (!%p138_p2)  }
   0xa   : > { %2256 = vmatprep.subr.bf16.mxu1 (!%p138_p2), %v2547_v1  ;;  %v2432_v58 = vld [vmem:[%s3084_s1 + $0xb0] sm:$0xff] (!%p138_p2)  }
   0xb   : > { %2245 = vmatpush3.bf16.msra.mxu0 (!%p138_p2), %v2416_v2 }
   0xc   : > { %2246 = vmatprep.subr.bf16.mxu0 (!%p138_p2), %v2547_v1 }
   0xd   : > { %s3088_s13 = smov (!%p161_p3, %s1938_s13), 1  ;;  %2257 = vmatpush3.bf16.msra.mxu1 %v2421_v5 }
   0xe   : > { %s2398_s18 = smul.u32 24, %s3088_s13  ;;  %2258 = vmatprep.subr.bf16.mxu1 %v2547_v1  ;;  %s2106_s9 = sshll.u32 %s3088_s13, 4 }
   0xf   : > { %2247 = vmatpush3.bf16.msra.mxu0 %v2418_v4  ;;  %v2436_v4 = vld [vmem:[%s3084_s1 + $0xb8] sm:$0xff]   ;;  %s3052_s16 = scalar_lea.vmem %s3086_s3, %s2106_s9 }
  0x10   : > { %s2603_s25 = scalar_lea.vmem %s3083_s0, %s2398_s18  ;;  %2248 = vmatprep.subr.bf16.mxu0 %v2547_v1 }
  0x11   : > { %v2410_v6 = vld [vmem:[%s2603_s25 + $0x8] ss:$0 sps:$4 sm:$0x77]   ;;  %v2411_v7 = vld [vmem:[%s2603_s25] ss:$0 sps:$4 sm:$0x77]   ;;  %2259 = vmatpush3.bf16.msra.mxu1 %v2423_v14 }
  0x12   : > { %v631_v9 = vshrl.u32 %v2410_v6, 16  ;;  %v634_v10 = vshll.u32 %v2410_v6, 16  ;;  %v614_v11 = vshrl.u32 %v2411_v7, 16  ;;  %v617_v12 = vshll.u32 %v2411_v7, 16  ;;  %v1946_v25 = vld [vmem:[%s2603_s25 + $0x8] sm:$0x7]  ;;  %2260 = vmatprep.subr.bf16.mxu1 %v2547_v1 }
  0x13   : > { %v2412_v13 = vld [vmem:[%s2603_s25 + $0x10] ss:$0 sps:$4 sm:$0x77]   ;;  %v2413_v16 = vld [vmem:[%s2603_s25 + $0x8] ss:$0 sps:$4 sm:$0x77]   ;;  %2249 = vmatpush3.bf16.msra.mxu0 %v2420_v8 }
  0x14   : > { %v633_v15 = vrot.slane %v631_v9, 7  ;;  %v616_v17 = vrot.slane %v614_v11, 7  ;;  %v838_v18 = vshrl.u32 %v2412_v13, 16  ;;  %v841_v19 = vshll.u32 %v2412_v13, 16  ;;  %2266 = vmatprep.subr.bf16.mxu0 %v2547_v1  ;;  %v389_v44 = vld [vmem:[%s2603_s25] sm:$0x7] }
  0x15   : > { %v2415_v20 = vld [vmem:[%s2603_s25] ss:$0 sps:$4 sm:$0x77]   ;;  %v986_v23 = vshrl.u32 %v2413_v16, 16  ;;  %v989_v24 = vshll.u32 %v2413_v16, 16  ;;  %2261 = vmatpush3.bf16.msra.mxu1 %v2425_v37  ;;  %v2433_v7 = vld [vmem:[%s3084_s1 + $0x68] sm:$0xff]  }
  0x16   : > { %v636_v22 = vor.u32 %v634_v10, %v633_v15  ;;  %v840_v26 = vrot.slane %v838_v18, 7  ;;  %v962_v27 = vshrl.u32 %v2415_v20, 16  ;;  %v965_v28 = vshll.u32 %v2415_v20, 16  ;;  %v2417_v29 = vld [vmem:[%s2603_s25 + $0x10] ss:$0 sps:$4 sm:$0x77]   ;;  %2251 = vmatmul.mubr.msk.bf16.vlgmr.msra.gmra.mrb[0].mxu0 %vm416_vm1, %v1946_v25  ;;  %2278 = vmatprep.subr.bf16.mxu1 %v2547_v1 }
  0x17   : > { %v619_v30 = vor.u32 %v617_v12, %v616_v17  ;;  %v988_v31 = vrot.slane %v986_v23, 6  ;;  %v991_v32 = vrot.slane %v989_v24, 7  ;;  %v1202_v36 = vshrl.u32 %v2417_v29, 16  ;;  %2267 = vmatpush3.bf16.msra.mxu0 %v2422_v21  ;;  %2274 = vmatprep.mubr.msk.bf16.mxu0 %vm2548_vm0, %v2547_v1  ;;  %v2431_v49 = vld [vmem:[%s2603_s25 + $0x8] ss:$0 sps:$4 sm:$0x77]  }
  0x18   : > { %637 = vrot.lane.b32.xlu0 %v636_v22, %s2549_s7  ;;  %v843_v33 = vor.u32 %v841_v19, %v840_v26  ;;  %v964_v34 = vrot.slane %v962_v27, 6  ;;  %v967_v35 = vrot.slane %v965_v28, 7  ;;  %v1205_v38 = vshll.u32 %v2417_v29, 16  ;;  %2268 = vmatprep.subr.bf16.mxu0 %v2547_v1  ;;  %v2666_v52 = vld [vmem:[%s2603_s25 + $0xc] sm:$0x1]  ;;  %v2439_v10 = vld [vmem:[%s3084_s1 + $0xc0] sm:$0xff]  }
  0x19   : > { %v992_v39 = vor.u32 %v991_v32, %v988_v31  ;;  %v1204_v40 = vrot.slane %v1202_v36, 6  ;;  %2263 = vmatmul.mubr.msk.bf16.vlgmr.msra.gmra.mrb[0].mxu1 %vm416_vm1, %v389_v44  ;;  %v1397_v51 = vrot.slane %v2431_v49, 6  ;;  %v2039_v53 = vld [vmem:[%s2603_s25 + $0x8] sm:$0xe]  ;;  %v1957_v56 = vld [vmem:[%s2603_s25 + $0x10] sm:$0x7] }
  0x1a   : > { %844 = vrot.lane.b32.xlu1 %v843_v33, %s2549_s7  ;;  %v968_v42 = vor.u32 %v967_v35, %v964_v34  ;;  %v1207_v43 = vrot.slane %v1205_v38, 7  ;;  %2279 = vmatpush3.bf16.msra.mxu1 %v2428_v45  ;;  %v2043_v54 = vcombine.low %v2039_v53, %v2666_v52  ;;  %v2435_v55 = vld [vmem:[%s2603_s25] ss:$0 sps:$4 sm:$0x77]   ;;  %v2683_v62 = vld [vmem:[%s2603_s25 + $0x4] sm:$0x1] }
  0x1b   : > { %2269 = vmatpush3.bf16.msra.mxu0 %v2424_v41  ;;  %2294 = vmatprep.mubr.msk.bf16.mxu1 %vm2548_vm0, %v2547_v1  ;;  %v1352_v61 = vrot.slane %v2435_v55, 6  ;;  %v1318_v63 = vld [vmem:[%s2603_s25] sm:$0xe]  ;;  %v2437_v11 = vld [vmem:[%s3084_s1 + $0x70] sm:$0xff]   ;;  %v2441_v12 = vld [vmem:[%s3084_s1 + $0xc8] sm:$0xff]  }
  0x1c   : > { %620 = vrot.lane.b32.xlu0 %v619_v30, %s2549_s7  ;;  %v1208_v46 = vor.u32 %v1207_v43, %v1204_v40  ;;  %2270 = vmatprep.subr.bf16.mxu0 %v2547_v1  ;;  %v1375_v59 = vshrl.u32 %v2043_v54, 16  ;;  %v1378_v60 = vshll.u32 %v2043_v54, 16  ;;  %v2034_v2 = vcombine.low %v1318_v63, %v2683_v62  ;;  %v2440_v13 = vld [vmem:[%s3084_s1 + $0x78] sm:$0xff]   ;;  %v2451_v14 = vld [vmem:[%s2603_s25 + $0x10] ss:$0 sps:$4 sm:$0x77]  }
  0x1d   : > { %2280 = vmatprep.subr.bf16.mxu1 %v2547_v1  ;;  %v2442_v15 = vld [vmem:[%s3084_s1 + $0x80] sm:$0xff]   ;;  %v2443_v16 = vld [vmem:[%s3084_s1 + $0xd0] sm:$0xff]   ;;  %v1726_v17 = vrot.slane %v2451_v14, 6  ;;  %v2444_v21 = vld [vmem:[%s3084_s1 + $0x88] sm:$0xff]  }
  0x1e   : > { %993 = vrot.lane.b32.xlu1 %v992_v39, %s2549_s7  ;;  %2281 = vmatpush3.bf16.msra.mxu1 %v2429_v48  ;;  %v1377_v0 = vrot.slane %v1375_v59, 7  ;;  %v1330_v5 = vshrl.u32 %v2034_v2, 16  ;;  %v1333_v6 = vshll.u32 %v2034_v2, 16  ;;  %v2727_v18 = vld [vmem:[%s2603_s25 + $0x14] sm:$0x1]  ;;  %v2445_v22 = vld [vmem:[%s3084_s1 + $0xd8] sm:$0xff]  }
  0x1f   : > { %2271 = vmatpush3.bf16.msra.mxu0 %v2426_v47  ;;  %2282 = vmatprep.subr.bf16.mxu1 %v2547_v1  ;;  %v2080_v19 = vld [vmem:[%s2603_s25 + $0x10] sm:$0xe]  ;;  %v2447_v28 = vld [vmem:[%s3084_s1 + $0x98] sm:$0xff]   ;;  %v1965_v29 = vld [vmem:[%s2603_s25 + $0x8] sm:$0xf] }
  0x20   : > { %969 = vrot.lane.b32.xlu0 %v968_v42, %s2549_s7  ;;  %2272 = vmatprep.subr.bf16.mxu0 %v2547_v1  ;;  %v1380_v3 = vor.u32 %v1378_v60, %v1377_v0  ;;  %v1332_v8 = vrot.slane %v1330_v5, 7  ;;  %v2084_v20 = vcombine.low %v2080_v19, %v2727_v18  ;;  %v2446_v27 = vld [vmem:[%s3084_s1 + $0x90] sm:$0xff]   ;;  %v608_v33 = vld [vmem:[%s2603_s25] sm:$0xf]  ;;  %v2449_v43 = vld [vmem:[%s3084_s1 + $0xe8] sm:$0xff]  }
  0x21   : > { %v2448_v38 = vld [vmem:[%s3084_s1 + $0xe0] sm:$0xff]   ;;  %v2453_v47 = vld [vmem:[%s3084_s1 + $0x168] sm:$0xff]   ;;  %v2455_v48 = vld [vmem:[%s3084_s1 + $0xf8] sm:$0xff]  }
  0x22   : > { %1209 = vrot.lane.b32.xlu1 %v1208_v46, %s2549_s7  ;;  %2283 = vmatpush3.bf16.msra.mxu1 %v2432_v58  ;;  %v1335_v9 = vor.u32 %v1333_v6, %v1332_v8  ;;  %v1704_v23 = vshrl.u32 %v2084_v20, 16  ;;  %v1707_v24 = vshll.u32 %v2084_v20, 16  ;;  %v2450_v44 = vld [vmem:[%s3084_s1 + $0x160] sm:$0xff]   ;;  %v2452_v46 = vld [vmem:[%s3084_s1 + $0xf0] sm:$0xff]   ;;  %v2459_v55 = vld [vmem:[%s3084_s1 + $0x108] sm:$0xff]  }
  0x23   : > { %2273 = vmatpush3.bf16.msra.mxu0 %v2427_v50  ;;  %2284 = vmatprep.subr.bf16.mxu1 %v2547_v1  ;;  %v2456_v49 = vld [vmem:[%s3084_s1 + $0x170] sm:$0xff]   ;;  %v2457_v50 = vld [vmem:[%s3084_s1 + $0x100] sm:$0xff]   ;;  %v2463_v58 = vld [vmem:[%s2603_s25 + $0x8] sm:$0x1e]  }
  0x24   : > { %1398 = vrot.lane.b32.xlu0 %v1397_v51, %s2549_s7  ;;  %2298 = vmatprep.subr.bf16.mxu0 %v2547_v1  ;;  %v1706_v25 = vrot.slane %v1704_v23, 7  ;;  %v2458_v51 = vld [vmem:[%s3084_s1 + $0x178] sm:$0xff]   ;;  %v1984_v54 = vld [vmem:[%s2603_s25 + $0x10] sm:$0xf]  ;;  %v2462_v63 = vld [vmem:[%s3084_s1 + $0x188] sm:$0xff]  }
  0x25   : > { %v2464_v6 = vld [vmem:[%s3084_s1 + $0x118] sm:$0xff]   ;;  %v2468_v14 = vld [vmem:[%s3084_s1 + $0x128] sm:$0xff]   ;;  %v2473_v20 = vld [vmem:[%s3084_s1 + $0x1b0] sm:$0xff]  }
  0x26   : > { %2275 = vmatmul.mubr.msk.bf16.vlgmr.msra.gmra.mrb[4].mxu0 %vm416_vm1, %v1957_v56  ;;  %1381 = vrot.lane.b32.xlu1 %v1380_v3, %s2549_s7  ;;  %v1709_v26 = vor.u32 %v1707_v24, %v1706_v25  ;;  %v2460_v56 = vld [vmem:[%s3084_s1 + $0x180] sm:$0xff]   ;;  %v2472_v19 = vld [vmem:[%s3084_s1 + $0x138] sm:$0xff]  }
  0x27   : > { %2299 = vmatpush3.bf16.msra.mxu0 %v2430_v57  ;;  %2314 = vmatprep.mubr.msk.bf16.mxu0 %vm2548_vm0, %v2547_v1  ;;  %v2475_v23 = vld [vmem:[%s3084_s1 + $0x1b8] sm:$0xff]   ;;  %v2478_v24 = vld [vmem:[%s2603_s25] sm:$0x1e]  }
  0x28   : > { %1353 = vrot.lane.b32.xlu0 %v1352_v61, %s2549_s7  ;;  %2300 = vmatprep.subr.bf16.mxu0 %v2547_v1  ;;  %v2461_v61 = vld [vmem:[%s3084_s1 + $0x110] sm:$0xff]  }
  0x29   : > { %2285 = vmatpush3.bf16.msra.mxu1 %v2436_v4 }
  0x2a   : > { %2286 = vmatprep.subr.bf16.mxu1 %v2547_v1  ;;  %1336 = vrot.lane.b32.xlu1 %v1335_v9, %s2549_s7 }
  0x2b   : > { %2301 = vmatpush3.bf16.msra.mxu0 %v2433_v7  ;;  %v2465_v7 = vld [vmem:[%s3084_s1 + $0x190] sm:$0xff]  }
  0x2c   : > { %2302 = vmatprep.subr.bf16.mxu0 %v2547_v1  ;;  %1727 = vrot.lane.b32.xlu0 %v1726_v17, %s2549_s7  ;;  %v2471_v17 = vld [vmem:[%s3084_s1 + $0x1a8] sm:$0xff]  }
  0x2d   : > { %2287 = vmatpush3.bf16.msra.mxu1 %v2439_v10 }
  0x2e   : > { %2288 = vmatprep.subr.bf16.mxu1 %v2547_v1  ;;  %1710 = vrot.lane.b32.xlu1 %v1709_v26, %s2549_s7 }
  0x2f   : > { %2303 = vmatpush3.bf16.msra.mxu0 %v2437_v11  ;;  %v2466_v11 = vld [vmem:[%s3084_s1 + $0x198] sm:$0xff]  }
  0x30   : > { %2304 = vmatprep.subr.bf16.mxu0 %v2547_v1 }
  0x31   : > { %2289 = vmatpush3.bf16.msra.mxu1 %v2441_v12  ;;  %v2467_v12 = vld [vmem:[%s3084_s1 + $0x120] sm:$0xff]  }
  0x32   : > { %2290 = vmatprep.subr.bf16.mxu1 %v2547_v1 }
  0x33   : > { %2305 = vmatpush3.bf16.msra.mxu0 %v2440_v13 }
  0x34   : > { %2306 = vmatprep.subr.bf16.mxu0 %v2547_v1 }
  0x35   : > { %2291 = vmatpush3.bf16.msra.mxu1 %v2443_v16  ;;  %v2470_v16 = vld [vmem:[%s3084_s1 + $0x130] sm:$0xff]  }
  0x36   : > { %2292 = vmatprep.subr.bf16.mxu1 %v2547_v1 }
  0x37   : > { %2307 = vmatpush3.bf16.msra.mxu0 %v2442_v15  ;;  %v2469_v15 = vld [vmem:[%s3084_s1 + $0x1a0] sm:$0xff]  }
  0x38   : > { %2308 = vmatprep.subr.bf16.mxu0 %v2547_v1 }
  0x39   : > { %2293 = vmatpush3.bf16.msra.mxu1 %v2445_v22  ;;  %v2474_v22 = vld [vmem:[%s3084_s1 + $0x140] sm:$0xff]  }
  0x3a   : > { %2318 = vmatprep.subr.bf16.mxu1 %v2547_v1 }
  0x3b   : > { %2309 = vmatpush3.bf16.msra.mxu0 %v2444_v21  ;;  %v2511_v21 = vld [vmem:[%s2603_s25 + $0x8] ss:$0 sps:$4 sm:$0xff]  }
  0x3c   : > { %2310 = vmatprep.subr.bf16.mxu0 %v2547_v1  ;;  %v1387_v26 = vshrl.u32 %v2511_v21, 16 }
  0x3f   : > { %2311 = vmatpush3.bf16.msra.mxu0 %v2446_v27  ;;  %v1390_v27 = vshll.u32 %v2511_v21, 16  ;;  %v2502_v21 = vld [vmem:[%s3084_s1 + $0x1f8] sm:$0xff]  }
  0x40   : > { %2312 = vmatprep.subr.bf16.mxu0 %v2547_v1 }
  0x43   : > { %2313 = vmatpush3.bf16.msra.mxu0 %v2447_v28  ;;  %v2517_v28 = vld [vmem:[%s2603_s25] ss:$0 sps:$4 sm:$0xff]  }
  0x44   : > { %2338 = vmatprep.subr.bf16.mxu0 %v2547_v1 }
  0x8a   : > { %v638_v30 = vpop.permute.xlu0 %637 }
  0x8b   : > { %v641_v31 = vsel %vm416_vm1, %v1965_v29, %v638_v30  ;;  %v2476_v29 = vld [vmem:[%s3084_s1 + $0x148] sm:$0xff]   ;;  %v2477_v30 = vld [vmem:[%s3084_s1 + $0x1c0] sm:$0xff]  }
  0x8c   : > { %v644_v32 = vshll.u32 %v641_v31, 16  ;;  %v642_v34 = vshrl.u32 %v641_v31, 16  ;;  %v845_v53 = vpop.permute.xlu1 %844 }
  0x8d   : > { %v848_v57 = vsel %vm416_vm1, %v1984_v54, %v845_v53  ;;  %v2483_v53 = vld [vmem:[%s3084_s1 + $0x1d0] sm:$0xff]   ;;  %v2484_v54 = vld [vmem:[%s3084_s1 + $0x2a0] sm:$0xff]  }
  0x8e   : > { %v646_v35 = vrot.slane %v644_v32, 1  ;;  %v621_v36 = vpop.permute.xlu0 %620  ;;  %v851_v60 = vshll.u32 %v848_v57, 16  ;;  %v849_v2 = vshrl.u32 %v848_v57, 16  ;;  %v2481_v32 = vld [vmem:[%s2603_s25 + $0x10] sm:$0x1e]  }
  0x8f   : > { %v624_v37 = vsel %vm416_vm1, %v608_v33, %v621_v36  ;;  %v1342_v36 = vshrl.u32 %v2517_v28, 16 }
  0x90   : > { %v647_v39 = vor.u32 %v646_v35, %v642_v34  ;;  %v737_v40 = vshrl.u32 %v624_v37, 16  ;;  %v739_v41 = vshll.u32 %v624_v37, 16  ;;  %v994_v59 = vpop.permute.xlu1 %993  ;;  %v853_v3 = vrot.slane %v851_v60, 1  ;;  %v2485_v60 = vld [vmem:[%s3084_s1 + $0x1d8] sm:$0xff]  }
  0x91   : > { %v997_v0 = vsel %vm416_vm1, %v2463_v58, %v994_v59  ;;  %v1389_v34 = vrot.slane %v1387_v26, 6  ;;  %v1392_v35 = vrot.slane %v1390_v27, 7  ;;  %v1345_v37 = vshll.u32 %v2517_v28, 16  ;;  %v2505_v26 = vld [vmem:[%s3084_s1 + $0x288] sm:$0xff]   ;;  %v2506_v27 = vld [vmem:[%s3084_s1 + $0x200] sm:$0xff]   ;;  %v2507_v28 = vld [vmem:[%s3084_s1 + $0x2d0] sm:$0xff]  }
  0x92   : > { %v741_v42 = vrot.slane %v739_v41, 1  ;;  %2295 = vmatmul.mubr.bf16.vlgmr.msra.gmra.mrb[4].mxu1 %v647_v39  ;;  %v998_v4 = vshrl.u32 %v997_v0, 16  ;;  %v1001_v5 = vshll.u32 %v997_v0, 16  ;;  %v854_v8 = vor.u32 %v853_v3, %v849_v2  ;;  %v970_v25 = vpop.permute.xlu0 %969  ;;  %v2480_v41 = vld [vmem:[%s3084_s1 + $0x1c8] sm:$0xff]   ;;  %v2488_v2 = vld [vmem:[%s3084_s1 + $0x220] sm:$0xff]  }
  0x93   : > { %2319 = vmatpush3.bf16.msra.mxu1 %v2448_v38  ;;  %2334 = vmatprep.mubr.msk.bf16.mxu1 %vm2548_vm0, %v2547_v1  ;;  %v973_v31 = vsel %vm416_vm1, %v2478_v24, %v970_v25  ;;  %v2487_v0 = vld [vmem:[%s3084_s1 + $0x2a8] sm:$0xff]  }
  0x94   : > { %v742_v45 = vor.u32 %v741_v42, %v737_v40  ;;  %2320 = vmatprep.subr.bf16.mxu1 %v2547_v1  ;;  %v1000_v9 = vrot.slane %v998_v4, 1  ;;  %v1003_v10 = vrot.slane %v1001_v5, 2  ;;  %v1210_v33 = vpop.permute.xlu1 %1209  ;;  %v1094_v38 = vshrl.u32 %v973_v31, 16  ;;  %v2479_v40 = vld [vmem:[%s3084_s1 + $0x150] sm:$0xff]  }
  0x95   : > { %v1097_v39 = vshll.u32 %v973_v31, 16  ;;  %v1213_v42 = vsel %vm416_vm1, %v2481_v32, %v1210_v33 }
  0x96   : > { %2315 = vmatmul.mubr.bf16.vlgmr.msra.gmra.mrb[8].mxu0 %v742_v45  ;;  %v1004_v13 = vor.u32 %v1003_v10, %v1000_v9  ;;  %v1344_v45 = vrot.slane %v1342_v36, 6  ;;  %v2493_v10 = vld [vmem:[%s3084_s1 + $0x270] sm:$0xff]  }
  0x97   : > { %2321 = vmatpush3.bf16.msra.mxu1 %v2449_v43  ;;  %2339 = vmatpush3.bf16.msra.mxu0 %v2450_v44  ;;  %v1393_v43 = vor.u32 %v1392_v35, %v1389_v34  ;;  %v1399_v44 = vpop.permute.xlu0 %1398  ;;  %v2509_v34 = vld [vmem:[%s3084_s1 + $0x290] sm:$0xff]   ;;  %v2510_v35 = vld [vmem:[%s3084_s1 + $0x208] sm:$0xff]  }
  0x98   : > { %2322 = vmatprep.subr.bf16.mxu1 %v2547_v1  ;;  %2340 = vmatprep.subr.bf16.mxu0 %v2547_v1  ;;  %v1382_v33 = vpop.permute.xlu1 %1381 }
  0x99   : > { %2354 = vmatprep.mubr.msk.bf16.mxu0 %vm2548_vm0, %v2547_v1  ;;  %v1405_v59 = vsel %vm416_vm1, %v1393_v43, %v1399_v44  ;;  %v2516_v43 = vld [vmem:[%s3084_s1 + $0x210] sm:$0xff]  }
  0x9a   : > { %v1409_v3 = vrot.slane %v1405_v59, 2 }
  0x9b   : > { %2323 = vmatpush3.bf16.msra.mxu1 %v2452_v46  ;;  %2341 = vmatpush3.bf16.msra.mxu0 %v2453_v47  ;;  %v1347_v46 = vrot.slane %v1345_v37, 7  ;;  %v1096_v47 = vrot.slane %v1094_v38, 1  ;;  %v2513_v37 = vld [vmem:[%s3084_s1 + $0x2d8] sm:$0xff]   ;;  %v2514_v38 = vld [vmem:[%s3084_s1 + $0x250] sm:$0xff]  }
  0x9c   : > { %2324 = vmatprep.subr.bf16.mxu1 %v2547_v1  ;;  %2342 = vmatprep.subr.bf16.mxu0 %v2547_v1 }
  0x9f   : > { %2325 = vmatpush3.bf16.msra.mxu1 %v2455_v48  ;;  %2343 = vmatpush3.bf16.msra.mxu0 %v2456_v49  ;;  %v1099_v48 = vrot.slane %v1097_v39, 2  ;;  %v1214_v49 = vshrl.u32 %v1213_v42, 16  ;;  %v1316_v39 = vld [vmem:[%s2603_s25] sm:$0xc] }
  0xa0   : > { %2326 = vmatprep.subr.bf16.mxu1 %v2547_v1  ;;  %2344 = vmatprep.subr.bf16.mxu0 %v2547_v1  ;;  %v2033_v44 = vcombine.low %v1316_v39, %v2683_v62 }
  0xa1   : > { %v1216_v57 = vrot.slane %v1214_v49, 1 }
  0xa3   : > { %2327 = vmatpush3.bf16.msra.mxu1 %v2457_v50  ;;  %2345 = vmatpush3.bf16.msra.mxu0 %v2458_v51  ;;  %v1217_v50 = vshll.u32 %v1213_v42, 16  ;;  %v2482_v51 = vld [vmem:[%s3084_s1 + $0x158] sm:$0xff]  }
  0xa4   : > { %2328 = vmatprep.subr.bf16.mxu1 %v2547_v1  ;;  %2346 = vmatprep.subr.bf16.mxu0 %v2547_v1 }
  0xa5   : > { %v1219_v58 = vrot.slane %v1217_v50, 2 }
  0xa7   : > { %2329 = vmatpush3.bf16.msra.mxu1 %v2459_v55  ;;  %2347 = vmatpush3.bf16.msra.mxu0 %v2460_v56  ;;  %v1348_v55 = vor.u32 %v1347_v46, %v1344_v45  ;;  %v1100_v56 = vor.u32 %v1099_v48, %v1096_v47  ;;  %v1220_v4 = vor.u32 %v1219_v58, %v1216_v57  ;;  %v1337_v45 = vpop.permute.xlu1 %1336  ;;  %v2519_v46 = vld [vmem:[%s3084_s1 + $0x258] sm:$0xff]   ;;  %v2520_v47 = vld [vmem:[%s3084_s1 + $0x320] sm:$0xff]  }
  0xa8   : > { %2330 = vmatprep.subr.bf16.mxu1 %v2547_v1  ;;  %2348 = vmatprep.subr.bf16.mxu0 %v2547_v1  ;;  %v1357_v62 = vsel %vm416_vm1, %v2033_v44, %v1337_v45 }
  0xa9   : > { %v1550_v59 = vrot.slane %v1357_v62, 2 }
  0xab   : > { %2331 = vmatpush3.bf16.msra.mxu1 %v2461_v61  ;;  %2349 = vmatpush3.bf16.msra.mxu0 %v2462_v63  ;;  %v2486_v61 = vld [vmem:[%s3084_s1 + $0x260] sm:$0xff]   ;;  %v1354_v63 = vpop.permute.xlu0 %1353 }
  0xac   : > { %2332 = vmatprep.subr.bf16.mxu1 %v2547_v1  ;;  %2350 = vmatprep.subr.bf16.mxu0 %v2547_v1  ;;  %v1360_v5 = vsel %vm416_vm1, %v1348_v55, %v1354_v63 }
  0xad   : > { %v1551_v9 = vrot.slane %v1360_v5, 2 }
  0xaf   : > { %2333 = vmatpush3.bf16.msra.mxu1 %v2464_v6  ;;  %2351 = vmatpush3.bf16.msra.mxu0 %v2465_v7  ;;  %v2490_v6 = vld [vmem:[%s3084_s1 + $0x1e0] sm:$0xff]   ;;  %v2491_v7 = vld [vmem:[%s3084_s1 + $0x2b0] sm:$0xff]  }
  0xb0   : > { %2352 = vmatprep.subr.bf16.mxu0 %v2547_v1  ;;  %2358 = vmatprep.subr.bf16.mxu1 %v2547_v1 }
  0xb2   : > { %2335 = vmatmul.mubr.bf16.vlgmr.msra.gmra.mrb[8].mxu1 %v854_v8  ;;  %v2492_v8 = vld [vmem:[%s3084_s1 + $0x228] sm:$0xff]  }
  0xb3   : > { %2353 = vmatpush3.bf16.msra.mxu0 %v2466_v11  ;;  %2359 = vmatpush3.bf16.msra.mxu1 %v2467_v12  ;;  %v2494_v11 = vld [vmem:[%s3084_s1 + $0x1e8] sm:$0xff]   ;;  %v2495_v12 = vld [vmem:[%s3084_s1 + $0x2b8] sm:$0xff]  }
  0xb4   : > { %2360 = vmatprep.subr.bf16.mxu1 %v2547_v1  ;;  %2378 = vmatprep.subr.bf16.mxu0 %v2547_v1 }
  0xb5   : > { %2374 = vmatprep.mubr.msk.bf16.mxu1 %vm2548_vm0, %v2547_v1 }
  0xb6   : > { %2355 = vmatmul.mubr.bf16.vlgmr.msra.gmra.mrb[12].mxu0 %v1004_v13  ;;  %v2496_v13 = vld [vmem:[%s3084_s1 + $0x230] sm:$0xff]  }
  0xb7   : > { %2361 = vmatpush3.bf16.msra.mxu1 %v2468_v14  ;;  %2379 = vmatpush3.bf16.msra.mxu0 %v2469_v15  ;;  %v2497_v14 = vld [vmem:[%s3084_s1 + $0x278] sm:$0xff]   ;;  %v2498_v15 = vld [vmem:[%s3084_s1 + $0x1f0] sm:$0xff]  }
  0xb8   : > { %2362 = vmatprep.subr.bf16.mxu1 %v2547_v1  ;;  %2380 = vmatprep.subr.bf16.mxu0 %v2547_v1 }
  0xb9   : > { %2394 = vmatprep.mubr.msk.bf16.mxu0 %vm2548_vm0, %v2547_v1 }
  0xbb   : > { %2363 = vmatpush3.bf16.msra.mxu1 %v2470_v16  ;;  %2381 = vmatpush3.bf16.msra.mxu0 %v2471_v17  ;;  %v2499_v16 = vld [vmem:[%s3084_s1 + $0x2c0] sm:$0xff]   ;;  %v2500_v17 = vld [vmem:[%s3084_s1 + $0x238] sm:$0xff]  }
  0xbc   : > { %2364 = vmatprep.subr.bf16.mxu1 %v2547_v1  ;;  %2382 = vmatprep.subr.bf16.mxu0 %v2547_v1 }
  0xbf   : > { %2365 = vmatpush3.bf16.msra.mxu1 %v2472_v19  ;;  %2383 = vmatpush3.bf16.msra.mxu0 %v2473_v20  ;;  %v2535_v19 = vld [vmem:[%s2603_s25 + $0x10] ss:$0 sps:$4 sm:$0xff]   ;;  %v2501_v20 = vld [vmem:[%s3084_s1 + $0x280] sm:$0xff]  }
  0xc0   : > { %2366 = vmatprep.subr.bf16.mxu1 %v2547_v1  ;;  %2384 = vmatprep.subr.bf16.mxu0 %v2547_v1  ;;  %v1716_v24 = vshrl.u32 %v2535_v19, 16  ;;  %v1719_v25 = vshll.u32 %v2535_v19, 16  ;;  %v2532_v19 = vld [vmem:[%s3084_s1 + $0x308] sm:$0xff]  }
  0xc2   : > { %v1718_v31 = vrot.slane %v1716_v24, 6  ;;  %v1721_v32 = vrot.slane %v1719_v25, 7  ;;  %v1711_v25 = vpop.permute.xlu1 %1710 }
  0xc3   : > { %2367 = vmatpush3.bf16.msra.mxu1 %v2474_v22  ;;  %2385 = vmatpush3.bf16.msra.mxu0 %v2475_v23  ;;  %v2503_v22 = vld [vmem:[%s3084_s1 + $0x2c8] sm:$0xff]   ;;  %v2504_v23 = vld [vmem:[%s3084_s1 + $0x240] sm:$0xff]  }
  0xc4   : > { %2368 = vmatprep.subr.bf16.mxu1 %v2547_v1  ;;  %2386 = vmatprep.subr.bf16.mxu0 %v2547_v1 }
  0xc7   : > { %2369 = vmatpush3.bf16.msra.mxu1 %v2476_v29  ;;  %2387 = vmatpush3.bf16.msra.mxu0 %v2477_v30  ;;  %v2508_v29 = vld [vmem:[%s3084_s1 + $0x248] sm:$0xff]  }
  0xc8   : > { %2370 = vmatprep.subr.bf16.mxu1 %v2547_v1  ;;  %2388 = vmatprep.subr.bf16.mxu0 %v2547_v1  ;;  %v2037_v30 = vld [vmem:[%s2603_s25 + $0x8] sm:$0xc] }
  0xc9   : > { %v2042_v36 = vcombine.low %v2037_v30, %v2666_v52  ;;  %v2515_v52 = vld [vmem:[%s3084_s1 + $0x298] sm:$0xff]  }
  0xcb   : > { %2371 = vmatpush3.bf16.msra.mxu1 %v2479_v40  ;;  %2389 = vmatpush3.bf16.msra.mxu0 %v2480_v41  ;;  %v1722_v40 = vor.u32 %v1721_v32, %v1718_v31  ;;  %v1728_v41 = vpop.permute.xlu0 %1727  ;;  %v1402_v42 = vsel %vm416_vm1, %v2042_v36, %v1382_v33 }
  0xcc   : > { %2372 = vmatprep.subr.bf16.mxu1 %v2547_v1  ;;  %2390 = vmatprep.subr.bf16.mxu0 %v2547_v1  ;;  %v1408_v50 = vrot.slane %v1402_v42, 2 }
  0xcd   : > { %v1734_v48 = vsel %vm416_vm1, %v1722_v40, %v1728_v41 }
  0xce   : > { %v1738_v57 = vrot.slane %v1734_v48, 2 }
  0xcf   : > { %2373 = vmatpush3.bf16.msra.mxu1 %v2482_v51  ;;  %2391 = vmatpush3.bf16.msra.mxu0 %v2483_v53  ;;  %v2521_v53 = vld [vmem:[%s3084_s1 + $0x218] sm:$0xff]  }
  0xd0   : > { %2392 = vmatprep.subr.bf16.mxu0 %v2547_v1  ;;  %2176 = vmatprep.subr.bf16.mxu1 %v2484_v54  ;;  %v2489_v1 = vld [vmem:[%s3084_s1 + $0x268] sm:$0xff]   ;;  %v2522_v54 = vld [vmem:[%s3084_s1 + $0x2e0] sm:$0xff]  }
  0xd2   : > { %2375 = vmatmul.mubr.bf16.vlgmr.msra.gmra.mrb[12].mxu1 %v1100_v56  ;;  %v2523_v56 = vld [vmem:[%s3084_s1 + $0x328] sm:$0xff]  }
  0xd3   : > { %2393 = vmatpush3.bf16.msra.mxu0 %v2485_v60  ;;  %2177 = vmatpush3.bf16.msra.mxu1 %v2486_v61  ;;  %v2524_v60 = vld [vmem:[%s3084_s1 + $0x2e8] sm:$0xff]   ;;  %v2525_v61 = vld [vmem:[%s3084_s1 + $0x330] sm:$0xff]  }
  0xd4   : > { %2178 = vmatprep.subr.bf16.mxu1 %v2487_v0  ;;  %2198 = vmatprep.subr.bf16.mxu0 %v2488_v2 }
  0xd5   : > { %1540 = vmatprep.mubr.bf16.mxu1 %v1409_v3 }
  0xd6   : > { %2395 = vmatmul.mubr.bf16.vlgmr.msra.gmra.mrb[16].mxu0 %v1220_v4  ;;  %v2526_v4 = vld [vmem:[%s3084_s1 + $0x2f0] sm:$0xff]  }
  0xd7   : > { %2179 = vmatpush3.bf16.msra.mxu1 %v2489_v1  ;;  %2199 = vmatpush3.bf16.msra.mxu0 %v2490_v6  ;;  %v2527_v1 = vld [vmem:[%s3084_s1 + $0x338] sm:$0xff]  }
  0xd8   : > { %2180 = vmatprep.subr.bf16.mxu1 %v2491_v7  ;;  %2200 = vmatprep.subr.bf16.mxu0 %v2492_v8  ;;  %v2528_v6 = vld [vmem:[%s3084_s1 + $0x2f8] sm:$0xff]   ;;  %v2529_v7 = vld [vmem:[%s3084_s1 + $0x340] sm:$0xff]  }
  0xd9   : > { %1682 = vmatprep.mubr.bf16.mxu0 %v1551_v9  ;;  %v3036_v8 = vld [vmem:[%s3085_s2] ss:$0 sm:$0xff] }
  0xdb   : > { %2181 = vmatpush3.bf16.msra.mxu1 %v2493_v10  ;;  %2201 = vmatpush3.bf16.msra.mxu0 %v2494_v11 }
  0xdc   : > { %2182 = vmatprep.subr.bf16.mxu1 %v2495_v12  ;;  %2202 = vmatprep.subr.bf16.mxu0 %v2496_v13  ;;  %v2530_v12 = vld [vmem:[%s3084_s1 + $0x300] sm:$0xff]  }
  0xdf   : > { %2183 = vmatpush3.bf16.msra.mxu1 %v2497_v14  ;;  %2203 = vmatpush3.bf16.msra.mxu0 %v2498_v15  ;;  %v2531_v14 = vld [vmem:[%s3084_s1 + $0x348] sm:$0xff]  }
  0xe0   : > { %2184 = vmatprep.subr.bf16.mxu1 %v2499_v16  ;;  %2204 = vmatprep.subr.bf16.mxu0 %v2500_v17 }
  0xe3   : > { %2185 = vmatpush3.bf16.msra.mxu1 %v2501_v20  ;;  %2205 = vmatpush3.bf16.msra.mxu0 %v2502_v21  ;;  %v2533_v20 = vld [vmem:[%s3084_s1 + $0x350] sm:$0xff]  }
  0xe4   : > { %2186 = vmatprep.subr.bf16.mxu1 %v2503_v22  ;;  %2206 = vmatprep.subr.bf16.mxu0 %v2504_v23  ;;  %v2078_v21 = vld [vmem:[%s2603_s25 + $0x10] sm:$0xc] }
  0xe5   : > { %v2534_v23 = vld [vmem:[%s3084_s1 + $0x310] sm:$0xff]   ;;  %v2083_v24 = vcombine.low %v2078_v21, %v2727_v18 }
  0xe7   : > { %2187 = vmatpush3.bf16.msra.mxu1 %v2505_v26  ;;  %2207 = vmatpush3.bf16.msra.mxu0 %v2506_v27  ;;  %v2537_v26 = vld [vmem:[%s3084_s1 + $0x358] sm:$0xff]   ;;  %v1731_v27 = vsel %vm416_vm1, %v2083_v24, %v1711_v25 }
  0xe8   : > { %2188 = vmatprep.subr.bf16.mxu1 %v2507_v28  ;;  %2208 = vmatprep.subr.bf16.mxu0 %v2508_v29  ;;  %v2538_v28 = vld [vmem:[%s3084_s1 + $0x318] sm:$0xff]   ;;  %v1737_v29 = vrot.slane %v1731_v27, 2 }
  0xe9   : > { %v454_v49 = vpop.f32.mrb[0].mxu0 }
  0xea   : > { %v2252_v51 = vpop.f32.mrb[1].mxu0 }
  0xeb   : > { %2189 = vmatpush3.bf16.msra.mxu1 %v2509_v34  ;;  %2209 = vmatpush3.bf16.msra.mxu0 %v2510_v35  ;;  %v457_v55 = vpop.f32.mrb[2].mxu0 }
  0xec   : > { %2190 = vmatprep.subr.bf16.mxu1 %v2513_v37  ;;  %2210 = vmatprep.subr.bf16.mxu0 %v2514_v38  ;;  %v2253_v58 = vpop.f32.mrb[3].mxu0  ;;  %v521_v63 = vpop.f32.mrb[0].mxu1 }
  0xed   : > { %v522_v0 = vadd.f32 %v521_v63, %v454_v49  ;;  %v2264_v2 = vpop.f32.mrb[1].mxu1 }
  0xee   : > { %v524_v3 = vpop.f32.mrb[2].mxu1 }
  0xef   : > { %2191 = vmatpush3.bf16.msra.mxu1 %v2515_v52  ;;  %2211 = vmatpush3.bf16.msra.mxu0 %v2516_v43  ;;  %v2265_v5 = vpop.f32.mrb[3].mxu1 }
  0xf0   : > { %2212 = vmatprep.subr.bf16.mxu0 %v2519_v46  ;;  %2220 = vmatprep.subr.bf16.mxu1 %v2520_v47 }
  0xf2   : > { %1541 = vmatmul.mubr.bf16.vlgmr.msra.gmra.mrb[16].mxu1 %v1408_v50 }
  0xf3   : > { %2213 = vmatpush3.bf16.msra.mxu0 %v2521_v53  ;;  %2221 = vmatpush3.bf16.msra.mxu1 %v2522_v54 }
  0xf4   : > { %2222 = vmatprep.subr.bf16.mxu1 %v2523_v56  ;;  %1869 = vmatprep.mubr.bf16.mxu1 %v1738_v57 }
  0xf6   : > { %1683 = vmatmul.mubr.bf16.vlgmr.msra.gmra.mrb[20].mxu0 %v1550_v59 }
  0xf7   : > { %2223 = vmatpush3.bf16.msra.mxu1 %v2524_v60 }
  0xf8   : > { %2224 = vmatprep.subr.bf16.mxu1 %v2525_v61 }
  0xf9   : > { %v590_v9 = vpop.f32.mrb[4].mxu0 }
  0xfa   : > { %v596_v10 = vadd.f32 %v590_v9, %v522_v0  ;;  %v2276_v11 = vpop.f32.mrb[5].mxu0 }
  0xfb   : > { %2225 = vmatpush3.bf16.msra.mxu1 %v2526_v4  ;;  %v593_v13 = vpop.f32.mrb[6].mxu0 }
  0xfc   : > { %2226 = vmatprep.subr.bf16.mxu1 %v2527_v1  ;;  %v603_v15 = vadd.f32 %v3036_v8, %v596_v10  ;;  %v2277_v16 = vpop.f32.mrb[7].mxu0 }
  0xfe   : > { %v604_v17 = vmax.f32 %v603_v15, 0.0 }
  0xff   : > { %2227 = vmatpush3.bf16.msra.mxu1 %v2528_v6 }
 0x100   : > { %2228 = vmatprep.subr.bf16.mxu1 %v2529_v7  ;;  %v605_v22 = vpack.c.bf16 %v604_v17, %v604_v17 }
 0x102   : > { %607 = vst.msk [vmem:[%s3052_s16] sm:$0x7] %vm606_vm2, %v605_v22 }
 0x103   : > { %2229 = vmatpush3.bf16.msra.mxu1 %v2530_v12 }
 0x104   : > { %2230 = vmatprep.subr.bf16.mxu1 %v2531_v14 }
 0x107   : > { %2231 = vmatpush3.bf16.msra.mxu1 %v2532_v19 }
 0x108   : > { %2232 = vmatprep.subr.bf16.mxu1 %v2533_v20 }
 0x10b   : > { %2233 = vmatpush3.bf16.msra.mxu1 %v2534_v23 }
 0x10c   : > { %2234 = vmatprep.subr.bf16.mxu1 %v2537_v26 }
 0x10f   : > { %2235 = vmatpush3.bf16.msra.mxu1 %v2538_v28 }
 0x112   : > { %1870 = vmatmul.mubr.bf16.vlgmr.msra.gmra.mrb[20].mxu1 %v1737_v29 }
 0x165   : > { %v731_v30 = vpop.f32.mrb[4].mxu1 }
 0x166   : > { %v2296_v31 = vpop.f32.mrb[5].mxu1 }
 0x167   : > { %v734_v18 = vpop.f32.mrb[6].mxu1 }
 0x168   : > { %v2297_v32 = vpop.f32.mrb[7].mxu1 }
 0x169   : > { %v826_v33 = vpop.f32.mrb[8].mxu0 }
 0x16a   : > { %v827_v34 = vadd.f32 %v826_v33, %v731_v30  ;;  %v2316_v35 = vpop.f32.mrb[9].mxu0 }
 0x16b   : > { %v829_v36 = vpop.f32.mrb[10].mxu0 }
 0x16c   : > { %v2317_v37 = vpop.f32.mrb[11].mxu0 }
 0x185   : > { %v938_v38 = vpop.f32.mrb[8].mxu1 }
 0x186   : > { %v944_v39 = vadd.f32 %v938_v38, %v827_v34  ;;  %v2336_v40 = vpop.f32.mrb[9].mxu1 }
 0x187   : > { %v941_v41 = vpop.f32.mrb[10].mxu1 }
 0x188   : > { %v945_v42 = vadd.f32 %v3036_v8, %v944_v39  ;;  %v2337_v52 = vpop.f32.mrb[11].mxu1 }
 0x189   : > { %v1088_v43 = vpop.f32.mrb[12].mxu0 }
 0x18a   : > { %v946_v44 = vmax.f32 %v945_v42, 0.0  ;;  %v2356_v45 = vpop.f32.mrb[13].mxu0 }
 0x18b   : > { %v1091_v46 = vpop.f32.mrb[14].mxu0 }
 0x18c   : > { %v947_v47 = vpack.c.bf16 %v946_v44, %v946_v44  ;;  %v2357_v48 = vpop.f32.mrb[15].mxu0 }
 0x18e   : > { %1995 = vst.msk [vmem:[%s3052_s16 + $0x4] sm:$0x7] %vm606_vm2, %v947_v47 }
 0x1a5   : > { %v1184_v49 = vpop.f32.mrb[12].mxu1 }
 0x1a6   : > { %v1185_v50 = vadd.f32 %v1184_v49, %v1088_v43  ;;  %v2376_v51 = vpop.f32.mrb[13].mxu1 }
 0x1a7   : > { %v1187_v62 = vpop.f32.mrb[14].mxu1 }
 0x1a8   : > { %v2377_v53 = vpop.f32.mrb[15].mxu1 }
 0x1a9   : > { %v1304_v54 = vpop.f32.mrb[16].mxu0 }
 0x1aa   : > { %v1310_v55 = vadd.f32 %v1304_v54, %v1185_v50  ;;  %v2396_v56 = vpop.f32.mrb[17].mxu0 }
 0x1ab   : > { %v1307_v57 = vpop.f32.mrb[18].mxu0 }
 0x1ac   : > { %v1311_v58 = vadd.f32 %v3036_v8, %v1310_v55  ;;  %v2397_v59 = vpop.f32.mrb[19].mxu0 }
 0x1ae   : > { %v1312_v60 = vmax.f32 %v1311_v58, 0.0 }
 0x1b0   : > { %v1313_v61 = vpack.c.bf16 %v1312_v60, %v1312_v60 }
 0x1b2   : > { %2032 = vst.msk [vmem:[%s3052_s16 + $0x8] sm:$0x7] %vm606_vm2, %v1313_v61 }
 0x1c5   : > { %v2192_v63 = vpop.f32.mrb[16].mxu1 }
 0x1c6   : > { %v2193_v0 = vpop.f32.mrb[17].mxu1 }
 0x1c7   : > { %v2194_v2 = vadd.f32 %v2193_v0, %v2192_v63  ;;  %v2195_v3 = vpop.f32.mrb[18].mxu1 }
 0x1c8   : > { %v2196_v4 = vpop.f32.mrb[19].mxu1 }
 0x1c9   : > { %v2214_v5 = vpop.f32.mrb[20].mxu0 }
 0x1ca   : > { %v2215_v1 = vpop.f32.mrb[21].mxu0 }
 0x1cb   : > { %v2216_v6 = vadd.f32 %v2215_v1, %v2214_v5  ;;  %v2217_v7 = vpop.f32.mrb[22].mxu0 }
 0x1cc   : > { %v2218_v9 = vpop.f32.mrb[23].mxu0 }
 0x1cd   : > { %v1685_v10 = vadd.f32 %v2216_v6, %v2194_v2 }
 0x1e5   : > { %v2236_v11 = vpop.f32.mrb[20].mxu1 }
 0x1e6   : > { %v2237_v12 = vpop.f32.mrb[21].mxu1 }
 0x1e7   : > { %v2238_v13 = vadd.f32 %v2237_v12, %v2236_v11  ;;  %v2239_v14 = vpop.f32.mrb[22].mxu1 }
 0x1e8   : > { %v2240_v15 = vpop.f32.mrb[23].mxu1 }
 0x1e9   : > { %v1877_v16 = vadd.f32 %v2238_v13, %v1685_v10 }
 0x1eb   : > { %v1878_v17 = vadd.f32 %v3036_v8, %v1877_v16 }
 0x1ed   : > { %v1879_v19 = vmax.f32 %v1878_v17, 0.0 }
 0x1ef   : > { %v1880_v20 = vpack.c.bf16 %v1879_v19, %v1879_v19 }
 0x1f1   : > { %2103 = vst.msk [vmem:[%s3052_s16 + $0xc] sm:$0x7] %vm606_vm2, %v1880_v20 }
 0x1f2 PF: > { %s13_s12 = sadd.s32 1, %s2545_s12  }
 0x1f3   : > { %p10_p4 = scmp.ge.s32.totalorder %s13_s12, 4  }
 0x1f5   :  { %12 = sbr.rel (!%p10_p4) target bundleno = 1 (0x1), region = 67 }

// kernel: rise_mamba_forward.27
= control target key start
LH: loop header
LB: loop body
LE: loop exit
PB: predicated region body
PF: predicated region fallthrough
CT: control target
= control target key end

     0   :  { %s941_s12 = smov 0   ;;  %s1120_s0 = inlined_call_operand.vmem [shape: bf16[2,1,42,32], index: 0, kind: input, shape index: {}]   ;;  %s1121_s1 = inlined_call_operand.vmem [shape: bf16[288,128], index: 1, kind: input, shape index: {}]   ;;  %s1122_s2 = inlined_call_operand.vmem [shape: f32[1,128], index: 2, kind: input, shape index: {}]   ;;  %s1123_s3 = inlined_call_operand.vmem [shape: bf16[2,1,24,128], index: 3, kind: output, shape index: {}]  }
   0x1 LB: > { %s738_s13 = sadd.s32 4294967295, %s917_s12   ;;  %p742_p0 = scmp.ge.s32.totalorder %s917_s12, 1  ;;  %s917_s12 = sphi %s941_s12, %s13_s12  }
   0x2   : > { %p137_p1 = scmp.lt.s32.totalorder %s917_s12, 3 }
   0x4   : > { %p138_p2 = pnand %p742_p0, %p137_p1 }
   0x5   : > { %p161_p3 = scmp.lt.s32.totalorder (!%p138_p2), %s738_s13, 1  ;;  %v890_v0 = vld [vmem:[%s1121_s1 + $0x30] sm:$0xff] (!%p138_p2)   ;;  %v891_v1 = vld [vmem:[%s1121_s1 + $0x38] sm:$0xff] (!%p138_p2)   ;;  %v892_v2 = vld [vmem:[%s1121_s1 + $0x40] sm:$0xff] (!%p138_p2)   ;;  %vm225_vm0 = vsmask.f32 (!%p138_p2), 7424 }
   0x6   : > { %141 = sbr.rel (%p138_p2) target bundleno = 398 (0x18e), region = 32  ;;  %820 = vmatprep.subr.bf16.mxu0 (!%p138_p2), %v890_v0  ;;  %v894_v3 = vld [vmem:[%s1121_s1] sm:$0xff] (!%p138_p2)   ;;  %vm300_vm1 = vcmask (!%p138_p2), 1042432   ;;  %v893_v17 = vld [vmem:[%s1121_s1 + $0x48] sm:$0xff] (!%p138_p2)   ;;  %s919_s30 = smov (!%p138_p2), 64   ;;  %v895_v32 = vld [vmem:[%s1121_s1 + $0x50] sm:$0xff] (!%p138_p2)  }
   0x7   : > { %821 = vmatpush3.bf16.msra.mxu0 (!%p138_p2), %v890_v0  ;;  %836 = vmatprep.subr.bf16.mxu1 (!%p138_p2), %v894_v3  ;;  %v896_v23 = vld [vmem:[%s1121_s1 + $0x8] sm:$0xff] (!%p138_p2)   ;;  %vm248_vm2 = vcmask (!%p138_p2), 1046528   ;;  %v898_v44 = vld [vmem:[%s1121_s1 + $0x58] sm:$0xff] (!%p138_p2)   ;;  %v899_v45 = vld [vmem:[%s1121_s1 + $0x10] sm:$0xff] (!%p138_p2)   ;;  %s920_s10 = smov (!%p138_p2), 32   ;;  %vm256_vm3 = vcmask (!%p138_p2), 261120  }
   0x8   : > { %822 = vmatprep.subr.bf16.mxu0 (!%p138_p2), %v891_v1  ;;  %837 = vmatpush3.bf16.msra.mxu1 (!%p138_p2), %v894_v3  ;;  %v902_v54 = vld [vmem:[%s1121_s1 + $0x18] sm:$0xff] (!%p138_p2)   ;;  %v901_v61 = vld [vmem:[%s1121_s1 + $0x60] sm:$0xff] (!%p138_p2)   ;;  %v907_v3 = vld [vmem:[%s1121_s1 + $0x28] sm:$0xff] (!%p138_p2)   ;;  %vm262_vm4 = vcmask (!%p138_p2), 523264   ;;  %vm319_vm5 = vcmask (!%p138_p2), 1044480   ;;  %vm359_vm6 = vcmask (!%p138_p2), 785408  }
   0x9   : > { %838 = vmatprep.subr.bf16.mxu1 (!%p138_p2), %v896_v23  ;;  %v904_v0 = vld [vmem:[%s1121_s1 + $0x20] sm:$0xff] (!%p138_p2)   ;;  %vm561_vm7 = vcmask (!%p138_p2), 1045504  }
   0xb   : > { %823 = vmatpush3.bf16.msra.mxu0 (!%p138_p2), %v891_v1 }
   0xc   : > { %824 = vmatprep.subr.bf16.mxu0 (!%p138_p2), %v892_v2  ;;  %839 = vmatpush3.bf16.msra.mxu1 (!%p138_p2), %v896_v23 }
   0xd   : > { %s1125_s13 = smov (!%p161_p3, %s738_s13), 1  ;;  %840 = vmatprep.subr.bf16.mxu1 %v899_v45 }
   0xe   : > { %s868_s18 = smul.u32 24, %s1125_s13 }
   0xf   : > { %825 = vmatpush3.bf16.msra.mxu0 %v892_v2  ;;  %s869_s4 = smul.u32 12, %s1125_s13 }
  0x10   : > { %s967_s25 = scalar_lea.vmem %s1120_s0, %s868_s18  ;;  %826 = vmatprep.subr.bf16.mxu0 %v893_v17  ;;  %841 = vmatpush3.bf16.msra.mxu1 %v899_v45 }
  0x11   : > { %v970_v4 = vld [vmem:[%s967_s25 + $0x4] sm:$0xf]  ;;  %v973_v5 = vld [vmem:[%s967_s25 + $0x8] sm:$0xf]  ;;  %v267_v6 = vld [vmem:[%s967_s25] sm:$0x8]  ;;  %842 = vmatprep.subr.bf16.mxu1 %v902_v54  ;;  %s170_s9 = scalar_lea.vmem %s1123_s3, %s869_s4 }
  0x12   : > { %v269_v7 = vld [vmem:[%s967_s25 + $0xc] sm:$0xf]  ;;  %v978_v8 = vcombine.low %v267_v6, %v970_v4  ;;  %v752_v9 = vcombine.low %v970_v4, %v973_v5  ;;  %v506_v11 = vld [vmem:[%s967_s25 + $0x10] sm:$0x7]  ;;  %v502_v15 = vld [vmem:[%s967_s25 + $0x4] sm:$0xc] }
  0x13   : > { %v983_v10 = vld [vmem:[%s967_s25 + $0xc] sm:$0xf]  ;;  %v751_v12 = vcombine.low %v973_v5, %v269_v7  ;;  %v753_v13 = vcombine.low %v269_v7, %v269_v7  ;;  %v503_v16 = vld [vmem:[%s967_s25 + $0x8] sm:$0xf]  ;;  %v507_v22 = vld [vmem:[%s967_s25 + $0x4] sm:$0x8]  ;;  %827 = vmatpush3.bf16.msra.mxu0 %v893_v17 }
  0x14   : > { %v988_v14 = vcombine.low %v983_v10, %v506_v11  ;;  %v280_v18 = vshrl.u32 %v978_v8, 16  ;;  %v282_v19 = vshll.u32 %v978_v8, 16  ;;  %v301_v20 = vrot.slane %v752_v9, 5  ;;  %v209_v26 = vld [vmem:[%s967_s25] sm:$0xf]  ;;  %828 = vmatprep.subr.bf16.mxu0 %v895_v32  ;;  %843 = vmatpush3.bf16.msra.mxu1 %v902_v54 }
  0x15   : > { %v997_v21 = vcombine.low %v502_v15, %v503_v16  ;;  %v287_v24 = vshll.u32 %v751_v12, 16  ;;  %v302_v25 = vrot.slane %v753_v13, 5  ;;  %v212_v27 = vld [vmem:[%s967_s25 + $0xc] sm:$0x1]  ;;  %v291_v29 = vshrl.u32 %v751_v12, 16  ;;  %844 = vmatprep.subr.bf16.mxu1 %v904_v0 }
  0x16   : > { %v284_v28 = vrot.slane %v282_v19, 1  ;;  %304 = vrot.lane.b32.xlu1 %v301_v20, %s919_s30  ;;  %v529_v30 = vshll.u32 %v988_v14, 16  ;;  %v533_v31 = vshrl.u32 %v988_v14, 16  ;;  %v773_v36 = vcombine.low %v507_v22, %v503_v16  ;;  %v1020_v41 = vld [vmem:[%s967_s25 + $0xc] sm:$0x7] }
  0x17   : > { %v289_v33 = vrot.slane %v287_v24, 1  ;;  %v303_v34 = vsel %vm300_vm1, %v301_v20, %v302_v25  ;;  %v524_v35 = vshll.u32 %v997_v21, 16  ;;  %v1014_v39 = vcombine.low %v209_v26, %v970_v4  ;;  %v1033_v49 = vld [vmem:[%s967_s25 + $0x10] sm:$0x3]  ;;  %829 = vmatpush3.bf16.msra.mxu0 %v895_v32  ;;  %v213_v1 = vld [vmem:[%s967_s25] sm:$0xe] }
  0x18   : > { %v285_v37 = vor.u32 %v284_v28, %v280_v18  ;;  %v531_v38 = vrot.slane %v529_v30, 1  ;;  %v1017_v40 = vcombine.low %v973_v5, %v212_v27  ;;  %v543_v47 = vrot.slane %v773_v36, 1  ;;  %830 = vmatprep.subr.bf16.mxu0 %v898_v44  ;;  %845 = vmatpush3.bf16.msra.mxu1 %v904_v0 }
  0x19   : > { %v293_v46 = vor.u32 %v291_v29, %v289_v33  ;;  %v522_v50 = vshrl.u32 %v997_v21, 16  ;;  %v526_v51 = vrot.slane %v524_v35, 1  ;;  %v229_v52 = vshll.u32 %v1014_v39, 16  ;;  %846 = vmatprep.subr.bf16.mxu1 %v907_v3  ;;  %v906_v35 = vld [vmem:[%s1121_s1 + $0x70] sm:$0xff]  }
  0x1a   : > { %v290_v42 = vsel %vm225_vm0, %v285_v37, %v289_v33  ;;  %306 = vrot.lane.b32.xlu1 %v303_v34, %s919_s30  ;;  %v535_v43 = vor.u32 %v533_v31, %v531_v38  ;;  %v234_v48 = vshll.u32 %v1017_v40, 16  ;;  %v750_v53 = vcombine.low %v973_v5, %v1020_v41 }
  0x1b   : > { %294 = vrot.lane.b32.xlu0 %v290_v42, %s920_s10  ;;  %v544_v55 = vrot.slane %v988_v14, 1  ;;  %v771_v56 = vcombine.low %v983_v10, %v1033_v49  ;;  %v238_v58 = vshrl.u32 %v1017_v40, 16  ;;  %v227_v60 = vshrl.u32 %v1014_v39, 16  ;;  %831 = vmatpush3.bf16.msra.mxu0 %v898_v44 }
  0x1c   : > { %v236_v57 = vrot.slane %v234_v48, 1  ;;  %v527_v62 = vor.u32 %v526_v51, %v522_v50  ;;  %v231_v63 = vrot.slane %v229_v52, 1  ;;  %852 = vmatprep.subr.bf16.mxu0 %v901_v61  ;;  %v748_v9 = vcombine.low %v213_v1, %v970_v4  ;;  %847 = vmatpush3.bf16.msra.mxu1 %v907_v3 }
  0x1d   : > { %v545_v59 = vsel %vm248_vm2, %v543_v47, %v544_v55  ;;  %v250_v12 = vrot.slane %v1017_v40, 1  ;;  %v746_v34 = vcombine.low %v973_v5, %v973_v5 }
  0x1e   : > { %538 = vrot.lane.b32.xlu1 %v535_v43, %s920_s10  ;;  %v240_v2 = vor.u32 %v238_v58, %v236_v57  ;;  %v532_v6 = vsel %vm225_vm0, %v527_v62, %v531_v38  ;;  %v232_v7 = vor.u32 %v231_v63, %v227_v60  ;;  %v249_v11 = vrot.slane %v748_v9, 1  ;;  %v782_v58 = vld [vmem:[%s1122_s2] ss:$0 sm:$0xff] }
  0x1f   : > { %296 = vrot.lane.b32.xlu0 %v293_v46, %s920_s10  ;;  %v909_v46 = vld [vmem:[%s1121_s1 + $0x80] sm:$0xff]  }
  0x20   : > { %v237_v10 = vsel %vm225_vm0, %v232_v7, %v236_v57  ;;  %v251_v13 = vsel %vm248_vm2, %v249_v11, %v250_v12 }
  0x22   : > { %546 = vrot.lane.b32.xlu1 %v545_v59, %s919_s30 }
  0x23   : > { %548 = vrot.lane.b32.xlu0 %v544_v55, %s919_s30 }
  0x26   : > { %243 = vrot.lane.b32.xlu1 %v240_v2, %s920_s10 }
  0x27   : > { %536 = vrot.lane.b32.xlu0 %v532_v6, %s920_s10 }
  0x2a   : > { %254 = vrot.lane.b32.xlu1 %v250_v12, %s919_s30 }
  0x2b   : > { %241 = vrot.lane.b32.xlu0 %v237_v10, %s920_s10 }
  0x2f   : > { %252 = vrot.lane.b32.xlu0 %v251_v13, %s919_s30 }
  0x88   : > { %v305_v4 = vpop.permute.xlu1 %304 }
  0x8c   : > { %v307_v14 = vpop.permute.xlu1 %306 }
  0x8d   : > { %v295_v15 = vpop.permute.xlu0 %294 }
  0x8e   : > { %v309_v16 = vsel %vm256_vm3, %v978_v8, %v295_v15  ;;  %v903_v8 = vld [vmem:[%s1121_s1 + $0x68] sm:$0xff]  }
  0x8f   : > { %v314_v18 = vsel %vm262_vm4, %v309_v16, %v305_v4 }
  0x90   : > { %v539_v17 = vpop.permute.xlu1 %538  ;;  %v320_v23 = vrot.slane %v314_v18, 3 }
  0x91   : > { %v297_v19 = vpop.permute.xlu0 %296  ;;  %v554_v25 = vsel %vm256_vm3, %v771_v56, %v539_v17 }
  0x92   : > { %v312_v20 = vsel %vm256_vm3, %v750_v53, %v297_v19 }
  0x93   : > { %v316_v22 = vsel %vm262_vm4, %v312_v20, %v307_v14 }
  0x94   : > { %v321_v24 = vrot.slane %v316_v22, 3  ;;  %v547_v26 = vpop.permute.xlu1 %546 }
  0x95   : > { %v549_v27 = vpop.permute.xlu0 %548 }
  0x96   : > { %v322_v28 = vsel %vm319_vm5, %v320_v23, %v321_v24  ;;  %v558_v29 = vsel %vm262_vm4, %v554_v25, %v549_v27 }
  0x97   : > { %832 = vmatprep.mubr.msk.bf16.mxu0 %vm359_vm6, %v322_v28  ;;  %v563_v32 = vrot.slane %v558_v29, 2 }
  0x98   : > { %833 = vmatmul.mubr.msk.bf16.vlgmr.msra.gmra.mrb[0].mxu0 %vm359_vm6, %v321_v24  ;;  %v244_v30 = vpop.permute.xlu1 %243 }
  0x99   : > { %853 = vmatpush3.bf16.msra.mxu0 %v901_v61  ;;  %v537_v31 = vpop.permute.xlu0 %536  ;;  %v261_v40 = vsel %vm256_vm3, %v746_v34, %v244_v30 }
  0x9a   : > { %v551_v33 = vsel %vm256_vm3, %v997_v21, %v537_v31  ;;  %854 = vmatprep.subr.bf16.mxu0 %v903_v8  ;;  %v908_v21 = vld [vmem:[%s1121_s1 + $0x78] sm:$0xff]  }
  0x9b   : > { %v556_v36 = vsel %vm262_vm4, %v551_v33, %v547_v26 }
  0x9c   : > { %v562_v37 = vrot.slane %v556_v36, 2  ;;  %v255_v41 = vpop.permute.xlu1 %254 }
  0x9d   : > { %855 = vmatpush3.bf16.msra.mxu0 %v903_v8  ;;  %v242_v38 = vpop.permute.xlu0 %241  ;;  %v266_v44 = vsel %vm262_vm4, %v261_v40, %v255_v41 }
  0x9e   : > { %856 = vmatprep.subr.bf16.mxu0 %v906_v35  ;;  %v564_v42 = vsel %vm561_vm7, %v562_v37, %v563_v32  ;;  %v258_v5 = vsel %vm256_vm3, %v1014_v39, %v242_v38  ;;  %v910_v39 = vld [vmem:[%s1121_s1 + $0x88] sm:$0xff]  }
  0x9f   : > { %864 = vmatprep.mubr.msk.bf16.mxu0 %vm359_vm6, %v564_v42 }
  0xa1   : > { %857 = vmatpush3.bf16.msra.mxu0 %v906_v35  ;;  %v253_v43 = vpop.permute.xlu0 %252 }
  0xa2   : > { %v264_v45 = vsel %vm262_vm4, %v258_v5, %v253_v43  ;;  %858 = vmatprep.subr.bf16.mxu0 %v908_v21 }
  0xa3   : > { %848 = vmatprep.mubr.msk.bf16.mxu1 %vm359_vm6, %v264_v45 }
  0xa4   : > { %849 = vmatmul.mubr.msk.bf16.vlgmr.msra.gmra.mrb[0].mxu1 %vm359_vm6, %v266_v44 }
  0xa5   : > { %859 = vmatpush3.bf16.msra.mxu0 %v908_v21 }
  0xa6   : > { %860 = vmatprep.subr.bf16.mxu0 %v909_v46 }
  0xa9   : > { %861 = vmatpush3.bf16.msra.mxu0 %v909_v46 }
  0xaa   : > { %862 = vmatprep.subr.bf16.mxu0 %v910_v39 }
  0xad   : > { %863 = vmatpush3.bf16.msra.mxu0 %v910_v39 }
  0xb0   : > { %865 = vmatmul.mubr.msk.bf16.vlgmr.msra.gmra.mrb[4].mxu0 %vm359_vm6, %v563_v32 }
 0x16b   : > { %v834_v47 = vpop.f32.mrb[0].mxu0 }
 0x16c   : > { %v400_v48 = vpop.f32.mrb[1].mxu0 }
 0x16d   : > { %v835_v49 = vpop.f32.mrb[2].mxu0 }
 0x16e   : > { %v403_v50 = vpop.f32.mrb[3].mxu0 }
 0x177   : > { %v850_v51 = vpop.f32.mrb[0].mxu1 }
 0x178   : > { %v497_v52 = vadd.f32 %v850_v51, %v834_v47  ;;  %v488_v53 = vpop.f32.mrb[1].mxu1 }
 0x179   : > { %v489_v54 = vadd.f32 %v488_v53, %v400_v48  ;;  %v851_v55 = vpop.f32.mrb[2].mxu1 }
 0x17a   : > { %v491_v56 = vpop.f32.mrb[3].mxu1 }
 0x17b   : > { %v492_v57 = vadd.f32 %v491_v56, %v403_v50 }
 0x183   : > { %v866_v59 = vpop.f32.mrb[4].mxu0 }
 0x184   : > { %v657_v60 = vadd.f32 %v866_v59, %v497_v52  ;;  %v641_v61 = vpop.f32.mrb[5].mxu0 }
 0x185   : > { %v655_v62 = vadd.f32 %v641_v61, %v489_v54  ;;  %v867_v63 = vpop.f32.mrb[6].mxu0 }
 0x186   : > { %v666_v0 = vadd.f32 %v782_v58, %v657_v60  ;;  %v644_v1 = vpop.f32.mrb[7].mxu0 }
 0x187   : > { %v656_v2 = vadd.f32 %v644_v1, %v492_v57  ;;  %v664_v6 = vadd.f32 %v782_v58, %v655_v62 }
 0x188   : > { %v790_v3 = vpack.c.bf16 %v666_v0, %v666_v0 }
 0x189   : > { %v665_v7 = vadd.f32 %v782_v58, %v656_v2 }
 0x18a   : > { %682 = vst [vmem:[%s170_s9 + $0x8] sm:$0xf] %v790_v3 }
 0x18b   : > { %v794_v9 = vpack.c.bf16 %v665_v7, %v664_v6 }
 0x18d   : > { %795 = vst [vmem:[%s170_s9] sm:$0xff] %v794_v9  }
 0x18e PF: > { %s13_s12 = sadd.s32 1, %s917_s12  }
 0x18f   : > { %p10_p4 = scmp.ge.s32.totalorder %s13_s12, 4  }
 0x191   :  { %12 = sbr.rel (!%p10_p4) target bundleno = 1 (0x1), region = 62 }

// kernel: rise_mamba_forward.28
= control target key start
LH: loop header
LB: loop body
LE: loop exit
PB: predicated region body
PF: predicated region fallthrough
CT: control target
= control target key end

     0   :  { %s1484_s12 = smov 0   ;;  %s1965_s0 = inlined_call_operand.vmem [shape: bf16[2,1,110,32], index: 0, kind: input, shape index: {}]   ;;  %s1966_s1 = inlined_call_operand.vmem [shape: bf16[288,64], index: 1, kind: input, shape index: {}]   ;;  %s1967_s2 = inlined_call_operand.vmem [shape: f32[1,64], index: 2, kind: input, shape index: {}]   ;;  %s1968_s3 = inlined_call_operand.vmem [shape: bf16[2,1,80,64], index: 3, kind: output, shape index: {}]  }
   0x1 LB: > { %s1170_s13 = sadd.s32 4294967295, %s1458_s12   ;;  %p1174_p0 = scmp.ge.s32.totalorder %s1458_s12, 1  ;;  %s1458_s12 = sphi %s1484_s12, %s13_s12  }
   0x2   : > { %p137_p1 = scmp.lt.s32.totalorder %s1458_s12, 3 }
   0x4   : > { %p138_p2 = pnand %p1174_p0, %p137_p1 }
   0x5   : > { %p161_p3 = scmp.lt.s32.totalorder (!%p138_p2), %s1170_s13, 1  ;;  %v1460_v0 = vmov (!%p138_p2), 0.0   ;;  %v1432_v1 = vld [vmem:[%s1966_s1 + $0x30] sm:$0xff] (!%p138_p2)   ;;  %v1433_v2 = vld [vmem:[%s1966_s1 + $0x38] sm:$0xff] (!%p138_p2)   ;;  %vm307_vm0 = vcmask (!%p138_p2), 1046528   ;;  %v1434_v3 = vld [vmem:[%s1966_s1 + $0x40] sm:$0xff] (!%p138_p2)  }
   0x6   : > { %141 = sbr.rel (%p138_p2) target bundleno = 435 (0x1b3), region = 32  ;;  %1385 = vmatprep.subr.bf16.mxu1 (!%p138_p2), %v1460_v0  ;;  %1289 = vmatprep.subr.bf16.mxu0 (!%p138_p2), %v1460_v0  ;;  %vm249_vm1 = vsmask.f32 (!%p138_p2), 7424  ;;  %v1435_v17 = vld [vmem:[%s1966_s1 + $0x48] sm:$0xff] (!%p138_p2)   ;;  %s1461_s26 = smov (!%p138_p2), 64   ;;  %v1436_v41 = vld [vmem:[%s1966_s1 + $0x50] sm:$0xff] (!%p138_p2)  }
   0x7   : > { %1391 = vmatpush3.bf16.msra.mxu1 (!%p138_p2), %v1432_v1  ;;  %1290 = vmatpush3.bf16.msra.mxu0 (!%p138_p2), %v1432_v1  ;;  %s1462_s29 = smov (!%p138_p2), 32   ;;  %v1437_v56 = vld [vmem:[%s1966_s1 + $0x58] sm:$0xff] (!%p138_p2)   ;;  %vm1463_vm2 = vmmov (!%p138_p2), 0   ;;  %vm329_vm3 = vcmask (!%p138_p2), 261120   ;;  %vm340_vm4 = vcmask (!%p138_p2), 523264   ;;  %vm534_vm5 = vcmask (!%p138_p2), 785408  }
   0x8   : > { %1386 = vmatprep.subr.bf16.mxu1 (!%p138_p2), %v1460_v0  ;;  %1291 = vmatprep.subr.bf16.mxu0 (!%p138_p2), %v1460_v0  ;;  %vm902_vm6 = vcmask (!%p138_p2), 1045504   ;;  %vm1104_vm7 = vcmask (!%p138_p2), 519168  }
   0x9   : > { %1313 = vmatprep.mubr.msk.bf16.mxu1 (!%p138_p2), %vm1463_vm2, %v1460_v0  ;;  %1301 = vmatprep.mubr.msk.bf16.mxu0 (!%p138_p2), %vm1463_vm2, %v1460_v0 }
   0xb   : > { %1392 = vmatpush3.bf16.msra.mxu1 (!%p138_p2), %v1433_v2  ;;  %1292 = vmatpush3.bf16.msra.mxu0 (!%p138_p2), %v1433_v2 }
   0xc   : > { %1387 = vmatprep.subr.bf16.mxu1 (!%p138_p2), %v1460_v0  ;;  %1293 = vmatprep.subr.bf16.mxu0 (!%p138_p2), %v1460_v0 }
   0xd   : > { %s1970_s13 = smov (!%p161_p3, %s1170_s13), 1 }
   0xe   : > { %s1397_s18 = smul.u32 56, %s1970_s13 }
   0xf   : > { %1393 = vmatpush3.bf16.msra.mxu1 %v1434_v3  ;;  %1294 = vmatpush3.bf16.msra.mxu0 %v1434_v3 }
  0x10   : > { %s1511_s23 = scalar_lea.vmem %s1965_s0, %s1397_s18  ;;  %1388 = vmatprep.subr.bf16.mxu1 %v1460_v0  ;;  %1295 = vmatprep.subr.bf16.mxu0 %v1460_v0 }
  0x11   : > { %v1514_v4 = vld [vmem:[%s1511_s23 + $0x24] sm:$0xf]  ;;  %v352_v5 = vld [vmem:[%s1511_s23 + $0x28] sm:$0xf]  ;;  %v1524_v8 = vld [vmem:[%s1511_s23 + $0x1c] sm:$0xf] }
  0x12   : > { %v1518_v6 = vcombine.low %v1514_v4, %v352_v5  ;;  %v1521_v7 = vld [vmem:[%s1511_s23 + $0x2c] ss:$0 sps:$4 sm:$0x33]   ;;  %v1529_v9 = vld [vmem:[%s1511_s23 + $0x20] sm:$0xf]  ;;  %v1625_v63 = vld [vmem:[%s1511_s23 + $0x10] sm:$0xff]  }
  0x13   : > { %v1532_v10 = vld [vmem:[%s1511_s23 + $0x8] sm:$0xf]  ;;  %v1535_v11 = vld [vmem:[%s1511_s23 + $0xc] sm:$0xf]  ;;  %v442_v13 = vrot.slane %v1521_v7, 1  ;;  %v1541_v14 = vcombine.low %v1524_v8, %v1529_v9  ;;  %v411_v21 = vshll.u32 %v1521_v7, 16  ;;  %1394 = vmatpush3.bf16.msra.mxu1 %v1435_v17  ;;  %1296 = vmatpush3.bf16.msra.mxu0 %v1435_v17 }
  0x14   : > { %v440_v12 = vrot.slane %v1518_v6, 1  ;;  %v403_v15 = vshll.u32 %v1518_v6, 16  ;;  %v1545_v16 = vld [vmem:[%s1511_s23 + $0x10] sm:$0xf]  ;;  %v351_v18 = vld [vmem:[%s1511_s23 + $0x4] sm:$0xe]  ;;  %1389 = vmatprep.subr.bf16.mxu1 %v1460_v0  ;;  %1297 = vmatprep.subr.bf16.mxu0 %v1460_v0 }
  0x15   : > { %v1553_v19 = vcombine.low %v1535_v11, %v1545_v16  ;;  %v407_v20 = vshrl.u32 %v1518_v6, 16  ;;  %v1558_v22 = vld [vmem:[%s1511_s23 + $0x14] sm:$0xf]  ;;  %v438_v24 = vrot.slane %v1541_v14, 1  ;;  %v395_v25 = vshll.u32 %v1541_v14, 16 }
  0x16   : > { %v443_v23 = vsel %vm307_vm0, %v440_v12, %v442_v13  ;;  %v399_v26 = vshrl.u32 %v1541_v14, 16  ;;  %v1567_v27 = vld [vmem:[%s1511_s23 + $0x18] sm:$0xf]  ;;  %v405_v28 = vrot.slane %v403_v15, 1  ;;  %v1573_v29 = vcombine.low %v351_v18, %v1532_v10  ;;  %v355_v32 = vld [vmem:[%s1511_s23 + $0x4] sm:$0xc] }
  0x17   : > { %452 = vrot.lane.b32.xlu1 %v443_v23, %s1461_s26  ;;  %v379_v30 = vshll.u32 %v1553_v19, 16  ;;  %v1576_v31 = vrot.slane %v411_v21, 1  ;;  %v441_v33 = vsel %vm307_vm0, %v438_v24, %v440_v12  ;;  %v397_v34 = vrot.slane %v395_v25, 1  ;;  %v742_v40 = vld [vmem:[%s1511_s23 + $0x8] sm:$0xc]  ;;  %1395 = vmatpush3.bf16.msra.mxu1 %v1436_v41 }
  0x18   : > { %v1584_v35 = vcombine.low %v1558_v22, %v1567_v27  ;;  %v383_v36 = vshrl.u32 %v1553_v19, 16  ;;  %450 = vrot.lane.b32.xlu0 %v441_v33, %s1461_s26  ;;  %v372_v37 = vshrl.u32 %v1573_v29, 16  ;;  %v374_v38 = vshll.u32 %v1573_v29, 16  ;;  %v1598_v47 = vld [vmem:[%s1511_s23 + $0xc] sm:$0xf]  ;;  %1298 = vmatpush3.bf16.msra.mxu0 %v1436_v41 }
  0x19   : > { %v381_v39 = vrot.slane %v379_v30, 1  ;;  %v401_v42 = vor.u32 %v399_v26, %v397_v34  ;;  %v409_v43 = vor.u32 %v407_v20, %v405_v28  ;;  %v1191_v45 = vcombine.low %v355_v32, %v1532_v10  ;;  %v209_v55 = vld [vmem:[%s1511_s23] sm:$0xf]  ;;  %v1616_v60 = vld [vmem:[%s1511_s23 + $0x4] sm:$0xf]  ;;  %1390 = vmatprep.subr.bf16.mxu1 %v1460_v0  ;;  %1299 = vmatprep.subr.bf16.mxu0 %v1460_v0  ;;  %v1641_v20 = vld [vmem:[%s1511_s23 + $0x18] sm:$0xff]  }
  0x1a   : > { %v387_v44 = vshll.u32 %v1584_v35, 16  ;;  %v376_v46 = vrot.slane %v374_v38, 1  ;;  %v434_v50 = vrot.slane %v1553_v19, 1  ;;  %v391_v54 = vshrl.u32 %v1584_v35, 16  ;;  %v754_v32 = vld [vmem:[%s1511_s23 + $0x8] sm:$0x8] }
  0x1b   : > { %v406_v48 = vsel %vm249_vm1, %v401_v42, %v405_v28  ;;  %v385_v49 = vor.u32 %v383_v36, %v381_v39  ;;  %v433_v53 = vrot.slane %v1191_v45, 1  ;;  %v414_v57 = vsel %vm249_vm1, %v409_v43, %v1576_v31  ;;  %1396 = vmatpush3.bf16.msra.mxu1 %v1437_v56 }
  0x1c   : > { %424 = vrot.lane.b32.xlu0 %v406_v48, %s1462_s29  ;;  %v377_v51 = vor.u32 %v376_v46, %v372_v37  ;;  %v389_v52 = vrot.slane %v387_v44, 1  ;;  %v1612_v58 = vcombine.low %v742_v40, %v1598_v47  ;;  %v436_v62 = vrot.slane %v1584_v35, 1  ;;  %1300 = vmatpush3.bf16.msra.mxu0 %v1437_v56  ;;  %v220_v40 = vld [vmem:[%s1511_s23] sm:$0xe] }
  0x1d   : > { %v435_v1 = vsel %vm307_vm0, %v433_v53, %v434_v50  ;;  %v1630_v5 = vcombine.low %v209_v55, %v1616_v60  ;;  %1321 = vmatprep.subr.bf16.mxu1 %v1460_v0  ;;  %1353 = vmatprep.subr.bf16.mxu0 %v1460_v0  ;;  %v415_v12 = vshrl.u32 %v1521_v7, 16  ;;  %v794_v18 = vshll.u32 %v1625_v63, 16  ;;  %v1666_v44 = vld [vmem:[%s1511_s23 + $0x20] sm:$0xff]  }
  0x1e   : > { %v382_v59 = vsel %vm249_vm1, %v377_v51, %v381_v39  ;;  %v390_v61 = vsel %vm249_vm1, %v385_v49, %v389_v52  ;;  %v393_v2 = vor.u32 %v391_v54, %v389_v52  ;;  %v789_v3 = vshll.u32 %v1612_v58, 16 }
  0x1f   : > { %418 = vrot.lane.b32.xlu1 %v382_v59, %s1462_s29  ;;  %v437_v15 = vsel %vm307_vm0, %v434_v50, %v436_v62  ;;  %v787_v17 = vshrl.u32 %v1612_v58, 16  ;;  %v1645_v21 = vcombine.low %v1532_v10, %v1535_v11  ;;  %v253_v26 = vshll.u32 %v1630_v5, 16  ;;  %v1695_v59 = vld [vmem:[%s1511_s23 + $0x28] sm:$0xff]  }
  0x20   : > { %426 = vrot.lane.b32.xlu0 %v414_v57, %s1462_s29  ;;  %v398_v23 = vsel %vm249_vm1, %v393_v2, %v397_v34  ;;  %v791_v25 = vrot.slane %v789_v3, 1  ;;  %v439_v28 = vsel %vm307_vm0, %v436_v62, %v438_v24  ;;  %v417_v30 = vor.u32 %v415_v12, %v1576_v31 }
  0x21   : > { %v796_v33 = vrot.slane %v794_v18, 1  ;;  %v798_v10 = vshrl.u32 %v1625_v63, 16  ;;  %v802_v11 = vshll.u32 %v1641_v20, 16  ;;  %v258_v34 = vshll.u32 %v1645_v21, 16 }
  0x22   : > { %v792_v36 = vor.u32 %v791_v25, %v787_v17  ;;  %v251_v37 = vshrl.u32 %v1630_v5, 16  ;;  %v255_v38 = vrot.slane %v253_v26, 1  ;;  %v1221_v39 = vcombine.low %v754_v32, %v1598_v47 }
  0x23   : > { %420 = vrot.lane.b32.xlu1 %v390_v61, %s1462_s29  ;;  %v800_v24 = vor.u32 %v798_v10, %v796_v33  ;;  %v804_v31 = vrot.slane %v802_v11, 1  ;;  %v260_v43 = vrot.slane %v258_v34, 1  ;;  %v849_v45 = vrot.slane %v1625_v63, 1 }
  0x24   : > { %444 = vrot.lane.b32.xlu0 %v435_v1, %s1461_s26  ;;  %v797_v41 = vsel %vm249_vm1, %v792_v36, %v796_v33  ;;  %v256_v42 = vor.u32 %v255_v38, %v251_v37  ;;  %v848_v48 = vrot.slane %v1221_v39, 1  ;;  %v1183_v47 = vcombine.low %v220_v40, %v1616_v60 }
  0x25   : > { %v805_v46 = vsel %vm249_vm1, %v800_v24, %v804_v31  ;;  %v1677_v49 = vcombine.low %v1545_v16, %v1558_v22  ;;  %v851_v51 = vrot.slane %v1641_v20, 1  ;;  %v806_v7 = vshrl.u32 %v1641_v20, 16 }
  0x26   : > { %v261_v50 = vsel %vm249_vm1, %v256_v42, %v260_v43  ;;  %v309_v52 = vrot.slane %v1645_v21, 1  ;;  %v850_v16 = vsel %vm307_vm0, %v848_v48, %v849_v45  ;;  %v308_v22 = vrot.slane %v1183_v47, 1 }
  0x27   : > { %446 = vrot.lane.b32.xlu1 %v437_v15, %s1461_s26  ;;  %v262_v53 = vshrl.u32 %v1645_v21, 16  ;;  %v266_v54 = vshll.u32 %v1677_v49, 16  ;;  %v852_v55 = vsel %vm307_vm0, %v849_v45, %v851_v51  ;;  %v808_v56 = vor.u32 %v806_v7, %v804_v31  ;;  %v1431_v45 = vld [vmem:[%s1511_s23 + $0x28] ss:$0 sps:$4 sm:$0x11]  }
  0x28   : > { %422 = vrot.lane.b32.xlu0 %v398_v23, %s1462_s29  ;;  %v310_v60 = vsel %vm307_vm0, %v308_v22, %v309_v52  ;;  %v1702_v1 = vcombine.low %v1567_v27, %v1524_v8  ;;  %v853_v3 = vrot.slane %v1666_v44, 1  ;;  %v814_v12 = vshrl.u32 %v1666_v44, 16 }
  0x29   : > { %v264_v61 = vor.u32 %v262_v53, %v260_v43  ;;  %v268_v62 = vrot.slane %v266_v54, 1  ;;  %v818_v15 = vshll.u32 %v1695_v59, 16  ;;  %v311_v18 = vrot.slane %v1677_v49, 1 }
  0x2a   : > { %v270_v23 = vshrl.u32 %v1677_v49, 16  ;;  %v274_v8 = vshll.u32 %v1702_v1, 16  ;;  %v854_v27 = vsel %vm307_vm0, %v851_v51, %v853_v3  ;;  %v1721_v10 = vcombine.low %v1529_v9, %v1514_v4 }
  0x2b   : > { %448 = vrot.lane.b32.xlu1 %v439_v28, %s1461_s26  ;;  %v269_v17 = vsel %vm249_vm1, %v264_v61, %v268_v62  ;;  %v820_v26 = vrot.slane %v818_v15, 1  ;;  %v1429_v28 = vld [vmem:[%s1511_s23 + $0x30] ss:$0 sps:$4 sm:$0x77]   ;;  %v855_v34 = vrot.slane %v1695_v59, 1  ;;  %v822_v36 = vshrl.u32 %v1695_v59, 16 }
  0x2c   : > { %428 = vrot.lane.b32.xlu0 %v417_v30, %s1462_s29  ;;  %v312_v30 = vsel %vm307_vm0, %v309_v52, %v311_v18  ;;  %v272_v32 = vor.u32 %v270_v23, %v268_v62  ;;  %v276_v33 = vrot.slane %v274_v8, 1  ;;  %v826_v37 = vshll.u32 %v1429_v28, 16 }
  0x2d   : > { %v313_v24 = vrot.slane %v1702_v1, 1  ;;  %v278_v31 = vshrl.u32 %v1702_v1, 16  ;;  %v282_v4 = vshll.u32 %v1721_v10, 16  ;;  %v856_v9 = vsel %vm307_vm0, %v853_v3, %v855_v34 }
  0x2e   : > { %v277_v38 = vsel %vm249_vm1, %v272_v32, %v276_v33  ;;  %v824_v39 = vor.u32 %v822_v36, %v820_v26  ;;  %v828_v40 = vrot.slane %v826_v37, 1  ;;  %v857_v48 = vrot.slane %v1429_v28, 1 }
  0x2f   : > { %454 = vrot.lane.b32.xlu1 %v442_v13, %s1461_s26  ;;  %v810_v13 = vshll.u32 %v1666_v44, 16  ;;  %v280_v42 = vor.u32 %v278_v31, %v276_v33  ;;  %v284_v43 = vrot.slane %v282_v4, 1  ;;  %v830_v47 = vshrl.u32 %v1429_v28, 16  ;;  %v1443_v4 = vld [vmem:[%s1966_s1 + $0x10] sm:$0xff]  }
  0x30   : > { %833 = vrot.lane.b32.xlu0 %v797_v41, %s1462_s29  ;;  %v314_v41 = vsel %vm307_vm0, %v311_v18, %v313_v24  ;;  %v315_v51 = vrot.slane %v1721_v10, 1  ;;  %v286_v7 = vshrl.u32 %v1721_v10, 16  ;;  %v858_v52 = vsel %vm307_vm0, %v855_v34, %v857_v48 }
  0x31   : > { %v812_v57 = vrot.slane %v810_v13, 1  ;;  %v290_v13 = vshll.u32 %v1431_v45, 16  ;;  %v832_v22 = vor.u32 %v830_v47, %v828_v40  ;;  %v1444_v47 = vld [vmem:[%s1966_s1 + $0x70] sm:$0xff]  }
  0x32   : > { %v288_v53 = vor.u32 %v286_v7, %v284_v43 }
  0x33   : > { %835 = vrot.lane.b32.xlu1 %v805_v46, %s1462_s29  ;;  %v813_v2 = vsel %vm249_vm1, %v808_v56, %v812_v57  ;;  %v816_v25 = vor.u32 %v814_v12, %v812_v57  ;;  %v829_v46 = vsel %vm249_vm1, %v824_v39, %v828_v40  ;;  %v292_v54 = vrot.slane %v290_v13, 1  ;;  %v1442_v40 = vld [vmem:[%s1966_s1 + $0x68] sm:$0xff]   ;;  %v1447_v13 = vld [vmem:[%s1966_s1 + $0x20] sm:$0xff]  }
  0x34   : > { %294 = vrot.lane.b32.xlu0 %v261_v50, %s1462_s29  ;;  %v285_v50 = vsel %vm249_vm1, %v280_v42, %v284_v43  ;;  %v317_v56 = vrot.slane %v1431_v45, 1  ;;  %v1445_v43 = vld [vmem:[%s1966_s1 + $0x18] sm:$0xff]  }
  0x35   : > { %v821_v11 = vsel %vm249_vm1, %v816_v25, %v820_v26  ;;  %v1438_v25 = vld [vmem:[%s1966_s1] sm:$0xff]  }
  0x36   : > { %v318_v57 = vsel %vm307_vm0, %v315_v51, %v317_v56 }
  0x37   : > { %859 = vrot.lane.b32.xlu1 %v850_v16, %s1461_s26  ;;  %v316_v16 = vsel %vm307_vm0, %v313_v24, %v315_v51 }
  0x38   : > { %861 = vrot.lane.b32.xlu0 %v852_v55, %s1461_s26  ;;  %v293_v55 = vsel %vm249_vm1, %v288_v53, %v292_v54  ;;  %v1449_v53 = vld [vmem:[%s1966_s1 + $0x28] sm:$0xff]  }
  0x3b   : > { %319 = vrot.lane.b32.xlu1 %v310_v60, %s1461_s26 }
  0x3c   : > { %837 = vrot.lane.b32.xlu0 %v813_v2, %s1462_s29 }
  0x3f   : > { %296 = vrot.lane.b32.xlu1 %v269_v17, %s1462_s29 }
  0x40   : > { %863 = vrot.lane.b32.xlu0 %v854_v27, %s1461_s26 }
  0x43   : > { %321 = vrot.lane.b32.xlu1 %v312_v30, %s1461_s26 }
  0x44   : > { %839 = vrot.lane.b32.xlu0 %v821_v11, %s1462_s29 }
  0x47   : > { %298 = vrot.lane.b32.xlu1 %v277_v38, %s1462_s29  ;;  %v1441_v38 = vld [vmem:[%s1511_s23 + $0x2c] ss:$0 sps:$4 sm:$0x11]  }
  0x48   : > { %865 = vrot.lane.b32.xlu0 %v856_v9, %s1461_s26 }
  0x4b   : > { %323 = vrot.lane.b32.xlu1 %v314_v41, %s1461_s26 }
  0x4c   : > { %841 = vrot.lane.b32.xlu0 %v829_v46, %s1462_s29 }
  0x4f   : > { %300 = vrot.lane.b32.xlu1 %v285_v50, %s1462_s29 }
  0x50   : > { %867 = vrot.lane.b32.xlu0 %v858_v52, %s1461_s26 }
  0x53   : > { %325 = vrot.lane.b32.xlu1 %v316_v16, %s1461_s26  ;;  %v1446_v16 = vld [vmem:[%s1966_s1 + $0x78] sm:$0xff]  }
  0x54   : > { %843 = vrot.lane.b32.xlu0 %v832_v22, %s1462_s29 }
  0x57   : > { %302 = vrot.lane.b32.xlu1 %v293_v55, %s1462_s29  ;;  %v1448_v55 = vld [vmem:[%s1966_s1 + $0x80] sm:$0xff]  }
  0x58   : > { %869 = vrot.lane.b32.xlu0 %v857_v48, %s1461_s26 }
  0x5b   : > { %327 = vrot.lane.b32.xlu1 %v318_v57, %s1461_s26 }
  0x89   : > { %v453_v61 = vpop.permute.xlu1 %452 }
  0x8a   : > { %v451_v60 = vpop.permute.xlu0 %450 }
  0x8e   : > { %v425_v62 = vpop.permute.xlu0 %424 }
  0x8f   : > { %v463_v2 = vsel %vm329_vm3, %v1541_v14, %v425_v62 }
  0x90   : > { %v1757_v12 = vsel %vm340_vm4, %v463_v2, %v451_v60 }
  0x91   : > { %v419_v3 = vpop.permute.xlu1 %418  ;;  %v492_v23 = vrot.slane %v1757_v12, 1 }
  0x92   : > { %v427_v15 = vpop.permute.xlu0 %426  ;;  %v457_v14 = vsel %vm329_vm3, %v1573_v29, %v419_v3  ;;  %v1440_v29 = vld [vmem:[%s1966_s1 + $0x8] sm:$0xff]  }
  0x93   : > { %v465_v17 = vsel %vm329_vm3, %v1518_v6, %v427_v15 }
  0x94   : > { %v478_v18 = vsel %vm340_vm4, %v465_v17, %v453_v61 }
  0x95   : > { %v494_v8 = vrot.slane %v478_v18, 1  ;;  %v421_v27 = vpop.permute.xlu1 %420 }
  0x96   : > { %v445_v26 = vpop.permute.xlu0 %444  ;;  %v459_v30 = vsel %vm329_vm3, %v1553_v19, %v421_v27  ;;  %v1439_v19 = vld [vmem:[%s1966_s1 + $0x60] sm:$0xff]  }
  0x97   : > { %v470_v28 = vsel %vm340_vm4, %v457_v14, %v445_v26  ;;  %v495_v6 = vsel %vm307_vm0, %v492_v23, %v494_v8 }
  0x98   : > { %1314 = vmatmul.mubr.msk.bf16.vlgmr.msra.gmra.mrb[0].mxu1 %vm534_vm5, %v495_v6  ;;  %v487_v32 = vrot.slane %v470_v28, 1 }
  0x99   : > { %v447_v33 = vpop.permute.xlu1 %446  ;;  %1322 = vmatpush3.bf16.msra.mxu1 %v1438_v25  ;;  %1317 = vmatprep.mubr.msk.bf16.mxu1 %vm1463_vm2, %v1460_v0 }
  0x9a   : > { %v472_v11 = vsel %vm340_vm4, %v459_v30, %v447_v33  ;;  %v423_v34 = vpop.permute.xlu0 %422  ;;  %1323 = vmatprep.subr.bf16.mxu1 %v1460_v0 }
  0x9b   : > { %v488_v36 = vrot.slane %v472_v11, 1  ;;  %v461_v37 = vsel %vm329_vm3, %v1584_v35, %v423_v34 }
  0x9d   : > { %v489_v24 = vsel %vm307_vm0, %v487_v32, %v488_v36  ;;  %v449_v31 = vpop.permute.xlu1 %448  ;;  %1324 = vmatpush3.bf16.msra.mxu1 %v1440_v29 }
  0x9e   : > { %1302 = vmatmul.mubr.msk.bf16.vlgmr.msra.gmra.mrb[0].mxu0 %vm534_vm5, %v489_v24  ;;  %v474_v9 = vsel %vm340_vm4, %v461_v37, %v449_v31  ;;  %v429_v39 = vpop.permute.xlu0 %428  ;;  %1325 = vmatprep.subr.bf16.mxu1 %v1460_v0 }
  0x9f   : > { %1354 = vmatpush3.bf16.msra.mxu0 %v1439_v19  ;;  %v468_v35 = vsel %vm329_vm3, %v1441_v38, %v429_v39  ;;  %1305 = vmatprep.mubr.msk.bf16.mxu0 %vm1463_vm2, %v1460_v0  ;;  %v490_v41 = vrot.slane %v474_v9, 1 }
  0xa0   : > { %1355 = vmatprep.subr.bf16.mxu0 %v1460_v0 }
  0xa1   : > { %v455_v42 = vpop.permute.xlu1 %454  ;;  %1326 = vmatpush3.bf16.msra.mxu1 %v1443_v4  ;;  %v491_v50 = vsel %vm307_vm0, %v488_v36, %v490_v41  ;;  %v493_v61 = vsel %vm307_vm0, %v490_v41, %v492_v23 }
  0xa2   : > { %v480_v45 = vsel %vm340_vm4, %v468_v35, %v455_v42  ;;  %v834_v46 = vpop.permute.xlu0 %833  ;;  %1327 = vmatprep.subr.bf16.mxu1 %v1460_v0  ;;  %v1451_v35 = vld [vmem:[%s1511_s23 + $0x30] ss:$0 sps:$4 sm:$0x33]   ;;  %s1398_s23 = smul.u32 40, %s1970_s13 }
  0xa3   : > { %1356 = vmatpush3.bf16.msra.mxu0 %v1442_v40  ;;  %v496_v48 = vrot.slane %v480_v45, 1  ;;  %v872_v57 = vsel %vm329_vm3, %v1612_v58, %v834_v46  ;;  %v1450_v58 = vld [vmem:[%s1966_s1 + $0x88] sm:$0xff]  }
  0xa4   : > { %1357 = vmatprep.subr.bf16.mxu0 %v1460_v0  ;;  %s1927_s13 = scalar_lea.vmem %s1968_s3, %s1398_s23 }
  0xa5   : > { %v836_v51 = vpop.permute.xlu1 %835  ;;  %v497_v7 = vsel %vm307_vm0, %v494_v8, %v496_v48  ;;  %1328 = vmatpush3.bf16.msra.mxu1 %v1445_v43 }
  0xa6   : > { %1306 = vmatmul.mubr.msk.bf16.gmra.mrb[4].mxu0 %vm534_vm5, %v491_v50  ;;  %1318 = vmatmul.mubr.msk.bf16.gmra.mrb[4].mxu1 %vm534_vm5, %v497_v7  ;;  %v295_v52 = vpop.permute.xlu0 %294  ;;  %v874_v60 = vsel %vm329_vm3, %v1625_v63, %v836_v51 }
  0xa7   : > { %1358 = vmatpush3.bf16.msra.mxu0 %v1444_v47  ;;  %1329 = vmatprep.subr.bf16.mxu1 %v1460_v0  ;;  %v331_v56 = vsel %vm329_vm3, %v1630_v5, %v295_v52 }
  0xa8   : > { %1359 = vmatprep.subr.bf16.mxu0 %v1460_v0  ;;  %1309 = vmatprep.mubr.msk.bf16.mxu0 %vm1463_vm2, %v1460_v0 }
  0xa9   : > { %v860_v22 = vpop.permute.xlu1 %859  ;;  %1330 = vmatpush3.bf16.msra.mxu1 %v1447_v13  ;;  %1333 = vmatprep.mubr.msk.bf16.mxu1 %vm1463_vm2, %v1460_v0 }
  0xaa   : > { %v862_v54 = vpop.permute.xlu0 %861  ;;  %1331 = vmatprep.subr.bf16.mxu1 %v1460_v0  ;;  %v885_v63 = vsel %vm340_vm4, %v872_v57, %v860_v22 }
  0xab   : > { %1360 = vmatpush3.bf16.msra.mxu0 %v1446_v16  ;;  %v887_v2 = vsel %vm340_vm4, %v874_v60, %v862_v54  ;;  %v903_v18 = vrot.slane %v885_v63, 2 }
  0xac   : > { %1361 = vmatprep.subr.bf16.mxu0 %v1460_v0  ;;  %v904_v12 = vrot.slane %v887_v2, 2 }
  0xad   : > { %v320_v62 = vpop.permute.xlu1 %319  ;;  %1332 = vmatpush3.bf16.msra.mxu1 %v1449_v53 }
  0xae   : > { %1310 = vmatmul.mubr.msk.bf16.gmra.mrb[8].mxu0 %vm534_vm5, %v493_v61  ;;  %v838_v3 = vpop.permute.xlu0 %837  ;;  %v342_v5 = vsel %vm340_vm4, %v331_v56, %v320_v62  ;;  %v905_v27 = vsel %vm902_vm6, %v903_v18, %v904_v12 }
  0xaf   : > { %1362 = vmatpush3.bf16.msra.mxu0 %v1448_v55  ;;  %1365 = vmatprep.mubr.msk.bf16.mxu0 %vm1463_vm2, %v1460_v0  ;;  %v876_v23 = vsel %vm329_vm3, %v1641_v20, %v838_v3 }
  0xb0   : > { %1363 = vmatprep.subr.bf16.mxu0 %v1460_v0  ;;  %1334 = vmatmul.mubr.msk.bf16.vlgmr.msra.gmra.mrb[8].mxu1 %vm534_vm5, %v342_v5 }
  0xb1   : > { %v297_v15 = vpop.permute.xlu1 %296  ;;  %1337 = vmatprep.mubr.msk.bf16.mxu1 %vm1463_vm2, %v1460_v0 }
  0xb2   : > { %v864_v17 = vpop.permute.xlu0 %863  ;;  %v333_v8 = vsel %vm329_vm3, %v1645_v21, %v297_v15 }
  0xb3   : > { %1364 = vmatpush3.bf16.msra.mxu0 %v1450_v58  ;;  %v889_v14 = vsel %vm340_vm4, %v876_v23, %v864_v17 }
  0xb4   : > { %v906_v20 = vrot.slane %v889_v14, 2 }
  0xb5   : > { %v322_v25 = vpop.permute.xlu1 %321 }
  0xb6   : > { %1366 = vmatmul.mubr.msk.bf16.vlgmr.msra.gmra.mrb[12].mxu0 %vm534_vm5, %v905_v27  ;;  %v344_v26 = vsel %vm340_vm4, %v333_v8, %v322_v25  ;;  %v840_v28 = vpop.permute.xlu0 %839  ;;  %v907_v33 = vsel %vm902_vm6, %v904_v12, %v906_v20  ;;  %v1921_v8 = vld [vmem:[%s1967_s2] ss:$0 sm:$0xff] }
  0xb7   : > { %1369 = vmatprep.mubr.msk.bf16.mxu0 %vm1463_vm2, %v1460_v0  ;;  %v878_v30 = vsel %vm329_vm3, %v1666_v44, %v840_v28 }
  0xb8   : > { %1338 = vmatmul.mubr.msk.bf16.gmra.mrb[12].mxu1 %vm534_vm5, %v344_v26 }
  0xb9   : > { %v299_v6 = vpop.permute.xlu1 %298  ;;  %1341 = vmatprep.mubr.msk.bf16.mxu1 %vm1463_vm2, %v1460_v0 }
  0xba   : > { %v866_v21 = vpop.permute.xlu0 %865  ;;  %v335_v32 = vsel %vm329_vm3, %v1677_v49, %v299_v6 }
  0xbb   : > { %v891_v11 = vsel %vm340_vm4, %v878_v30, %v866_v21 }
  0xbc   : > { %v908_v44 = vrot.slane %v891_v11, 2 }
  0xbd   : > { %v324_v29 = vpop.permute.xlu1 %323 }
  0xbe   : > { %1370 = vmatmul.mubr.msk.bf16.gmra.mrb[16].mxu0 %vm534_vm5, %v907_v33  ;;  %v346_v34 = vsel %vm340_vm4, %v335_v32, %v324_v29  ;;  %v842_v36 = vpop.permute.xlu0 %841  ;;  %v909_v24 = vsel %vm902_vm6, %v906_v20, %v908_v44 }
  0xbf   : > { %1373 = vmatprep.mubr.msk.bf16.mxu0 %vm1463_vm2, %v1460_v0  ;;  %v880_v19 = vsel %vm329_vm3, %v1695_v59, %v842_v36 }
  0xc0   : > { %1342 = vmatmul.mubr.msk.bf16.gmra.mrb[16].mxu1 %vm534_vm5, %v346_v34 }
  0xc1   : > { %v301_v37 = vpop.permute.xlu1 %300  ;;  %1345 = vmatprep.mubr.msk.bf16.mxu1 %vm1463_vm2, %v1460_v0 }
  0xc2   : > { %v868_v49 = vpop.permute.xlu0 %867  ;;  %v337_v38 = vsel %vm329_vm3, %v1702_v1, %v301_v37 }
  0xc3   : > { %v893_v4 = vsel %vm340_vm4, %v880_v19, %v868_v49 }
  0xc4   : > { %v910_v59 = vrot.slane %v893_v4, 2 }
  0xc5   : > { %v326_v31 = vpop.permute.xlu1 %325 }
  0xc6   : > { %1374 = vmatmul.mubr.msk.bf16.gmra.mrb[20].mxu0 %vm534_vm5, %v909_v24  ;;  %v348_v9 = vsel %vm340_vm4, %v337_v38, %v326_v31  ;;  %v844_v39 = vpop.permute.xlu0 %843  ;;  %v911_v43 = vsel %vm902_vm6, %v908_v44, %v910_v59 }
  0xc7   : > { %1377 = vmatprep.mubr.msk.bf16.mxu0 %vm1463_vm2, %v1460_v0  ;;  %v883_v1 = vsel %vm329_vm3, %v1451_v35, %v844_v39 }
  0xc8   : > { %1346 = vmatmul.mubr.msk.bf16.gmra.mrb[20].mxu1 %vm534_vm5, %v348_v9 }
  0xc9   : > { %v303_v40 = vpop.permute.xlu1 %302  ;;  %1349 = vmatprep.mubr.msk.bf16.mxu1 %vm1463_vm2, %v1460_v0 }
  0xca   : > { %v339_v41 = vsel %vm329_vm3, %v1721_v10, %v303_v40  ;;  %v870_v42 = vpop.permute.xlu0 %869 }
  0xcb   : > { %v895_v46 = vsel %vm340_vm4, %v883_v1, %v870_v42 }
  0xcc   : > { %v912_v47 = vrot.slane %v895_v46, 2 }
  0xcd   : > { %v328_v45 = vpop.permute.xlu1 %327 }
  0xce   : > { %1378 = vmatmul.mubr.msk.bf16.gmra.mrb[24].mxu0 %vm534_vm5, %v911_v43  ;;  %v350_v48 = vsel %vm340_vm4, %v339_v41, %v328_v45  ;;  %v913_v50 = vsel %vm902_vm6, %v910_v59, %v912_v47 }
  0xcf   : > { %1381 = vmatprep.mubr.msk.bf16.mxu0 %vm1463_vm2, %v1460_v0 }
  0xd0   : > { %1350 = vmatmul.mubr.msk.bf16.gmra.mrb[24].mxu1 %vm534_vm5, %v350_v48 }
  0xd6   : > { %1382 = vmatmul.mubr.msk.bf16.gmra.mrb[28].mxu0 %vm534_vm5, %v913_v50 }
 0x16b   : > { %v1909_v10 = vpop.f32.mrb[0].mxu1 }
 0x16c   : > { %v1315_v51 = vpop.f32.mrb[1].mxu1 }
 0x16d   : > { %v1911_v7 = vpop.f32.mrb[2].mxu1 }
 0x16e   : > { %v1316_v13 = vpop.f32.mrb[3].mxu1 }
 0x171   : > { %v584_v52 = vpop.f32.mrb[0].mxu0 }
 0x172   : > { %v1303_v16 = vpop.f32.mrb[1].mxu0 }
 0x173   : > { %v587_v22 = vpop.f32.mrb[2].mxu0 }
 0x174   : > { %v1304_v53 = vpop.f32.mrb[3].mxu0 }
 0x179   : > { %v592_v54 = vpop.f32.mrb[4].mxu0  ;;  %v1913_v55 = vpop.f32.mrb[4].mxu1 }
 0x17a   : > { %v1307_v0 = vpop.f32.mrb[5].mxu0  ;;  %v1319_v56 = vpop.f32.mrb[5].mxu1 }
 0x17b   : > { %v595_v57 = vpop.f32.mrb[6].mxu0  ;;  %v1915_v60 = vpop.f32.mrb[6].mxu1 }
 0x17c   : > { %v1308_v61 = vpop.f32.mrb[7].mxu0  ;;  %v1320_v62 = vpop.f32.mrb[7].mxu1 }
 0x181   : > { %v600_v2 = vpop.f32.mrb[8].mxu0 }
 0x182   : > { %v1311_v3 = vpop.f32.mrb[9].mxu0 }
 0x183   : > { %v603_v5 = vpop.f32.mrb[10].mxu0  ;;  %v703_v58 = vpop.f32.mrb[8].mxu1 }
 0x184   : > { %v1312_v63 = vpop.f32.mrb[11].mxu0  ;;  %v704_v12 = vadd.f32 %v703_v58, %v584_v52  ;;  %v1335_v15 = vpop.f32.mrb[9].mxu1 }
 0x185   : > { %v706_v17 = vpop.f32.mrb[10].mxu1 }
 0x186   : > { %v707_v18 = vadd.f32 %v706_v17, %v587_v22  ;;  %v1336_v23 = vpop.f32.mrb[11].mxu1 }
 0x189   : > { %v999_v27 = vpop.f32.mrb[12].mxu0 }
 0x18a   : > { %v1038_v25 = vadd.f32 %v999_v27, %v704_v12  ;;  %v1367_v14 = vpop.f32.mrb[13].mxu0 }
 0x18b   : > { %v1002_v26 = vpop.f32.mrb[14].mxu0  ;;  %v711_v28 = vpop.f32.mrb[12].mxu1 }
 0x18c   : > { %v1054_v20 = vadd.f32 %v1921_v8, %v1038_v25  ;;  %v1039_v6 = vadd.f32 %v1002_v26, %v707_v18  ;;  %v1368_v21 = vpop.f32.mrb[15].mxu0  ;;  %v712_v30 = vadd.f32 %v711_v28, %v592_v54  ;;  %v1339_v32 = vpop.f32.mrb[13].mxu1 }
 0x18d   : > { %v714_v33 = vpop.f32.mrb[14].mxu1 }
 0x18e   : > { %v1246_v29 = vpack.c.bf16 %v1054_v20, %v1054_v20  ;;  %v1055_v11 = vadd.f32 %v1921_v8, %v1039_v6  ;;  %v715_v34 = vadd.f32 %v714_v33, %v595_v57  ;;  %v1340_v36 = vpop.f32.mrb[15].mxu1 }
 0x190   : > { %1105 = vst.msk [vmem:[%s1927_s13] sm:$0xf] %vm1104_vm7, %v1246_v29  ;;  %v1247_v44 = vpack.c.bf16 %v1055_v11, %v1055_v11 }
 0x191   : > { %v1007_v37 = vpop.f32.mrb[16].mxu0 }
 0x192   : > { %1106 = vst.msk [vmem:[%s1927_s13 + $0x4] sm:$0xf] %vm1104_vm7, %v1247_v44  ;;  %v1040_v49 = vadd.f32 %v1007_v37, %v712_v30  ;;  %v1371_v19 = vpop.f32.mrb[17].mxu0 }
 0x193   : > { %v1010_v38 = vpop.f32.mrb[18].mxu0  ;;  %v719_v24 = vpop.f32.mrb[16].mxu1 }
 0x194   : > { %v1056_v31 = vadd.f32 %v1921_v8, %v1040_v49  ;;  %v1041_v4 = vadd.f32 %v1010_v38, %v715_v34  ;;  %v1372_v9 = vpop.f32.mrb[19].mxu0  ;;  %v720_v39 = vadd.f32 %v719_v24, %v600_v2  ;;  %v1343_v35 = vpop.f32.mrb[17].mxu1 }
 0x195   : > { %v722_v59 = vpop.f32.mrb[18].mxu1 }
 0x196   : > { %v1248_v40 = vpack.c.bf16 %v1056_v31, %v1056_v31  ;;  %v1057_v1 = vadd.f32 %v1921_v8, %v1041_v4  ;;  %v723_v41 = vadd.f32 %v722_v59, %v603_v5  ;;  %v1344_v42 = vpop.f32.mrb[19].mxu1 }
 0x198   : > { %1107 = vst.msk [vmem:[%s1927_s13 + $0x8] sm:$0xf] %vm1104_vm7, %v1248_v40  ;;  %v1249_v43 = vpack.c.bf16 %v1057_v1, %v1057_v1 }
 0x199   : > { %v1015_v45 = vpop.f32.mrb[20].mxu0 }
 0x19a   : > { %1108 = vst.msk [vmem:[%s1927_s13 + $0xc] sm:$0xf] %vm1104_vm7, %v1249_v43  ;;  %v1042_v46 = vadd.f32 %v1015_v45, %v720_v39  ;;  %v1375_v48 = vpop.f32.mrb[21].mxu0 }
 0x19b   : > { %v1018_v47 = vpop.f32.mrb[22].mxu0  ;;  %v727_v50 = vpop.f32.mrb[20].mxu1 }
 0x19c   : > { %v1058_v51 = vadd.f32 %v1921_v8, %v1042_v46  ;;  %v1043_v13 = vadd.f32 %v1018_v47, %v723_v41  ;;  %v1376_v52 = vpop.f32.mrb[23].mxu0  ;;  %v728_v16 = vadd.f32 %v727_v50, %v1909_v10  ;;  %v1347_v22 = vpop.f32.mrb[21].mxu1 }
 0x19d   : > { %v730_v53 = vpop.f32.mrb[22].mxu1 }
 0x19e   : > { %v1250_v54 = vpack.c.bf16 %v1058_v51, %v1058_v51  ;;  %v1059_v0 = vadd.f32 %v1921_v8, %v1043_v13  ;;  %v731_v56 = vadd.f32 %v730_v53, %v1911_v7  ;;  %v1348_v57 = vpop.f32.mrb[23].mxu1 }
 0x1a0   : > { %1109 = vst.msk [vmem:[%s1927_s13 + $0x10] sm:$0xf] %vm1104_vm7, %v1250_v54  ;;  %v1251_v61 = vpack.c.bf16 %v1059_v0, %v1059_v0 }
 0x1a1   : > { %v1023_v62 = vpop.f32.mrb[24].mxu0 }
 0x1a2   : > { %1110 = vst.msk [vmem:[%s1927_s13 + $0x14] sm:$0xf] %vm1104_vm7, %v1251_v61  ;;  %v1044_v2 = vadd.f32 %v1023_v62, %v728_v16  ;;  %v1379_v3 = vpop.f32.mrb[25].mxu0 }
 0x1a3   : > { %v1026_v5 = vpop.f32.mrb[26].mxu0  ;;  %v735_v10 = vpop.f32.mrb[24].mxu1 }
 0x1a4   : > { %v1060_v58 = vadd.f32 %v1921_v8, %v1044_v2  ;;  %v1045_v63 = vadd.f32 %v1026_v5, %v731_v56  ;;  %v1380_v12 = vpop.f32.mrb[27].mxu0  ;;  %v736_v15 = vadd.f32 %v735_v10, %v1913_v55  ;;  %v1351_v7 = vpop.f32.mrb[25].mxu1 }
 0x1a5   : > { %v738_v17 = vpop.f32.mrb[26].mxu1 }
 0x1a6   : > { %v1252_v18 = vpack.c.bf16 %v1060_v58, %v1060_v58  ;;  %v1061_v23 = vadd.f32 %v1921_v8, %v1045_v63  ;;  %v739_v27 = vadd.f32 %v738_v17, %v1915_v60  ;;  %v1352_v25 = vpop.f32.mrb[27].mxu1 }
 0x1a8   : > { %1111 = vst.msk [vmem:[%s1927_s13 + $0x18] sm:$0xf] %vm1104_vm7, %v1252_v18  ;;  %v1253_v14 = vpack.c.bf16 %v1061_v23, %v1061_v23 }
 0x1a9   : > { %v1031_v26 = vpop.f32.mrb[28].mxu0 }
 0x1aa   : > { %1112 = vst.msk [vmem:[%s1927_s13 + $0x1c] sm:$0xf] %vm1104_vm7, %v1253_v14  ;;  %v1046_v28 = vadd.f32 %v1031_v26, %v736_v15  ;;  %v1383_v20 = vpop.f32.mrb[29].mxu0 }
 0x1ab   : > { %v1034_v6 = vpop.f32.mrb[30].mxu0 }
 0x1ac   : > { %v1062_v55 = vadd.f32 %v1921_v8, %v1046_v28  ;;  %v1047_v21 = vadd.f32 %v1034_v6, %v739_v27  ;;  %v1384_v30 = vpop.f32.mrb[31].mxu0 }
 0x1ae   : > { %v1254_v32 = vpack.c.bf16 %v1062_v55, %v1062_v55  ;;  %v1063_v33 = vadd.f32 %v1921_v8, %v1047_v21 }
 0x1b0   : > { %1113 = vst.msk [vmem:[%s1927_s13 + $0x20] sm:$0xf] %vm1104_vm7, %v1254_v32  ;;  %v1255_v60 = vpack.c.bf16 %v1063_v33, %v1063_v33 }
 0x1b2   : > { %1114 = vst.msk [vmem:[%s1927_s13 + $0x24] sm:$0xf] %vm1104_vm7, %v1255_v60 }
 0x1b3 PF: > { %s13_s12 = sadd.s32 1, %s1458_s12  }
 0x1b4   : > { %p10_p4 = scmp.ge.s32.totalorder %s13_s12, 4  }
 0x1b6   :  { %12 = sbr.rel (!%p10_p4) target bundleno = 1 (0x1), region = 62 }

// kernel: rise_mamba_forward.29
= control target key start
LH: loop header
LB: loop body
LE: loop exit
PB: predicated region body
PF: predicated region fallthrough
CT: control target
= control target key end

     0   :  { %s4579_s0 = inlined_call_operand.vmem [shape: bf16[2,16,18,18], index: 0, kind: input, shape index: {}]   ;;  %s4580_s1 = inlined_call_operand.vmem [shape: f32[16,9], index: 1, kind: input, shape index: {}]   ;;  %s4581_s2 = inlined_call_operand.<no memory space> [shape: f32[1,1], index: 2, kind: input, shape index: {}]   ;;  %s4582_s3 = inlined_call_operand.hbm [shape: f32[2,16,16], index: 3, kind: output, shape index: {}]  }
   0x1   :  { %8 = sst [smem:[#allocation2]] %s4581_s2 }
   0x2   :  { %9 = vsyncpa [#allocation5], 0 }
   0x3   :  { %10 = vsyncpa [#allocation4], 0 }
   0x4   :  { %12 = vsyncpa [#allocation4 + $0x1], 0  ;;  %s3238_s14 = smov 0   ;;  %s3240_s15 = smov 0  }
   0x5   :  { %s3242_s16 = smov 0   ;;  %s3244_s17 = smov 0  }
   0x6 LB: > { %s3259_s2 = sadd.s32 4294967295, %s3205_s17   ;;  %s2826_s18 = sadd.s32 4294967294, %s3205_s17   ;;  %s3205_s17 = sphi %s3244_s17, %s4590_s17   ;;  %s3201_s16 = sphi %s3242_s16, %s4589_s16   ;;  %s3197_s15 = sphi %s3240_s15, %s4588_s15   ;;  %s3193_s14 = sphi %s3238_s14, %s4587_s14  }
   0x7   : > { %s3263_s19 = sadd.s32 1, %s3205_s17   ;;  %s93_s20 = sadd.s32 1, %s3201_s16 }
   0x8   : > { %s90_s21 = ssub.s32 %s3205_s17, %s3263_s19  ;;  %p103_p0 = scmp.ne.s32.totalorder %s3201_s16, %s3197_s15 }
   0x9   : > { %p91_p1 = scmp.eq.s32.totalorder %s90_s21, 0  ;;  %p104_p2 = scmp.eq.s32.totalorder %s3259_s2, 1 }
   0xa   : > { %p109_p3 = scmp.ne.s32.totalorder %s3197_s15, %s3193_s14  ;;  %p110_p4 = scmp.eq.s32.totalorder %s2826_s18, 1 }
   0xb   : > { %s3274_s22 = scalar_select %p91_p1, %s3201_s16, %s93_s20  }
   0xc   : > { %p3276_p5 = por %p104_p2, %p103_p0  ;;  %p3280_p6 = por %p110_p4, %p109_p3 }
   0xd   : > { %p2827_p7 = scmp.ge.s32.totalorder %s3205_s17, 1  ;;  %p117_p8 = scmp.lt.s32.totalorder %s3205_s17, 3 }
   0xe   : > { %p3082_p9 = scmp.eq.s32.totalorder %s3259_s2, 0  ;;  %s129_s28 = sshll.u32 %s4580_s1, 4  ;;  %s130_s28 = int_to_ptr.vmem [resolvable:$true] %s129_s28 }
   0xf   : > { %p3287_p10 = pnand %p2827_p7, %p117_p8  ;;  %s3124_s30 = scalar_lea.vmem %s130_s28, 256 }
  0x10   : > { %p3125_p13 = scmp.ne.s32.totalorder %s130_s28, %s3124_s30  ;;  %p3132_p3 = scmp.lt.s32.totalorder %s130_s28, %s130_s28 }
  0x11   : > { %p3074_p11 = pneg %p3287_p10  ;;  %p3133_p4 = scmp.lt.s32.totalorder %s3124_s30, %s3124_s30 }
  0x13   : > { %p3298_p12 = pnand %p3082_p9, %p3074_p11  ;;  %p3134_p7 = por %p3133_p4, %p3132_p3 }
  0x15   : > { %p3126_p0 = pneg %p3298_p12 }
  0x17   : > { %p3127_p1 = pnand %p3126_p0, %p3125_p13 }
  0x19   : > { %p3128_p2 = pneg %p3127_p1 }
  0x1b   : > { %p3135_p8 = pnand %p3134_p7, %p3128_p2 }
  0x1d   : > { %3138 = shalt.err (!%p3135_p8)
}
  0x1e   : > { %s3207_s4 = smov [#allocation3]   ;;  %s3208_s5 = smov 128  }
  0x1f   : > { %s3209_s6 = smov 8   ;;  %156 = sbr.rel (%p3287_p10) target bundleno = 567 (0x237), region = 32 }
  0x20   : > { %3077 = dma.vmem_to_smem (!%p3298_p12), %s130_s28, 256, %s3207_s4, [#allocation5], %s3208_s5, %s3208_s5, %s3209_s6  }
  0x26   : > { %3184 = dma.done.wait (%p3082_p9), [#allocation5], 256  }
  0x27   : > { %3186 = vsyncadd (%p3082_p9), [#allocation5], 4294967040 }
  0x28   : > { %162 = sfence }
  0x29   : > { %p181_p11 = scmp.lt.s32.totalorder %s3259_s2, 1  ;;  %s3313_s7 = sld [smem:[#allocation3 + $0x2]]  ;;  %vm207_vm0 = vcmask 1046528   ;;  %vm225_vm1 = vcmask 1045504   ;;  %vm2735_vm2 = vcmask 130048  }
  0x2a   : > { %s2836_s8 = sld [smem:[#allocation3 + $0x1]]  ;;  %s2837_s10 = sld [smem:[#allocation3 + $0x4]] }
  0x2b   : > { %s182_s9 = scalar_select %p181_p11, %s3259_s2, 1 }
  0x2c   : > { %s2838_s12 = sld [smem:[#allocation3 + $0x7]]  ;;  %s2840_s13 = sld [smem:[#allocation3 + $0x5]] }
  0x2d   : > { %s3067_s11 = smul.u32 192, %s182_s9  ;;  %s2841_s25 = sld [smem:[#allocation3 + $0x8]] }
  0x2e   : > { %s3210_s26 = smov 126   ;;  %s3211_s27 = smov 127  }
  0x2f   : > { %s3319_s21 = scalar_lea.vmem %s4579_s0, %s3067_s11  ;;  %v292_v1 = vstv %s3313_s7  ;;  %s2849_s28 = sld [smem:[#allocation3 + $0x84]] }
  0x30   : > { %v3029_v0 = vld [vmem:[%s3319_s21] sm:$0xff]   ;;  %v236_v2 = vstv %s2836_s8  ;;  %v189_v3 = vld [vmem:[%s3319_s21 + $0x8] sm:$0x1]  ;;  %v250_v7 = vstv %s2837_s10  ;;  %s3349_s29 = sld [smem:[#allocation3 + $0x81]]  ;;  %s2850_s30 = sld [smem:[#allocation3 + $0x87]] }
  0x31   : > { %v3324_v4 = vunpack.c.h.bf16 %v3029_v0  ;;  %v3326_v5 = vunpack.c.l.bf16 %v3029_v0  ;;  %v3328_v6 = vunpack.c.l.bf16 %v189_v3  ;;  %v2843_v36 = vld [vmem:[%s3319_s21 + $0xc] sm:$0xff]   ;;  %v2844_v41 = vld [vmem:[%s3319_s21 + $0x14] sm:$0x1]  ;;  %s2852_s4 = sld [smem:[#allocation3 + $0x85]]  ;;  %s2851_s5 = sld [smem:[#allocation3 + $0x82]] }
  0x32   : > { %v271_v14 = vstv %s2838_s12  ;;  %v306_v18 = vstv %s2840_s13  ;;  %v3360_v42 = vunpack.c.h.bf16 %v2843_v36  ;;  %v3365_v44 = vunpack.c.l.bf16 %v2843_v36  ;;  %s2853_s6 = sld [smem:[#allocation3 + $0x88]]  ;;  %s2861_s7 = sld [smem:[#allocation3 + $0x104]] }
  0x33   : > { %v294_v8 = vmul.f32 %v3324_v4, %v292_v1  ;;  %v237_v9 = vmul.f32 %v3326_v5, %v236_v2  ;;  %v238_v10 = vmul.f32 %v3324_v4, %v236_v2  ;;  %v251_v11 = vmul.f32 %v3326_v5, %v250_v7  ;;  %s3402_s8 = sld [smem:[#allocation3 + $0x101]]  ;;  %s2862_s9 = sld [smem:[#allocation3 + $0x107]] }
  0x34   : > { %v252_v12 = vmul.f32 %v3324_v4, %v250_v7  ;;  %v253_v13 = vmul.f32 %v250_v7, %v3328_v6  ;;  %v273_v15 = vmul.f32 %v3324_v4, %v271_v14  ;;  %v274_v16 = vmul.f32 %v271_v14, %v3328_v6  ;;  %s3412_s10 = sld [smem:[#allocation3 + $0x102]]  ;;  %s2864_s11 = sld [smem:[#allocation3 + $0x105]] }
  0x35   : > { %299 = vrot.lane.b32.xlu1 %v294_v8, %s3210_s26  ;;  %241 = vrot.lane.b32.xlu0 %v237_v9, %s3211_s27  ;;  %v272_v17 = vmul.f32 %v3326_v5, %v271_v14  ;;  %v257_v19 = vrot.slane %v251_v11, 1  ;;  %v293_v22 = vmul.f32 %v3326_v5, %v292_v1  ;;  %v308_v24 = vmul.f32 %v3324_v4, %v306_v18  ;;  %s3423_s12 = sld [smem:[#allocation3]]  ;;  %s2834_s13 = sld [smem:[#allocation3 + $0x3]] }
  0x36   : > { %v258_v20 = vrot.slane %v252_v12, 1  ;;  %v260_v21 = vrot.slane %v253_v13, 1  ;;  %v279_v25 = vrot.slane %v273_v15, 2  ;;  %v281_v26 = vrot.slane %v274_v16, 2  ;;  %s2835_s18 = sld [smem:[#allocation3 + $0x6]]  ;;  %s2865_s20 = sld [smem:[#allocation3 + $0x108]] }
  0x37   : > { %v278_v27 = vrot.slane %v272_v17, 2  ;;  %v309_v28 = vmul.f32 %v306_v18, %v3328_v6  ;;  %v307_v30 = vmul.f32 %v3326_v5, %v306_v18  ;;  %v327_v31 = vstv %s2841_s25  ;;  %s3445_s25 = sld [smem:[#allocation3 + $0x184]] }
  0x38   : > { %v259_v23 = vsel %vm207_vm0, %v257_v19, %v258_v20  ;;  %v261_v29 = vsel %vm207_vm0, %v258_v20, %v260_v21  ;;  %v282_v32 = vsel %vm225_vm1, %v279_v25, %v281_v26  ;;  %v314_v34 = vrot.slane %v308_v24, 1  ;;  %v3060_v26 = vld [vmem:[%s3319_s21 + $0x18] sm:$0xff]  }
  0x39   : > { %262 = vrot.lane.b32.xlu1 %v259_v23, %s3211_s27  ;;  %243 = vrot.lane.b32.xlu0 %v238_v10, %s3211_s27  ;;  %v280_v33 = vsel %vm225_vm1, %v278_v27, %v279_v25  ;;  %v316_v35 = vrot.slane %v309_v28, 1  ;;  %v313_v37 = vrot.slane %v307_v30, 1  ;;  %v329_v38 = vmul.f32 %v3324_v4, %v327_v31  ;;  %v2856_v27 = vld [vmem:[%s3319_s21 + $0x20] sm:$0x1] }
  0x3a   : > { %v330_v39 = vmul.f32 %v327_v31, %v3328_v6  ;;  %v328_v40 = vmul.f32 %v3326_v5, %v327_v31  ;;  %v3367_v45 = vunpack.c.l.bf16 %v2844_v41  ;;  %v409_v46 = vstv %s2849_s28  ;;  %s3450_s28 = sld [smem:[#allocation3 + $0x181]] }
  0x3b   : > { %v317_v43 = vsel %vm207_vm0, %v314_v34, %v316_v35  ;;  %v315_v47 = vsel %vm207_vm0, %v313_v37, %v314_v34  ;;  %v335_v48 = vrot.slane %v329_v38, 2  ;;  %v395_v51 = vstv %s3349_s29  ;;  %s2846_s29 = sld [smem:[#allocation3 + $0x83]] }
  0x3c   : > { %v337_v49 = vrot.slane %v330_v39, 2  ;;  %v334_v50 = vrot.slane %v328_v40, 2  ;;  %v411_v52 = vmul.f32 %v409_v46, %v3360_v42  ;;  %v430_v53 = vstv %s2850_s30  ;;  %s2874_s30 = sld [smem:[#allocation3 + $0x187]] }
  0x3d   : > { %264 = vrot.lane.b32.xlu1 %v261_v29, %s3211_s27  ;;  %297 = vrot.lane.b32.xlu0 %v293_v22, %s3210_s26  ;;  %v412_v56 = vmul.f32 %v409_v46, %v3367_v45  ;;  %v410_v57 = vmul.f32 %v409_v46, %v3365_v44  ;;  %v397_v58 = vmul.f32 %v395_v51, %v3360_v42  ;;  %v465_v10 = vstv %s2852_s4  ;;  %s2847_s4 = sld [smem:[#allocation3 + $0x86]] }
  0x3e   : > { %v338_v54 = vsel %vm225_vm1, %v335_v48, %v337_v49  ;;  %v336_v55 = vsel %vm225_vm1, %v334_v50, %v335_v48  ;;  %v396_v59 = vmul.f32 %v395_v51, %v3365_v44  ;;  %v432_v60 = vmul.f32 %v430_v53, %v3360_v42 }
  0x3f   : > { %v433_v61 = vmul.f32 %v430_v53, %v3367_v45  ;;  %v417_v62 = vrot.slane %v411_v52, 1  ;;  %v419_v63 = vrot.slane %v412_v56, 1  ;;  %v416_v0 = vrot.slane %v410_v57, 1 }
  0x40   : > { %v431_v1 = vmul.f32 %v430_v53, %v3365_v44  ;;  %v438_v2 = vrot.slane %v432_v60, 2  ;;  %v451_v11 = vstv %s2851_s5  ;;  %v467_v12 = vmul.f32 %v465_v10, %v3360_v42  ;;  %s3499_s5 = sld [smem:[#allocation3 + $0x185]] }
  0x41   : > { %285 = vrot.lane.b32.xlu1 %v282_v32, %s3211_s27  ;;  %283 = vrot.lane.b32.xlu0 %v280_v33, %s3211_s27  ;;  %v440_v3 = vrot.slane %v433_v61, 2  ;;  %v420_v7 = vsel %vm207_vm0, %v417_v62, %v419_v63  ;;  %v418_v8 = vsel %vm207_vm0, %v416_v0, %v417_v62  ;;  %v468_v13 = vmul.f32 %v465_v10, %v3367_v45 }
  0x42   : > { %v437_v9 = vrot.slane %v431_v1, 2  ;;  %v466_v16 = vmul.f32 %v465_v10, %v3365_v44  ;;  %v486_v17 = vstv %s2853_s6  ;;  %v453_v18 = vmul.f32 %v451_v11, %v3360_v42  ;;  %s2875_s6 = sld [smem:[#allocation3 + $0x182]] }
  0x43   : > { %v441_v14 = vsel %vm225_vm1, %v438_v2, %v440_v3  ;;  %v452_v19 = vmul.f32 %v451_v11, %v3365_v44  ;;  %v473_v20 = vrot.slane %v467_v12, 1  ;;  %v475_v21 = vrot.slane %v468_v13, 1 }
  0x44   : > { %v439_v15 = vsel %vm225_vm1, %v437_v9, %v438_v2  ;;  %v488_v22 = vmul.f32 %v486_v17, %v3360_v42  ;;  %v489_v23 = vmul.f32 %v486_v17, %v3367_v45  ;;  %v472_v24 = vrot.slane %v466_v16, 1 }
  0x45   : > { %320 = vrot.lane.b32.xlu1 %v317_v43, %s3210_s26  ;;  %318 = vrot.lane.b32.xlu0 %v315_v47, %s3210_s26  ;;  %v487_v25 = vmul.f32 %v486_v17, %v3365_v44  ;;  %v476_v28 = vsel %vm207_vm0, %v473_v20, %v475_v21  ;;  %v3410_v31 = vunpack.c.h.bf16 %v3060_v26  ;;  %v3415_v34 = vunpack.c.l.bf16 %v3060_v26 }
  0x46   : > { %v494_v29 = vrot.slane %v488_v22, 2  ;;  %v496_v30 = vrot.slane %v489_v23, 2  ;;  %v474_v32 = vsel %vm207_vm0, %v472_v24, %v473_v20  ;;  %v3417_v35 = vunpack.c.l.bf16 %v2856_v27  ;;  %v2868_v23 = vld [vmem:[%s3319_s21 + $0x2c] sm:$0x1] }
  0x47   : > { %v493_v33 = vrot.slane %v487_v25, 2  ;;  %v568_v36 = vstv %s2861_s7  ;;  %v554_v38 = vstv %s3402_s8  ;;  %v589_v39 = vstv %s2862_s9  ;;  %s2877_s7 = sld [smem:[#allocation3 + $0x188]]  ;;  %s2885_s8 = sld [smem:[#allocation3 + $0x204]] }
  0x48   : > { %v497_v37 = vsel %vm225_vm1, %v494_v29, %v496_v30  ;;  %v570_v41 = vmul.f32 %v3410_v31, %v568_v36  ;;  %v571_v43 = vmul.f32 %v568_v36, %v3417_v35  ;;  %v569_v46 = vmul.f32 %v3415_v34, %v568_v36  ;;  %s3541_s9 = sld [smem:[#allocation3 + $0x201]] }
  0x49   : > { %341 = vrot.lane.b32.xlu1 %v338_v54, %s3210_s26  ;;  %339 = vrot.lane.b32.xlu0 %v336_v55, %s3210_s26  ;;  %v495_v40 = vsel %vm225_vm1, %v493_v33, %v494_v29  ;;  %v556_v47 = vmul.f32 %v3410_v31, %v554_v38  ;;  %v591_v48 = vmul.f32 %v3410_v31, %v589_v39  ;;  %v610_v52 = vstv %s3412_s10  ;;  %s2886_s10 = sld [smem:[#allocation3 + $0x207]] }
  0x4a   : > { %v555_v49 = vmul.f32 %v3415_v34, %v554_v38  ;;  %v592_v50 = vmul.f32 %v589_v39, %v3417_v35  ;;  %v590_v51 = vmul.f32 %v3415_v34, %v589_v39  ;;  %v576_v53 = vrot.slane %v570_v41, 1 }
  0x4b   : > { %v578_v54 = vrot.slane %v571_v43, 1  ;;  %v575_v55 = vrot.slane %v569_v46, 1  ;;  %v597_v56 = vrot.slane %v591_v48, 2  ;;  %v612_v57 = vmul.f32 %v3410_v31, %v610_v52 }
  0x4c   : > { %v596_v60 = vrot.slane %v590_v51, 2  ;;  %v194_v61 = vstv %s3423_s12  ;;  %v200_v62 = vstv %s2834_s13  ;;  %v218_v2 = vstv %s2835_s18  ;;  %s2887_s12 = sld [smem:[#allocation3 + $0x202]]  ;;  %s2889_s13 = sld [smem:[#allocation3 + $0x208]] }
  0x4d   : > { %402 = vrot.lane.b32.xlu1 %v397_v58, %s3211_s27  ;;  %400 = vrot.lane.b32.xlu0 %v396_v59, %s3211_s27  ;;  %v624_v58 = vstv %s2864_s11  ;;  %v599_v59 = vrot.slane %v592_v50, 2  ;;  %v579_v63 = vsel %vm207_vm0, %v576_v53, %v578_v54  ;;  %v577_v0 = vsel %vm207_vm0, %v575_v55, %v576_v53  ;;  %s2888_s11 = sld [smem:[#allocation3 + $0x205]]  ;;  %s2897_s18 = sld [smem:[#allocation3 + $0x284]] }
  0x4e   : > { %v202_v1 = vmul.f32 %v3324_v4, %v200_v62  ;;  %v611_v3 = vmul.f32 %v3415_v34, %v610_v52  ;;  %v201_v9 = vmul.f32 %v3326_v5, %v200_v62  ;;  %v626_v10 = vmul.f32 %v3410_v31, %v624_v58 }
  0x4f   : > { %v195_v12 = vmul.f32 %v3326_v5, %v194_v61  ;;  %v219_v13 = vmul.f32 %v3326_v5, %v218_v2  ;;  %v2867_v5 = vld [vmem:[%s3319_s21 + $0x24] sm:$0xff]   ;;  %v203_v25 = vmul.f32 %v200_v62, %v3328_v6  ;;  %v221_v26 = vmul.f32 %v218_v2, %v3328_v6 }
  0x50   : > { %v209_v11 = vrot.slane %v202_v1, 1  ;;  %v208_v17 = vrot.slane %v201_v9, 1  ;;  %v632_v27 = vrot.slane %v626_v10, 1  ;;  %v196_v30 = vmul.f32 %v3324_v4, %v194_v61 }
  0x51   : > { %423 = vrot.lane.b32.xlu1 %v420_v7, %s3211_s27  ;;  %421 = vrot.lane.b32.xlu0 %v418_v8, %s3211_s27  ;;  %v645_v7 = vstv %s2865_s20  ;;  %v220_v8 = vmul.f32 %v3324_v4, %v218_v2  ;;  %v226_v21 = vrot.slane %v219_v13, 2  ;;  %v211_v36 = vrot.slane %v203_v25, 1  ;;  %s3590_s20 = sld [smem:[#allocation3 + $0x281]] }
  0x52   : > { %v647_v20 = vmul.f32 %v3410_v31, %v645_v7  ;;  %v648_v22 = vmul.f32 %v645_v7, %v3417_v35  ;;  %v210_v24 = vsel %vm207_vm0, %v208_v17, %v209_v11  ;;  %v646_v33 = vmul.f32 %v3415_v34, %v645_v7 }
  0x53   : > { %v227_v16 = vrot.slane %v220_v8, 2  ;;  %v3472_v6 = vunpack.c.h.bf16 %v2867_v5  ;;  %v3474_v39 = vunpack.c.l.bf16 %v2868_v23  ;;  %v3478_v4 = vunpack.c.l.bf16 %v2867_v5 }
  0x54   : > { %v727_v41 = vstv %s3445_s25  ;;  %v212_v43 = vsel %vm207_vm0, %v209_v11, %v211_v36  ;;  %v653_v50 = vrot.slane %v647_v20, 2  ;;  %v655_v51 = vrot.slane %v648_v22, 2  ;;  %s2898_s25 = sld [smem:[#allocation3 + $0x287]] }
  0x55   : > { %444 = vrot.lane.b32.xlu1 %v441_v14, %s3211_s27  ;;  %442 = vrot.lane.b32.xlu0 %v439_v15, %s3211_s27  ;;  %v600_v14 = vsel %vm225_vm1, %v597_v56, %v599_v59  ;;  %v627_v15 = vmul.f32 %v624_v58, %v3417_v35  ;;  %v228_v29 = vsel %vm225_vm1, %v226_v21, %v227_v16  ;;  %v652_v52 = vrot.slane %v646_v33, 2 }
  0x56   : > { %v216_v48 = vadd.f32 %v212_v43, %v196_v30  ;;  %v729_v54 = vmul.f32 %v727_v41, %v3472_v6  ;;  %v730_v55 = vmul.f32 %v727_v41, %v3474_v39  ;;  %v361_v62 = vstv %s2846_s29  ;;  %s3613_s29 = sld [smem:[#allocation3 + $0x282]] }
  0x57   : > { %v748_v1 = vstv %s2874_s30  ;;  %v363_v2 = vmul.f32 %v361_v62, %v3360_v42  ;;  %v364_v7 = vmul.f32 %v361_v62, %v3367_v45  ;;  %v378_v8 = vstv %s2847_s4  ;;  %s2901_s30 = sld [smem:[#allocation3 + $0x288]] }
  0x58   : > { %v362_v9 = vmul.f32 %v361_v62, %v3365_v44  ;;  %v380_v11 = vmul.f32 %v378_v8, %v3360_v42  ;;  %v379_v13 = vmul.f32 %v378_v8, %v3365_v44  ;;  %s3621_s4 = sld [smem:[#allocation3 + $0x80]] }
  0x59   : > { %458 = vrot.lane.b32.xlu1 %v453_v18, %s3210_s26  ;;  %456 = vrot.lane.b32.xlu0 %v452_v19, %s3210_s26  ;;  %v598_v18 = vsel %vm225_vm1, %v596_v60, %v597_v56  ;;  %v625_v19 = vmul.f32 %v3415_v34, %v624_v58  ;;  %v728_v58 = vmul.f32 %v727_v41, %v3478_v4  ;;  %v369_v10 = vrot.slane %v363_v2, 1 }
  0x5a   : > { %v654_v60 = vsel %vm225_vm1, %v652_v52, %v653_v50  ;;  %v368_v17 = vrot.slane %v362_v9, 1  ;;  %v385_v21 = vrot.slane %v379_v13, 2  ;;  %v804_v41 = vstv %s2877_s7  ;;  %s3650_s7 = sld [smem:[#allocation3 + $0x307]] }
  0x5b   : > { %v631_v38 = vrot.slane %v625_v19, 1  ;;  %v386_v19 = vrot.slane %v380_v11, 2  ;;  %v807_v52 = vmul.f32 %v804_v41, %v3474_v39 }
  0x5c   : > { %v3516_v22 = vsel %vm207_vm0, %v368_v17, %v369_v10 }
  0x5d   : > { %479 = vrot.lane.b32.xlu1 %v476_v28, %s3210_s26  ;;  %477 = vrot.lane.b32.xlu0 %v474_v32, %s3210_s26  ;;  %v215_v28 = vadd.f32 %v210_v24, %v195_v12  ;;  %v634_v32 = vrot.slane %v627_v15, 1  ;;  %v633_v53 = vsel %vm207_vm0, %v631_v38, %v632_v27  ;;  %v381_v12 = vmul.f32 %v378_v8, %v3367_v45 }
  0x5e   : > { %v751_v15 = vmul.f32 %v748_v1, %v3474_v39  ;;  %v3522_v23 = vsel %vm225_vm1, %v385_v21, %v386_v19 }
  0x5f   : > { %v388_v20 = vrot.slane %v381_v12, 2 }
  0x61   : > { %500 = vrot.lane.b32.xlu1 %v497_v37, %s3210_s26  ;;  %498 = vrot.lane.b32.xlu0 %v495_v40, %s3210_s26  ;;  %v229_v37 = vrot.slane %v221_v26, 2  ;;  %v3476_v40 = vadd.f32 %v228_v29, %v215_v28  ;;  %v3519_v5 = vsel %vm225_vm1, %v386_v19, %v388_v20  ;;  %v783_v29 = vstv %s3499_s5  ;;  %s3637_s5 = sld [smem:[#allocation3 + $0x304]] }
  0x62   : > { %v785_v30 = vmul.f32 %v783_v29, %v3472_v6  ;;  %v784_v38 = vmul.f32 %v783_v29, %v3478_v4  ;;  %v942_v20 = vstv %s2888_s11  ;;  %s3681_s11 = sld [smem:[#allocation3 + $0x103]] }
  0x63   : > { %v230_v46 = vsel %vm225_vm1, %v227_v16, %v229_v37  ;;  %v371_v16 = vrot.slane %v364_v7, 1  ;;  %v769_v37 = vstv %s2875_s6  ;;  %s3643_s6 = sld [smem:[#allocation3 + $0x301]] }
  0x64   : > { %v3490_v56 = vadd.f32 %v230_v46, %v216_v48  ;;  %v771_v43 = vmul.f32 %v769_v37, %v3472_v6  ;;  %v770_v46 = vmul.f32 %v769_v37, %v3478_v4 }
  0x65   : > { %561 = vrot.lane.b32.xlu1 %v556_v47, %s3211_s27  ;;  %559 = vrot.lane.b32.xlu0 %v555_v49, %s3211_s27  ;;  %v713_v47 = vstv %s3450_s28  ;;  %v635_v49 = vsel %vm207_vm0, %v632_v27, %v634_v32  ;;  %v3513_v45 = vsel %vm207_vm0, %v369_v10, %v371_v16  ;;  %v758_v27 = vrot.slane %v751_v15, 2  ;;  %s2900_s28 = sld [smem:[#allocation3 + $0x285]] }
  0x66   : > { %v715_v59 = vmul.f32 %v713_v47, %v3472_v6  ;;  %v714_v61 = vmul.f32 %v713_v47, %v3478_v4  ;;  %v786_v32 = vmul.f32 %v783_v29, %v3474_v39  ;;  %v791_v47 = vrot.slane %v785_v30, 1 }
  0x67   : > { %v907_v10 = vstv %s2886_s10  ;;  %s3679_s10 = sld [smem:[#allocation3 + $0x100]] }
  0x68   : > { %v793_v48 = vrot.slane %v786_v32, 1 }
  0x69   : > { %582 = vrot.lane.b32.xlu1 %v579_v63, %s3211_s27  ;;  %580 = vrot.lane.b32.xlu0 %v577_v0, %s3211_s27  ;;  %v735_v63 = vrot.slane %v729_v54, 1  ;;  %v737_v0 = vrot.slane %v730_v55, 1  ;;  %v2880_v54 = vld [vmem:[%s3319_s21 + $0x38] sm:$0x1] }
  0x6b   : > { %v738_v24 = vsel %vm207_vm0, %v735_v63, %v737_v0 }
  0x6d   : > { %603 = vrot.lane.b32.xlu1 %v600_v14, %s3211_s27  ;;  %601 = vrot.lane.b32.xlu0 %v598_v18, %s3211_s27  ;;  %v750_v14 = vmul.f32 %v748_v1, %v3472_v6  ;;  %v749_v18 = vmul.f32 %v748_v1, %v3478_v4  ;;  %v872_v1 = vstv %s3541_s9  ;;  %s3675_s9 = sld [smem:[#allocation3 + $0x305]] }
  0x6f   : > { %v756_v26 = vrot.slane %v750_v14, 2  ;;  %v755_v28 = vrot.slane %v749_v18, 2 }
  0x71   : > { %617 = vrot.lane.b32.xlu1 %v612_v57, %s3210_s26  ;;  %615 = vrot.lane.b32.xlu0 %v611_v3, %s3210_s26  ;;  %v656_v57 = vsel %vm225_vm1, %v653_v50, %v655_v51  ;;  %v734_v3 = vrot.slane %v728_v58, 1  ;;  %v759_v33 = vsel %vm225_vm1, %v756_v26, %v758_v27  ;;  %v757_v36 = vsel %vm225_vm1, %v755_v28, %v756_v26 }
  0x72   : > { %v790_v50 = vrot.slane %v784_v38, 1  ;;  %v806_v51 = vmul.f32 %v804_v41, %v3472_v6  ;;  %v794_v58 = vsel %vm207_vm0, %v791_v47, %v793_v48  ;;  %v928_v28 = vstv %s2887_s12  ;;  %s3687_s12 = sld [smem:[#allocation3 + $0x106]] }
  0x73   : > { %v736_v25 = vsel %vm207_vm0, %v734_v3, %v735_v63  ;;  %v814_v63 = vrot.slane %v807_v52, 2 }
  0x74   : > { %v812_v62 = vrot.slane %v806_v51, 2  ;;  %v2892_v51 = vld [vmem:[%s3319_s21 + $0x44] sm:$0x1] }
  0x75   : > { %638 = vrot.lane.b32.xlu1 %v635_v49, %s3210_s26  ;;  %636 = vrot.lane.b32.xlu0 %v633_v53, %s3210_s26  ;;  %v3061_v49 = vld [vmem:[%s3319_s21 + $0x30] sm:$0xff]   ;;  %v805_v53 = vmul.f32 %v804_v41, %v3478_v4 }
  0x76   : > { %v3547_v55 = vunpack.c.h.bf16 %v3061_v49  ;;  %v815_v7 = vsel %vm225_vm1, %v812_v62, %v814_v63  ;;  %v3602_v63 = vunpack.c.l.bf16 %v2892_v51 }
  0x77   : > { %v811_v0 = vrot.slane %v805_v53, 2 }
  0x78   : > { %v874_v11 = vmul.f32 %v3547_v55, %v872_v1  ;;  %v909_v13 = vmul.f32 %v3547_v55, %v907_v10  ;;  %v944_v27 = vmul.f32 %v3547_v55, %v942_v20  ;;  %v930_v37 = vmul.f32 %v3547_v55, %v928_v28 }
  0x79   : > { %659 = vrot.lane.b32.xlu1 %v656_v57, %s3210_s26  ;;  %657 = vrot.lane.b32.xlu0 %v654_v60, %s3210_s26  ;;  %v3554_v57 = vunpack.c.l.bf16 %v2880_v54  ;;  %v886_v60 = vstv %s2885_s8  ;;  %v813_v8 = vsel %vm225_vm1, %v811_v0, %v812_v62  ;;  %v1045_v0 = vstv %s2897_s18  ;;  %s3667_s8 = sld [smem:[#allocation3 + $0x302]]  ;;  %s3718_s18 = sld [smem:[#allocation3 + $0x384]] }
  0x7a   : > { %v888_v2 = vmul.f32 %v3547_v55, %v886_v60  ;;  %v915_v19 = vrot.slane %v909_v13, 2  ;;  %v950_v41 = vrot.slane %v944_v27, 1 }
  0x7b   : > { %v889_v3 = vmul.f32 %v886_v60, %v3554_v57  ;;  %v910_v14 = vmul.f32 %v907_v10, %v3554_v57  ;;  %v945_v29 = vmul.f32 %v942_v20, %v3554_v57 }
  0x7c   : > { %v894_v15 = vrot.slane %v888_v2, 1 }
  0x7d   : > { %720 = vrot.lane.b32.xlu1 %v715_v59, %s3211_s27  ;;  %718 = vrot.lane.b32.xlu0 %v714_v61, %s3211_s27  ;;  %v3552_v59 = vunpack.c.l.bf16 %v3061_v49  ;;  %v792_v61 = vsel %vm207_vm0, %v790_v50, %v791_v47  ;;  %v896_v16 = vrot.slane %v889_v3, 1  ;;  %v2891_v50 = vld [vmem:[%s3319_s21 + $0x3c] sm:$0xff]   ;;  %v1031_v3 = vstv %s3590_s20  ;;  %s3728_s20 = sld [smem:[#allocation3 + $0x381]] }
  0x7e   : > { %v3600_v62 = vunpack.c.l.bf16 %v2891_v50 }
  0x7f   : > { %v887_v9 = vmul.f32 %v3552_v59, %v886_v60  ;;  %v873_v12 = vmul.f32 %v3552_v59, %v872_v1  ;;  %v908_v18 = vmul.f32 %v3552_v59, %v907_v10  ;;  %v897_v21 = vsel %vm207_vm0, %v894_v15, %v896_v16 }
  0x80   : > { %v929_v38 = vmul.f32 %v3552_v59, %v928_v28  ;;  %v1066_v10 = vstv %s2898_s25  ;;  %s3735_s25 = sld [smem:[#allocation3 + $0x387]] }
  0x81   : > { %741 = vrot.lane.b32.xlu1 %v738_v24, %s3211_s27  ;;  %739 = vrot.lane.b32.xlu0 %v736_v25, %s3211_s27  ;;  %v893_v17 = vrot.slane %v887_v9, 1  ;;  %v917_v25 = vrot.slane %v910_v14, 2  ;;  %v914_v26 = vrot.slane %v908_v18, 2  ;;  %v1046_v9 = vmul.f32 %v1045_v0, %v3600_v62 }
  0x82   : > { %v1032_v14 = vmul.f32 %v1031_v3, %v3600_v62  ;;  %v1069_v16 = vmul.f32 %v1066_v10, %v3602_v63 }
  0x83   : > { %v895_v24 = vsel %vm207_vm0, %v893_v17, %v894_v15  ;;  %v918_v30 = vsel %vm225_vm1, %v915_v19, %v917_v25  ;;  %v916_v32 = vsel %vm225_vm1, %v914_v26, %v915_v19  ;;  %v1052_v19 = vrot.slane %v1046_v9, 1  ;;  %v3062_v9 = vld [vmem:[%s3319_s21 + $0x48] sm:$0xff]  }
  0x84   : > { %v1101_v26 = vstv %s2900_s28  ;;  %s3755_s28 = sld [smem:[#allocation3 + $0x382]] }
  0x85   : > { %762 = vrot.lane.b32.xlu1 %v759_v33, %s3211_s27  ;;  %760 = vrot.lane.b32.xlu0 %v757_v36, %s3211_s27  ;;  %v943_v33 = vmul.f32 %v3552_v59, %v942_v20  ;;  %v963_v36 = vstv %s2889_s13  ;;  %v1067_v20 = vmul.f32 %v1066_v10, %v3600_v62  ;;  %s3696_s13 = sld [smem:[#allocation3 + $0x308]] }
  0x86   : > { %v966_v47 = vmul.f32 %v963_v36, %v3554_v57  ;;  %v964_v48 = vmul.f32 %v3552_v59, %v963_v36 }
  0x87   : > { %v949_v49 = vrot.slane %v943_v33, 1 }
  0x88   : > { %v973_v54 = vrot.slane %v966_v47, 2  ;;  %v1122_v47 = vstv %s2901_s30  ;;  %s3771_s30 = sld [smem:[#allocation3 + $0x183]] }
  0x89   : > { %776 = vrot.lane.b32.xlu1 %v771_v43, %s3210_s26  ;;  %774 = vrot.lane.b32.xlu0 %v770_v46, %s3210_s26  ;;  %v952_v43 = vrot.slane %v945_v29, 1  ;;  %v965_v46 = vmul.f32 %v3547_v55, %v963_v36  ;;  %v951_v60 = vsel %vm207_vm0, %v949_v49, %v950_v41  ;;  %v1076_v29 = vrot.slane %v1069_v16, 2  ;;  %v2904_v16 = vld [vmem:[%s3319_s21 + $0x50] sm:$0x1] }
  0x8b   : > { %v953_v52 = vsel %vm207_vm0, %v950_v41, %v952_v43  ;;  %v971_v53 = vrot.slane %v965_v46, 2  ;;  %v1104_v43 = vmul.f32 %v1101_v26, %v3602_v63  ;;  %v1102_v46 = vmul.f32 %v1101_v26, %v3600_v62 }
  0x8d   : > { %797 = vrot.lane.b32.xlu1 %v794_v58, %s3210_s26  ;;  %795 = vrot.lane.b32.xlu0 %v792_v61, %s3210_s26  ;;  %v970_v58 = vrot.slane %v964_v48, 2  ;;  %v3598_v61 = vunpack.c.h.bf16 %v2891_v50  ;;  %v974_v1 = vsel %vm225_vm1, %v971_v53, %v973_v54  ;;  %v355_v54 = vstv %s3621_s4  ;;  %s3778_s4 = sld [smem:[#allocation3 + $0x180]] }
  0x8f   : > { %v972_v2 = vsel %vm225_vm1, %v970_v58, %v971_v53  ;;  %v1033_v13 = vmul.f32 %v1031_v3, %v3598_v61  ;;  %v1068_v15 = vmul.f32 %v1066_v10, %v3598_v61  ;;  %v1103_v41 = vmul.f32 %v1101_v26, %v3598_v61 }
  0x90   : > { %v1108_v3 = vrot.slane %v1102_v46, 1 }
  0x91   : > { %818 = vrot.lane.b32.xlu1 %v815_v7, %s3210_s26  ;;  %816 = vrot.lane.b32.xlu0 %v813_v8, %s3210_s26  ;;  %v1047_v7 = vmul.f32 %v1045_v0, %v3598_v61  ;;  %v1048_v8 = vmul.f32 %v1045_v0, %v3602_v63  ;;  %v1074_v25 = vrot.slane %v1068_v15, 2  ;;  %v1109_v0 = vrot.slane %v1103_v41, 1 }
  0x92   : > { %v357_v15 = vmul.f32 %v355_v54, %v3360_v42  ;;  %v1225_v41 = vstv %s3650_s7  ;;  %s3805_s7 = sld [smem:[#allocation3 + $0x404]] }
  0x93   : > { %v1053_v17 = vrot.slane %v1047_v7, 1  ;;  %v1055_v18 = vrot.slane %v1048_v8, 1  ;;  %v1077_v50 = vsel %vm225_vm1, %v1074_v25, %v1076_v29  ;;  %v1125_v7 = vmul.f32 %v1122_v47, %v3602_v63 }
  0x94   : > { %v1123_v8 = vmul.f32 %v1122_v47, %v3600_v62 }
  0x95   : > { %879 = vrot.lane.b32.xlu1 %v874_v11, %s3211_s27  ;;  %877 = vrot.lane.b32.xlu0 %v873_v12, %s3211_s27  ;;  %v1056_v27 = vsel %vm207_vm0, %v1053_v17, %v1055_v18  ;;  %v1054_v28 = vsel %vm207_vm0, %v1052_v19, %v1053_v17  ;;  %v356_v17 = vmul.f32 %v355_v54, %v3365_v44  ;;  %v3655_v19 = vunpack.c.h.bf16 %v3062_v9 }
  0x96   : > { %v3663_v44 = vunpack.c.l.bf16 %v2904_v16 }
  0x97   : > { %v1227_v54 = vmul.f32 %v3655_v19, %v1225_v41 }
  0x99   : > { %900 = vrot.lane.b32.xlu1 %v897_v21, %s3211_s27  ;;  %898 = vrot.lane.b32.xlu0 %v895_v24, %s3211_s27 }
  0x9d   : > { %921 = vrot.lane.b32.xlu1 %v918_v30, %s3211_s27  ;;  %919 = vrot.lane.b32.xlu0 %v916_v32, %s3211_s27  ;;  %v1073_v30 = vrot.slane %v1067_v20, 2  ;;  %v3657_v20 = vunpack.c.l.bf16 %v3062_v9 }
  0xa1   : > { %935 = vrot.lane.b32.xlu1 %v930_v37, %s3210_s26  ;;  %933 = vrot.lane.b32.xlu0 %v929_v38, %s3210_s26  ;;  %v1087_v38 = vstv %s3613_s29  ;;  %s3763_s29 = sld [smem:[#allocation3 + $0x385]] }
  0xa2   : > { %v1088_v53 = vmul.f32 %v1087_v38, %v3600_v62 }
  0xa5   : > { %956 = vrot.lane.b32.xlu1 %v953_v52, %s3210_s26  ;;  %954 = vrot.lane.b32.xlu0 %v951_v60, %s3210_s26  ;;  %v1089_v52 = vmul.f32 %v1087_v38, %v3598_v61 }
  0xa7   : > { %v300_v11 = vpop.permute.xlu1 %299  ;;  %v242_v12 = vpop.permute.xlu0 %241 }
  0xa8   : > { %v247_v36 = vadd.f32 %v242_v12, %v3476_v40  ;;  %v1075_v40 = vsel %vm225_vm1, %v1073_v30, %v1074_v25  ;;  %v1129_v25 = vrot.slane %v1123_v8, 2  ;;  %v1233_v8 = vrot.slane %v1227_v54, 2 }
  0xa9   : > { %977 = vrot.lane.b32.xlu1 %v974_v1, %s3210_s26  ;;  %975 = vrot.lane.b32.xlu0 %v972_v2, %s3210_s26  ;;  %v1124_v1 = vmul.f32 %v1122_v47, %v3598_v61  ;;  %v1111_v2 = vrot.slane %v1104_v43, 1 }
  0xab   : > { %v263_v21 = vpop.permute.xlu1 %262  ;;  %v244_v24 = vpop.permute.xlu0 %243  ;;  %v1130_v18 = vrot.slane %v1124_v1, 2 }
  0xac   : > { %v248_v37 = vadd.f32 %v244_v24, %v3490_v56  ;;  %v268_v48 = vadd.f32 %v263_v21, %v247_v36  ;;  %v1110_v21 = vsel %vm207_vm0, %v1108_v3, %v1109_v0  ;;  %v1132_v24 = vrot.slane %v1125_v7, 2 }
  0xad   : > { %1038 = vrot.lane.b32.xlu1 %v1033_v13, %s3211_s27  ;;  %1036 = vrot.lane.b32.xlu0 %v1032_v14, %s3211_s27  ;;  %v1246_v7 = vstv %s3667_s8  ;;  %s3813_s8 = sld [smem:[#allocation3 + $0x401]] }
  0xae   : > { %v1133_v36 = vsel %vm225_vm1, %v1130_v18, %v1132_v24 }
  0xaf   : > { %v265_v32 = vpop.permute.xlu1 %264  ;;  %v298_v33 = vpop.permute.xlu0 %297 }
  0xb0   : > { %v269_v49 = vadd.f32 %v265_v32, %v248_v37  ;;  %v1131_v37 = vsel %vm225_vm1, %v1129_v25, %v1130_v18  ;;  %v514_v18 = vstv %s3679_s10  ;;  %s3838_s10 = sld [smem:[#allocation3 + $0x402]] }
  0xb1   : > { %1059 = vrot.lane.b32.xlu1 %v1056_v27, %s3211_s27  ;;  %1057 = vrot.lane.b32.xlu0 %v1054_v28, %s3211_s27  ;;  %v1204_v27 = vstv %s3637_s5  ;;  %v515_v54 = vmul.f32 %v3415_v34, %v514_v18  ;;  %s3780_s5 = sld [smem:[#allocation3 + $0x388]] }
  0xb2   : > { %v1206_v38 = vmul.f32 %v3655_v19, %v1204_v27  ;;  %v1207_v47 = vmul.f32 %v1204_v27, %v3663_v44 }
  0xb3   : > { %v286_v56 = vpop.permute.xlu1 %285  ;;  %v284_v51 = vpop.permute.xlu0 %283 }
  0xb4   : > { %v290_v58 = vadd.f32 %v286_v56, %v269_v49  ;;  %v289_v60 = vadd.f32 %v284_v51, %v268_v48  ;;  %v1205_v48 = vmul.f32 %v3657_v20, %v1204_v27 }
  0xb5   : > { %1080 = vrot.lane.b32.xlu1 %v1077_v50, %s3211_s27  ;;  %1078 = vrot.lane.b32.xlu0 %v1075_v40, %s3211_s27 }
  0xb6   : > { %v304_v10 = vadd.f32 %v300_v11, %v290_v58  ;;  %v303_v12 = vadd.f32 %v298_v33, %v289_v60  ;;  %v1112_v11 = vsel %vm207_vm0, %v1109_v0, %v1111_v2  ;;  %v1190_v33 = vstv %s3643_s6  ;;  %s3782_s6 = sld [smem:[#allocation3 + $0x186]] }
  0xb7   : > { %v321_v13 = vpop.permute.xlu1 %320  ;;  %v319_v14 = vpop.permute.xlu0 %318  ;;  %v1192_v51 = vmul.f32 %v3655_v19, %v1190_v33  ;;  %v1228_v58 = vmul.f32 %v1225_v41, %v3663_v44  ;;  %v1214_v0 = vrot.slane %v1207_v47, 1  ;;  %v1211_v1 = vrot.slane %v1205_v48, 1 }
  0xb8   : > { %v325_v42 = vadd.f32 %v321_v13, %v304_v10  ;;  %v324_v26 = vadd.f32 %v319_v14, %v303_v12 }
  0xb9   : > { %1094 = vrot.lane.b32.xlu1 %v1089_v52, %s3210_s26  ;;  %1092 = vrot.lane.b32.xlu0 %v1088_v53, %s3210_s26  ;;  %v1191_v52 = vmul.f32 %v3657_v20, %v1190_v33  ;;  %v1212_v53 = vrot.slane %v1206_v38, 1  ;;  %v1235_v9 = vrot.slane %v1228_v58, 2  ;;  %v1281_v33 = vstv %s3696_s13  ;;  %s3857_s13 = sld [smem:[#allocation3 + $0x200]] }
  0xba   : > { %v516_v38 = vmul.f32 %v3410_v31, %v514_v18 }
  0xbb   : > { %v342_v28 = vpop.permute.xlu1 %341  ;;  %v340_v29 = vpop.permute.xlu0 %339  ;;  %v1215_v13 = vsel %vm207_vm0, %v1212_v53, %v1214_v0  ;;  %v1213_v14 = vsel %vm207_vm0, %v1211_v1, %v1212_v53 }
  0xbc   : > { %v346_v30 = vadd.f32 %v342_v28, %v325_v42  ;;  %v345_v32 = vadd.f32 %v340_v29, %v324_v26  ;;  %v1236_v26 = vsel %vm225_vm1, %v1233_v8, %v1235_v9  ;;  %v1247_v28 = vmul.f32 %v3657_v20, %v1246_v7 }
  0xbd   : > { %1115 = vrot.lane.b32.xlu1 %v1112_v11, %s3210_s26  ;;  %1113 = vrot.lane.b32.xlu0 %v1110_v21, %s3210_s26  ;;  %v520_v11 = vstv %s3681_s11  ;;  %v537_v21 = vstv %s3687_s12  ;;  %s3846_s11 = sld [smem:[#allocation3 + $0x405]]  ;;  %s3850_s12 = sld [smem:[#allocation3 + $0x203]] }
  0xbe   : > { %v359_v43 = vadd.f32 %v357_v15, %v346_v30  ;;  %v358_v46 = vadd.f32 %v356_v17, %v345_v32  ;;  %v1248_v17 = vmul.f32 %v3655_v19, %v1246_v7  ;;  %v522_v32 = vmul.f32 %v3410_v31, %v520_v11 }
  0xbf   : > { %v403_v49 = vpop.permute.xlu1 %402  ;;  %v401_v50 = vpop.permute.xlu0 %400  ;;  %v540_v47 = vmul.f32 %v537_v21, %v3417_v35  ;;  %v538_v0 = vmul.f32 %v3415_v34, %v537_v21 }
  0xc0   : > { %v376_v40 = vadd.f32 %v3513_v45, %v359_v43  ;;  %v375_v56 = vadd.f32 %v3516_v22, %v358_v46  ;;  %v1226_v45 = vmul.f32 %v3657_v20, %v1225_v41  ;;  %v523_v41 = vmul.f32 %v520_v11, %v3417_v35 }
  0xc1   : > { %1136 = vrot.lane.b32.xlu1 %v1133_v36, %s3210_s26  ;;  %1134 = vrot.lane.b32.xlu0 %v1131_v37, %s3210_s26  ;;  %v3723_v43 = vmul.f32 %v3410_v31, %v537_v21  ;;  %v521_v46 = vmul.f32 %v3415_v34, %v520_v11  ;;  %v1284_v31 = vmul.f32 %v1281_v33, %v3663_v44  ;;  %v528_v53 = vrot.slane %v522_v32, 1 }
  0xc2   : > { %v393_v22 = vadd.f32 %v3519_v5, %v376_v40  ;;  %v392_v60 = vadd.f32 %v3522_v23, %v375_v56  ;;  %v1232_v10 = vrot.slane %v1226_v45, 2  ;;  %v1260_v5 = vstv %s3675_s9  ;;  %v2915_v40 = vld [vmem:[%s3319_s21 + $0x54] sm:$0xff]   ;;  %s3820_s9 = sld [smem:[#allocation3 + $0x407]] }
  0xc3   : > { %v424_v2 = vpop.permute.xlu1 %423  ;;  %v422_v3 = vpop.permute.xlu0 %421  ;;  %v1262_v24 = vmul.f32 %v3655_v19, %v1260_v5  ;;  %v1263_v25 = vmul.f32 %v1260_v5, %v3663_v44  ;;  %v1261_v42 = vmul.f32 %v3657_v20, %v1260_v5  ;;  %v1283_v56 = vmul.f32 %v3655_v19, %v1281_v33 }
  0xc4   : > { %v407_v12 = vadd.f32 %v403_v49, %v393_v22  ;;  %v406_v23 = vadd.f32 %v401_v50, %v392_v60  ;;  %v1234_v27 = vsel %vm225_vm1, %v1232_v10, %v1233_v8  ;;  %v530_v22 = vrot.slane %v523_v41, 1 }
  0xc5   : > { %1197 = vrot.lane.b32.xlu1 %v1192_v51, %s3211_s27  ;;  %1195 = vrot.lane.b32.xlu0 %v1191_v52, %s3211_s27  ;;  %v1268_v48 = vrot.slane %v1262_v24, 1  ;;  %v1270_v49 = vrot.slane %v1263_v25, 1  ;;  %v1267_v50 = vrot.slane %v1261_v42, 1  ;;  %v1282_v51 = vmul.f32 %v3657_v20, %v1281_v33 }
  0xc6   : > { %v428_v29 = vadd.f32 %v424_v2, %v407_v12  ;;  %v427_v30 = vadd.f32 %v422_v3, %v406_v23  ;;  %v527_v60 = vrot.slane %v521_v46, 1  ;;  %v3739_v1 = vunpack.c.h.bf16 %v2915_v40  ;;  %v2916_v2 = vld [vmem:[%s3319_s21 + $0x5c] sm:$0x1] }
  0xc7   : > { %v445_v15 = vpop.permute.xlu1 %444  ;;  %v443_v16 = vpop.permute.xlu0 %442  ;;  %v1271_v8 = vsel %vm207_vm0, %v1268_v48, %v1270_v49  ;;  %v1269_v9 = vsel %vm207_vm0, %v1267_v50, %v1268_v48  ;;  %v1289_v10 = vrot.slane %v1283_v56, 2  ;;  %v1291_v5 = vrot.slane %v1284_v31, 2 }
  0xc8   : > { %v449_v35 = vadd.f32 %v445_v15, %v428_v29  ;;  %v448_v52 = vadd.f32 %v443_v16, %v427_v30  ;;  %v1288_v12 = vrot.slane %v1282_v51, 2  ;;  %v3746_v23 = vunpack.c.l.bf16 %v2915_v40 }
  0xc9   : > { %1218 = vrot.lane.b32.xlu1 %v1215_v13, %s3211_s27  ;;  %1216 = vrot.lane.b32.xlu0 %v1213_v14, %s3211_s27  ;;  %v3748_v14 = vunpack.c.l.bf16 %v2916_v2  ;;  %v1363_v15 = vstv %s3718_s18  ;;  %v531_v16 = vsel %vm207_vm0, %v528_v53, %v530_v22  ;;  %v545_v18 = vrot.slane %v3723_v43, 2  ;;  %s2937_s18 = sld [smem:[#allocation3 + $0x408]] }
  0xca   : > { %v547_v11 = vrot.slane %v540_v47, 2  ;;  %v544_v21 = vrot.slane %v538_v0, 2  ;;  %v529_v42 = vsel %vm207_vm0, %v527_v60, %v528_v53  ;;  %v1290_v29 = vsel %vm225_vm1, %v1288_v12, %v1289_v10  ;;  %v3063_v0 = vld [vmem:[%s3319_s21 + $0x60] sm:$0xff]  }
  0xcb   : > { %v459_v36 = vpop.permute.xlu1 %458  ;;  %v457_v37 = vpop.permute.xlu0 %456  ;;  %v1365_v30 = vmul.f32 %v1363_v15, %v3739_v1  ;;  %v1384_v32 = vstv %s3735_s25  ;;  %v1364_v41 = vmul.f32 %v1363_v15, %v3746_v23  ;;  %v1405_v60 = vstv %s3755_s28  ;;  %s3883_s25 = sld [smem:[#allocation3 + $0x484]]  ;;  %s3892_s28 = sld [smem:[#allocation3 + $0x481]] }
  0xcc   : > { %v463_v3 = vadd.f32 %v459_v36, %v449_v35  ;;  %v462_v7 = vadd.f32 %v457_v37, %v448_v52  ;;  %v1366_v37 = vmul.f32 %v1363_v15, %v3748_v14  ;;  %v548_v43 = vsel %vm225_vm1, %v545_v18, %v547_v11 }
  0xcd   : > { %1239 = vrot.lane.b32.xlu1 %v1236_v26, %s3211_s27  ;;  %1237 = vrot.lane.b32.xlu0 %v1234_v27, %s3211_s27  ;;  %v1349_v27 = vstv %s3728_s20  ;;  %v546_v46 = vsel %vm225_vm1, %v544_v21, %v545_v18  ;;  %v1386_v31 = vmul.f32 %v1384_v32, %v3739_v1  ;;  %v1387_v51 = vmul.f32 %v1384_v32, %v3748_v14  ;;  %s3863_s20 = sld [smem:[#allocation3 + $0x206]] }
  0xce   : > { %v1351_v40 = vmul.f32 %v1349_v27, %v3739_v1  ;;  %v1350_v56 = vmul.f32 %v1349_v27, %v3746_v23  ;;  %v1385_v35 = vmul.f32 %v1384_v32, %v3746_v23  ;;  %v3791_v15 = vunpack.c.h.bf16 %v3063_v0 }
  0xcf   : > { %v480_v58 = vpop.permute.xlu1 %479  ;;  %v478_v45 = vpop.permute.xlu0 %477  ;;  %v1392_v2 = vrot.slane %v1386_v31, 2  ;;  %v679_v18 = vstv %s3771_s30  ;;  %s3918_s30 = sld [smem:[#allocation3 + $0x485]] }
  0xd0   : > { %v484_v34 = vadd.f32 %v480_v58, %v463_v3  ;;  %v483_v13 = vadd.f32 %v478_v45, %v462_v7  ;;  %v1370_v58 = vrot.slane %v1364_v41, 1  ;;  %v1394_v3 = vrot.slane %v1387_v51, 2 }
  0xd1   : > { %1253 = vrot.lane.b32.xlu1 %v1248_v17, %s3210_s26  ;;  %1251 = vrot.lane.b32.xlu0 %v1247_v28, %s3210_s26  ;;  %v1292_v28 = vsel %vm225_vm1, %v1289_v10, %v1291_v5  ;;  %v1391_v7 = vrot.slane %v1385_v35, 2  ;;  %v680_v41 = vmul.f32 %v679_v18, %v3478_v4 }
  0xd2   : > { %v1395_v21 = vsel %vm225_vm1, %v1392_v2, %v1394_v3 }
  0xd3   : > { %v501_v17 = vpop.permute.xlu1 %500  ;;  %v499_v24 = vpop.permute.xlu0 %498 }
  0xd4   : > { %v505_v25 = vadd.f32 %v501_v17, %v484_v34  ;;  %v504_v26 = vadd.f32 %v499_v24, %v483_v13  ;;  %v1406_v24 = vmul.f32 %v1405_v60, %v3746_v23 }
  0xd5   : > { %1274 = vrot.lane.b32.xlu1 %v1271_v8, %s3210_s26  ;;  %1272 = vrot.lane.b32.xlu0 %v1269_v9, %s3210_s26  ;;  %v1419_v8 = vstv %s3763_s29  ;;  %s3898_s29 = sld [smem:[#allocation3 + $0x487]] }
  0xd6   : > { %v518_v33 = vadd.f32 %v516_v38, %v505_v25  ;;  %v517_v36 = vadd.f32 %v515_v54, %v504_v26  ;;  %v1371_v38 = vrot.slane %v1365_v30, 1  ;;  %v1373_v54 = vrot.slane %v1366_v37, 1 }
  0xd7   : > { %v562_v47 = vpop.permute.xlu1 %561  ;;  %v560_v48 = vpop.permute.xlu0 %559  ;;  %v1421_v11 = vmul.f32 %v1419_v8, %v3739_v1  ;;  %v1422_v17 = vmul.f32 %v1419_v8, %v3748_v14  ;;  %v673_v25 = vstv %s3778_s4  ;;  %v696_v37 = vstv %s3782_s6  ;;  %s3926_s4 = sld [smem:[#allocation3 + $0x482]]  ;;  %s3936_s6 = sld [smem:[#allocation3 + $0x280]] }
  0xd8   : > { %v535_v49 = vadd.f32 %v531_v16, %v518_v33  ;;  %v534_v50 = vadd.f32 %v529_v42, %v517_v36  ;;  %v1374_v5 = vsel %vm207_vm0, %v1371_v38, %v1373_v54  ;;  %v1372_v12 = vsel %vm207_vm0, %v1370_v58, %v1371_v38 }
  0xd9   : > { %1295 = vrot.lane.b32.xlu1 %v1292_v28, %s3210_s26  ;;  %1293 = vrot.lane.b32.xlu0 %v1290_v29, %s3210_s26  ;;  %v1407_v16 = vmul.f32 %v1405_v60, %v3739_v1  ;;  %v1420_v42 = vmul.f32 %v1419_v8, %v3746_v23  ;;  %v1393_v28 = vsel %vm225_vm1, %v1391_v7, %v1392_v2  ;;  %v1440_v29 = vstv %s3780_s5  ;;  %v2928_v60 = vld [vmem:[%s3319_s21 + $0x68] sm:$0x1]  ;;  %s3932_s5 = sld [smem:[#allocation3 + $0x283]] }
  0xda   : > { %v552_v52 = vadd.f32 %v548_v43, %v535_v49  ;;  %v551_v53 = vadd.f32 %v546_v46, %v534_v50  ;;  %v681_v33 = vmul.f32 %v679_v18, %v3472_v6  ;;  %v682_v36 = vmul.f32 %v679_v18, %v3474_v39 }
  0xdb   : > { %v583_v45 = vpop.permute.xlu1 %582  ;;  %v581_v22 = vpop.permute.xlu0 %580  ;;  %v675_v43 = vmul.f32 %v673_v25, %v3472_v6  ;;  %v674_v46 = vmul.f32 %v673_v25, %v3478_v4  ;;  %v1426_v49 = vrot.slane %v1420_v42, 1  ;;  %v1442_v50 = vmul.f32 %v1440_v29, %v3739_v1 }
  0xdc   : > { %v566_v9 = vadd.f32 %v562_v47, %v552_v52  ;;  %v565_v10 = vadd.f32 %v560_v48, %v551_v53  ;;  %v1427_v47 = vrot.slane %v1421_v11, 1  ;;  %v1429_v48 = vrot.slane %v1422_v17, 1 }
  0xdd   : > { %1356 = vrot.lane.b32.xlu1 %v1351_v40, %s3211_s27  ;;  %1354 = vrot.lane.b32.xlu0 %v1350_v56, %s3211_s27  ;;  %v1443_v40 = vmul.f32 %v1440_v29, %v3748_v14  ;;  %v1441_v56 = vmul.f32 %v1440_v29, %v3746_v23  ;;  %v698_v51 = vmul.f32 %v696_v37, %v3472_v6  ;;  %v687_v54 = vrot.slane %v681_v33, 1 }
  0xde   : > { %v587_v26 = vadd.f32 %v583_v45, %v566_v9  ;;  %v586_v27 = vadd.f32 %v581_v22, %v565_v10  ;;  %v699_v35 = vmul.f32 %v696_v37, %v3474_v39  ;;  %v689_v58 = vrot.slane %v682_v36, 1 }
  0xdf   : > { %v604_v34 = vpop.permute.xlu1 %603  ;;  %v602_v13 = vpop.permute.xlu0 %601  ;;  %v686_v45 = vrot.slane %v680_v41, 1  ;;  %v697_v22 = vmul.f32 %v696_v37, %v3478_v4  ;;  %v1430_v7 = vsel %vm207_vm0, %v1427_v47, %v1429_v48  ;;  %v3827_v8 = vunpack.c.l.bf16 %v3063_v0 }
  0xe0   : > { %v608_v38 = vadd.f32 %v604_v34, %v587_v26  ;;  %v607_v31 = vadd.f32 %v602_v13, %v586_v27  ;;  %v1428_v6 = vsel %vm207_vm0, %v1426_v49, %v1427_v47  ;;  %v1448_v39 = vrot.slane %v1442_v50, 2 }
  0xe1   : > { %1377 = vrot.lane.b32.xlu1 %v1374_v5, %s3211_s27  ;;  %1375 = vrot.lane.b32.xlu0 %v1372_v12, %s3211_s27  ;;  %v1450_v9 = vrot.slane %v1443_v40, 2  ;;  %v1447_v10 = vrot.slane %v1441_v56, 2  ;;  %v3832_v4 = vunpack.c.l.bf16 %v2928_v60  ;;  %v1522_v34 = vstv %s3805_s7  ;;  %s3943_s7 = sld [smem:[#allocation3 + $0x286]] }
  0xe2   : > { %v690_v13 = vsel %vm207_vm0, %v687_v54, %v689_v58  ;;  %v704_v0 = vrot.slane %v698_v51, 2  ;;  %v706_v18 = vrot.slane %v699_v35, 2  ;;  %v1508_v42 = vstv %s3813_s8  ;;  %s3945_s8 = sld [smem:[#allocation3 + $0x488]] }
  0xe3   : > { %v618_v30 = vpop.permute.xlu1 %617  ;;  %v616_v32 = vpop.permute.xlu0 %615  ;;  %v1451_v26 = vsel %vm225_vm1, %v1448_v39, %v1450_v9  ;;  %v1524_v27 = vmul.f32 %v3791_v15, %v1522_v34  ;;  %v1543_v29 = vstv %s3820_s9  ;;  %v1449_v33 = vsel %vm225_vm1, %v1447_v10, %v1448_v39  ;;  %s3967_s9 = sld [smem:[#allocation3 + $0x504]] }
  0xe4   : > { %v622_v2 = vadd.f32 %v618_v30, %v608_v38  ;;  %v621_v3 = vadd.f32 %v616_v32, %v607_v31  ;;  %v1525_v36 = vmul.f32 %v1522_v34, %v3832_v4  ;;  %v707_v37 = vsel %vm225_vm1, %v704_v0, %v706_v18 }
  0xe5   : > { %1398 = vrot.lane.b32.xlu1 %v1395_v21, %s3211_s27  ;;  %1396 = vrot.lane.b32.xlu0 %v1393_v28, %s3211_s27  ;;  %v1523_v28 = vmul.f32 %v3827_v8, %v1522_v34  ;;  %v1510_v49 = vmul.f32 %v3791_v15, %v1508_v42  ;;  %v1509_v56 = vmul.f32 %v3827_v8, %v1508_v42  ;;  %v838_v10 = vstv %s3850_s12  ;;  %s4001_s12 = sld [smem:[#allocation3 + $0x505]] }
  0xe6   : > { %v1546_v31 = vmul.f32 %v1543_v29, %v3832_v4  ;;  %v1544_v51 = vmul.f32 %v3827_v8, %v1543_v29 }
  0xe7   : > { %v639_v52 = vpop.permute.xlu1 %638  ;;  %v637_v53 = vpop.permute.xlu0 %636  ;;  %v1529_v38 = vrot.slane %v1523_v28, 1 }
  0xe8   : > { %v643_v5 = vadd.f32 %v639_v52, %v622_v2  ;;  %v642_v12 = vadd.f32 %v637_v53, %v621_v3  ;;  %v1532_v53 = vrot.slane %v1525_v36, 1  ;;  %v1553_v2 = vrot.slane %v1546_v31, 2 }
  0xe9   : > { %1412 = vrot.lane.b32.xlu1 %v1407_v16, %s3210_s26  ;;  %1410 = vrot.lane.b32.xlu0 %v1406_v24, %s3210_s26  ;;  %v703_v16 = vrot.slane %v697_v22, 2  ;;  %v688_v24 = vsel %vm207_vm0, %v686_v45, %v687_v54  ;;  %v1564_v22 = vstv %s3838_s10  ;;  %v1550_v3 = vrot.slane %v1544_v51, 2  ;;  %s3974_s10 = sld [smem:[#allocation3 + $0x501]] }
  0xea   : > { %v1566_v34 = vmul.f32 %v3791_v15, %v1564_v22 }
  0xeb   : > { %v660_v11 = vpop.permute.xlu1 %659  ;;  %v658_v17 = vpop.permute.xlu0 %657  ;;  %v705_v41 = vsel %vm225_vm1, %v703_v16, %v704_v0  ;;  %v840_v16 = vmul.f32 %v3547_v55, %v838_v10 }
  0xec   : > { %v664_v21 = vadd.f32 %v660_v11, %v643_v5  ;;  %v663_v25 = vadd.f32 %v658_v17, %v642_v12 }
  0xed   : > { %1433 = vrot.lane.b32.xlu1 %v1430_v7, %s3210_s26  ;;  %1431 = vrot.lane.b32.xlu0 %v1428_v6, %s3210_s26  ;;  %v1578_v7 = vstv %s3846_s11  ;;  %s3981_s11 = sld [smem:[#allocation3 + $0x507]] }
  0xee   : > { %v677_v30 = vadd.f32 %v675_v43, %v664_v21  ;;  %v676_v32 = vadd.f32 %v674_v46, %v663_v25  ;;  %v1545_v43 = vmul.f32 %v3791_v15, %v1543_v29  ;;  %v1530_v46 = vrot.slane %v1524_v27, 1 }
  0xef   : > { %v721_v47 = vpop.permute.xlu1 %720  ;;  %v719_v48 = vpop.permute.xlu0 %718  ;;  %v1580_v0 = vmul.f32 %v3791_v15, %v1578_v7  ;;  %v1581_v18 = vmul.f32 %v1578_v7, %v3832_v4  ;;  %v1579_v17 = vmul.f32 %v3827_v8, %v1578_v7  ;;  %v1599_v21 = vstv %s2937_s18  ;;  %s4015_s18 = sld [smem:[#allocation3 + $0x303]] }
  0xf0   : > { %v694_v50 = vadd.f32 %v690_v13, %v677_v30  ;;  %v693_v40 = vadd.f32 %v688_v24, %v676_v32  ;;  %v1551_v45 = vrot.slane %v1545_v43, 2  ;;  %v1531_v60 = vsel %vm207_vm0, %v1529_v38, %v1530_v46 }
  0xf1   : > { %1454 = vrot.lane.b32.xlu1 %v1451_v26, %s3210_s26  ;;  %1452 = vrot.lane.b32.xlu0 %v1449_v33, %s3210_s26  ;;  %v1533_v9 = vsel %vm207_vm0, %v1530_v46, %v1532_v53  ;;  %v832_v13 = vstv %s3857_s13  ;;  %v841_v26 = vmul.f32 %v838_v10, %v3554_v57  ;;  %v1565_v29 = vmul.f32 %v3827_v8, %v1564_v22  ;;  %s4009_s13 = sld [smem:[#allocation3 + $0x502]] }
  0xf2   : > { %v711_v35 = vadd.f32 %v707_v37, %v694_v50  ;;  %v710_v52 = vadd.f32 %v705_v41, %v693_v40  ;;  %v1554_v11 = vsel %vm225_vm1, %v1551_v45, %v1553_v2  ;;  %v1552_v42 = vsel %vm225_vm1, %v1550_v3, %v1551_v45  ;;  %v2940_v45 = vld [vmem:[%s3319_s21 + $0x74] sm:$0x1] }
  0xf3   : > { %v742_v54 = vpop.permute.xlu1 %741  ;;  %v740_v58 = vpop.permute.xlu0 %739  ;;  %v834_v30 = vmul.f32 %v3547_v55, %v832_v13  ;;  %v855_v32 = vstv %s3863_s20  ;;  %v839_v33 = vmul.f32 %v3552_v59, %v838_v10  ;;  %v833_v36 = vmul.f32 %v3552_v59, %v832_v13  ;;  %s4019_s20 = sld [smem:[#allocation3 + $0x300]] }
  0xf4   : > { %v725_v6 = vadd.f32 %v721_v47, %v711_v35  ;;  %v724_v39 = vadd.f32 %v719_v48, %v710_v52  ;;  %v1586_v37 = vrot.slane %v1580_v0, 1  ;;  %v1588_v41 = vrot.slane %v1581_v18, 1  ;;  %v2939_v48 = vld [vmem:[%s3319_s21 + $0x6c] sm:$0xff]  }
  0xf5   : > { %1515 = vrot.lane.b32.xlu1 %v1510_v49, %s3211_s27  ;;  %1513 = vrot.lane.b32.xlu0 %v1509_v56, %s3211_s27  ;;  %v1601_v47 = vmul.f32 %v3791_v15, %v1599_v21  ;;  %v846_v49 = vrot.slane %v840_v16, 1  ;;  %v1585_v50 = vrot.slane %v1579_v17, 1  ;;  %v1602_v40 = vmul.f32 %v1599_v21, %v3832_v4 }
  0xf6   : > { %v746_v24 = vadd.f32 %v742_v54, %v725_v6  ;;  %v745_v25 = vadd.f32 %v740_v58, %v724_v39  ;;  %v1600_v56 = vmul.f32 %v3827_v8, %v1599_v21  ;;  %v848_v38 = vrot.slane %v841_v26, 1 }
  0xf7   : > { %v763_v5 = vpop.permute.xlu1 %762  ;;  %v761_v12 = vpop.permute.xlu0 %760  ;;  %v857_v31 = vmul.f32 %v3547_v55, %v855_v32  ;;  %v858_v52 = vmul.f32 %v855_v32, %v3554_v57  ;;  %v845_v53 = vrot.slane %v839_v33, 1  ;;  %v856_v54 = vmul.f32 %v3552_v59, %v855_v32 }
  0xf8   : > { %v767_v43 = vadd.f32 %v763_v5, %v746_v24  ;;  %v766_v46 = vadd.f32 %v761_v12, %v745_v25  ;;  %v3903_v58 = vunpack.c.h.bf16 %v2939_v48  ;;  %v1589_v2 = vsel %vm207_vm0, %v1586_v37, %v1588_v41 }
  0xf9   : > { %1536 = vrot.lane.b32.xlu1 %v1533_v9, %s3211_s27  ;;  %1534 = vrot.lane.b32.xlu0 %v1531_v60, %s3211_s27  ;;  %v1607_v3 = vrot.slane %v1601_v47, 2  ;;  %v1587_v55 = vsel %vm207_vm0, %v1585_v50, %v1586_v37  ;;  %v1609_v7 = vrot.slane %v1602_v40, 2  ;;  %v1606_v57 = vrot.slane %v1600_v56, 2 }
  0xfa   : > { %v3910_v6 = vunpack.c.l.bf16 %v2939_v48  ;;  %v3912_v9 = vunpack.c.l.bf16 %v2940_v45  ;;  %v1681_v10 = vstv %s3883_s25  ;;  %v849_v5 = vsel %vm207_vm0, %v846_v49, %v848_v38  ;;  %s2907_s25 = sld [smem:[#allocation3 + $0x306]] }
  0xfb   : > { %v777_v27 = vpop.permute.xlu1 %776  ;;  %v775_v28 = vpop.permute.xlu0 %774  ;;  %v863_v12 = vrot.slane %v857_v31, 2  ;;  %v865_v13 = vrot.slane %v858_v52, 2  ;;  %v862_v0 = vrot.slane %v856_v54, 2  ;;  %v847_v16 = vsel %vm207_vm0, %v845_v53, %v846_v49 }
  0xfc   : > { %v781_v22 = vadd.f32 %v777_v27, %v767_v43  ;;  %v780_v60 = vadd.f32 %v775_v28, %v766_v46  ;;  %v1667_v21 = vstv %s3892_s28  ;;  %v1610_v24 = vsel %vm225_vm1, %v1607_v3, %v1609_v7  ;;  %s2961_s28 = sld [smem:[#allocation3 + $0x508]] }
  0xfd   : > { %1557 = vrot.lane.b32.xlu1 %v1554_v11, %s3211_s27  ;;  %1555 = vrot.lane.b32.xlu0 %v1552_v42, %s3211_s27  ;;  %v1608_v25 = vsel %vm225_vm1, %v1606_v57, %v1607_v3  ;;  %v1683_v42 = vmul.f32 %v1681_v10, %v3903_v58  ;;  %v1702_v26 = vstv %s3898_s29  ;;  %v1682_v32 = vmul.f32 %v1681_v10, %v3910_v6  ;;  %s4043_s29 = sld [smem:[#allocation3 + $0x584]] }
  0xfe   : > { %v866_v33 = vsel %vm225_vm1, %v863_v12, %v865_v13  ;;  %v864_v37 = vsel %vm225_vm1, %v862_v0, %v863_v12  ;;  %v1669_v50 = vmul.f32 %v1667_v21, %v3903_v58  ;;  %v1668_v40 = vmul.f32 %v1667_v21, %v3910_v6 }
  0xff   : > { %v798_v51 = vpop.permute.xlu1 %797  ;;  %v796_v35 = vpop.permute.xlu0 %795  ;;  %v1705_v56 = vmul.f32 %v1702_v26, %v3912_v9  ;;  %v1703_v43 = vmul.f32 %v1702_v26, %v3910_v6  ;;  %v1737_v53 = vstv %s3918_s30  ;;  %v991_v13 = vstv %s3936_s6  ;;  %s4051_s30 = sld [smem:[#allocation3 + $0x581]]  ;;  %s4086_s6 = sld [smem:[#allocation3 + $0x383]] }
 0x100   : > { %v802_v59 = vadd.f32 %v798_v51, %v781_v22  ;;  %v801_v39 = vadd.f32 %v796_v35, %v780_v60  ;;  %v1688_v51 = vrot.slane %v1682_v32, 1  ;;  %v1723_v60 = vstv %s3926_s4  ;;  %s4059_s4 = sld [smem:[#allocation3 + $0x587]] }
 0x101   : > { %1571 = vrot.lane.b32.xlu1 %v1566_v34, %s3210_s26  ;;  %1569 = vrot.lane.b32.xlu0 %v1565_v29, %s3210_s26  ;;  %v1684_v29 = vmul.f32 %v1681_v10, %v3912_v9  ;;  %v1712_v45 = vrot.slane %v1705_v56, 2  ;;  %v1709_v22 = vrot.slane %v1703_v43, 2  ;;  %v1739_v10 = vmul.f32 %v1737_v53, %v3903_v58  ;;  %v3064_v56 = vld [vmem:[%s3319_s21 + $0x78] sm:$0xff]  }
 0x102   : > { %v1725_v12 = vmul.f32 %v1723_v60, %v3903_v58 }
 0x103   : > { %v819_v34 = vpop.permute.xlu1 %818  ;;  %v817_v18 = vpop.permute.xlu0 %816  ;;  %v1691_v31 = vrot.slane %v1684_v29, 1  ;;  %v1745_v29 = vrot.slane %v1739_v10, 1 }
 0x104   : > { %v823_v11 = vadd.f32 %v819_v34, %v802_v59  ;;  %v822_v17 = vadd.f32 %v817_v18, %v801_v39  ;;  %v997_v39 = vstv %s3932_s5  ;;  %v1738_v34 = vmul.f32 %v1737_v53, %v3910_v6  ;;  %s4084_s5 = sld [smem:[#allocation3 + $0x582]] }
 0x105   : > { %1592 = vrot.lane.b32.xlu1 %v1589_v2, %s3210_s26  ;;  %1590 = vrot.lane.b32.xlu0 %v1587_v55, %s3210_s26 }
 0x106   : > { %v836_v27 = vadd.f32 %v834_v30, %v823_v11  ;;  %v835_v28 = vadd.f32 %v833_v36, %v822_v17  ;;  %v1689_v30 = vrot.slane %v1683_v42, 1  ;;  %v1704_v36 = vmul.f32 %v1702_v26, %v3903_v58 }
 0x107   : > { %v880_v41 = vpop.permute.xlu1 %879  ;;  %v878_v47 = vpop.permute.xlu0 %877  ;;  %v1014_v11 = vstv %s3943_s7  ;;  %s4090_s7 = sld [smem:[#allocation3 + $0x585]] }
 0x108   : > { %v853_v48 = vadd.f32 %v849_v5, %v836_v27  ;;  %v852_v49 = vadd.f32 %v847_v16, %v835_v28  ;;  %v1710_v54 = vrot.slane %v1704_v36, 2  ;;  %v1692_v55 = vsel %vm207_vm0, %v1689_v30, %v1691_v31 }
 0x109   : > { %1613 = vrot.lane.b32.xlu1 %v1610_v24, %s3210_s26  ;;  %1611 = vrot.lane.b32.xlu0 %v1608_v25, %s3210_s26  ;;  %v1690_v7 = vsel %vm207_vm0, %v1688_v51, %v1689_v30  ;;  %v1740_v5 = vmul.f32 %v1737_v53, %v3912_v9  ;;  %v1758_v16 = vstv %s3945_s8  ;;  %v999_v24 = vmul.f32 %v997_v39, %v3598_v61  ;;  %s4097_s8 = sld [smem:[#allocation3 + $0x588]] }
 0x10a   : > { %v870_v46 = vadd.f32 %v866_v33, %v853_v48  ;;  %v869_v38 = vadd.f32 %v864_v37, %v852_v49  ;;  %v1713_v0 = vsel %vm225_vm1, %v1710_v54, %v1712_v45  ;;  %v1711_v18 = vsel %vm225_vm1, %v1709_v22, %v1710_v54 }
 0x10b   : > { %v901_v35 = vpop.permute.xlu1 %900  ;;  %v899_v52 = vpop.permute.xlu0 %898  ;;  %v1000_v25 = vmul.f32 %v997_v39, %v3602_v63  ;;  %v1724_v27 = vmul.f32 %v1723_v60, %v3910_v6  ;;  %v998_v28 = vmul.f32 %v997_v39, %v3600_v62  ;;  %v1747_v32 = vrot.slane %v1740_v5, 1 }
 0x10c   : > { %v884_v2 = vadd.f32 %v880_v41, %v870_v46  ;;  %v883_v3 = vadd.f32 %v878_v47, %v869_v38  ;;  %v993_v33 = vmul.f32 %v991_v13, %v3598_v61  ;;  %v1016_v37 = vmul.f32 %v1014_v11, %v3598_v61 }
 0x10d   : > { %1674 = vrot.lane.b32.xlu1 %v1669_v50, %s3211_s27  ;;  %1672 = vrot.lane.b32.xlu0 %v1668_v40, %s3211_s27  ;;  %v1744_v41 = vrot.slane %v1738_v34, 1  ;;  %v1760_v47 = vmul.f32 %v1758_v16, %v3903_v58  ;;  %v1017_v48 = vmul.f32 %v1014_v11, %v3602_v63  ;;  %v1761_v49 = vmul.f32 %v1758_v16, %v3912_v9 }
 0x10e   : > { %v905_v17 = vadd.f32 %v901_v35, %v884_v2  ;;  %v904_v21 = vadd.f32 %v899_v52, %v883_v3  ;;  %v1759_v50 = vmul.f32 %v1758_v16, %v3910_v6  ;;  %v1005_v30 = vrot.slane %v999_v24, 1  ;;  %v2952_v35 = vld [vmem:[%s3319_s21 + $0x80] sm:$0x1] }
 0x10f   : > { %v922_v57 = vpop.permute.xlu1 %921  ;;  %v920_v59 = vpop.permute.xlu0 %919  ;;  %v1007_v36 = vrot.slane %v1000_v25, 1  ;;  %v992_v38 = vmul.f32 %v991_v13, %v3600_v62  ;;  %v1004_v31 = vrot.slane %v998_v28, 1  ;;  %v1015_v51 = vmul.f32 %v1014_v11, %v3600_v62 }
 0x110   : > { %v926_v40 = vadd.f32 %v922_v57, %v905_v17  ;;  %v925_v61 = vadd.f32 %v920_v59, %v904_v21  ;;  %v1748_v63 = vsel %vm207_vm0, %v1745_v29, %v1747_v32  ;;  %v1746_v54 = vsel %vm207_vm0, %v1744_v41, %v1745_v29 }
 0x111   : > { %1695 = vrot.lane.b32.xlu1 %v1692_v55, %s3211_s27  ;;  %1693 = vrot.lane.b32.xlu0 %v1690_v7, %s3211_s27  ;;  %v1766_v45 = vrot.slane %v1760_v47, 2  ;;  %v1768_v22 = vrot.slane %v1761_v49, 2  ;;  %v1765_v60 = vrot.slane %v1759_v50, 2  ;;  %v3991_v2 = vunpack.c.h.bf16 %v3064_v56 }
 0x112   : > { %v3993_v3 = vunpack.c.l.bf16 %v3064_v56  ;;  %v3995_v7 = vunpack.c.l.bf16 %v2952_v35  ;;  %v1840_v57 = vstv %s3967_s9  ;;  %v1008_v59 = vsel %vm207_vm0, %v1005_v30, %v1007_v36  ;;  %s4103_s9 = sld [smem:[#allocation3 + $0x380]] }
 0x113   : > { %v936_v42 = vpop.permute.xlu1 %935  ;;  %v934_v26 = vpop.permute.xlu0 %933  ;;  %v1022_v39 = vrot.slane %v1016_v37, 2  ;;  %v1024_v10 = vrot.slane %v1017_v48, 2  ;;  %v1826_v11 = vstv %s3974_s10  ;;  %v1769_v16 = vsel %vm225_vm1, %v1766_v45, %v1768_v22  ;;  %s4105_s10 = sld [smem:[#allocation3 + $0x386]] }
 0x114   : > { %v940_v52 = vadd.f32 %v936_v42, %v926_v40  ;;  %v939_v53 = vadd.f32 %v934_v26, %v925_v61  ;;  %v1767_v17 = vsel %vm225_vm1, %v1765_v60, %v1766_v45  ;;  %v1842_v21 = vmul.f32 %v3991_v2, %v1840_v57 }
 0x115   : > { %1716 = vrot.lane.b32.xlu1 %v1713_v0, %s3211_s27  ;;  %1714 = vrot.lane.b32.xlu0 %v1711_v18, %s3211_s27  ;;  %v1006_v0 = vsel %vm207_vm0, %v1004_v31, %v1005_v30  ;;  %v1861_v24 = vstv %s3981_s11  ;;  %v1843_v26 = vmul.f32 %v1840_v57, %v3995_v7  ;;  %v1025_v28 = vsel %vm225_vm1, %v1022_v39, %v1024_v10  ;;  %s4128_s11 = sld [smem:[#allocation3 + $0x604]] }
 0x116   : > { %v1828_v48 = vmul.f32 %v3991_v2, %v1826_v11  ;;  %v1827_v49 = vmul.f32 %v3993_v3, %v1826_v11  ;;  %v1863_v50 = vmul.f32 %v3991_v2, %v1861_v24  ;;  %v1864_v40 = vmul.f32 %v1861_v24, %v3995_v7 }
 0x117   : > { %v957_v43 = vpop.permute.xlu1 %956  ;;  %v955_v46 = vpop.permute.xlu0 %954  ;;  %v1862_v61 = vmul.f32 %v3993_v3, %v1861_v24  ;;  %v1850_v56 = vrot.slane %v1843_v26, 1  ;;  %v1896_v31 = vstv %s4001_s12  ;;  %v1150_v10 = vstv %s4019_s20  ;;  %s4138_s12 = sld [smem:[#allocation3 + $0x601]]  ;;  %s4176_s20 = sld [smem:[#allocation3 + $0x602]] }
 0x118   : > { %v961_v62 = vadd.f32 %v957_v43, %v940_v52  ;;  %v960_v55 = vadd.f32 %v955_v46, %v939_v53  ;;  %v1882_v52 = vstv %s4009_s13  ;;  %s4143_s13 = sld [smem:[#allocation3 + $0x607]] }
 0x119   : > { %1730 = vrot.lane.b32.xlu1 %v1725_v12, %s3210_s26  ;;  %1728 = vrot.lane.b32.xlu0 %v1724_v27, %s3210_s26  ;;  %v1021_v12 = vrot.slane %v1015_v51, 2  ;;  %v1841_v27 = vmul.f32 %v3993_v3, %v1840_v57  ;;  %v1869_v51 = vrot.slane %v1863_v50, 2  ;;  %v1868_v35 = vrot.slane %v1862_v61, 2 }
 0x11a   : > { %v1898_v57 = vmul.f32 %v3991_v2, %v1896_v31 }
 0x11b   : > { %v978_v5 = vpop.permute.xlu1 %977  ;;  %v976_v13 = vpop.permute.xlu0 %975  ;;  %v1023_v29 = vsel %vm225_vm1, %v1021_v12, %v1022_v39  ;;  %v1847_v43 = vrot.slane %v1841_v27, 1  ;;  %v1884_v39 = vmul.f32 %v3991_v2, %v1882_v52  ;;  %v1870_v12 = vsel %vm225_vm1, %v1868_v35, %v1869_v51 }
 0x11c   : > { %v982_v34 = vadd.f32 %v978_v5, %v961_v62  ;;  %v981_v18 = vadd.f32 %v976_v13, %v960_v55  ;;  %v1156_v55 = vstv %s4015_s18  ;;  %v1173_v13 = vstv %s2907_s25  ;;  %s4170_s18 = sld [smem:[#allocation3 + $0x605]]  ;;  %s4180_s25 = sld [smem:[#allocation3 + $0x403]] }
 0x11d   : > { %1751 = vrot.lane.b32.xlu1 %v1748_v63, %s3210_s26  ;;  %1749 = vrot.lane.b32.xlu0 %v1746_v54, %s3210_s26  ;;  %v1871_v63 = vrot.slane %v1864_v40, 2  ;;  %v1158_v11 = vmul.f32 %v3655_v19, %v1156_v55  ;;  %v1159_v24 = vmul.f32 %v1156_v55, %v3663_v44  ;;  %v1883_v27 = vmul.f32 %v3993_v3, %v1882_v52  ;;  %v2964_v40 = vld [vmem:[%s3319_s21 + $0x8c] sm:$0x1] }
 0x11e   : > { %v995_v25 = vadd.f32 %v993_v33, %v982_v34  ;;  %v994_v42 = vadd.f32 %v992_v38, %v981_v18  ;;  %v1848_v33 = vrot.slane %v1842_v21, 1  ;;  %v1897_v34 = vmul.f32 %v3993_v3, %v1896_v31 }
 0x11f   : > { %v1039_v32 = vpop.permute.xlu1 %1038  ;;  %v1037_v37 = vpop.permute.xlu0 %1036  ;;  %v1872_v5 = vsel %vm225_vm1, %v1869_v51, %v1871_v63  ;;  %v1164_v50 = vrot.slane %v1158_v11, 1 }
 0x120   : > { %v1012_v41 = vadd.f32 %v1008_v59, %v995_v25  ;;  %v1011_v47 = vadd.f32 %v1006_v0, %v994_v42  ;;  %v1851_v45 = vsel %vm207_vm0, %v1848_v33, %v1850_v56  ;;  %v1849_v22 = vsel %vm207_vm0, %v1847_v43, %v1848_v33 }
 0x121   : > { %1772 = vrot.lane.b32.xlu1 %v1769_v16, %s3210_s26  ;;  %1770 = vrot.lane.b32.xlu0 %v1767_v17, %s3210_s26  ;;  %v1899_v59 = vmul.f32 %v1896_v31, %v3995_v7  ;;  %v1917_v16 = vstv %s2961_s28  ;;  %v1157_v25 = vmul.f32 %v3657_v20, %v1156_v55  ;;  %v1904_v42 = vrot.slane %v1898_v57, 1  ;;  %s4187_s28 = sld [smem:[#allocation3 + $0x400]] }
 0x122   : > { %v1029_v30 = vadd.f32 %v1025_v28, %v1012_v41  ;;  %v1028_v36 = vadd.f32 %v1023_v29, %v1011_v47  ;;  %v1152_v28 = vmul.f32 %v3655_v19, %v1150_v10  ;;  %v1175_v29 = vmul.f32 %v3655_v19, %v1173_v13 }
 0x123   : > { %v1060_v46 = vpop.permute.xlu1 %1059  ;;  %v1058_v38 = vpop.permute.xlu0 %1057  ;;  %v1906_v26 = vrot.slane %v1899_v59, 1  ;;  %v1903_v41 = vrot.slane %v1897_v34, 1  ;;  %v1919_v47 = vmul.f32 %v3991_v2, %v1917_v16  ;;  %v1163_v56 = vrot.slane %v1157_v25, 1 }
 0x124   : > { %v1043_v53 = vadd.f32 %v1039_v32, %v1029_v30  ;;  %v1042_v54 = vadd.f32 %v1037_v37, %v1028_v36  ;;  %v1176_v32 = vmul.f32 %v1173_v13, %v3663_v44  ;;  %v1151_v37 = vmul.f32 %v3657_v20, %v1150_v10 }
 0x125   : > { %1833 = vrot.lane.b32.xlu1 %v1828_v48, %s3211_s27  ;;  %1831 = vrot.lane.b32.xlu0 %v1827_v49, %s3211_s27  ;;  %v1920_v48 = vmul.f32 %v1917_v16, %v3995_v7  ;;  %v2963_v49 = vld [vmem:[%s3319_s21 + $0x84] sm:$0xff]   ;;  %v1918_v44 = vmul.f32 %v3993_v3, %v1917_v16  ;;  %v1166_v36 = vrot.slane %v1159_v24, 1  ;;  %v1174_v43 = vmul.f32 %v3657_v20, %v1173_v13 }
 0x126   : > { %v1064_v0 = vadd.f32 %v1060_v46, %v1043_v53  ;;  %v1063_v18 = vadd.f32 %v1058_v38, %v1042_v54  ;;  %v1907_v46 = vsel %vm207_vm0, %v1904_v42, %v1906_v26  ;;  %v4065_v51 = vunpack.c.h.bf16 %v2963_v49 }
 0x127   : > { %v1081_v60 = vpop.permute.xlu1 %1080  ;;  %v1079_v62 = vpop.permute.xlu0 %1078  ;;  %v4067_v63 = vunpack.c.l.bf16 %v2963_v49  ;;  %v1905_v35 = vsel %vm207_vm0, %v1903_v41, %v1904_v42  ;;  %v1925_v52 = vrot.slane %v1919_v47, 2  ;;  %v1927_v53 = vrot.slane %v1920_v48, 2 }
 0x128   : > { %v1085_v33 = vadd.f32 %v1081_v60, %v1064_v0  ;;  %v1084_v19 = vadd.f32 %v1079_v62, %v1063_v18  ;;  %v4072_v54 = vunpack.c.l.bf16 %v2964_v40  ;;  %v1999_v60 = vstv %s4043_s29  ;;  %s4189_s29 = sld [smem:[#allocation3 + $0x608]] }
 0x129   : > { %1854 = vrot.lane.b32.xlu1 %v1851_v45, %s3211_s27  ;;  %1852 = vrot.lane.b32.xlu0 %v1849_v22, %s3211_s27  ;;  %v1924_v22 = vrot.slane %v1918_v44, 2  ;;  %v1167_v62 = vsel %vm207_vm0, %v1164_v50, %v1166_v36  ;;  %v1181_v55 = vrot.slane %v1175_v29, 2  ;;  %v1183_v57 = vrot.slane %v1176_v32, 2 }
 0x12a   : > { %v1985_v34 = vstv %s4051_s30  ;;  %v1928_v0 = vsel %vm225_vm1, %v1925_v52, %v1927_v53  ;;  %v2001_v18 = vmul.f32 %v1999_v60, %v4065_v51  ;;  %v2002_v11 = vmul.f32 %v1999_v60, %v4072_v54  ;;  %s4191_s30 = sld [smem:[#allocation3 + $0x406]] }
 0x12b   : > { %v1095_v17 = vpop.permute.xlu1 %1094  ;;  %v1093_v21 = vpop.permute.xlu0 %1092  ;;  %v2020_v16 = vstv %s4059_s4  ;;  %v1926_v24 = vsel %vm225_vm1, %v1924_v22, %v1925_v52  ;;  %v2000_v25 = vmul.f32 %v1999_v60, %v4067_v63  ;;  %v1184_v42 = vsel %vm225_vm1, %v1181_v55, %v1183_v57  ;;  %s4217_s4 = sld [smem:[#allocation3 + $0x684]] }
 0x12c   : > { %v1099_v38 = vadd.f32 %v1095_v17, %v1085_v33  ;;  %v1098_v31 = vadd.f32 %v1093_v21, %v1084_v19  ;;  %v1987_v32 = vmul.f32 %v1985_v34, %v4065_v51  ;;  %v2022_v48 = vmul.f32 %v2020_v16, %v4065_v51 }
 0x12d   : > { %1875 = vrot.lane.b32.xlu1 %v1872_v5, %s3211_s27  ;;  %1873 = vrot.lane.b32.xlu0 %v1870_v12, %s3211_s27  ;;  %v1165_v12 = vsel %vm207_vm0, %v1163_v56, %v1164_v50  ;;  %v2007_v49 = vrot.slane %v2001_v18, 1  ;;  %v2009_v33 = vrot.slane %v2002_v11, 1  ;;  %v2021_v19 = vmul.f32 %v2020_v16, %v4067_v63 }
 0x12e   : > { %v2006_v40 = vrot.slane %v2000_v25, 1  ;;  %v2028_v36 = vrot.slane %v2022_v48, 2  ;;  %v2076_v57 = vstv %s4097_s8  ;;  %s4261_s8 = sld [smem:[#allocation3 + $0x483]] }
 0x12f   : > { %v1116_v61 = vpop.permute.xlu1 %1115  ;;  %v1114_v30 = vpop.permute.xlu0 %1113 }
 0x130   : > { %v1120_v20 = vadd.f32 %v1116_v61, %v1099_v38  ;;  %v1119_v45 = vadd.f32 %v1114_v30, %v1098_v31  ;;  %v2041_v38 = vstv %s4084_s5  ;;  %v1315_v31 = vstv %s4086_s6  ;;  %s4225_s5 = sld [smem:[#allocation3 + $0x681]]  ;;  %s4232_s6 = sld [smem:[#allocation3 + $0x687]] }
 0x131   : > { %1889 = vrot.lane.b32.xlu1 %v1884_v39, %s3210_s26  ;;  %1887 = vrot.lane.b32.xlu0 %v1883_v27, %s3210_s26  ;;  %v1180_v39 = vrot.slane %v1174_v43, 2  ;;  %v2010_v43 = vsel %vm207_vm0, %v2007_v49, %v2009_v33  ;;  %v2008_v53 = vsel %vm207_vm0, %v2006_v40, %v2007_v49  ;;  %v2043_v60 = vmul.f32 %v2041_v38, %v4065_v51  ;;  %v3065_v33 = vld [vmem:[%s3319_s21 + $0x90] sm:$0xff]  }
 0x133   : > { %v1137_v59 = vpop.permute.xlu1 %1136  ;;  %v1135_v10 = vpop.permute.xlu0 %1134  ;;  %v1182_v26 = vsel %vm225_vm1, %v1180_v39, %v1181_v55  ;;  %v4117_v55 = vmul.f32 %v1315_v31, %v3739_v1 }
 0x134   : > { %v1141_v5 = vadd.f32 %v1137_v59, %v1120_v20  ;;  %v1140_v13 = vadd.f32 %v1135_v10, %v1119_v45  ;;  %v2055_v20 = vstv %s4090_s7  ;;  %v1309_v59 = vstv %s4103_s9  ;;  %s4257_s7 = sld [smem:[#allocation3 + $0x685]]  ;;  %s4266_s9 = sld [smem:[#allocation3 + $0x682]] }
 0x135   : > { %1910 = vrot.lane.b32.xlu1 %v1907_v46, %s3210_s26  ;;  %1908 = vrot.lane.b32.xlu0 %v1905_v35, %s3210_s26  ;;  %v2027_v46 = vrot.slane %v2021_v19, 2  ;;  %v2057_v39 = vmul.f32 %v2055_v20, %v4065_v51  ;;  %v2058_v10 = vmul.f32 %v2055_v20, %v4072_v54  ;;  %v1311_v25 = vmul.f32 %v1309_v59, %v3739_v1 }
 0x136   : > { %v1154_v17 = vadd.f32 %v1152_v28, %v1141_v5  ;;  %v1153_v21 = vadd.f32 %v1151_v37, %v1140_v13  ;;  %v2023_v28 = vmul.f32 %v2020_v16, %v4072_v54  ;;  %v1986_v37 = vmul.f32 %v1985_v34, %v4067_v63 }
 0x137   : > { %v1198_v27 = vpop.permute.xlu1 %1197  ;;  %v1196_v29 = vpop.permute.xlu0 %1195  ;;  %v2056_v5 = vmul.f32 %v2055_v20, %v4067_v63  ;;  %v1318_v16 = vmul.f32 %v1315_v31, %v3748_v14  ;;  %v2158_v20 = vstv %s4128_s11  ;;  %s2943_s11 = sld [smem:[#allocation3 + $0x486]] }
 0x138   : > { %v1171_v41 = vadd.f32 %v1167_v62, %v1154_v17  ;;  %v1170_v47 = vadd.f32 %v1165_v12, %v1153_v21  ;;  %v2030_v56 = vrot.slane %v2023_v28, 2  ;;  %v2042_v62 = vmul.f32 %v2041_v38, %v4067_v63 }
 0x139   : > { %1931 = vrot.lane.b32.xlu1 %v1928_v0, %s3210_s26  ;;  %1929 = vrot.lane.b32.xlu0 %v1926_v24, %s3210_s26  ;;  %v2029_v0 = vsel %vm225_vm1, %v2027_v46, %v2028_v36  ;;  %v1332_v17 = vstv %s4105_s10  ;;  %v1316_v21 = vmul.f32 %v1315_v31, %v3746_v23  ;;  %v2078_v24 = vmul.f32 %v2076_v57, %v4065_v51  ;;  %s4270_s10 = sld [smem:[#allocation3 + $0x480]] }
 0x13a   : > { %v1188_v50 = vadd.f32 %v1184_v42, %v1171_v41  ;;  %v1187_v44 = vadd.f32 %v1182_v26, %v1170_v47  ;;  %v2031_v34 = vsel %vm225_vm1, %v2028_v36, %v2030_v56  ;;  %v1310_v42 = vmul.f32 %v1309_v59, %v3746_v23  ;;  %v2976_v36 = vld [vmem:[%s3319_s21 + $0x98] sm:$0x1] }
 0x13b   : > { %v1219_v61 = vpop.permute.xlu1 %1218  ;;  %v1217_v30 = vpop.permute.xlu0 %1216  ;;  %v2079_v26 = vmul.f32 %v2076_v57, %v4072_v54  ;;  %v2065_v41 = vrot.slane %v2058_v10, 1  ;;  %v2062_v47 = vrot.slane %v2056_v5, 1  ;;  %v1335_v49 = vmul.f32 %v1332_v17, %v3748_v14 }
 0x13c   : > { %v1202_v35 = vadd.f32 %v1198_v27, %v1188_v50  ;;  %v1201_v52 = vadd.f32 %v1196_v29, %v1187_v44  ;;  %v2077_v27 = vmul.f32 %v2076_v57, %v4067_v63  ;;  %v1323_v29 = vrot.slane %v4117_v55, 1 }
 0x13d   : > { %1992 = vrot.lane.b32.xlu1 %v1987_v32, %s3211_s27  ;;  %1990 = vrot.lane.b32.xlu0 %v1986_v37, %s3211_s27  ;;  %v2063_v32 = vrot.slane %v2057_v39, 1  ;;  %v1334_v37 = vmul.f32 %v1332_v17, %v3739_v1  ;;  %v1325_v44 = vrot.slane %v1318_v16, 1  ;;  %v1322_v40 = vrot.slane %v1316_v21, 1 }
 0x13e   : > { %v1223_v12 = vadd.f32 %v1219_v61, %v1202_v35  ;;  %v1222_v13 = vadd.f32 %v1217_v30, %v1201_v52  ;;  %v1333_v61 = vmul.f32 %v1332_v17, %v3746_v23  ;;  %v2084_v30 = vrot.slane %v2078_v24, 2 }
 0x13f   : > { %v1240_v45 = vpop.permute.xlu1 %1239  ;;  %v1238_v22 = vpop.permute.xlu0 %1237  ;;  %v2086_v46 = vrot.slane %v2079_v26, 2  ;;  %v2083_v38 = vrot.slane %v2077_v27, 2  ;;  %v2066_v1 = vsel %vm207_vm0, %v2063_v32, %v2065_v41  ;;  %v2064_v14 = vsel %vm207_vm0, %v2062_v47, %v2063_v32 }
 0x140   : > { %v1244_v48 = vadd.f32 %v1240_v45, %v1223_v12  ;;  %v1243_v28 = vadd.f32 %v1238_v22, %v1222_v13  ;;  %v4154_v31 = vunpack.c.h.bf16 %v3065_v33  ;;  %v4156_v35 = vunpack.c.l.bf16 %v3065_v33 }
 0x141   : > { %2013 = vrot.lane.b32.xlu1 %v2010_v43, %s3211_s27  ;;  %2011 = vrot.lane.b32.xlu0 %v2008_v53, %s3211_s27  ;;  %v4158_v53 = vunpack.c.l.bf16 %v2976_v36  ;;  %v1326_v45 = vsel %vm207_vm0, %v1323_v29, %v1325_v44  ;;  %v1340_v22 = vrot.slane %v1334_v37, 2  ;;  %v1339_v55 = vrot.slane %v1333_v61, 2 }
 0x142   : > { %v1324_v39 = vsel %vm207_vm0, %v1322_v40, %v1323_v29  ;;  %v2087_v5 = vsel %vm225_vm1, %v2084_v30, %v2086_v46  ;;  %v2085_v12 = vsel %vm225_vm1, %v2083_v38, %v2084_v30  ;;  %v2144_v13 = vstv %s4138_s12  ;;  %v4194_v30 = vld [vmem:[%s3319_s21 + $0x9c] sm:$0xff]   ;;  %s2997_s12 = sld [smem:[#allocation3 + $0x688]] }
 0x143   : > { %v1254_v18 = vpop.permute.xlu1 %1253  ;;  %v1252_v11 = vpop.permute.xlu0 %1251  ;;  %v2161_v16 = vmul.f32 %v2158_v20, %v4158_v53  ;;  %v2159_v17 = vmul.f32 %v4156_v35, %v2158_v20  ;;  %v1341_v24 = vsel %vm225_vm1, %v1339_v55, %v1340_v22 }
 0x144   : > { %v1258_v56 = vadd.f32 %v1254_v18, %v1244_v48  ;;  %v1257_v43 = vadd.f32 %v1252_v11, %v1243_v28 }
 0x145   : > { %2034 = vrot.lane.b32.xlu1 %v2031_v34, %s3211_s27  ;;  %2032 = vrot.lane.b32.xlu0 %v2029_v0, %s3211_s27  ;;  %v2160_v34 = vmul.f32 %v4154_v31, %v2158_v20  ;;  %v2179_v0 = vstv %s4143_s13  ;;  %v2168_v33 = vrot.slane %v2161_v16, 1  ;;  %v4203_v20 = vunpack.c.h.bf16 %v4194_v30  ;;  %s4293_s13 = sld [smem:[#allocation3 + $0x704]] }
 0x146   : > { %v2181_v41 = vmul.f32 %v4154_v31, %v2179_v0  ;;  %v2182_v47 = vmul.f32 %v2179_v0, %v4158_v53  ;;  %v2180_v28 = vmul.f32 %v4156_v35, %v2179_v0 }
 0x147   : > { %v1275_v19 = vpop.permute.xlu1 %1274  ;;  %v1273_v50 = vpop.permute.xlu0 %1272  ;;  %v2166_v48 = vrot.slane %v2160_v34, 1 }
 0x148   : > { %v1279_v23 = vadd.f32 %v1275_v19, %v1258_v56  ;;  %v1278_v52 = vadd.f32 %v1273_v50, %v1257_v43  ;;  %v2165_v19 = vrot.slane %v2159_v17, 1  ;;  %v2187_v40 = vrot.slane %v2181_v41, 2 }
 0x149   : > { %2048 = vrot.lane.b32.xlu1 %v2043_v60, %s3210_s26  ;;  %2046 = vrot.lane.b32.xlu0 %v2042_v62, %s3210_s26  ;;  %v1342_v60 = vrot.slane %v1335_v49, 2  ;;  %v2189_v61 = vrot.slane %v2182_v47, 2  ;;  %v2186_v36 = vrot.slane %v2180_v28, 2  ;;  %v2214_v56 = vstv %s4170_s18  ;;  %s4304_s18 = sld [smem:[#allocation3 + $0x701]] }
 0x14a   : > { %v2169_v38 = vsel %vm207_vm0, %v2166_v48, %v2168_v33 }
 0x14b   : > { %v1296_v62 = vpop.permute.xlu1 %1295  ;;  %v1294_v57 = vpop.permute.xlu0 %1293  ;;  %v1343_v21 = vsel %vm225_vm1, %v1340_v22, %v1342_v60  ;;  %v1474_v22 = vstv %s4180_s25  ;;  %v2216_v60 = vmul.f32 %v4154_v31, %v2214_v56  ;;  %v2188_v55 = vsel %vm225_vm1, %v2186_v36, %v2187_v40  ;;  %s4337_s25 = sld [smem:[#allocation3 + $0x705]] }
 0x14c   : > { %v1300_v59 = vadd.f32 %v1296_v62, %v1279_v23  ;;  %v1299_v10 = vadd.f32 %v1294_v57, %v1278_v52  ;;  %v2200_v52 = vstv %s4176_s20  ;;  %v2217_v62 = vmul.f32 %v2214_v56, %v4158_v53  ;;  %s4311_s20 = sld [smem:[#allocation3 + $0x707]] }
 0x14d   : > { %2069 = vrot.lane.b32.xlu1 %v2066_v1, %s3210_s26  ;;  %2067 = vrot.lane.b32.xlu0 %v2064_v14, %s3210_s26  ;;  %v2167_v1 = vsel %vm207_vm0, %v2165_v19, %v2166_v48  ;;  %v1468_v57 = vstv %s4187_s28  ;;  %v1477_v16 = vmul.f32 %v1474_v22, %v3832_v4  ;;  %v1475_v17 = vmul.f32 %v3827_v8, %v1474_v22  ;;  %s4341_s28 = sld [smem:[#allocation3 + $0x503]] }
 0x14e   : > { %v1313_v18 = vadd.f32 %v1311_v25, %v1300_v59  ;;  %v1312_v11 = vadd.f32 %v1310_v42, %v1299_v10  ;;  %v2146_v25 = vmul.f32 %v4154_v31, %v2144_v13  ;;  %v2145_v42 = vmul.f32 %v4156_v35, %v2144_v13 }
 0x14f   : > { %v1357_v26 = vpop.permute.xlu1 %1356  ;;  %v1355_v27 = vpop.permute.xlu0 %1354  ;;  %v2215_v59 = vmul.f32 %v4156_v35, %v2214_v56  ;;  %v1491_v13 = vstv %s4191_s30  ;;  %s4350_s30 = sld [smem:[#allocation3 + $0x500]] }
 0x150   : > { %v1330_v29 = vadd.f32 %v1326_v45, %v1313_v18  ;;  %v1329_v32 = vadd.f32 %v1324_v39, %v1312_v11  ;;  %v2190_v45 = vsel %vm225_vm1, %v2187_v40, %v2189_v61  ;;  %v2235_v39 = vstv %s4189_s29  ;;  %s4346_s29 = sld [smem:[#allocation3 + $0x702]] }
 0x151   : > { %2090 = vrot.lane.b32.xlu1 %v2087_v5, %s3210_s26  ;;  %2088 = vrot.lane.b32.xlu0 %v2085_v12, %s3210_s26  ;;  %v2202_v12 = vmul.f32 %v4154_v31, %v2200_v52  ;;  %v2201_v18 = vmul.f32 %v4156_v35, %v2200_v52  ;;  %v1476_v11 = vmul.f32 %v3791_v15, %v1474_v22  ;;  %v2221_v41 = vrot.slane %v2215_v59, 1 }
 0x152   : > { %v1347_v37 = vadd.f32 %v1343_v21, %v1330_v29  ;;  %v1346_v49 = vadd.f32 %v1341_v24, %v1329_v32  ;;  %v1470_v21 = vmul.f32 %v3791_v15, %v1468_v57  ;;  %v2222_v24 = vrot.slane %v2216_v60, 1 }
 0x153   : > { %v1378_v50 = vpop.permute.xlu1 %1377  ;;  %v1376_v44 = vpop.permute.xlu0 %1375  ;;  %v1493_v29 = vmul.f32 %v3791_v15, %v1491_v13  ;;  %v1469_v32 = vmul.f32 %v3827_v8, %v1468_v57  ;;  %v2238_v47 = vmul.f32 %v2235_v39, %v4158_v53  ;;  %v1494_v48 = vmul.f32 %v1491_v13, %v3832_v4 }
 0x154   : > { %v1361_v43 = vadd.f32 %v1357_v26, %v1347_v37  ;;  %v1360_v46 = vadd.f32 %v1355_v27, %v1346_v49  ;;  %v2224_v26 = vrot.slane %v2217_v62, 1  ;;  %v2237_v27 = vmul.f32 %v4154_v31, %v2235_v39  ;;  %v2988_v37 = vld [vmem:[%s3319_s21 + $0xa4] sm:$0x1] }
 0x155   : > { %2151 = vrot.lane.b32.xlu1 %v2146_v25, %s3211_s27  ;;  %2149 = vrot.lane.b32.xlu0 %v2145_v42, %s3211_s27  ;;  %v2236_v28 = vmul.f32 %v4156_v35, %v2235_v39  ;;  %v1482_v19 = vrot.slane %v1476_v11, 1  ;;  %v1481_v15 = vrot.slane %v1475_v17, 1  ;;  %v2223_v4 = vsel %vm207_vm0, %v2221_v41, %v2222_v24 }
 0x156   : > { %v1382_v10 = vadd.f32 %v1378_v50, %v1361_v43  ;;  %v1381_v5 = vadd.f32 %v1376_v44, %v1360_v46  ;;  %v1484_v50 = vrot.slane %v1477_v16, 1  ;;  %v1492_v44 = vmul.f32 %v3827_v8, %v1491_v13 }
 0x157   : > { %v1399_v14 = vpop.permute.xlu1 %1398  ;;  %v1397_v23 = vpop.permute.xlu0 %1396  ;;  %v2225_v36 = vsel %vm207_vm0, %v2222_v24, %v2224_v26  ;;  %v2243_v56 = vrot.slane %v2237_v27, 2  ;;  %v2245_v43 = vrot.slane %v2238_v47, 2  ;;  %v4243_v46 = vunpack.c.l.bf16 %v4194_v30 }
 0x158   : > { %v1403_v25 = vadd.f32 %v1399_v14, %v1382_v10  ;;  %v1402_v42 = vadd.f32 %v1397_v23, %v1381_v5  ;;  %v2242_v14 = vrot.slane %v2236_v28, 2  ;;  %v2317_v23 = vstv %s4217_s4  ;;  %s2955_s4 = sld [smem:[#allocation3 + $0x506]] }
 0x159   : > { %2172 = vrot.lane.b32.xlu1 %v2169_v38, %s3211_s27  ;;  %2170 = vrot.lane.b32.xlu0 %v2167_v1, %s3211_s27  ;;  %v4245_v38 = vunpack.c.l.bf16 %v2988_v37  ;;  %v1485_v52 = vsel %vm207_vm0, %v1482_v19, %v1484_v50  ;;  %v1501_v22 = vrot.slane %v1494_v48, 2  ;;  %v1498_v62 = vrot.slane %v1492_v44, 2 }
 0x15a   : > { %v1483_v59 = vsel %vm207_vm0, %v1481_v15, %v1482_v19  ;;  %v2303_v30 = vstv %s4225_s5  ;;  %v2246_v10 = vsel %vm225_vm1, %v2243_v56, %v2245_v43  ;;  %v2319_v5 = vmul.f32 %v2317_v23, %v4203_v20  ;;  %s3009_s5 = sld [smem:[#allocation3 + $0x708]] }
 0x15b   : > { %v1413_v34 = vpop.permute.xlu1 %1412  ;;  %v1411_v0 = vpop.permute.xlu0 %1410  ;;  %v2338_v13 = vstv %s4232_s6  ;;  %v2318_v11 = vmul.f32 %v2317_v23, %v4243_v46  ;;  %v2305_v27 = vmul.f32 %v2303_v30, %v4203_v20  ;;  %v2304_v47 = vmul.f32 %v2303_v30, %v4243_v46  ;;  %s4373_s6 = sld [smem:[#allocation3 + $0x784]] }
 0x15c   : > { %v1417_v40 = vadd.f32 %v1413_v34, %v1403_v25  ;;  %v1416_v61 = vadd.f32 %v1411_v0, %v1402_v42  ;;  %v2325_v25 = vrot.slane %v2319_v5, 1  ;;  %v2339_v48 = vmul.f32 %v2338_v13, %v4243_v46 }
 0x15d   : > { %2193 = vrot.lane.b32.xlu1 %v2190_v45, %s3211_s27  ;;  %2191 = vrot.lane.b32.xlu0 %v2188_v55, %s3211_s27  ;;  %v1499_v45 = vrot.slane %v1493_v29, 2  ;;  %v1633_v43 = vstv %s4261_s8  ;;  %s4388_s8 = sld [smem:[#allocation3 + $0x787]] }
 0x15e   : > { %v1636_v30 = vmul.f32 %v1633_v43, %v3912_v9 }
 0x15f   : > { %v1434_v49 = vpop.permute.xlu1 %1433  ;;  %v1432_v33 = vpop.permute.xlu0 %1431  ;;  %v1502_v16 = vsel %vm225_vm1, %v1499_v45, %v1501_v22  ;;  %v1500_v17 = vsel %vm225_vm1, %v1498_v62, %v1499_v45  ;;  %v1635_v62 = vmul.f32 %v1633_v43, %v3903_v58 }
 0x160   : > { %v1438_v1 = vadd.f32 %v1434_v49, %v1417_v40  ;;  %v1437_v8 = vadd.f32 %v1432_v33, %v1416_v61  ;;  %v2324_v49 = vrot.slane %v2318_v11, 1  ;;  %v2345_v40 = vrot.slane %v2339_v48, 2 }
 0x161   : > { %2207 = vrot.lane.b32.xlu1 %v2202_v12, %s3210_s26  ;;  %2205 = vrot.lane.b32.xlu0 %v2201_v18, %s3210_s26  ;;  %v2320_v12 = vmul.f32 %v2317_v23, %v4245_v38  ;;  %v2244_v18 = vsel %vm225_vm1, %v2242_v14, %v2243_v56  ;;  %v2373_v61 = vstv %s4257_s7  ;;  %v2359_v14 = vstv %s4266_s9  ;;  %s4381_s7 = sld [smem:[#allocation3 + $0x781]]  ;;  %s4423_s9 = sld [smem:[#allocation3 + $0x782]] }
 0x162   : > { %v2375_v45 = vmul.f32 %v2373_v61, %v4203_v20  ;;  %v2376_v22 = vmul.f32 %v2373_v61, %v4245_v38 }
 0x163   : > { %v1455_v60 = vpop.permute.xlu1 %1454  ;;  %v1453_v55 = vpop.permute.xlu0 %1452  ;;  %v2327_v42 = vrot.slane %v2320_v12, 1 }
 0x164   : > { %v1459_v57 = vadd.f32 %v1455_v60, %v1438_v1  ;;  %v1458_v39 = vadd.f32 %v1453_v55, %v1437_v8  ;;  %v1650_v55 = vstv %s2943_s11  ;;  %s2966_s11 = sld [smem:[#allocation3 + $0x583]] }
 0x165   : > { %2228 = vrot.lane.b32.xlu1 %v2225_v36, %s3210_s26  ;;  %2226 = vrot.lane.b32.xlu0 %v2223_v4, %s3210_s26  ;;  %v2328_v44 = vsel %vm207_vm0, %v2325_v25, %v2327_v42  ;;  %v2326_v4 = vsel %vm207_vm0, %v2324_v49, %v2325_v25  ;;  %v4300_v11 = vmul.f32 %v1650_v55, %v3903_v58 }
 0x166   : > { %v1472_v34 = vadd.f32 %v1470_v21, %v1459_v57  ;;  %v1471_v0 = vadd.f32 %v1469_v32, %v1458_v39  ;;  %v2340_v21 = vmul.f32 %v2338_v13, %v4203_v20  ;;  %v2341_v32 = vmul.f32 %v2338_v13, %v4245_v38 }
 0x167   : > { %v1516_v24 = vpop.permute.xlu1 %1515  ;;  %v1514_v26 = vpop.permute.xlu0 %1513  ;;  %v2374_v57 = vmul.f32 %v2373_v61, %v4243_v46  ;;  %v2361_v13 = vmul.f32 %v2359_v14, %v4203_v20 }
 0x168   : > { %v1489_v29 = vadd.f32 %v1485_v52, %v1472_v34  ;;  %v1488_v41 = vadd.f32 %v1483_v59, %v1471_v0  ;;  %v2346_v50 = vrot.slane %v2340_v21, 2  ;;  %v2348_v15 = vrot.slane %v2341_v32, 2 }
 0x169   : > { %2249 = vrot.lane.b32.xlu1 %v2246_v10, %s3210_s26  ;;  %2247 = vrot.lane.b32.xlu0 %v2244_v18, %s3210_s26  ;;  %v1627_v52 = vstv %s4270_s10  ;;  %v2394_v10 = vstv %s2997_s12  ;;  %v2360_v34 = vmul.f32 %v2359_v14, %v4243_v46  ;;  %v1634_v18 = vmul.f32 %v1633_v43, %v3910_v6  ;;  %s4425_s10 = sld [smem:[#allocation3 + $0x580]] }
 0x16a   : > { %v1506_v28 = vadd.f32 %v1502_v16, %v1489_v29  ;;  %v1505_v37 = vadd.f32 %v1500_v17, %v1488_v41  ;;  %v2349_v23 = vsel %vm225_vm1, %v2346_v50, %v2348_v15  ;;  %v2347_v60 = vsel %vm225_vm1, %v2345_v40, %v2346_v50  ;;  %s3021_s12 = sld [smem:[#allocation3 + $0x788]] }
 0x16b   : > { %v1537_v33 = vpop.permute.xlu1 %1536  ;;  %v1535_v19 = vpop.permute.xlu0 %1534  ;;  %v1629_v0 = vmul.f32 %v1627_v52, %v3903_v58  ;;  %v1653_v16 = vmul.f32 %v1650_v55, %v3912_v9  ;;  %v2381_v17 = vrot.slane %v2375_v45, 1  ;;  %v2396_v29 = vmul.f32 %v2394_v10, %v4203_v20 }
 0x16c   : > { %v1520_v36 = vadd.f32 %v1516_v24, %v1506_v28  ;;  %v1519_v56 = vadd.f32 %v1514_v26, %v1505_v37  ;;  %v2383_v24 = vrot.slane %v2376_v22, 1  ;;  %v3066_v26 = vld [vmem:[%s3319_s21 + $0xa8] sm:$0xff]   ;;  %v2397_v41 = vmul.f32 %v2394_v10, %v4245_v38 }
 0x16d   : > { %2310 = vrot.lane.b32.xlu1 %v2305_v27, %s3211_s27  ;;  %2308 = vrot.lane.b32.xlu0 %v2304_v47, %s3211_s27  ;;  %v2380_v27 = vrot.slane %v2374_v57, 1  ;;  %v2395_v58 = vmul.f32 %v2394_v10, %v4243_v46  ;;  %v1641_v32 = vrot.slane %v1635_v62, 1  ;;  %v1643_v47 = vrot.slane %v1636_v30, 1 }
 0x16e   : > { %v1541_v59 = vadd.f32 %v1537_v33, %v1520_v36  ;;  %v1540_v39 = vadd.f32 %v1535_v19, %v1519_v56  ;;  %v1628_v48 = vmul.f32 %v1627_v52, %v3910_v6  ;;  %v1640_v28 = vrot.slane %v1634_v18, 1  ;;  %v3000_v33 = vld [vmem:[%s3319_s21 + $0xb0] sm:$0x1] }
 0x16f   : > { %v1558_v1 = vpop.permute.xlu1 %1557  ;;  %v1556_v8 = vpop.permute.xlu0 %1555  ;;  %v1651_v37 = vmul.f32 %v1650_v55, %v3910_v6  ;;  %v4315_v49 = vunpack.c.h.bf16 %v3066_v26  ;;  %v2384_v15 = vsel %vm207_vm0, %v2381_v17, %v2383_v24  ;;  %v2382_v40 = vsel %vm207_vm0, %v2380_v27, %v2381_v17 }
 0x170   : > { %v1562_v9 = vadd.f32 %v1558_v1, %v1541_v59  ;;  %v1561_v21 = vadd.f32 %v1556_v8, %v1540_v39  ;;  %v2402_v61 = vrot.slane %v2396_v29, 2  ;;  %v2404_v36 = vrot.slane %v2397_v41, 2 }
 0x171   : > { %2331 = vrot.lane.b32.xlu1 %v2328_v44, %s3211_s27  ;;  %2329 = vrot.lane.b32.xlu0 %v2326_v4, %s3211_s27  ;;  %v4319_v44 = vunpack.c.l.bf16 %v3066_v26  ;;  %v2401_v6 = vrot.slane %v2395_v58, 2  ;;  %v4324_v43 = vunpack.c.l.bf16 %v3000_v33  ;;  %v2476_v1 = vstv %s4293_s13  ;;  %s4431_s13 = sld [smem:[#allocation3 + $0x586]] }
 0x172   : > { %v1644_v8 = vsel %vm207_vm0, %v1641_v32, %v1643_v47  ;;  %v1658_v14 = vrot.slane %v4300_v11, 2  ;;  %v1657_v45 = vrot.slane %v1651_v37, 2  ;;  %v1642_v62 = vsel %vm207_vm0, %v1640_v28, %v1641_v32 }
 0x173   : > { %v1572_v5 = vpop.permute.xlu1 %1571  ;;  %v1570_v12 = vpop.permute.xlu0 %1569  ;;  %v2462_v57 = vstv %s4304_s18  ;;  %v2405_v59 = vsel %vm225_vm1, %v2402_v61, %v2404_v36  ;;  %v2478_v39 = vmul.f32 %v4315_v49, %v2476_v1  ;;  %v2477_v30 = vmul.f32 %v4319_v44, %v2476_v1  ;;  %s2979_s18 = sld [smem:[#allocation3 + $0x606]] }
 0x174   : > { %v1576_v19 = vadd.f32 %v1572_v5, %v1562_v9  ;;  %v1575_v50 = vadd.f32 %v1570_v12, %v1561_v21  ;;  %v2497_v10 = vstv %s4311_s20  ;;  %v1659_v11 = vsel %vm225_vm1, %v1657_v45, %v1658_v14  ;;  %s2977_s20 = sld [smem:[#allocation3 + $0x600]] }
 0x175   : > { %2352 = vrot.lane.b32.xlu1 %v2349_v23, %s3211_s27  ;;  %2350 = vrot.lane.b32.xlu0 %v2347_v60, %s3211_s27  ;;  %v1660_v23 = vrot.slane %v1653_v16, 2  ;;  %v2464_v24 = vmul.f32 %v4315_v49, %v2462_v57  ;;  %v2499_v29 = vmul.f32 %v4315_v49, %v2497_v10  ;;  %v2484_v41 = vrot.slane %v2478_v39, 1 }
 0x176   : > { %v2483_v58 = vrot.slane %v2477_v30, 1  ;;  %v2500_v9 = vmul.f32 %v2497_v10, %v4324_v43  ;;  %v2498_v21 = vmul.f32 %v4319_v44, %v2497_v10  ;;  %v1792_v36 = vstv %s4341_s28  ;;  %s2989_s28 = sld [smem:[#allocation3 + $0x680]] }
 0x177   : > { %v1593_v25 = vpop.permute.xlu1 %1592  ;;  %v1591_v42 = vpop.permute.xlu0 %1590  ;;  %v1661_v18 = vsel %vm225_vm1, %v1658_v14, %v1660_v23  ;;  %v2505_v28 = vrot.slane %v2499_v29, 2 }
 0x178   : > { %v1597_v56 = vadd.f32 %v1593_v25, %v1576_v19  ;;  %v1596_v4 = vadd.f32 %v1591_v42, %v1575_v50  ;;  %v2485_v37 = vsel %vm207_vm0, %v2483_v58, %v2484_v41  ;;  %v2507_v33 = vrot.slane %v2500_v9, 2  ;;  %v3012_v9 = vld [vmem:[%s3319_s21 + $0xbc] sm:$0x1] }
 0x179   : > { %2366 = vrot.lane.b32.xlu1 %v2361_v13, %s3210_s26  ;;  %2364 = vrot.lane.b32.xlu0 %v2360_v34, %s3210_s26  ;;  %v2403_v13 = vsel %vm225_vm1, %v2401_v6, %v2402_v61  ;;  %v2479_v34 = vmul.f32 %v2476_v1, %v4324_v43  ;;  %v2504_v19 = vrot.slane %v2498_v21, 2  ;;  %v2532_v50 = vstv %s4337_s25  ;;  %s2991_s25 = sld [smem:[#allocation3 + $0x686]] }
 0x17a   : > { %v1786_v1 = vstv %s4350_s30  ;;  %v2535_v14 = vmul.f32 %v2532_v50, %v4324_v43  ;;  %v2533_v23 = vmul.f32 %v4319_v44, %v2532_v50  ;;  %s3003_s30 = sld [smem:[#allocation3 + $0x706]] }
 0x17b   : > { %v1614_v52 = vpop.permute.xlu1 %1613  ;;  %v1612_v22 = vpop.permute.xlu0 %1611  ;;  %v2486_v25 = vrot.slane %v2479_v34, 1  ;;  %v2506_v45 = vsel %vm225_vm1, %v2504_v19, %v2505_v28 }
 0x17c   : > { %v1618_v60 = vadd.f32 %v1614_v52, %v1597_v56  ;;  %v1617_v55 = vadd.f32 %v1612_v22, %v1596_v4  ;;  %v2518_v4 = vstv %s4346_s29  ;;  %v2508_v52 = vsel %vm225_vm1, %v2505_v28, %v2507_v33  ;;  %s3002_s29 = sld [smem:[#allocation3 + $0x703]] }
 0x17d   : > { %2387 = vrot.lane.b32.xlu1 %v2384_v15, %s3210_s26  ;;  %2385 = vrot.lane.b32.xlu0 %v2382_v40, %s3210_s26  ;;  %v2487_v61 = vsel %vm207_vm0, %v2484_v41, %v2486_v25  ;;  %v1794_v22 = vmul.f32 %v3991_v2, %v1792_v36  ;;  %v2520_v10 = vmul.f32 %v4315_v49, %v2518_v4 }
 0x17e   : > { %v1631_v5 = vadd.f32 %v1629_v0, %v1618_v60  ;;  %v1630_v12 = vadd.f32 %v1628_v48, %v1617_v55  ;;  %v2463_v0 = vmul.f32 %v4319_v44, %v2462_v57  ;;  %v1809_v60 = vstv %s2955_s4  ;;  %s3001_s4 = sld [smem:[#allocation3 + $0x700]] }
 0x17f   : > { %v1675_v16 = vpop.permute.xlu1 %1674  ;;  %v1673_v17 = vpop.permute.xlu0 %1672  ;;  %v1795_v57 = vmul.f32 %v1792_v36, %v3995_v7  ;;  %v1811_v34 = vmul.f32 %v3991_v2, %v1809_v60 }
 0x180   : > { %v1648_v26 = vadd.f32 %v1644_v8, %v1631_v5  ;;  %v1647_v27 = vadd.f32 %v1642_v62, %v1630_v12  ;;  %v2534_v8 = vmul.f32 %v4315_v49, %v2532_v50  ;;  %v2519_v5 = vmul.f32 %v4319_v44, %v2518_v4 }
 0x181   : > { %2408 = vrot.lane.b32.xlu1 %v2405_v59, %s3210_s26  ;;  %2406 = vrot.lane.b32.xlu0 %v2403_v13, %s3210_s26  ;;  %v2553_v59 = vstv %s3009_s5  ;;  %v1788_v12 = vmul.f32 %v3991_v2, %v1786_v1  ;;  %v1793_v13 = vmul.f32 %v3993_v3, %v1792_v36  ;;  %v1802_v41 = vrot.slane %v1795_v57, 1  ;;  %s3014_s5 = sld [smem:[#allocation3 + $0x783]] }
 0x182   : > { %v1665_v32 = vadd.f32 %v1661_v18, %v1648_v26  ;;  %v1664_v47 = vadd.f32 %v1659_v11, %v1647_v27  ;;  %v2540_v18 = vrot.slane %v2534_v8, 1  ;;  %v2542_v11 = vrot.slane %v2535_v14, 1 }
 0x183   : > { %v1696_v42 = vpop.permute.xlu1 %1695  ;;  %v1694_v48 = vpop.permute.xlu0 %1693  ;;  %v1812_v26 = vmul.f32 %v1809_v60, %v3995_v7  ;;  %v2555_v27 = vmul.f32 %v4315_v49, %v2553_v59  ;;  %v2554_v58 = vmul.f32 %v4319_v44, %v2553_v59  ;;  %v1799_v25 = vrot.slane %v1793_v13, 1 }
 0x184   : > { %v1679_v15 = vadd.f32 %v1675_v16, %v1665_v32  ;;  %v1678_v40 = vadd.f32 %v1673_v17, %v1664_v47  ;;  %v2539_v16 = vrot.slane %v2533_v23, 1  ;;  %v3011_v17 = vld [vmem:[%s3319_s21 + $0xb4] sm:$0xff]   ;;  %v1787_v47 = vmul.f32 %v3993_v3, %v1786_v1  ;;  %s4416_s21 = sld [smem:[#allocation3 + $0x785]] }
 0x185   : > { %2469 = vrot.lane.b32.xlu1 %v2464_v24, %s3211_s27  ;;  %2467 = vrot.lane.b32.xlu0 %v2463_v0, %s3211_s27  ;;  %v1800_v24 = vrot.slane %v1794_v22, 1  ;;  %v2556_v0 = vmul.f32 %v2553_v59, %v4324_v43  ;;  %v1810_v7 = vmul.f32 %v3993_v3, %v1809_v60  ;;  %v2561_v19 = vrot.slane %v2555_v27, 2 }
 0x186   : > { %v1700_v62 = vadd.f32 %v1696_v42, %v1679_v15  ;;  %v1699_v55 = vadd.f32 %v1694_v48, %v1678_v40  ;;  %v4394_v42 = vunpack.c.h.bf16 %v3011_v17  ;;  %v2541_v33 = vsel %vm207_vm0, %v2539_v16, %v2540_v18 }
 0x187   : > { %v1717_v6 = vpop.permute.xlu1 %1716  ;;  %v1715_v56 = vpop.permute.xlu0 %1714  ;;  %v2563_v50 = vrot.slane %v2556_v0, 2  ;;  %v4400_v15 = vunpack.c.l.bf16 %v3011_v17  ;;  %v4402_v40 = vunpack.c.l.bf16 %v3012_v9  ;;  %v2560_v36 = vrot.slane %v2554_v58, 2 }
 0x188   : > { %v1721_v2 = vadd.f32 %v1717_v6, %v1700_v62  ;;  %v1720_v29 = vadd.f32 %v1715_v56, %v1699_v55  ;;  %v2635_v6 = vstv %s4373_s6  ;;  %v1803_v56 = vsel %vm207_vm0, %v1800_v24, %v1802_v41  ;;  %s3015_s6 = sld [smem:[#allocation3 + $0x786]] }
 0x189   : > { %2490 = vrot.lane.b32.xlu1 %v2487_v61, %s3211_s27  ;;  %2488 = vrot.lane.b32.xlu0 %v2485_v37, %s3211_s27  ;;  %v2543_v37 = vsel %vm207_vm0, %v2540_v18, %v2542_v11  ;;  %v1817_v4 = vrot.slane %v1811_v34, 2  ;;  %v1819_v1 = vrot.slane %v1812_v26, 2  ;;  %v1816_v14 = vrot.slane %v1810_v7, 2 }
 0x18a   : > { %v2621_v60 = vstv %s4381_s7  ;;  %v2637_v62 = vmul.f32 %v2635_v6, %v4394_v42  ;;  %v2638_v55 = vmul.f32 %v2635_v6, %v4402_v40  ;;  %v2636_v57 = vmul.f32 %v2635_v6, %v4400_v15  ;;  %s3013_s7 = sld [smem:[#allocation3 + $0x780]] }
 0x18b   : > { %v1731_v39 = vpop.permute.xlu1 %1730  ;;  %v1729_v30 = vpop.permute.xlu0 %1728  ;;  %v2656_v59 = vstv %s4388_s8  ;;  %v1820_v13 = vsel %vm225_vm1, %v1817_v4, %v1819_v1  ;;  %v1818_v34 = vsel %vm225_vm1, %v1816_v14, %v1817_v4  ;;  %v2623_v16 = vmul.f32 %v2621_v60, %v4394_v42  ;;  %s178_s8 = sand.u32 1, %s3197_s15  }
 0x18c   : > { %v1735_v48 = vadd.f32 %v1731_v39, %v1721_v2  ;;  %v1734_v28 = vadd.f32 %v1729_v30, %v1720_v29  ;;  %v2658_v26 = vmul.f32 %v2656_v59, %v4394_v42  ;;  %v2622_v27 = vmul.f32 %v2621_v60, %v4400_v15 }
 0x18d   : > { %2511 = vrot.lane.b32.xlu1 %v2508_v52, %s3211_s27  ;;  %2509 = vrot.lane.b32.xlu0 %v2506_v45, %s3211_s27  ;;  %v1801_v45 = vsel %vm207_vm0, %v1799_v25, %v1800_v24  ;;  %v2643_v0 = vrot.slane %v2637_v62, 1  ;;  %v2645_v2 = vrot.slane %v2638_v55, 1  ;;  %v2642_v29 = vrot.slane %v2636_v57, 1 }
 0x18e   : > { %v2657_v9 = vmul.f32 %v2656_v59, %v4400_v15  ;;  %v1945_v6 = vstv %s4425_s10 }
 0x18f   : > { %v1752_v21 = vpop.permute.xlu1 %1751  ;;  %v1750_v32 = vpop.permute.xlu0 %1749  ;;  %v2646_v7 = vsel %vm207_vm0, %v2643_v0, %v2645_v2  ;;  %v1947_v57 = vmul.f32 %v1945_v6, %v4065_v51 }
 0x190   : > { %v1756_v3 = vadd.f32 %v1752_v21, %v1735_v48  ;;  %v1755_v61 = vadd.f32 %v1750_v32, %v1734_v28  ;;  %v2644_v48 = vsel %vm207_vm0, %v2642_v29, %v2643_v0 }
 0x191   : > { %2525 = vrot.lane.b32.xlu1 %v2520_v10, %s3210_s26  ;;  %2523 = vrot.lane.b32.xlu0 %v2519_v5, %s3210_s26  ;;  %v2564_v10 = vsel %vm225_vm1, %v2561_v19, %v2563_v50  ;;  %v2562_v5 = vsel %vm225_vm1, %v2560_v36, %v2561_v19  ;;  %v2691_v19 = vstv %s4416_s21  ;;  %v2677_v36 = vstv %s4423_s9  ;;  %s186_s21 = sld [smem:[#allocation2]]  ;;  %s2832_s9 = sshll.u32 %s178_s8, 4 }
 0x192   : > { %v2693_v4 = vmul.f32 %v2691_v19, %v4394_v42  ;;  %v2694_v1 = vmul.f32 %v2691_v19, %v4402_v40  ;;  %v2679_v62 = vmul.f32 %v2677_v36, %v4394_v42  ;;  %v2678_v55 = vmul.f32 %v2677_v36, %v4400_v15  ;;  %s180_s10 = scalar_lea.vmem [#allocation6], %s2832_s9 }
 0x193   : > { %v1773_v8 = vpop.permute.xlu1 %1772  ;;  %v1771_v23 = vpop.permute.xlu0 %1770 }
 0x194   : > { %v1777_v52 = vadd.f32 %v1773_v8, %v1756_v3  ;;  %v1776_v22 = vadd.f32 %v1771_v23, %v1755_v61  ;;  %v2692_v8 = vmul.f32 %v2691_v19, %v4400_v15 }
 0x195   : > { %2546 = vrot.lane.b32.xlu1 %v2543_v37, %s3210_s26  ;;  %2544 = vrot.lane.b32.xlu0 %v2541_v33, %s3210_s26  ;;  %v2663_v33 = vrot.slane %v2657_v9, 2 }
 0x196   : > { %v1790_v39 = vadd.f32 %v1788_v12, %v1777_v52  ;;  %v1789_v30 = vadd.f32 %v1787_v47, %v1776_v22  ;;  %v2659_v12 = vmul.f32 %v2656_v59, %v4402_v40  ;;  %v2664_v47 = vrot.slane %v2658_v26, 2 }
 0x197   : > { %v1834_v18 = vpop.permute.xlu1 %1833  ;;  %v1832_v11 = vpop.permute.xlu0 %1831 }
 0x198   : > { %v1807_v17 = vadd.f32 %v1803_v56, %v1790_v39  ;;  %v1806_v24 = vadd.f32 %v1801_v45, %v1789_v30  ;;  %v2666_v25 = vrot.slane %v2659_v12, 2  ;;  %v1951_v56 = vstv %s2966_s11  ;;  %s2752_s11 = sshll.u32 %s180_s10, 4  ;;  %s4534_s11 = int_to_ptr.vmem [resolvable:$true] %s2752_s11 }
 0x199   : > { %2567 = vrot.lane.b32.xlu1 %v2564_v10, %s3210_s26  ;;  %2565 = vrot.lane.b32.xlu0 %v2562_v5, %s3210_s26  ;;  %v2665_v52 = vsel %vm225_vm1, %v2663_v33, %v2664_v47  ;;  %v2712_v45 = vstv %s3021_s12  ;;  %v1953_v59 = vmul.f32 %v1951_v56, %v4065_v51  ;;  %v1954_v39 = vmul.f32 %v1951_v56, %v4072_v54  ;;  %s3027_s12 = sshll.u32 %s3259_s2, 8  ;;  %s4538_s2 = scalar_lea.sflag [#allocation4], %s178_s8 }
 0x19a   : > { %v1824_v41 = vadd.f32 %v1820_v13, %v1807_v17  ;;  %v1823_v58 = vadd.f32 %v1818_v34, %v1806_v24  ;;  %v2667_v61 = vsel %vm225_vm1, %v2664_v47, %v2666_v25  ;;  %v1952_v30 = vmul.f32 %v1951_v56, %v4067_v63 }
 0x19b   : > { %v1855_v21 = vpop.permute.xlu1 %1854  ;;  %v1853_v32 = vpop.permute.xlu0 %1852  ;;  %v1968_v10 = vstv %s4431_s13  ;;  %v2699_v5 = vrot.slane %v2693_v4, 1  ;;  %v2701_v13 = vrot.slane %v2694_v1, 1  ;;  %v2698_v34 = vrot.slane %v2692_v8, 1 }
 0x19c   : > { %v1838_v28 = vadd.f32 %v1834_v18, %v1824_v41  ;;  %v1837_v37 = vadd.f32 %v1832_v11, %v1823_v58  ;;  %v2714_v18 = vmul.f32 %v2712_v45, %v4394_v42  ;;  %v2715_v17 = vmul.f32 %v2712_v45, %v4402_v40 }
 0x19d   : > { %2628 = vrot.lane.b32.xlu1 %v2623_v16, %s3211_s27  ;;  %2626 = vrot.lane.b32.xlu0 %v2622_v27, %s3211_s27  ;;  %v2713_v24 = vmul.f32 %v2712_v45, %v4400_v15  ;;  %v1946_v27 = vmul.f32 %v1945_v6, %v4067_v63  ;;  %v1970_v0 = vmul.f32 %v1968_v10, %v4065_v51  ;;  %v1959_v9 = vrot.slane %v1953_v59, 1 }
 0x19e   : > { %v1859_v14 = vadd.f32 %v1855_v21, %v1838_v28  ;;  %v1858_v23 = vadd.f32 %v1853_v32, %v1837_v37  ;;  %v1971_v2 = vmul.f32 %v1968_v10, %v4072_v54  ;;  %v1969_v29 = vmul.f32 %v1968_v10, %v4067_v63 }
 0x19f   : > { %v1876_v50 = vpop.permute.xlu1 %1875  ;;  %v1874_v3 = vpop.permute.xlu0 %1873  ;;  %v1961_v21 = vrot.slane %v1954_v39, 1  ;;  %v1958_v32 = vrot.slane %v1952_v30, 1  ;;  %v2702_v47 = vsel %vm207_vm0, %v2699_v5, %v2701_v13  ;;  %v2700_v25 = vsel %vm207_vm0, %v2698_v34, %v2699_v5 }
 0x1a0   : > { %v1880_v11 = vadd.f32 %v1876_v50, %v1859_v14  ;;  %v1879_v16 = vadd.f32 %v1874_v3, %v1858_v23  ;;  %v2722_v28 = vrot.slane %v2715_v17, 2  ;;  %v2719_v54 = vrot.slane %v2713_v24, 2 }
 0x1a1   : > { %2649 = vrot.lane.b32.xlu1 %v2646_v7, %s3211_s27  ;;  %2647 = vrot.lane.b32.xlu0 %v2644_v48, %s3211_s27  ;;  %v2720_v7 = vrot.slane %v2714_v18, 2  ;;  %v1976_v33 = vrot.slane %v1970_v0, 2  ;;  %v1978_v19 = vrot.slane %v1971_v2, 2  ;;  %v1975_v50 = vrot.slane %v1969_v29, 2 }
 0x1a2   : > { %v1962_v36 = vsel %vm207_vm0, %v1959_v9, %v1961_v21  ;;  %v1960_v6 = vsel %vm207_vm0, %v1958_v32, %v1959_v9  ;;  %v2127_v17 = vstv %s2979_s18  ;;  %s4532_s18 = scalar_lea.hbm %s4582_s3, %s3027_s12 }
 0x1a3   : > { %v1890_v22 = vpop.permute.xlu1 %1889  ;;  %v1888_v60 = vpop.permute.xlu0 %1887  ;;  %v2723_v1 = vsel %vm225_vm1, %v2720_v7, %v2722_v28  ;;  %v2721_v8 = vsel %vm225_vm1, %v2719_v54, %v2720_v7  ;;  %v1979_v14 = vsel %vm225_vm1, %v1976_v33, %v1978_v19  ;;  %v2130_v9 = vmul.f32 %v2127_v17, %v4158_v53 }
 0x1a4   : > { %v1894_v41 = vadd.f32 %v1890_v22, %v1880_v11  ;;  %v1893_v58 = vadd.f32 %v1888_v60, %v1879_v16  ;;  %v2128_v21 = vmul.f32 %v4156_v35, %v2127_v17 }
 0x1a5   : > { %2670 = vrot.lane.b32.xlu1 %v2667_v61, %s3211_s27  ;;  %2668 = vrot.lane.b32.xlu0 %v2665_v52, %s3211_s27  ;;  %v1977_v52 = vsel %vm225_vm1, %v1975_v50, %v1976_v33  ;;  %s2978_s27 = sld [smem:[#allocation3 + $0x603]]  ;;  %v2137_v50 = vrot.slane %v2130_v9, 2 }
 0x1a7   : > { %v1911_v26 = vpop.permute.xlu1 %1910  ;;  %v1909_v12 = vpop.permute.xlu0 %1908 }
 0x1a8   : > { %v1915_v48 = vadd.f32 %v1911_v26, %v1894_v41  ;;  %v1914_v51 = vadd.f32 %v1909_v12, %v1893_v58  ;;  %v2104_v41 = vstv %s2977_s20  ;;  %v2129_v58 = vmul.f32 %v4154_v31, %v2127_v17  ;;  %s3139_s20 = scalar_lea.vmem %s4534_s11, 256 }
 0x1a9   : > { %2684 = vrot.lane.b32.xlu1 %v2679_v62, %s3210_s26  ;;  %2682 = vrot.lane.b32.xlu0 %v2678_v55, %s3210_s26  ;;  %v2106_v54 = vmul.f32 %v4154_v31, %v2104_v41  ;;  %p3140_p9 = scmp.ne.s32.totalorder %s4534_s11, %s3139_s20 }
 0x1aa   : > { %v2135_v19 = vrot.slane %v2129_v58, 2 }
 0x1ab   : > { %v1932_v37 = vpop.permute.xlu1 %1931  ;;  %v1930_v63 = vpop.permute.xlu0 %1929  ;;  %v2110_v18 = vstv %s2978_s27  ;;  %p3141_p10 = pnand %p3140_p9, %p3276_p5 }
 0x1ac   : > { %v1936_v3 = vadd.f32 %v1932_v37, %v1915_v48  ;;  %v1935_v61 = vadd.f32 %v1930_v63, %v1914_v51  ;;  %v2112_v24 = vmul.f32 %v4154_v31, %v2110_v18  ;;  %v2113_v26 = vmul.f32 %v2110_v18, %v4158_v53 }
 0x1ad   : > { %2705 = vrot.lane.b32.xlu1 %v2702_v47, %s3210_s26  ;;  %2703 = vrot.lane.b32.xlu0 %v2700_v25, %s3210_s26  ;;  %v2111_v12 = vmul.f32 %v4156_v35, %v2110_v18  ;;  %v2105_v37 = vmul.f32 %v4156_v35, %v2104_v41  ;;  %p3142_p12 = pneg %p3141_p10 }
 0x1ae   : > { %v1949_v56 = vadd.f32 %v1947_v57, %v1936_v3  ;;  %v1948_v4 = vadd.f32 %v1946_v27, %v1935_v61  ;;  %v2118_v25 = vrot.slane %v2112_v24, 1  ;;  %v2120_v7 = vrot.slane %v2113_v26, 1 }
 0x1af   : > { %v1993_v23 = vpop.permute.xlu1 %1992  ;;  %v1991_v45 = vpop.permute.xlu0 %1990  ;;  %v2117_v48 = vrot.slane %v2111_v12, 1  ;;  %v2134_v3 = vrot.slane %v2128_v21, 2 }
 0x1b0   : > { %v1966_v22 = vadd.f32 %v1962_v36, %v1949_v56  ;;  %v1965_v60 = vadd.f32 %v1960_v6, %v1948_v4  ;;  %v2121_v36 = vsel %vm207_vm0, %v2118_v25, %v2120_v7 }
 0x1b1   : > { %2726 = vrot.lane.b32.xlu1 %v2723_v1, %s3210_s26  ;;  %2724 = vrot.lane.b32.xlu0 %v2721_v8, %s3210_s26  ;;  %v2119_v6 = vsel %vm207_vm0, %v2117_v48, %v2118_v25  ;;  %v2138_v1 = vsel %vm225_vm1, %v2135_v19, %v2137_v50  ;;  %v2136_v31 = vsel %vm225_vm1, %v2134_v3, %v2135_v19  ;;  %s2990_s26 = sld [smem:[#allocation3 + $0x683]] }
 0x1b2   : > { %v1983_v62 = vadd.f32 %v1979_v14, %v1966_v22  ;;  %v1982_v55 = vadd.f32 %v1977_v52, %v1965_v60 }
 0x1b3   : > { %v2014_v57 = vpop.permute.xlu1 %2013  ;;  %v2012_v59 = vpop.permute.xlu0 %2011 }
 0x1b4   : > { %v1997_v39 = vadd.f32 %v1993_v23, %v1983_v62  ;;  %v1996_v30 = vadd.f32 %v1991_v45, %v1982_v55 }
 0x1b6   : > { %v2018_v13 = vadd.f32 %v2014_v57, %v1997_v39  ;;  %v2017_v34 = vadd.f32 %v2012_v59, %v1996_v30 }
 0x1b7   : > { %v2035_v10 = vpop.permute.xlu1 %2034  ;;  %v2033_v5 = vpop.permute.xlu0 %2032 }
 0x1b8   : > { %v2039_v27 = vadd.f32 %v2035_v10, %v2018_v13  ;;  %v2038_v0 = vadd.f32 %v2033_v5, %v2017_v34  ;;  %v2269_v10 = vstv %s2990_s26  ;;  %v2286_v34 = vstv %s2991_s25  ;;  %s3212_s26 = smov [#allocation6]  }
 0x1b9   : > { %v2271_v18 = vmul.f32 %v2269_v10, %v4203_v20  ;;  %s3143_s25 = sshll.u32 %s3212_s26, 4  ;;  %s3144_s25 = int_to_ptr.vmem [resolvable:$false] %s3143_s25 }
 0x1ba   : > { %p3146_p13 = scmp.lt.s32.totalorder %s4534_s11, %s3144_s25 }
 0x1bb   : > { %v2049_v11 = vpop.permute.xlu1 %2048  ;;  %v2047_v16 = vpop.permute.xlu0 %2046  ;;  %v2277_v9 = vrot.slane %v2271_v18, 1  ;;  %v2422_v18 = vstv %s3001_s4 }
 0x1bc   : > { %v2053_v32 = vadd.f32 %v2049_v11, %v2039_v27  ;;  %v2052_v47 = vadd.f32 %v2047_v16, %v2038_v0  ;;  %v2272_v11 = vmul.f32 %v2269_v10, %v4245_v38  ;;  %v2270_v16 = vmul.f32 %v2269_v10, %v4243_v46 }
 0x1bd   : > { %v2263_v27 = vstv %s2989_s28  ;;  %v2288_v0 = vmul.f32 %v2286_v34, %v4203_v20  ;;  %s3145_s28 = scalar_lea.vmem %s3144_s25, 512 }
 0x1be   : > { %v2279_v21 = vrot.slane %v2272_v11, 1  ;;  %v2265_v7 = vmul.f32 %v2263_v27, %v4203_v20  ;;  %v2264_v48 = vmul.f32 %v2263_v27, %v4243_v46  ;;  %p3147_p0 = scmp.lt.s32.totalorder %s3145_s28, %s3139_s20 }
 0x1bf   : > { %v2070_v2 = vpop.permute.xlu1 %2069  ;;  %v2068_v29 = vpop.permute.xlu0 %2067 }
 0x1c0   : > { %v2074_v51 = vadd.f32 %v2070_v2, %v2053_v32  ;;  %v2073_v28 = vadd.f32 %v2068_v29, %v2052_v47  ;;  %v2289_v2 = vmul.f32 %v2286_v34, %v4245_v38  ;;  %v2287_v29 = vmul.f32 %v2286_v34, %v4243_v46  ;;  %p3148_p1 = por %p3147_p0, %p3146_p13 }
 0x1c1   : > { %v2276_v32 = vrot.slane %v2270_v16, 1  ;;  %v2280_v19 = vsel %vm207_vm0, %v2277_v9, %v2279_v21 }
 0x1c2   : > { %p3149_p2 = pnand %p3148_p1, %p3142_p12 }
 0x1c3   : > { %v2091_v63 = vpop.permute.xlu1 %2090  ;;  %v2089_v33 = vpop.permute.xlu0 %2088  ;;  %v2278_v50 = vsel %vm207_vm0, %v2276_v32, %v2277_v9 }
 0x1c4   : > { %v2095_v61 = vadd.f32 %v2091_v63, %v2074_v51  ;;  %v2094_v53 = vadd.f32 %v2089_v33, %v2073_v28  ;;  %v2293_v63 = vrot.slane %v2287_v29, 2 }
 0x1c6   : > { %v2108_v56 = vadd.f32 %v2106_v54, %v2095_v61  ;;  %v2107_v4 = vadd.f32 %v2105_v37, %v2094_v53  ;;  %v2294_v54 = vrot.slane %v2288_v0, 2  ;;  %v2296_v37 = vrot.slane %v2289_v2, 2 }
 0x1c7   : > { %v2152_v8 = vpop.permute.xlu1 %2151  ;;  %v2150_v14 = vpop.permute.xlu0 %2149 }
 0x1c8   : > { %v2125_v35 = vadd.f32 %v2121_v36, %v2108_v56  ;;  %v2124_v23 = vadd.f32 %v2119_v6, %v2107_v4  ;;  %v2297_v53 = vsel %vm225_vm1, %v2294_v54, %v2296_v37  ;;  %v2295_v20 = vsel %vm225_vm1, %v2293_v63, %v2294_v54 }
 0x1ca   : > { %v2142_v52 = vadd.f32 %v2138_v1, %v2125_v35  ;;  %v2141_v45 = vadd.f32 %v2136_v31, %v2124_v23 }
 0x1cb   : > { %v2173_v22 = vpop.permute.xlu1 %2172  ;;  %v2171_v60 = vpop.permute.xlu0 %2170 }
 0x1cc   : > { %v2156_v62 = vadd.f32 %v2152_v8, %v2142_v52  ;;  %v2155_v55 = vadd.f32 %v2150_v14, %v2141_v45 }
 0x1ce   : > { %v2177_v39 = vadd.f32 %v2173_v22, %v2156_v62  ;;  %v2176_v30 = vadd.f32 %v2171_v60, %v2155_v55  ;;  %v2428_v60 = vstv %s3002_s29 }
 0x1cf   : > { %v2194_v57 = vpop.permute.xlu1 %2193  ;;  %v2192_v59 = vpop.permute.xlu0 %2191 }
 0x1d0   : > { %v2198_v17 = vadd.f32 %v2194_v57, %v2177_v39  ;;  %v2197_v24 = vadd.f32 %v2192_v59, %v2176_v30  ;;  %v2445_v57 = vstv %s3003_s30  ;;  %v2430_v59 = vmul.f32 %v4315_v49, %v2428_v60 }
 0x1d1   : > { %v2431_v39 = vmul.f32 %v2428_v60, %v4324_v43  ;;  %v2429_v30 = vmul.f32 %v4319_v44, %v2428_v60  ;;  %v2447_v11 = vmul.f32 %v4315_v49, %v2445_v57  ;;  %v2448_v16 = vmul.f32 %v2445_v57, %v4324_v43 }
 0x1d3   : > { %v2208_v5 = vpop.permute.xlu1 %2207  ;;  %v2206_v13 = vpop.permute.xlu0 %2205  ;;  %v2438_v27 = vrot.slane %v2431_v39, 1  ;;  %v2435_v0 = vrot.slane %v2429_v30, 1  ;;  %v2453_v32 = vrot.slane %v2447_v11, 2 }
 0x1d4   : > { %v2212_v41 = vadd.f32 %v2208_v5, %v2198_v17  ;;  %v2211_v58 = vadd.f32 %v2206_v13, %v2197_v24  ;;  %v2446_v17 = vmul.f32 %v4319_v44, %v2445_v57 }
 0x1d7   : > { %v2229_v26 = vpop.permute.xlu1 %2228  ;;  %v2227_v12 = vpop.permute.xlu0 %2226 }
 0x1d8   : > { %v2233_v47 = vadd.f32 %v2229_v26, %v2212_v41  ;;  %v2232_v25 = vadd.f32 %v2227_v12, %v2211_v58  ;;  %v2436_v12 = vrot.slane %v2430_v59, 1  ;;  %v2424_v41 = vmul.f32 %v4315_v49, %v2422_v18 }
 0x1d9   : > { %v2423_v58 = vmul.f32 %v4319_v44, %v2422_v18 }
 0x1db   : > { %v2250_v51 = vpop.permute.xlu1 %2249  ;;  %v2248_v28 = vpop.permute.xlu0 %2247 }
 0x1dc   : > { %v2254_v33 = vadd.f32 %v2250_v51, %v2233_v47  ;;  %v2253_v38 = vadd.f32 %v2248_v28, %v2232_v25  ;;  %v2455_v47 = vrot.slane %v2448_v16, 2  ;;  %v2452_v25 = vrot.slane %v2446_v17, 2 }
 0x1dd   : > { %v2437_v51 = vsel %vm207_vm0, %v2435_v0, %v2436_v12 }
 0x1de   : > { %v2267_v3 = vadd.f32 %v2265_v7, %v2254_v33  ;;  %v2266_v61 = vadd.f32 %v2264_v48, %v2253_v38  ;;  %v2439_v48 = vsel %vm207_vm0, %v2436_v12, %v2438_v27  ;;  %v2456_v37 = vsel %vm225_vm1, %v2453_v32, %v2455_v47 }
 0x1df   : > { %v2311_v36 = vpop.permute.xlu1 %2310  ;;  %v2309_v6 = vpop.permute.xlu0 %2308  ;;  %v2454_v49 = vsel %vm225_vm1, %v2452_v25, %v2453_v32 }
 0x1e0   : > { %v2284_v46 = vadd.f32 %v2280_v19, %v2267_v3  ;;  %v2283_v56 = vadd.f32 %v2278_v50, %v2266_v61 }
 0x1e2   : > { %v2301_v4 = vadd.f32 %v2297_v53, %v2284_v46  ;;  %v2300_v1 = vadd.f32 %v2295_v20, %v2283_v56 }
 0x1e3   : > { %v2332_v8 = vpop.permute.xlu1 %2331  ;;  %v2330_v31 = vpop.permute.xlu0 %2329 }
 0x1e4   : > { %v2315_v14 = vadd.f32 %v2311_v36, %v2301_v4  ;;  %v2314_v35 = vadd.f32 %v2309_v6, %v2300_v1  ;;  %v2587_v4 = vstv %s3014_s5 }
 0x1e6   : > { %v2336_v45 = vadd.f32 %v2332_v8, %v2315_v14  ;;  %v2335_v22 = vadd.f32 %v2330_v31, %v2314_v35  ;;  %v2604_v31 = vstv %s3015_s6  ;;  %v2589_v14 = vmul.f32 %v2587_v4, %v4394_v42 }
 0x1e7   : > { %v2353_v23 = vpop.permute.xlu1 %2352  ;;  %v2351_v52 = vpop.permute.xlu0 %2350  ;;  %v2590_v35 = vmul.f32 %v2587_v4, %v4402_v40  ;;  %v2607_v57 = vmul.f32 %v2604_v31, %v4402_v40  ;;  %v2605_v59 = vmul.f32 %v2604_v31, %v4400_v15 }
 0x1e8   : > { %v2357_v10 = vadd.f32 %v2353_v23, %v2336_v45  ;;  %v2356_v5 = vadd.f32 %v2351_v52, %v2335_v22  ;;  %v2588_v23 = vmul.f32 %v2587_v4, %v4400_v15 }
 0x1e9   : > { %v2614_v12 = vrot.slane %v2607_v57, 2  ;;  %v2611_v27 = vrot.slane %v2605_v59, 2 }
 0x1eb   : > { %v2367_v62 = vpop.permute.xlu1 %2366  ;;  %v2365_v55 = vpop.permute.xlu0 %2364 }
 0x1ec   : > { %v2371_v24 = vadd.f32 %v2367_v62, %v2357_v10  ;;  %v2370_v26 = vadd.f32 %v2365_v55, %v2356_v5  ;;  %v2581_v62 = vstv %s3013_s7  ;;  %v2606_v55 = vmul.f32 %v2604_v31, %v4394_v42 }
 0x1ed   : > { %v2595_v10 = vrot.slane %v2589_v14, 1  ;;  %v2597_v5 = vrot.slane %v2590_v35, 1  ;;  %v2583_v11 = vmul.f32 %v2581_v62, %v4394_v42  ;;  %v2582_v16 = vmul.f32 %v2581_v62, %v4400_v15 }
 0x1ef   : > { %v2388_v13 = vpop.permute.xlu1 %2387  ;;  %v2386_v34 = vpop.permute.xlu0 %2385 }
 0x1f0   : > { %v2392_v2 = vadd.f32 %v2388_v13, %v2371_v24  ;;  %v2391_v29 = vadd.f32 %v2386_v34, %v2370_v26  ;;  %v2594_v13 = vrot.slane %v2588_v23, 1  ;;  %v2612_v26 = vrot.slane %v2606_v55, 2 }
 0x1f2   : > { %v2613_v42 = vsel %vm225_vm1, %v2611_v27, %v2612_v26 }
 0x1f3   : > { %v2409_v9 = vpop.permute.xlu1 %2408  ;;  %v2407_v21 = vpop.permute.xlu0 %2406 }
 0x1f4   : > { %v2413_v7 = vadd.f32 %v2409_v9, %v2392_v2  ;;  %v2412_v43 = vadd.f32 %v2407_v21, %v2391_v29  ;;  %v2598_v2 = vsel %vm207_vm0, %v2595_v10, %v2597_v5  ;;  %v2596_v29 = vsel %vm207_vm0, %v2594_v13, %v2595_v10 }
 0x1f5   : > { %v2615_v9 = vsel %vm225_vm1, %v2612_v26, %v2614_v12 }
 0x1f6   : > { %v2426_v28 = vadd.f32 %v2424_v41, %v2413_v7  ;;  %v2425_v54 = vadd.f32 %v2423_v58, %v2412_v43 }
 0x1f7   : > { %v2470_v63 = vpop.permute.xlu1 %2469  ;;  %v2468_v33 = vpop.permute.xlu0 %2467 }
 0x1f8   : > { %v2443_v44 = vadd.f32 %v2439_v48, %v2426_v28  ;;  %v2442_v38 = vadd.f32 %v2437_v51, %v2425_v54 }
 0x1fa   : > { %v2460_v19 = vadd.f32 %v2456_v37, %v2443_v44  ;;  %v2459_v50 = vadd.f32 %v2454_v49, %v2442_v38 }
 0x1fb   : > { %v2491_v3 = vpop.permute.xlu1 %2490  ;;  %v2489_v61 = vpop.permute.xlu0 %2488 }
 0x1fc   : > { %v2474_v53 = vadd.f32 %v2470_v63, %v2460_v19  ;;  %v2473_v36 = vadd.f32 %v2468_v33, %v2459_v50 }
 0x1fe   : > { %v2495_v46 = vadd.f32 %v2491_v3, %v2474_v53  ;;  %v2494_v56 = vadd.f32 %v2489_v61, %v2473_v36 }
 0x1ff   : > { %v2512_v20 = vpop.permute.xlu1 %2511  ;;  %v2510_v6 = vpop.permute.xlu0 %2509 }
 0x200   : > { %v2516_v52 = vadd.f32 %v2512_v20, %v2495_v46  ;;  %v2515_v45 = vadd.f32 %v2510_v6, %v2494_v56  ;;  %v2732_v6 = vstv %s186_s21 }
 0x203   : > { %v2526_v1 = vpop.permute.xlu1 %2525  ;;  %v2524_v8 = vpop.permute.xlu0 %2523 }
 0x204   : > { %v2530_v39 = vadd.f32 %v2526_v1, %v2516_v52  ;;  %v2529_v30 = vadd.f32 %v2524_v8, %v2515_v45 }
 0x207   : > { %v2547_v22 = vpop.permute.xlu1 %2546  ;;  %v2545_v60 = vpop.permute.xlu0 %2544 }
 0x208   : > { %v2551_v34 = vadd.f32 %v2547_v22, %v2530_v39  ;;  %v2550_v18 = vadd.f32 %v2545_v60, %v2529_v30 }
 0x20b   : > { %v2568_v17 = vpop.permute.xlu1 %2567  ;;  %v2566_v24 = vpop.permute.xlu0 %2565 }
 0x20c   : > { %v2572_v0 = vadd.f32 %v2568_v17, %v2551_v34  ;;  %v2571_v40 = vadd.f32 %v2566_v24, %v2550_v18 }
 0x20e   : > { %v2585_v41 = vadd.f32 %v2583_v11, %v2572_v0  ;;  %v2584_v58 = vadd.f32 %v2582_v16, %v2571_v40 }
 0x20f   : > { %v2629_v21 = vpop.permute.xlu1 %2628  ;;  %v2627_v15 = vpop.permute.xlu0 %2626 }
 0x210   : > { %v2602_v32 = vadd.f32 %v2598_v2, %v2585_v41  ;;  %v2601_v47 = vadd.f32 %v2596_v29, %v2584_v58 }
 0x212   : > { %v2619_v25 = vadd.f32 %v2615_v9, %v2602_v32  ;;  %v2618_v7 = vadd.f32 %v2613_v42, %v2601_v47 }
 0x213   : > { %v2650_v43 = vpop.permute.xlu1 %2649  ;;  %v2648_v48 = vpop.permute.xlu0 %2647 }
 0x214   : > { %v2633_v51 = vadd.f32 %v2629_v21, %v2619_v25  ;;  %v2632_v28 = vadd.f32 %v2627_v15, %v2618_v7 }
 0x216   : > { %v2654_v63 = vadd.f32 %v2650_v43, %v2633_v51  ;;  %v2653_v49 = vadd.f32 %v2648_v48, %v2632_v28 }
 0x217   : > { %v2671_v54 = vpop.permute.xlu1 %2670  ;;  %v2669_v37 = vpop.permute.xlu0 %2668 }
 0x218   : > { %v2675_v38 = vadd.f32 %v2671_v54, %v2654_v63  ;;  %v2674_v19 = vadd.f32 %v2669_v37, %v2653_v49 }
 0x21b   : > { %v2685_v33 = vpop.permute.xlu1 %2684  ;;  %v2683_v44 = vpop.permute.xlu0 %2682 }
 0x21c   : > { %v2689_v61 = vadd.f32 %v2685_v33, %v2675_v38  ;;  %v2688_v53 = vadd.f32 %v2683_v44, %v2674_v19 }
 0x21f   : > { %v2706_v50 = vpop.permute.xlu1 %2705  ;;  %v2704_v3 = vpop.permute.xlu0 %2703 }
 0x220   : > { %v2710_v36 = vadd.f32 %v2706_v50, %v2689_v61  ;;  %v2709_v20 = vadd.f32 %v2704_v3, %v2688_v53 }
 0x223   : > { %v2727_v46 = vpop.permute.xlu1 %2726  ;;  %v2725_v56 = vpop.permute.xlu0 %2724 }
 0x224   : > { %v2731_v4 = vadd.f32 %v2727_v46, %v2710_v36  ;;  %v2730_v1 = vadd.f32 %v2725_v56, %v2709_v20 }
 0x226   : > { %v2734_v8 = vadd.f32 %v2732_v6, %v2731_v4  ;;  %v2733_v31 = vadd.f32 %v2732_v6, %v2730_v1 }
 0x228   : > { %2737 = vst.msk [vmem:[%s180_s10 + $0x8] sm:$0xff] %vm2735_vm2, %v2734_v8  ;;  %2736 = vst.msk [vmem:[%s180_s10] sm:$0xff] %vm2735_vm2, %v2733_v31 }
 0x229   : > { %3152 = shalt.err (!%p3149_p2)
}
 0x22a   : > { %s3153_s29 = scalar_lea.hbm %s4532_s18, 256  ;;  %s3157_s5 = scalar_lea.hbm %s4582_s3, 512 }
 0x22b   : > { %p3154_p3 = scmp.ne.s32.totalorder %s4532_s18, %s3153_s29  ;;  %p3158_p8 = scmp.lt.u32.totalorder %s4532_s18, %s4582_s3 }
 0x22c   : > { %p3159_p11 = scmp.lt.u32.totalorder %s3157_s5, %s3153_s29  ;;  %p3161_p10 = scmp.lt.u32.totalorder %s3153_s29, %s4532_s18 }
 0x22d   : > { %p3155_p4 = pnand %p3154_p3, %p3276_p5 }
 0x22e   : > { %p3160_p9 = por %p3159_p11, %p3158_p8 }
 0x22f   : > { %p3156_p7 = pneg %p3155_p4 }
 0x230   : > { %p3162_p12 = por %p3161_p10, %p3160_p9 }
 0x232   : > { %p3163_p13 = pnand %p3162_p12, %p3156_p7 }
 0x234   : > { %3166 = shalt.err (!%p3163_p13)
}
 0x235   : > { %s3213_s8 = smov 128   ;;  %s3214_s21 = smov 8  }
 0x236   : > { %3072 = dma.vmem_to_hbm [thread:$0]  (%p3276_p5), %s4534_s11, 256, %s4532_s18, %s4538_s2, %s3213_s8, %s3213_s8, %s3214_s21  }
 0x237 PF: > { %p3084_p0 = scmp.ge.s32.totalorder %s3205_s17, 2  ;;  %s2767_s9 = sand.u32 1, %s3193_s14  }
 0x238   : > { %s2768_s10 = scalar_lea.sflag [#allocation4], %s2767_s9 }
 0x239   : > { %p3079_p1 = pnand %p3084_p0, %p3280_p6 }
 0x23b   : > { %3188 = dma.done.wait (!%p3079_p1), %s2768_s10, 256  }
 0x23c   : > { %3190 = vsyncadd (!%p3079_p1), %s2768_s10, 4294967040  ;;  %p15_p2 = scmp.ge.s32.totalorder %s3263_s19, 4   ;;  %s4587_s14 = smov %s3197_s15 }
 0x23d   : > { %s4588_s15 = smov %s3201_s16  ;;  %s4589_s16 = smov %s3274_s22 }
 0x23e   : > { %s4590_s17 = smov %s3263_s19  ;;  %17 = sbr.rel (!%p15_p2) target bundleno = 6 (0x6), region = 87 }
 0x245   :  { %2773 = vsyncpa [#allocation4], 1 }
 0x246   :  { %2775 = vsyncpa [#allocation4 + $0x1], 1 }
 0x247   :  { %2776 = vsyncpa [#allocation5], 1 }
 0x248   :  { %2778 = vsyncpa [#allocation5 + $0x1], 1 }

</bundles_post_ra>
